<compile_context>
chip_gen: v6e
topology: v6e:2x2x1
jax: 0.10.0
libtpu: 0.0.40
codegen_flags: <defaults>
</compile_context>

<pallas_src>
import numpy as np
import jax
import jax.numpy as jnp
from jax import lax
from jax.experimental import pallas as pl
from jax.experimental.pallas import tpu as pltpu

TB = 8  # images per grid step


# ------------------------------ fused kernel --------------------------------

def _convnet_kernel(x_ref, w1_ref, b1_ref, w2_ref, b2_ref,
                    wfc1_ref, bfc1_ref, wfc2_ref, bfc2_ref,
                    o_ref, y2_scr):
    f32 = jnp.float32
    b1 = jnp.broadcast_to(b1_ref[...], (15, 128))   # hoisted broadcasts
    b2 = jnp.broadcast_to(b2_ref[...], (13, 128))

    # ---- per-image: conv1 + ReLU + fused 2x2 max-pool, then conv2 + ReLU ----
    for i in range(TB):
        # accE/accO: conv1 pre-activations at even/odd conv rows; lanes 0-127
        # are even output columns, 128-255 odd output columns (pool window).
        accE = jnp.zeros((15, 256), f32)
        accO = jnp.zeros((15, 256), f32)
        for ki in range(3):
            w = w1_ref[ki]                                                     # (128,256)
            xe = x_ref[i, ki % 2, ki // 2: ki // 2 + 15, :]                    # (15,128)
            xo = x_ref[i, (ki + 1) % 2, (ki + 1) // 2: (ki + 1) // 2 + 15, :]  # (15,128)
            accE = accE + jnp.dot(xe, w, preferred_element_type=f32)
            accO = accO + jnp.dot(xo, w, preferred_element_type=f32)
        pooled = jnp.maximum(jnp.maximum(accE[:, :128], accE[:, 128:]),
                             jnp.maximum(accO[:, :128], accO[:, 128:]))
        p = jnp.maximum(pooled + b1, 0.0)                                      # (15,128)

        y2 = jnp.zeros((13, 128), f32)
        for ki in range(3):
            y2 = y2 + jnp.dot(p[ki:ki + 13, :], w2_ref[ki],
                              preferred_element_type=f32)
        y2 = jnp.maximum(y2 + b2, 0.0)                                         # (13,128)
        y2_scr[i] = y2        # stage for the batched fc matmuls

    # ---- fc1 + ReLU (M = TB, no more M=1 matmuls) ----
    acc = jnp.zeros((TB, 128), f32)
    for oh in range(13):
        acc = acc + jnp.dot(y2_scr[:, oh, :], wfc1_ref[oh],
                            preferred_element_type=f32)
    h1 = jnp.maximum(acc + bfc1_ref[...], 0.0)                                 # (TB,128)

    # ---- fc2 (output lanes zero-padded 10 -> 128) ----
    o_ref[...] = jnp.dot(h1, wfc2_ref[...], preferred_element_type=f32) + bfc2_ref[...]


# ------------------------------ parameters ----------------------------------

def init_params(key):
    def uniform(key, shape, fan_in):
        bound = 1.0 / jnp.sqrt(jnp.float32(fan_in))
        return jax.random.uniform(key, shape, jnp.float32, -bound, bound)

    ks = jax.random.split(key, 8)
    return {
        "conv1_w": uniform(ks[0], (6, 3, 3, 3), 3 * 3 * 3),
        "conv1_b": uniform(ks[1], (6,), 3 * 3 * 3),
        "conv2_w": uniform(ks[2], (9, 6, 3, 3), 6 * 3 * 3),
        "conv2_b": uniform(ks[3], (9,), 6 * 3 * 3),
        "fc1_w": uniform(ks[4], (13 * 13 * 9, 128), 13 * 13 * 9),   # [in, out]
        "fc1_b": uniform(ks[5], (128,), 13 * 13 * 9),
        "fc2_w": uniform(ks[6], (128, 10), 128),                    # [in, out]
        "fc2_b": uniform(ks[7], (10,), 128),
    }


def prepare_params(params):
    """One-time host-side restructuring into lane-dense structured matrices."""
    w1 = np.asarray(params["conv1_w"], np.float32)   # (6,3,3,3) [oc,c,ki,kj]
    b1 = np.asarray(params["conv1_b"], np.float32)
    w2 = np.asarray(params["conv2_w"], np.float32)   # (9,6,3,3)
    b2 = np.asarray(params["conv2_b"], np.float32)
    fw1 = np.asarray(params["fc1_w"], np.float32)    # (1521,128)
    fb1 = np.asarray(params["fc1_b"], np.float32)
    fw2 = np.asarray(params["fc2_w"], np.float32)    # (128,10)
    fb2 = np.asarray(params["fc2_b"], np.float32)

    # conv1: banded weights. rows = c*32 + w_in (96 used of 128);
    # cols = s*128 + oc*15 + pw, s = output-column parity (folds the 2x2 pool).
    w1b = np.zeros((3, 128, 256), np.float32)
    for oc in range(6):
        for c in range(3):
            for ki in range(3):
                for kj in range(3):
                    for pw in range(15):
                        w1b[ki, c * 32 + 2 * pw + kj, oc * 15 + pw] = w1[oc, c, ki, kj]
                        w1b[ki, c * 32 + 2 * pw + 1 + kj, 128 + oc * 15 + pw] = w1[oc, c, ki, kj]
    b1p = np.zeros((1, 128), np.float32)
    b1p[0, :90] = np.repeat(b1, 15)

    # conv2: banded weights per kernel row. rows = c2*15 + w_pooled (90 used of
    # 128); cols = oc*13 + ow (117 used of 128).
    w2b = np.zeros((3, 128, 128), np.float32)
    for oc in range(9):
        for c in range(6):
            for ki in range(3):
                for kj in range(3):
                    for ow in range(13):
                        w2b[ki, c * 15 + ow + kj, oc * 13 + ow] = w2[oc, c, ki, kj]
    b2p = np.zeros((1, 128), np.float32)
    b2p[0, :117] = np.repeat(b2, 13)

    # fc1: rows permuted to the kernel's (oh, oc*13+ow) layout (reproduces
    # PyTorch NCHW flatten order without an activation transpose), K pad 117->128.
    wfc1 = np.zeros((13, 128, 128), np.float32)
    wfc1[:, :117, :] = fw1.reshape(9, 13, 13, 128).transpose(1, 0, 2, 3).reshape(13, 117, 128)
    bfc1 = fb1.reshape(1, 128)

    # fc2: zero-pad N from 10 to 128 for a lane-dense output store.
    wfc2 = np.zeros((128, 128), np.float32)
    wfc2[:, :10] = fw2
    bfc2 = np.zeros((1, 128), np.float32)
    bfc2[0, :10] = fb2

    return {
        "w1": jnp.asarray(w1b), "b1": jnp.asarray(b1p),
        "w2": jnp.asarray(w2b), "b2": jnp.asarray(b2p),
        "wfc1": jnp.asarray(wfc1), "bfc1": jnp.asarray(bfc1),
        "wfc2": jnp.asarray(wfc2), "bfc2": jnp.asarray(bfc2),
    }


# -------------------------------- forward -----------------------------------

@jax.jit
def convnet_forward(prep, x_nchw):
    B = x_nchw.shape[0]
    B_pad = ((B + TB - 1) // TB) * TB
    # (B,3,32,32) -> (B,2,16,96): split rows into even/odd planes and fold the
    # channel into the lane dim (lane = c*32 + w); pad lanes 96->128, batch->B_pad.
    x_r = x_nchw.reshape(B, 3, 16, 2, 32).transpose(0, 3, 2, 1, 4).reshape(B, 2, 16, 96)
    x_r = jnp.pad(x_r, ((0, B_pad - B), (0, 0), (0, 0), (0, 32)))

    out = pl.pallas_call(
        _convnet_kernel,
        out_shape=jax.ShapeDtypeStruct((B_pad, 128), jnp.float32),
        grid=(B_pad // TB,),
        in_specs=[
            pl.BlockSpec((TB, 2, 16, 128), lambda b: (b, 0, 0, 0)),
            pl.BlockSpec((3, 128, 256), lambda b: (0, 0, 0)),
            pl.BlockSpec((1, 128), lambda b: (0, 0)),
            pl.BlockSpec((3, 128, 128), lambda b: (0, 0, 0)),
            pl.BlockSpec((1, 128), lambda b: (0, 0)),
            pl.BlockSpec((13, 128, 128), lambda b: (0, 0, 0)),
            pl.BlockSpec((1, 128), lambda b: (0, 0)),
            pl.BlockSpec((128, 128), lambda b: (0, 0)),
            pl.BlockSpec((1, 128), lambda b: (0, 0)),
        ],
        out_specs=pl.BlockSpec((TB, 128), lambda b: (b, 0)),
        scratch_shapes=[pltpu.VMEM((TB, 13, 128), jnp.float32)],
        compiler_params=pltpu.CompilerParams(
            dimension_semantics=("parallel",)),
    )(x_r, prep["w1"], prep["b1"], prep["w2"], prep["b2"],
      prep["wfc1"], prep["bfc1"], prep["wfc2"], prep["bfc2"])

    return out[:B, :10]


# ------------------------- pure-JAX reference (check) ------------------------

def reference_forward(params, x):
    hi = lax.Precision.HIGHEST
    dn = ("NCHW", "OIHW", "NCHW")
    y = lax.conv_general_dilated(x, params["conv1_w"], (1, 1), "VALID",
                                 dimension_numbers=dn, precision=hi)
    y = jnp.maximum(y + params["conv1_b"][None, :, None, None], 0.0)
    y = lax.reduce_window(y, -jnp.inf, lax.max, (1, 1, 2, 2), (1, 1, 2, 2), "VALID")
    y = lax.conv_general_dilated(y, params["conv2_w"], (1, 1), "VALID",
                                 dimension_numbers=dn, precision=hi)
    y = jnp.maximum(y + params["conv2_b"][None, :, None, None], 0.0)
    y = y.reshape(y.shape[0], -1)
    y = jnp.maximum(jnp.dot(y, params["fc1_w"], precision=hi) + params["fc1_b"], 0.0)
    y = jnp.dot(y, params["fc2_w"], precision=hi) + params["fc2_b"]
    return y


# --------------------------------- main --------------------------------------

if __name__ == "__main__":
    key = jax.random.PRNGKey(0)
    k_params, k_x = jax.random.split(key)

    params = init_params(k_params)
    prep = prepare_params(params)          # one-time weight restructuring (host)

    # Input spatial size fixed at 32x32 by fc1 (13*13*9); B=10 exercises both
    # batch padding (10 -> 16) and a 2-step grid (one step per v7x TensorCore).
    x = jax.random.normal(k_x, (10, 3, 32, 32), jnp.float32)

    out = convnet_forward(prep, x)
    out = jax.block_until_ready(out)
    assert out.shape == (10, 10), out.shape

    ref = reference_forward(params, x)
    max_err = float(jnp.max(jnp.abs(out - ref)))
    assert jnp.allclose(out, ref, atol=1e-2, rtol=1e-2), max_err

    print("KERNEL_OK")
</pallas_src>

<mosaic_0001>
module attributes {stable_mosaic.version = 11 : i64} {
  func.func @_convnet_kernel(%arg0: i32, %arg1: memref<8x2x16x128xf32, #tpu.memory_space<vmem>>, %arg2: memref<3x128x256xf32, #tpu.memory_space<vmem>>, %arg3: memref<1x128xf32, #tpu.memory_space<vmem>>, %arg4: memref<3x128x128xf32, #tpu.memory_space<vmem>>, %arg5: memref<1x128xf32, #tpu.memory_space<vmem>>, %arg6: memref<13x128x128xf32, #tpu.memory_space<vmem>>, %arg7: memref<1x128xf32, #tpu.memory_space<vmem>>, %arg8: memref<128x128xf32, #tpu.memory_space<vmem>>, %arg9: memref<1x128xf32, #tpu.memory_space<vmem>>, %arg10: memref<8x128xf32, #tpu.memory_space<vmem>>, %arg11: memref<8x13x128xf32, #tpu.memory_space<vmem>>) attributes {dimension_semantics = [#tpu.dimension_semantics<parallel>], iteration_bounds = array<i64: 2>, scalar_prefetch = 0 : i64, scratch_operands = 1 : i64, tpu.core_type = #tpu.core_type<tc>, window_params = [{transform_indices = @transform_0, window_bounds = array<i64: 8, 2, 16, 128>}, {pipeline_mode = #tpu.pipeline_mode<synchronous>, transform_indices = @transform_1, window_bounds = array<i64: 3, 128, 256>}, {pipeline_mode = #tpu.pipeline_mode<synchronous>, transform_indices = @transform_2, window_bounds = array<i64: 1, 128>}, {pipeline_mode = #tpu.pipeline_mode<synchronous>, transform_indices = @transform_3, window_bounds = array<i64: 3, 128, 128>}, {pipeline_mode = #tpu.pipeline_mode<synchronous>, transform_indices = @transform_4, window_bounds = array<i64: 1, 128>}, {pipeline_mode = #tpu.pipeline_mode<synchronous>, transform_indices = @transform_5, window_bounds = array<i64: 13, 128, 128>}, {pipeline_mode = #tpu.pipeline_mode<synchronous>, transform_indices = @transform_6, window_bounds = array<i64: 1, 128>}, {pipeline_mode = #tpu.pipeline_mode<synchronous>, transform_indices = @transform_7, window_bounds = array<i64: 128, 128>}, {pipeline_mode = #tpu.pipeline_mode<synchronous>, transform_indices = @transform_8, window_bounds = array<i64: 1, 128>}, {transform_indices = @transform_9, window_bounds = array<i64: 8, 128>}]} {
    %c0 = arith.constant 0 : index
    %c0_0 = arith.constant 0 : index
    %0 = vector.load %arg3[%c0, %c0_0] : memref<1x128xf32, #tpu.memory_space<vmem>>, vector<1x128xf32>
    %1 = vector.shape_cast %0 : vector<1x128xf32> to vector<1x128xf32>
    %2 = vector.broadcast %1 : vector<1x128xf32> to vector<15x128xf32>
    %c0_1 = arith.constant 0 : index
    %c0_2 = arith.constant 0 : index
    %3 = vector.load %arg5[%c0_1, %c0_2] : memref<1x128xf32, #tpu.memory_space<vmem>>, vector<1x128xf32>
    %4 = vector.shape_cast %3 : vector<1x128xf32> to vector<1x128xf32>
    %5 = vector.broadcast %4 : vector<1x128xf32> to vector<13x128xf32>
    %cst = arith.constant 0.000000e+00 : f32
    %6 = vector.broadcast %cst : f32 to vector<15x256xf32>
    %cst_3 = arith.constant 0.000000e+00 : f32
    %7 = vector.broadcast %cst_3 : f32 to vector<15x256xf32>
    %c0_4 = arith.constant 0 : index
    %c0_5 = arith.constant 0 : index
    %c0_6 = arith.constant 0 : index
    %8 = vector.load %arg2[%c0_4, %c0_5, %c0_6] : memref<3x128x256xf32, #tpu.memory_space<vmem>>, vector<1x128x256xf32>
    %9 = vector.shape_cast %8 : vector<1x128x256xf32> to vector<128x256xf32>
    %c0_7 = arith.constant 0 : index
    %c0_8 = arith.constant 0 : index
    %c0_9 = arith.constant 0 : index
    %c0_10 = arith.constant 0 : index
    %10 = vector.load %arg1[%c0_7, %c0_8, %c0_9, %c0_10] : memref<8x2x16x128xf32, #tpu.memory_space<vmem>>, vector<1x1x15x128xf32>
    %11 = vector.shape_cast %10 : vector<1x1x15x128xf32> to vector<15x128xf32>
    %c0_11 = arith.constant 0 : index
    %c1 = arith.constant 1 : index
    %c0_12 = arith.constant 0 : index
    %c0_13 = arith.constant 0 : index
    %12 = vector.load %arg1[%c0_11, %c1, %c0_12, %c0_13] : memref<8x2x16x128xf32, #tpu.memory_space<vmem>>, vector<1x1x15x128xf32>
    %13 = vector.shape_cast %12 : vector<1x1x15x128xf32> to vector<15x128xf32>
    %cst_14 = arith.constant dense<0.000000e+00> : vector<15x256xf32>
    %14 = tpu.matmul %11, %9, %cst_14 {dimension_numbers = #tpu.dot_dimension_numbers<[1], [0], [0], [1], [0, 0, 1, 1], [], []>} : vector<15x128xf32>, vector<128x256xf32>, vector<15x256xf32> -> vector<15x256xf32>
    %15 = arith.addf %6, %14 : vector<15x256xf32>
    %cst_15 = arith.constant dense<0.000000e+00> : vector<15x256xf32>
    %16 = tpu.matmul %13, %9, %cst_15 {dimension_numbers = #tpu.dot_dimension_numbers<[1], [0], [0], [1], [0, 0, 1, 1], [], []>} : vector<15x128xf32>, vector<128x256xf32>, vector<15x256xf32> -> vector<15x256xf32>
    %17 = arith.addf %7, %16 : vector<15x256xf32>
    %c1_16 = arith.constant 1 : index
    %c0_17 = arith.constant 0 : index
    %c0_18 = arith.constant 0 : index
    %18 = vector.load %arg2[%c1_16, %c0_17, %c0_18] : memref<3x128x256xf32, #tpu.memory_space<vmem>>, vector<1x128x256xf32>
    %19 = vector.shape_cast %18 : vector<1x128x256xf32> to vector<128x256xf32>
    %c0_19 = arith.constant 0 : index
    %c1_20 = arith.constant 1 : index
    %c0_21 = arith.constant 0 : index
    %c0_22 = arith.constant 0 : index
    %20 = vector.load %arg1[%c0_19, %c1_20, %c0_21, %c0_22] : memref<8x2x16x128xf32, #tpu.memory_space<vmem>>, vector<1x1x15x128xf32>
    %21 = vector.shape_cast %20 : vector<1x1x15x128xf32> to vector<15x128xf32>
    %c0_23 = arith.constant 0 : index
    %c0_24 = arith.constant 0 : index
    %c1_25 = arith.constant 1 : index
    %c0_26 = arith.constant 0 : index
    %22 = vector.load %arg1[%c0_23, %c0_24, %c1_25, %c0_26] : memref<8x2x16x128xf32, #tpu.memory_space<vmem>>, vector<1x1x15x128xf32>
    %23 = vector.shape_cast %22 : vector<1x1x15x128xf32> to vector<15x128xf32>
    %cst_27 = arith.constant dense<0.000000e+00> : vector<15x256xf32>
    %24 = tpu.matmul %21, %19, %cst_27 {dimension_numbers = #tpu.dot_dimension_numbers<[1], [0], [0], [1], [0, 0, 1, 1], [], []>} : vector<15x128xf32>, vector<128x256xf32>, vector<15x256xf32> -> vector<15x256xf32>
    %25 = arith.addf %15, %24 : vector<15x256xf32>
    %cst_28 = arith.constant dense<0.000000e+00> : vector<15x256xf32>
    %26 = tpu.matmul %23, %19, %cst_28 {dimension_numbers = #tpu.dot_dimension_numbers<[1], [0], [0], [1], [0, 0, 1, 1], [], []>} : vector<15x128xf32>, vector<128x256xf32>, vector<15x256xf32> -> vector<15x256xf32>
    %27 = arith.addf %17, %26 : vector<15x256xf32>
    %c2 = arith.constant 2 : index
    %c0_29 = arith.constant 0 : index
    %c0_30 = arith.constant 0 : index
    %28 = vector.load %arg2[%c2, %c0_29, %c0_30] : memref<3x128x256xf32, #tpu.memory_space<vmem>>, vector<1x128x256xf32>
    %29 = vector.shape_cast %28 : vector<1x128x256xf32> to vector<128x256xf32>
    %c0_31 = arith.constant 0 : index
    %c0_32 = arith.constant 0 : index
    %c1_33 = arith.constant 1 : index
    %c0_34 = arith.constant 0 : index
    %30 = vector.load %arg1[%c0_31, %c0_32, %c1_33, %c0_34] : memref<8x2x16x128xf32, #tpu.memory_space<vmem>>, vector<1x1x15x128xf32>
    %31 = vector.shape_cast %30 : vector<1x1x15x128xf32> to vector<15x128xf32>
    %c0_35 = arith.constant 0 : index
    %c1_36 = arith.constant 1 : index
    %c1_37 = arith.constant 1 : index
    %c0_38 = arith.constant 0 : index
    %32 = vector.load %arg1[%c0_35, %c1_36, %c1_37, %c0_38] : memref<8x2x16x128xf32, #tpu.memory_space<vmem>>, vector<1x1x15x128xf32>
    %33 = vector.shape_cast %32 : vector<1x1x15x128xf32> to vector<15x128xf32>
    %cst_39 = arith.constant dense<0.000000e+00> : vector<15x256xf32>
    %34 = tpu.matmul %31, %29, %cst_39 {dimension_numbers = #tpu.dot_dimension_numbers<[1], [0], [0], [1], [0, 0, 1, 1], [], []>} : vector<15x128xf32>, vector<128x256xf32>, vector<15x256xf32> -> vector<15x256xf32>
    %35 = arith.addf %25, %34 : vector<15x256xf32>
    %cst_40 = arith.constant dense<0.000000e+00> : vector<15x256xf32>
    %36 = tpu.matmul %33, %29, %cst_40 {dimension_numbers = #tpu.dot_dimension_numbers<[1], [0], [0], [1], [0, 0, 1, 1], [], []>} : vector<15x128xf32>, vector<128x256xf32>, vector<15x256xf32> -> vector<15x256xf32>
    %37 = arith.addf %27, %36 : vector<15x256xf32>
    %38 = vector.extract_strided_slice %35 {offsets = [0, 0], sizes = [15, 128], strides = [1, 1]} : vector<15x256xf32> to vector<15x128xf32>
    %39 = vector.extract_strided_slice %35 {offsets = [0, 128], sizes = [15, 128], strides = [1, 1]} : vector<15x256xf32> to vector<15x128xf32>
    %40 = arith.maximumf %38, %39 : vector<15x128xf32>
    %41 = vector.extract_strided_slice %37 {offsets = [0, 0], sizes = [15, 128], strides = [1, 1]} : vector<15x256xf32> to vector<15x128xf32>
    %42 = vector.extract_strided_slice %37 {offsets = [0, 128], sizes = [15, 128], strides = [1, 1]} : vector<15x256xf32> to vector<15x128xf32>
    %43 = arith.maximumf %41, %42 : vector<15x128xf32>
    %44 = arith.maximumf %40, %43 : vector<15x128xf32>
    %45 = arith.addf %44, %2 : vector<15x128xf32>
    %cst_41 = arith.constant 0.000000e+00 : f32
    %46 = vector.broadcast %cst_41 : f32 to vector<15x128xf32>
    %47 = arith.maximumf %45, %46 : vector<15x128xf32>
    %cst_42 = arith.constant 0.000000e+00 : f32
    %48 = vector.broadcast %cst_42 : f32 to vector<13x128xf32>
    %49 = vector.extract_strided_slice %47 {offsets = [0, 0], sizes = [13, 128], strides = [1, 1]} : vector<15x128xf32> to vector<13x128xf32>
    %c0_43 = arith.constant 0 : index
    %c0_44 = arith.constant 0 : index
    %c0_45 = arith.constant 0 : index
    %50 = vector.load %arg4[%c0_43, %c0_44, %c0_45] : memref<3x128x128xf32, #tpu.memory_space<vmem>>, vector<1x128x128xf32>
    %51 = vector.shape_cast %50 : vector<1x128x128xf32> to vector<128x128xf32>
    %cst_46 = arith.constant dense<0.000000e+00> : vector<13x128xf32>
    %52 = tpu.matmul %49, %51, %cst_46 {dimension_numbers = #tpu.dot_dimension_numbers<[1], [0], [0], [1], [0, 0, 1, 1], [], []>} : vector<13x128xf32>, vector<128x128xf32>, vector<13x128xf32> -> vector<13x128xf32>
    %53 = arith.addf %48, %52 : vector<13x128xf32>
    %54 = vector.extract_strided_slice %47 {offsets = [1, 0], sizes = [13, 128], strides = [1, 1]} : vector<15x128xf32> to vector<13x128xf32>
    %c1_47 = arith.constant 1 : index
    %c0_48 = arith.constant 0 : index
    %c0_49 = arith.constant 0 : index
    %55 = vector.load %arg4[%c1_47, %c0_48, %c0_49] : memref<3x128x128xf32, #tpu.memory_space<vmem>>, vector<1x128x128xf32>
    %56 = vector.shape_cast %55 : vector<1x128x128xf32> to vector<128x128xf32>
    %cst_50 = arith.constant dense<0.000000e+00> : vector<13x128xf32>
    %57 = tpu.matmul %54, %56, %cst_50 {dimension_numbers = #tpu.dot_dimension_numbers<[1], [0], [0], [1], [0, 0, 1, 1], [], []>} : vector<13x128xf32>, vector<128x128xf32>, vector<13x128xf32> -> vector<13x128xf32>
    %58 = arith.addf %53, %57 : vector<13x128xf32>
    %59 = vector.extract_strided_slice %47 {offsets = [2, 0], sizes = [13, 128], strides = [1, 1]} : vector<15x128xf32> to vector<13x128xf32>
    %c2_51 = arith.constant 2 : index
    %c0_52 = arith.constant 0 : index
    %c0_53 = arith.constant 0 : index
    %60 = vector.load %arg4[%c2_51, %c0_52, %c0_53] : memref<3x128x128xf32, #tpu.memory_space<vmem>>, vector<1x128x128xf32>
    %61 = vector.shape_cast %60 : vector<1x128x128xf32> to vector<128x128xf32>
    %cst_54 = arith.constant dense<0.000000e+00> : vector<13x128xf32>
    %62 = tpu.matmul %59, %61, %cst_54 {dimension_numbers = #tpu.dot_dimension_numbers<[1], [0], [0], [1], [0, 0, 1, 1], [], []>} : vector<13x128xf32>, vector<128x128xf32>, vector<13x128xf32> -> vector<13x128xf32>
    %63 = arith.addf %58, %62 : vector<13x128xf32>
    %64 = arith.addf %63, %5 : vector<13x128xf32>
    %cst_55 = arith.constant 0.000000e+00 : f32
    %65 = vector.broadcast %cst_55 : f32 to vector<13x128xf32>
    %66 = arith.maximumf %64, %65 : vector<13x128xf32>
    %c0_56 = arith.constant 0 : index
    %c0_57 = arith.constant 0 : index
    %c0_58 = arith.constant 0 : index
    %67 = vector.load %arg11[%c0_56, %c0_57, %c0_58] : memref<8x13x128xf32, #tpu.memory_space<vmem>>, vector<1x13x128xf32>
    %68 = vector.shape_cast %67 : vector<1x13x128xf32> to vector<13x128xf32>
    %69 = vector.shape_cast %66 : vector<13x128xf32> to vector<1x13x128xf32>
    tpu.vector_store %arg11[%c0_56, %c0_57, %c0_58], %69 {strides = array<i32>} : memref<8x13x128xf32, #tpu.memory_space<vmem>>, vector<1x13x128xf32>,
    %cst_59 = arith.constant 0.000000e+00 : f32
    %70 = vector.broadcast %cst_59 : f32 to vector<15x256xf32>
    %cst_60 = arith.constant 0.000000e+00 : f32
    %71 = vector.broadcast %cst_60 : f32 to vector<15x256xf32>
    %c0_61 = arith.constant 0 : index
    %c0_62 = arith.constant 0 : index
    %c0_63 = arith.constant 0 : index
    %72 = vector.load %arg2[%c0_61, %c0_62, %c0_63] : memref<3x128x256xf32, #tpu.memory_space<vmem>>, vector<1x128x256xf32>
    %73 = vector.shape_cast %72 : vector<1x128x256xf32> to vector<128x256xf32>
    %c1_64 = arith.constant 1 : index
    %c0_65 = arith.constant 0 : index
    %c0_66 = arith.constant 0 : index
    %c0_67 = arith.constant 0 : index
    %74 = vector.load %arg1[%c1_64, %c0_65, %c0_66, %c0_67] : memref<8x2x16x128xf32, #tpu.memory_space<vmem>>, vector<1x1x15x128xf32>
    %75 = vector.shape_cast %74 : vector<1x1x15x128xf32> to vector<15x128xf32>
    %c1_68 = arith.constant 1 : index
    %c1_69 = arith.constant 1 : index
    %c0_70 = arith.constant 0 : index
    %c0_71 = arith.constant 0 : index
    %76 = vector.load %arg1[%c1_68, %c1_69, %c0_70, %c0_71] : memref<8x2x16x128xf32, #tpu.memory_space<vmem>>, vector<1x1x15x128xf32>
    %77 = vector.shape_cast %76 : vector<1x1x15x128xf32> to vector<15x128xf32>
    %cst_72 = arith.constant dense<0.000000e+00> : vector<15x256xf32>
    %78 = tpu.matmul %75, %73, %cst_72 {dimension_numbers = #tpu.dot_dimension_numbers<[1], [0], [0], [1], [0, 0, 1, 1], [], []>} : vector<15x128xf32>, vector<128x256xf32>, vector<15x256xf32> -> vector<15x256xf32>
    %79 = arith.addf %70, %78 : vector<15x256xf32>
    %cst_73 = arith.constant dense<0.000000e+00> : vector<15x256xf32>
    %80 = tpu.matmul %77, %73, %cst_73 {dimension_numbers = #tpu.dot_dimension_numbers<[1], [0], [0], [1], [0, 0, 1, 1], [], []>} : vector<15x128xf32>, vector<128x256xf32>, vector<15x256xf32> -> vector<15x256xf32>
    %81 = arith.addf %71, %80 : vector<15x256xf32>
    %c1_74 = arith.constant 1 : index
    %c0_75 = arith.constant 0 : index
    %c0_76 = arith.constant 0 : index
    %82 = vector.load %arg2[%c1_74, %c0_75, %c0_76] : memref<3x128x256xf32, #tpu.memory_space<vmem>>, vector<1x128x256xf32>
    %83 = vector.shape_cast %82 : vector<1x128x256xf32> to vector<128x256xf32>
    %c1_77 = arith.constant 1 : index
    %c1_78 = arith.constant 1 : index
    %c0_79 = arith.constant 0 : index
    %c0_80 = arith.constant 0 : index
    %84 = vector.load %arg1[%c1_77, %c1_78, %c0_79, %c0_80] : memref<8x2x16x128xf32, #tpu.memory_space<vmem>>, vector<1x1x15x128xf32>
    %85 = vector.shape_cast %84 : vector<1x1x15x128xf32> to vector<15x128xf32>
    %c1_81 = arith.constant 1 : index
    %c0_82 = arith.constant 0 : index
    %c1_83 = arith.constant 1 : index
    %c0_84 = arith.constant 0 : index
    %86 = vector.load %arg1[%c1_81, %c0_82, %c1_83, %c0_84] : memref<8x2x16x128xf32, #tpu.memory_space<vmem>>, vector<1x1x15x128xf32>
    %87 = vector.shape_cast %86 : vector<1x1x15x128xf32> to vector<15x128xf32>
    %cst_85 = arith.constant dense<0.000000e+00> : vector<15x256xf32>
    %88 = tpu.matmul %85, %83, %cst_85 {dimension_numbers = #tpu.dot_dimension_numbers<[1], [0], [0], [1], [0, 0, 1, 1], [], []>} : vector<15x128xf32>, vector<128x256xf32>, vector<15x256xf32> -> vector<15x256xf32>
    %89 = arith.addf %79, %88 : vector<15x256xf32>
    %cst_86 = arith.constant dense<0.000000e+00> : vector<15x256xf32>
    %90 = tpu.matmul %87, %83, %cst_86 {dimension_numbers = #tpu.dot_dimension_numbers<[1], [0], [0], [1], [0, 0, 1, 1], [], []>} : vector<15x128xf32>, vector<128x256xf32>, vector<15x256xf32> -> vector<15x256xf32>
    %91 = arith.addf %81, %90 : vector<15x256xf32>
    %c2_87 = arith.constant 2 : index
    %c0_88 = arith.constant 0 : index
    %c0_89 = arith.constant 0 : index
    %92 = vector.load %arg2[%c2_87, %c0_88, %c0_89] : memref<3x128x256xf32, #tpu.memory_space<vmem>>, vector<1x128x256xf32>
    %93 = vector.shape_cast %92 : vector<1x128x256xf32> to vector<128x256xf32>
    %c1_90 = arith.constant 1 : index
    %c0_91 = arith.constant 0 : index
    %c1_92 = arith.constant 1 : index
    %c0_93 = arith.constant 0 : index
    %94 = vector.load %arg1[%c1_90, %c0_91, %c1_92, %c0_93] : memref<8x2x16x128xf32, #tpu.memory_space<vmem>>, vector<1x1x15x128xf32>
    %95 = vector.shape_cast %94 : vector<1x1x15x128xf32> to vector<15x128xf32>
    %c1_94 = arith.constant 1 : index
    %c1_95 = arith.constant 1 : index
    %c1_96 = arith.constant 1 : index
    %c0_97 = arith.constant 0 : index
    %96 = vector.load %arg1[%c1_94, %c1_95, %c1_96, %c0_97] : memref<8x2x16x128xf32, #tpu.memory_space<vmem>>, vector<1x1x15x128xf32>
    %97 = vector.shape_cast %96 : vector<1x1x15x128xf32> to vector<15x128xf32>
    %cst_98 = arith.constant dense<0.000000e+00> : vector<15x256xf32>
    %98 = tpu.matmul %95, %93, %cst_98 {dimension_numbers = #tpu.dot_dimension_numbers<[1], [0], [0], [1], [0, 0, 1, 1], [], []>} : vector<15x128xf32>, vector<128x256xf32>, vector<15x256xf32> -> vector<15x256xf32>
    %99 = arith.addf %89, %98 : vector<15x256xf32>
    %cst_99 = arith.constant dense<0.000000e+00> : vector<15x256xf32>
    %100 = tpu.matmul %97, %93, %cst_99 {dimension_numbers = #tpu.dot_dimension_numbers<[1], [0], [0], [1], [0, 0, 1, 1], [], []>} : vector<15x128xf32>, vector<128x256xf32>, vector<15x256xf32> -> vector<15x256xf32>
    %101 = arith.addf %91, %100 : vector<15x256xf32>
    %102 = vector.extract_strided_slice %99 {offsets = [0, 0], sizes = [15, 128], strides = [1, 1]} : vector<15x256xf32> to vector<15x128xf32>
    %103 = vector.extract_strided_slice %99 {offsets = [0, 128], sizes = [15, 128], strides = [1, 1]} : vector<15x256xf32> to vector<15x128xf32>
    %104 = arith.maximumf %102, %103 : vector<15x128xf32>
    %105 = vector.extract_strided_slice %101 {offsets = [0, 0], sizes = [15, 128], strides = [1, 1]} : vector<15x256xf32> to vector<15x128xf32>
    %106 = vector.extract_strided_slice %101 {offsets = [0, 128], sizes = [15, 128], strides = [1, 1]} : vector<15x256xf32> to vector<15x128xf32>
    %107 = arith.maximumf %105, %106 : vector<15x128xf32>
    %108 = arith.maximumf %104, %107 : vector<15x128xf32>
    %109 = arith.addf %108, %2 : vector<15x128xf32>
    %cst_100 = arith.constant 0.000000e+00 : f32
    %110 = vector.broadcast %cst_100 : f32 to vector<15x128xf32>
    %111 = arith.maximumf %109, %110 : vector<15x128xf32>
    %cst_101 = arith.constant 0.000000e+00 : f32
    %112 = vector.broadcast %cst_101 : f32 to vector<13x128xf32>
    %113 = vector.extract_strided_slice %111 {offsets = [0, 0], sizes = [13, 128], strides = [1, 1]} : vector<15x128xf32> to vector<13x128xf32>
    %c0_102 = arith.constant 0 : index
    %c0_103 = arith.constant 0 : index
    %c0_104 = arith.constant 0 : index
    %114 = vector.load %arg4[%c0_102, %c0_103, %c0_104] : memref<3x128x128xf32, #tpu.memory_space<vmem>>, vector<1x128x128xf32>
    %115 = vector.shape_cast %114 : vector<1x128x128xf32> to vector<128x128xf32>
    %cst_105 = arith.constant dense<0.000000e+00> : vector<13x128xf32>
    %116 = tpu.matmul %113, %115, %cst_105 {dimension_numbers = #tpu.dot_dimension_numbers<[1], [0], [0], [1], [0, 0, 1, 1], [], []>} : vector<13x128xf32>, vector<128x128xf32>, vector<13x128xf32> -> vector<13x128xf32>
    %117 = arith.addf %112, %116 : vector<13x128xf32>
    %118 = vector.extract_strided_slice %111 {offsets = [1, 0], sizes = [13, 128], strides = [1, 1]} : vector<15x128xf32> to vector<13x128xf32>
    %c1_106 = arith.constant 1 : index
    %c0_107 = arith.constant 0 : index
    %c0_108 = arith.constant 0 : index
    %119 = vector.load %arg4[%c1_106, %c0_107, %c0_108] : memref<3x128x128xf32, #tpu.memory_space<vmem>>, vector<1x128x128xf32>
    %120 = vector.shape_cast %119 : vector<1x128x128xf32> to vector<128x128xf32>
    %cst_109 = arith.constant dense<0.000000e+00> : vector<13x128xf32>
    %121 = tpu.matmul %118, %120, %cst_109 {dimension_numbers = #tpu.dot_dimension_numbers<[1], [0], [0], [1], [0, 0, 1, 1], [], []>} : vector<13x128xf32>, vector<128x128xf32>, vector<13x128xf32> -> vector<13x128xf32>
    %122 = arith.addf %117, %121 : vector<13x128xf32>
    %123 = vector.extract_strided_slice %111 {offsets = [2, 0], sizes = [13, 128], strides = [1, 1]} : vector<15x128xf32> to vector<13x128xf32>
    %c2_110 = arith.constant 2 : index
    %c0_111 = arith.constant 0 : index
    %c0_112 = arith.constant 0 : index
    %124 = vector.load %arg4[%c2_110, %c0_111, %c0_112] : memref<3x128x128xf32, #tpu.memory_space<vmem>>, vector<1x128x128xf32>
    %125 = vector.shape_cast %124 : vector<1x128x128xf32> to vector<128x128xf32>
    %cst_113 = arith.constant dense<0.000000e+00> : vector<13x128xf32>
    %126 = tpu.matmul %123, %125, %cst_113 {dimension_numbers = #tpu.dot_dimension_numbers<[1], [0], [0], [1], [0, 0, 1, 1], [], []>} : vector<13x128xf32>, vector<128x128xf32>, vector<13x128xf32> -> vector<13x128xf32>
    %127 = arith.addf %122, %126 : vector<13x128xf32>
    %128 = arith.addf %127, %5 : vector<13x128xf32>
    %cst_114 = arith.constant 0.000000e+00 : f32
    %129 = vector.broadcast %cst_114 : f32 to vector<13x128xf32>
    %130 = arith.maximumf %128, %129 : vector<13x128xf32>
    %c1_115 = arith.constant 1 : index
    %c0_116 = arith.constant 0 : index
    %c0_117 = arith.constant 0 : index
    %131 = vector.load %arg11[%c1_115, %c0_116, %c0_117] : memref<8x13x128xf32, #tpu.memory_space<vmem>>, vector<1x13x128xf32>
    %132 = vector.shape_cast %131 : vector<1x13x128xf32> to vector<13x128xf32>
    %133 = vector.shape_cast %130 : vector<13x128xf32> to vector<1x13x128xf32>
    tpu.vector_store %arg11[%c1_115, %c0_116, %c0_117], %133 {strides = array<i32>} : memref<8x13x128xf32, #tpu.memory_space<vmem>>, vector<1x13x128xf32>,
    %cst_118 = arith.constant 0.000000e+00 : f32
    %134 = vector.broadcast %cst_118 : f32 to vector<15x256xf32>
    %cst_119 = arith.constant 0.000000e+00 : f32
    %135 = vector.broadcast %cst_119 : f32 to vector<15x256xf32>
    %c0_120 = arith.constant 0 : index
    %c0_121 = arith.constant 0 : index
    %c0_122 = arith.constant 0 : index
    %136 = vector.load %arg2[%c0_120, %c0_121, %c0_122] : memref<3x128x256xf32, #tpu.memory_space<vmem>>, vector<1x128x256xf32>
    %137 = vector.shape_cast %136 : vector<1x128x256xf32> to vector<128x256xf32>
    %c2_123 = arith.constant 2 : index
    %c0_124 = arith.constant 0 : index
    %c0_125 = arith.constant 0 : index
    %c0_126 = arith.constant 0 : index
    %138 = vector.load %arg1[%c2_123, %c0_124, %c0_125, %c0_126] : memref<8x2x16x128xf32, #tpu.memory_space<vmem>>, vector<1x1x15x128xf32>
    %139 = vector.shape_cast %138 : vector<1x1x15x128xf32> to vector<15x128xf32>
    %c2_127 = arith.constant 2 : index
    %c1_128 = arith.constant 1 : index
    %c0_129 = arith.constant 0 : index
    %c0_130 = arith.constant 0 : index
    %140 = vector.load %arg1[%c2_127, %c1_128, %c0_129, %c0_130] : memref<8x2x16x128xf32, #tpu.memory_space<vmem>>, vector<1x1x15x128xf32>
    %141 = vector.shape_cast %140 : vector<1x1x15x128xf32> to vector<15x128xf32>
    %cst_131 = arith.constant dense<0.000000e+00> : vector<15x256xf32>
    %142 = tpu.matmul %139, %137, %cst_131 {dimension_numbers = #tpu.dot_dimension_numbers<[1], [0], [0], [1], [0, 0, 1, 1], [], []>} : vector<15x128xf32>, vector<128x256xf32>, vector<15x256xf32> -> vector<15x256xf32>
    %143 = arith.addf %134, %142 : vector<15x256xf32>
    %cst_132 = arith.constant dense<0.000000e+00> : vector<15x256xf32>
    %144 = tpu.matmul %141, %137, %cst_132 {dimension_numbers = #tpu.dot_dimension_numbers<[1], [0], [0], [1], [0, 0, 1, 1], [], []>} : vector<15x128xf32>, vector<128x256xf32>, vector<15x256xf32> -> vector<15x256xf32>
    %145 = arith.addf %135, %144 : vector<15x256xf32>
    %c1_133 = arith.constant 1 : index
    %c0_134 = arith.constant 0 : index
    %c0_135 = arith.constant 0 : index
    %146 = vector.load %arg2[%c1_133, %c0_134, %c0_135] : memref<3x128x256xf32, #tpu.memory_space<vmem>>, vector<1x128x256xf32>
    %147 = vector.shape_cast %146 : vector<1x128x256xf32> to vector<128x256xf32>
    %c2_136 = arith.constant 2 : index
    %c1_137 = arith.constant 1 : index
    %c0_138 = arith.constant 0 : index
    %c0_139 = arith.constant 0 : index
    %148 = vector.load %arg1[%c2_136, %c1_137, %c0_138, %c0_139] : memref<8x2x16x128xf32, #tpu.memory_space<vmem>>, vector<1x1x15x128xf32>
    %149 = vector.shape_cast %148 : vector<1x1x15x128xf32> to vector<15x128xf32>
    %c2_140 = arith.constant 2 : index
    %c0_141 = arith.constant 0 : index
    %c1_142 = arith.constant 1 : index
    %c0_143 = arith.constant 0 : index
    %150 = vector.load %arg1[%c2_140, %c0_141, %c1_142, %c0_143] : memref<8x2x16x128xf32, #tpu.memory_space<vmem>>, vector<1x1x15x128xf32>
    %151 = vector.shape_cast %150 : vector<1x1x15x128xf32> to vector<15x128xf32>
    %cst_144 = arith.constant dense<0.000000e+00> : vector<15x256xf32>
    %152 = tpu.matmul %149, %147, %cst_144 {dimension_numbers = #tpu.dot_dimension_numbers<[1], [0], [0], [1], [0, 0, 1, 1], [], []>} : vector<15x128xf32>, vector<128x256xf32>, vector<15x256xf32> -> vector<15x256xf32>
    %153 = arith.addf %143, %152 : vector<15x256xf32>
    %cst_145 = arith.constant dense<0.000000e+00> : vector<15x256xf32>
    %154 = tpu.matmul %151, %147, %cst_145 {dimension_numbers = #tpu.dot_dimension_numbers<[1], [0], [0], [1], [0, 0, 1, 1], [], []>} : vector<15x128xf32>, vector<128x256xf32>, vector<15x256xf32> -> vector<15x256xf32>
    %155 = arith.addf %145, %154 : vector<15x256xf32>
    %c2_146 = arith.constant 2 : index
    %c0_147 = arith.constant 0 : index
    %c0_148 = arith.constant 0 : index
    %156 = vector.load %arg2[%c2_146, %c0_147, %c0_148] : memref<3x128x256xf32, #tpu.memory_space<vmem>>, vector<1x128x256xf32>
    %157 = vector.shape_cast %156 : vector<1x128x256xf32> to vector<128x256xf32>
    %c2_149 = arith.constant 2 : index
    %c0_150 = arith.constant 0 : index
    %c1_151 = arith.constant 1 : index
    %c0_152 = arith.constant 0 : index
    %158 = vector.load %arg1[%c2_149, %c0_150, %c1_151, %c0_152] : memref<8x2x16x128xf32, #tpu.memory_space<vmem>>, vector<1x1x15x128xf32>
    %159 = vector.shape_cast %158 : vector<1x1x15x128xf32> to vector<15x128xf32>
    %c2_153 = arith.constant 2 : index
    %c1_154 = arith.constant 1 : index
    %c1_155 = arith.constant 1 : index
    %c0_156 = arith.constant 0 : index
    %160 = vector.load %arg1[%c2_153, %c1_154, %c1_155, %c0_156] : memref<8x2x16x128xf32, #tpu.memory_space<vmem>>, vector<1x1x15x128xf32>
    %161 = vector.shape_cast %160 : vector<1x1x15x128xf32> to vector<15x128xf32>
    %cst_157 = arith.constant dense<0.000000e+00> : vector<15x256xf32>
    %162 = tpu.matmul %159, %157, %cst_157 {dimension_numbers = #tpu.dot_dimension_numbers<[1], [0], [0], [1], [0, 0, 1, 1], [], []>} : vector<15x128xf32>, vector<128x256xf32>, vector<15x256xf32> -> vector<15x256xf32>
    %163 = arith.addf %153, %162 : vector<15x256xf32>
    %cst_158 = arith.constant dense<0.000000e+00> : vector<15x256xf32>
    %164 = tpu.matmul %161, %157, %cst_158 {dimension_numbers = #tpu.dot_dimension_numbers<[1], [0], [0], [1], [0, 0, 1, 1], [], []>} : vector<15x128xf32>, vector<128x256xf32>, vector<15x256xf32> -> vector<15x256xf32>
    %165 = arith.addf %155, %164 : vector<15x256xf32>
    %166 = vector.extract_strided_slice %163 {offsets = [0, 0], sizes = [15, 128], strides = [1, 1]} : vector<15x256xf32> to vector<15x128xf32>
    %167 = vector.extract_strided_slice %163 {offsets = [0, 128], sizes = [15, 128], strides = [1, 1]} : vector<15x256xf32> to vector<15x128xf32>
    %168 = arith.maximumf %166, %167 : vector<15x128xf32>
    %169 = vector.extract_strided_slice %165 {offsets = [0, 0], sizes = [15, 128], strides = [1, 1]} : vector<15x256xf32> to vector<15x128xf32>
    %170 = vector.extract_strided_slice %165 {offsets = [0, 128], sizes = [15, 128], strides = [1, 1]} : vector<15x256xf32> to vector<15x128xf32>
    %171 = arith.maximumf %169, %170 : vector<15x128xf32>
    %172 = arith.maximumf %168, %171 : vector<15x128xf32>
    %173 = arith.addf %172, %2 : vector<15x128xf32>
    %cst_159 = arith.constant 0.000000e+00 : f32
    %174 = vector.broadcast %cst_159 : f32 to vector<15x128xf32>
    %175 = arith.maximumf %173, %174 : vector<15x128xf32>
    %cst_160 = arith.constant 0.000000e+00 : f32
    %176 = vector.broadcast %cst_160 : f32 to vector<13x128xf32>
    %177 = vector.extract_strided_slice %175 {offsets = [0, 0], sizes = [13, 128], strides = [1, 1]} : vector<15x128xf32> to vector<13x128xf32>
    %c0_161 = arith.constant 0 : index
    %c0_162 = arith.constant 0 : index
    %c0_163 = arith.constant 0 : index
    %178 = vector.load %arg4[%c0_161, %c0_162, %c0_163] : memref<3x128x128xf32, #tpu.memory_space<vmem>>, vector<1x128x128xf32>
    %179 = vector.shape_cast %178 : vector<1x128x128xf32> to vector<128x128xf32>
    %cst_164 = arith.constant dense<0.000000e+00> : vector<13x128xf32>
    %180 = tpu.matmul %177, %179, %cst_164 {dimension_numbers = #tpu.dot_dimension_numbers<[1], [0], [0], [1], [0, 0, 1, 1], [], []>} : vector<13x128xf32>, vector<128x128xf32>, vector<13x128xf32> -> vector<13x128xf32>
    %181 = arith.addf %176, %180 : vector<13x128xf32>
    %182 = vector.extract_strided_slice %175 {offsets = [1, 0], sizes = [13, 128], strides = [1, 1]} : vector<15x128xf32> to vector<13x128xf32>
    %c1_165 = arith.constant 1 : index
    %c0_166 = arith.constant 0 : index
    %c0_167 = arith.constant 0 : index
    %183 = vector.load %arg4[%c1_165, %c0_166, %c0_167] : memref<3x128x128xf32, #tpu.memory_space<vmem>>, vector<1x128x128xf32>
    %184 = vector.shape_cast %183 : vector<1x128x128xf32> to vector<128x128xf32>
    %cst_168 = arith.constant dense<0.000000e+00> : vector<13x128xf32>
    %185 = tpu.matmul %182, %184, %cst_168 {dimension_numbers = #tpu.dot_dimension_numbers<[1], [0], [0], [1], [0, 0, 1, 1], [], []>} : vector<13x128xf32>, vector<128x128xf32>, vector<13x128xf32> -> vector<13x128xf32>
    %186 = arith.addf %181, %185 : vector<13x128xf32>
    %187 = vector.extract_strided_slice %175 {offsets = [2, 0], sizes = [13, 128], strides = [1, 1]} : vector<15x128xf32> to vector<13x128xf32>
    %c2_169 = arith.constant 2 : index
    %c0_170 = arith.constant 0 : index
    %c0_171 = arith.constant 0 : index
    %188 = vector.load %arg4[%c2_169, %c0_170, %c0_171] : memref<3x128x128xf32, #tpu.memory_space<vmem>>, vector<1x128x128xf32>
    %189 = vector.shape_cast %188 : vector<1x128x128xf32> to vector<128x128xf32>
    %cst_172 = arith.constant dense<0.000000e+00> : vector<13x128xf32>
    %190 = tpu.matmul %187, %189, %cst_172 {dimension_numbers = #tpu.dot_dimension_numbers<[1], [0], [0], [1], [0, 0, 1, 1], [], []>} : vector<13x128xf32>, vector<128x128xf32>, vector<13x128xf32> -> vector<13x128xf32>
    %191 = arith.addf %186, %190 : vector<13x128xf32>
    %192 = arith.addf %191, %5 : vector<13x128xf32>
    %cst_173 = arith.constant 0.000000e+00 : f32
    %193 = vector.broadcast %cst_173 : f32 to vector<13x128xf32>
    %194 = arith.maximumf %192, %193 : vector<13x128xf32>
    %c2_174 = arith.constant 2 : index
    %c0_175 = arith.constant 0 : index
    %c0_176 = arith.constant 0 : index
    %195 = vector.load %arg11[%c2_174, %c0_175, %c0_176] : memref<8x13x128xf32, #tpu.memory_space<vmem>>, vector<1x13x128xf32>
    %196 = vector.shape_cast %195 : vector<1x13x128xf32> to vector<13x128xf32>
    %197 = vector.shape_cast %194 : vector<13x128xf32> to vector<1x13x128xf32>
    tpu.vector_store %arg11[%c2_174, %c0_175, %c0_176], %197 {strides = array<i32>} : memref<8x13x128xf32, #tpu.memory_space<vmem>>, vector<1x13x128xf32>,
    %cst_177 = arith.constant 0.000000e+00 : f32
    %198 = vector.broadcast %cst_177 : f32 to vector<15x256xf32>
    %cst_178 = arith.constant 0.000000e+00 : f32
    %199 = vector.broadcast %cst_178 : f32 to vector<15x256xf32>
    %c0_179 = arith.constant 0 : index
    %c0_180 = arith.constant 0 : index
    %c0_181 = arith.constant 0 : index
    %200 = vector.load %arg2[%c0_179, %c0_180, %c0_181] : memref<3x128x256xf32, #tpu.memory_space<vmem>>, vector<1x128x256xf32>
    %201 = vector.shape_cast %200 : vector<1x128x256xf32> to vector<128x256xf32>
    %c3 = arith.constant 3 : index
    %c0_182 = arith.constant 0 : index
    %c0_183 = arith.constant 0 : index
    %c0_184 = arith.constant 0 : index
    %202 = vector.load %arg1[%c3, %c0_182, %c0_183, %c0_184] : memref<8x2x16x128xf32, #tpu.memory_space<vmem>>, vector<1x1x15x128xf32>
    %203 = vector.shape_cast %202 : vector<1x1x15x128xf32> to vector<15x128xf32>
    %c3_185 = arith.constant 3 : index
    %c1_186 = arith.constant 1 : index
    %c0_187 = arith.constant 0 : index
    %c0_188 = arith.constant 0 : index
    %204 = vector.load %arg1[%c3_185, %c1_186, %c0_187, %c0_188] : memref<8x2x16x128xf32, #tpu.memory_space<vmem>>, vector<1x1x15x128xf32>
    %205 = vector.shape_cast %204 : vector<1x1x15x128xf32> to vector<15x128xf32>
    %cst_189 = arith.constant dense<0.000000e+00> : vector<15x256xf32>
    %206 = tpu.matmul %203, %201, %cst_189 {dimension_numbers = #tpu.dot_dimension_numbers<[1], [0], [0], [1], [0, 0, 1, 1], [], []>} : vector<15x128xf32>, vector<128x256xf32>, vector<15x256xf32> -> vector<15x256xf32>
    %207 = arith.addf %198, %206 : vector<15x256xf32>
    %cst_190 = arith.constant dense<0.000000e+00> : vector<15x256xf32>
    %208 = tpu.matmul %205, %201, %cst_190 {dimension_numbers = #tpu.dot_dimension_numbers<[1], [0], [0], [1], [0, 0, 1, 1], [], []>} : vector<15x128xf32>, vector<128x256xf32>, vector<15x256xf32> -> vector<15x256xf32>
    %209 = arith.addf %199, %208 : vector<15x256xf32>
    %c1_191 = arith.constant 1 : index
    %c0_192 = arith.constant 0 : index
    %c0_193 = arith.constant 0 : index
    %210 = vector.load %arg2[%c1_191, %c0_192, %c0_193] : memref<3x128x256xf32, #tpu.memory_space<vmem>>, vector<1x128x256xf32>
    %211 = vector.shape_cast %210 : vector<1x128x256xf32> to vector<128x256xf32>
    %c3_194 = arith.constant 3 : index
    %c1_195 = arith.constant 1 : index
    %c0_196 = arith.constant 0 : index
    %c0_197 = arith.constant 0 : index
    %212 = vector.load %arg1[%c3_194, %c1_195, %c0_196, %c0_197] : memref<8x2x16x128xf32, #tpu.memory_space<vmem>>, vector<1x1x15x128xf32>
    %213 = vector.shape_cast %212 : vector<1x1x15x128xf32> to vector<15x128xf32>
    %c3_198 = arith.constant 3 : index
    %c0_199 = arith.constant 0 : index
    %c1_200 = arith.constant 1 : index
    %c0_201 = arith.constant 0 : index
    %214 = vector.load %arg1[%c3_198, %c0_199, %c1_200, %c0_201] : memref<8x2x16x128xf32, #tpu.memory_space<vmem>>, vector<1x1x15x128xf32>
    %215 = vector.shape_cast %214 : vector<1x1x15x128xf32> to vector<15x128xf32>
    %cst_202 = arith.constant dense<0.000000e+00> : vector<15x256xf32>
    %216 = tpu.matmul %213, %211, %cst_202 {dimension_numbers = #tpu.dot_dimension_numbers<[1], [0], [0], [1], [0, 0, 1, 1], [], []>} : vector<15x128xf32>, vector<128x256xf32>, vector<15x256xf32> -> vector<15x256xf32>
    %217 = arith.addf %207, %216 : vector<15x256xf32>
    %cst_203 = arith.constant dense<0.000000e+00> : vector<15x256xf32>
    %218 = tpu.matmul %215, %211, %cst_203 {dimension_numbers = #tpu.dot_dimension_numbers<[1], [0], [0], [1], [0, 0, 1, 1], [], []>} : vector<15x128xf32>, vector<128x256xf32>, vector<15x256xf32> -> vector<15x256xf32>
    %219 = arith.addf %209, %218 : vector<15x256xf32>
    %c2_204 = arith.constant 2 : index
    %c0_205 = arith.constant 0 : index
    %c0_206 = arith.constant 0 : index
    %220 = vector.load %arg2[%c2_204, %c0_205, %c0_206] : memref<3x128x256xf32, #tpu.memory_space<vmem>>, vector<1x128x256xf32>
    %221 = vector.shape_cast %220 : vector<1x128x256xf32> to vector<128x256xf32>
    %c3_207 = arith.constant 3 : index
    %c0_208 = arith.constant 0 : index
    %c1_209 = arith.constant 1 : index
    %c0_210 = arith.constant 0 : index
    %222 = vector.load %arg1[%c3_207, %c0_208, %c1_209, %c0_210] : memref<8x2x16x128xf32, #tpu.memory_space<vmem>>, vector<1x1x15x128xf32>
    %223 = vector.shape_cast %222 : vector<1x1x15x128xf32> to vector<15x128xf32>
    %c3_211 = arith.constant 3 : index
    %c1_212 = arith.constant 1 : index
    %c1_213 = arith.constant 1 : index
    %c0_214 = arith.constant 0 : index
    %224 = vector.load %arg1[%c3_211, %c1_212, %c1_213, %c0_214] : memref<8x2x16x128xf32, #tpu.memory_space<vmem>>, vector<1x1x15x128xf32>
    %225 = vector.shape_cast %224 : vector<1x1x15x128xf32> to vector<15x128xf32>
    %cst_215 = arith.constant dense<0.000000e+00> : vector<15x256xf32>
    %226 = tpu.matmul %223, %221, %cst_215 {dimension_numbers = #tpu.dot_dimension_numbers<[1], [0], [0], [1], [0, 0, 1, 1], [], []>} : vector<15x128xf32>, vector<128x256xf32>, vector<15x256xf32> -> vector<15x256xf32>
    %227 = arith.addf %217, %226 : vector<15x256xf32>
    %cst_216 = arith.constant dense<0.000000e+00> : vector<15x256xf32>
    %228 = tpu.matmul %225, %221, %cst_216 {dimension_numbers = #tpu.dot_dimension_numbers<[1], [0], [0], [1], [0, 0, 1, 1], [], []>} : vector<15x128xf32>, vector<128x256xf32>, vector<15x256xf32> -> vector<15x256xf32>
    %229 = arith.addf %219, %228 : vector<15x256xf32>
    %230 = vector.extract_strided_slice %227 {offsets = [0, 0], sizes = [15, 128], strides = [1, 1]} : vector<15x256xf32> to vector<15x128xf32>
    %231 = vector.extract_strided_slice %227 {offsets = [0, 128], sizes = [15, 128], strides = [1, 1]} : vector<15x256xf32> to vector<15x128xf32>
    %232 = arith.maximumf %230, %231 : vector<15x128xf32>
    %233 = vector.extract_strided_slice %229 {offsets = [0, 0], sizes = [15, 128], strides = [1, 1]} : vector<15x256xf32> to vector<15x128xf32>
    %234 = vector.extract_strided_slice %229 {offsets = [0, 128], sizes = [15, 128], strides = [1, 1]} : vector<15x256xf32> to vector<15x128xf32>
    %235 = arith.maximumf %233, %234 : vector<15x128xf32>
    %236 = arith.maximumf %232, %235 : vector<15x128xf32>
    %237 = arith.addf %236, %2 : vector<15x128xf32>
    %cst_217 = arith.constant 0.000000e+00 : f32
    %238 = vector.broadcast %cst_217 : f32 to vector<15x128xf32>
    %239 = arith.maximumf %237, %238 : vector<15x128xf32>
    %cst_218 = arith.constant 0.000000e+00 : f32
    %240 = vector.broadcast %cst_218 : f32 to vector<13x128xf32>
    %241 = vector.extract_strided_slice %239 {offsets = [0, 0], sizes = [13, 128], strides = [1, 1]} : vector<15x128xf32> to vector<13x128xf32>
    %c0_219 = arith.constant 0 : index
    %c0_220 = arith.constant 0 : index
    %c0_221 = arith.constant 0 : index
    %242 = vector.load %arg4[%c0_219, %c0_220, %c0_221] : memref<3x128x128xf32, #tpu.memory_space<vmem>>, vector<1x128x128xf32>
    %243 = vector.shape_cast %242 : vector<1x128x128xf32> to vector<128x128xf32>
    %cst_222 = arith.constant dense<0.000000e+00> : vector<13x128xf32>
    %244 = tpu.matmul %241, %243, %cst_222 {dimension_numbers = #tpu.dot_dimension_numbers<[1], [0], [0], [1], [0, 0, 1, 1], [], []>} : vector<13x128xf32>, vector<128x128xf32>, vector<13x128xf32> -> vector<13x128xf32>
    %245 = arith.addf %240, %244 : vector<13x128xf32>
    %246 = vector.extract_strided_slice %239 {offsets = [1, 0], sizes = [13, 128], strides = [1, 1]} : vector<15x128xf32> to vector<13x128xf32>
    %c1_223 = arith.constant 1 : index
    %c0_224 = arith.constant 0 : index
    %c0_225 = arith.constant 0 : index
    %247 = vector.load %arg4[%c1_223, %c0_224, %c0_225] : memref<3x128x128xf32, #tpu.memory_space<vmem>>, vector<1x128x128xf32>
    %248 = vector.shape_cast %247 : vector<1x128x128xf32> to vector<128x128xf32>
    %cst_226 = arith.constant dense<0.000000e+00> : vector<13x128xf32>
    %249 = tpu.matmul %246, %248, %cst_226 {dimension_numbers = #tpu.dot_dimension_numbers<[1], [0], [0], [1], [0, 0, 1, 1], [], []>} : vector<13x128xf32>, vector<128x128xf32>, vector<13x128xf32> -> vector<13x128xf32>
    %250 = arith.addf %245, %249 : vector<13x128xf32>
    %251 = vector.extract_strided_slice %239 {offsets = [2, 0], sizes = [13, 128], strides = [1, 1]} : vector<15x128xf32> to vector<13x128xf32>
    %c2_227 = arith.constant 2 : index
    %c0_228 = arith.constant 0 : index
    %c0_229 = arith.constant 0 : index
    %252 = vector.load %arg4[%c2_227, %c0_228, %c0_229] : memref<3x128x128xf32, #tpu.memory_space<vmem>>, vector<1x128x128xf32>
    %253 = vector.shape_cast %252 : vector<1x128x128xf32> to vector<128x128xf32>
    %cst_230 = arith.constant dense<0.000000e+00> : vector<13x128xf32>
    %254 = tpu.matmul %251, %253, %cst_230 {dimension_numbers = #tpu.dot_dimension_numbers<[1], [0], [0], [1], [0, 0, 1, 1], [], []>} : vector<13x128xf32>, vector<128x128xf32>, vector<13x128xf32> -> vector<13x128xf32>
    %255 = arith.addf %250, %254 : vector<13x128xf32>
    %256 = arith.addf %255, %5 : vector<13x128xf32>
    %cst_231 = arith.constant 0.000000e+00 : f32
    %257 = vector.broadcast %cst_231 : f32 to vector<13x128xf32>
    %258 = arith.maximumf %256, %257 : vector<13x128xf32>
    %c3_232 = arith.constant 3 : index
    %c0_233 = arith.constant 0 : index
    %c0_234 = arith.constant 0 : index
    %259 = vector.load %arg11[%c3_232, %c0_233, %c0_234] : memref<8x13x128xf32, #tpu.memory_space<vmem>>, vector<1x13x128xf32>
    %260 = vector.shape_cast %259 : vector<1x13x128xf32> to vector<13x128xf32>
    %261 = vector.shape_cast %258 : vector<13x128xf32> to vector<1x13x128xf32>
    tpu.vector_store %arg11[%c3_232, %c0_233, %c0_234], %261 {strides = array<i32>} : memref<8x13x128xf32, #tpu.memory_space<vmem>>, vector<1x13x128xf32>,
    %cst_235 = arith.constant 0.000000e+00 : f32
    %262 = vector.broadcast %cst_235 : f32 to vector<15x256xf32>
    %cst_236 = arith.constant 0.000000e+00 : f32
    %263 = vector.broadcast %cst_236 : f32 to vector<15x256xf32>
    %c0_237 = arith.constant 0 : index
    %c0_238 = arith.constant 0 : index
    %c0_239 = arith.constant 0 : index
    %264 = vector.load %arg2[%c0_237, %c0_238, %c0_239] : memref<3x128x256xf32, #tpu.memory_space<vmem>>, vector<1x128x256xf32>
    %265 = vector.shape_cast %264 : vector<1x128x256xf32> to vector<128x256xf32>
    %c4 = arith.constant 4 : index
    %c0_240 = arith.constant 0 : index
    %c0_241 = arith.constant 0 : index
    %c0_242 = arith.constant 0 : index
    %266 = vector.load %arg1[%c4, %c0_240, %c0_241, %c0_242] : memref<8x2x16x128xf32, #tpu.memory_space<vmem>>, vector<1x1x15x128xf32>
    %267 = vector.shape_cast %266 : vector<1x1x15x128xf32> to vector<15x128xf32>
    %c4_243 = arith.constant 4 : index
    %c1_244 = arith.constant 1 : index
    %c0_245 = arith.constant 0 : index
    %c0_246 = arith.constant 0 : index
    %268 = vector.load %arg1[%c4_243, %c1_244, %c0_245, %c0_246] : memref<8x2x16x128xf32, #tpu.memory_space<vmem>>, vector<1x1x15x128xf32>
    %269 = vector.shape_cast %268 : vector<1x1x15x128xf32> to vector<15x128xf32>
    %cst_247 = arith.constant dense<0.000000e+00> : vector<15x256xf32>
    %270 = tpu.matmul %267, %265, %cst_247 {dimension_numbers = #tpu.dot_dimension_numbers<[1], [0], [0], [1], [0, 0, 1, 1], [], []>} : vector<15x128xf32>, vector<128x256xf32>, vector<15x256xf32> -> vector<15x256xf32>
    %271 = arith.addf %262, %270 : vector<15x256xf32>
    %cst_248 = arith.constant dense<0.000000e+00> : vector<15x256xf32>
    %272 = tpu.matmul %269, %265, %cst_248 {dimension_numbers = #tpu.dot_dimension_numbers<[1], [0], [0], [1], [0, 0, 1, 1], [], []>} : vector<15x128xf32>, vector<128x256xf32>, vector<15x256xf32> -> vector<15x256xf32>
    %273 = arith.addf %263, %272 : vector<15x256xf32>
    %c1_249 = arith.constant 1 : index
    %c0_250 = arith.constant 0 : index
    %c0_251 = arith.constant 0 : index
    %274 = vector.load %arg2[%c1_249, %c0_250, %c0_251] : memref<3x128x256xf32, #tpu.memory_space<vmem>>, vector<1x128x256xf32>
    %275 = vector.shape_cast %274 : vector<1x128x256xf32> to vector<128x256xf32>
    %c4_252 = arith.constant 4 : index
    %c1_253 = arith.constant 1 : index
    %c0_254 = arith.constant 0 : index
    %c0_255 = arith.constant 0 : index
    %276 = vector.load %arg1[%c4_252, %c1_253, %c0_254, %c0_255] : memref<8x2x16x128xf32, #tpu.memory_space<vmem>>, vector<1x1x15x128xf32>
    %277 = vector.shape_cast %276 : vector<1x1x15x128xf32> to vector<15x128xf32>
    %c4_256 = arith.constant 4 : index
    %c0_257 = arith.constant 0 : index
    %c1_258 = arith.constant 1 : index
    %c0_259 = arith.constant 0 : index
    %278 = vector.load %arg1[%c4_256, %c0_257, %c1_258, %c0_259] : memref<8x2x16x128xf32, #tpu.memory_space<vmem>>, vector<1x1x15x128xf32>
    %279 = vector.shape_cast %278 : vector<1x1x15x128xf32> to vector<15x128xf32>
    %cst_260 = arith.constant dense<0.000000e+00> : vector<15x256xf32>
    %280 = tpu.matmul %277, %275, %cst_260 {dimension_numbers = #tpu.dot_dimension_numbers<[1], [0], [0], [1], [0, 0, 1, 1], [], []>} : vector<15x128xf32>, vector<128x256xf32>, vector<15x256xf32> -> vector<15x256xf32>
    %281 = arith.addf %271, %280 : vector<15x256xf32>
    %cst_261 = arith.constant dense<0.000000e+00> : vector<15x256xf32>
    %282 = tpu.matmul %279, %275, %cst_261 {dimension_numbers = #tpu.dot_dimension_numbers<[1], [0], [0], [1], [0, 0, 1, 1], [], []>} : vector<15x128xf32>, vector<128x256xf32>, vector<15x256xf32> -> vector<15x256xf32>
    %283 = arith.addf %273, %282 : vector<15x256xf32>
    %c2_262 = arith.constant 2 : index
    %c0_263 = arith.constant 0 : index
    %c0_264 = arith.constant 0 : index
    %284 = vector.load %arg2[%c2_262, %c0_263, %c0_264] : memref<3x128x256xf32, #tpu.memory_space<vmem>>, vector<1x128x256xf32>
    %285 = vector.shape_cast %284 : vector<1x128x256xf32> to vector<128x256xf32>
    %c4_265 = arith.constant 4 : index
    %c0_266 = arith.constant 0 : index
    %c1_267 = arith.constant 1 : index
    %c0_268 = arith.constant 0 : index
    %286 = vector.load %arg1[%c4_265, %c0_266, %c1_267, %c0_268] : memref<8x2x16x128xf32, #tpu.memory_space<vmem>>, vector<1x1x15x128xf32>
    %287 = vector.shape_cast %286 : vector<1x1x15x128xf32> to vector<15x128xf32>
    %c4_269 = arith.constant 4 : index
    %c1_270 = arith.constant 1 : index
    %c1_271 = arith.constant 1 : index
    %c0_272 = arith.constant 0 : index
    %288 = vector.load %arg1[%c4_269, %c1_270, %c1_271, %c0_272] : memref<8x2x16x128xf32, #tpu.memory_space<vmem>>, vector<1x1x15x128xf32>
    %289 = vector.shape_cast %288 : vector<1x1x15x128xf32> to vector<15x128xf32>
    %cst_273 = arith.constant dense<0.000000e+00> : vector<15x256xf32>
    %290 = tpu.matmul %287, %285, %cst_273 {dimension_numbers = #tpu.dot_dimension_numbers<[1], [0], [0], [1], [0, 0, 1, 1], [], []>} : vector<15x128xf32>, vector<128x256xf32>, vector<15x256xf32> -> vector<15x256xf32>
    %291 = arith.addf %281, %290 : vector<15x256xf32>
    %cst_274 = arith.constant dense<0.000000e+00> : vector<15x256xf32>
    %292 = tpu.matmul %289, %285, %cst_274 {dimension_numbers = #tpu.dot_dimension_numbers<[1], [0], [0], [1], [0, 0, 1, 1], [], []>} : vector<15x128xf32>, vector<128x256xf32>, vector<15x256xf32> -> vector<15x256xf32>
    %293 = arith.addf %283, %292 : vector<15x256xf32>
    %294 = vector.extract_strided_slice %291 {offsets = [0, 0], sizes = [15, 128], strides = [1, 1]} : vector<15x256xf32> to vector<15x128xf32>
    %295 = vector.extract_strided_slice %291 {offsets = [0, 128], sizes = [15, 128], strides = [1, 1]} : vector<15x256xf32> to vector<15x128xf32>
    %296 = arith.maximumf %294, %295 : vector<15x128xf32>
    %297 = vector.extract_strided_slice %293 {offsets = [0, 0], sizes = [15, 128], strides = [1, 1]} : vector<15x256xf32> to vector<15x128xf32>
    %298 = vector.extract_strided_slice %293 {offsets = [0, 128], sizes = [15, 128], strides = [1, 1]} : vector<15x256xf32> to vector<15x128xf32>
    %299 = arith.maximumf %297, %298 : vector<15x128xf32>
    %300 = arith.maximumf %296, %299 : vector<15x128xf32>
    %301 = arith.addf %300, %2 : vector<15x128xf32>
    %cst_275 = arith.constant 0.000000e+00 : f32
    %302 = vector.broadcast %cst_275 : f32 to vector<15x128xf32>
    %303 = arith.maximumf %301, %302 : vector<15x128xf32>
    %cst_276 = arith.constant 0.000000e+00 : f32
    %304 = vector.broadcast %cst_276 : f32 to vector<13x128xf32>
    %305 = vector.extract_strided_slice %303 {offsets = [0, 0], sizes = [13, 128], strides = [1, 1]} : vector<15x128xf32> to vector<13x128xf32>
    %c0_277 = arith.constant 0 : index
    %c0_278 = arith.constant 0 : index
    %c0_279 = arith.constant 0 : index
    %306 = vector.load %arg4[%c0_277, %c0_278, %c0_279] : memref<3x128x128xf32, #tpu.memory_space<vmem>>, vector<1x128x128xf32>
    %307 = vector.shape_cast %306 : vector<1x128x128xf32> to vector<128x128xf32>
    %cst_280 = arith.constant dense<0.000000e+00> : vector<13x128xf32>
    %308 = tpu.matmul %305, %307, %cst_280 {dimension_numbers = #tpu.dot_dimension_numbers<[1], [0], [0], [1], [0, 0, 1, 1], [], []>} : vector<13x128xf32>, vector<128x128xf32>, vector<13x128xf32> -> vector<13x128xf32>
    %309 = arith.addf %304, %308 : vector<13x128xf32>
    %310 = vector.extract_strided_slice %303 {offsets = [1, 0], sizes = [13, 128], strides = [1, 1]} : vector<15x128xf32> to vector<13x128xf32>
    %c1_281 = arith.constant 1 : index
    %c0_282 = arith.constant 0 : index
    %c0_283 = arith.constant 0 : index
    %311 = vector.load %arg4[%c1_281, %c0_282, %c0_283] : memref<3x128x128xf32, #tpu.memory_space<vmem>>, vector<1x128x128xf32>
    %312 = vector.shape_cast %311 : vector<1x128x128xf32> to vector<128x128xf32>
    %cst_284 = arith.constant dense<0.000000e+00> : vector<13x128xf32>
    %313 = tpu.matmul %310, %312, %cst_284 {dimension_numbers = #tpu.dot_dimension_numbers<[1], [0], [0], [1], [0, 0, 1, 1], [], []>} : vector<13x128xf32>, vector<128x128xf32>, vector<13x128xf32> -> vector<13x128xf32>
    %314 = arith.addf %309, %313 : vector<13x128xf32>
    %315 = vector.extract_strided_slice %303 {offsets = [2, 0], sizes = [13, 128], strides = [1, 1]} : vector<15x128xf32> to vector<13x128xf32>
    %c2_285 = arith.constant 2 : index
    %c0_286 = arith.constant 0 : index
    %c0_287 = arith.constant 0 : index
    %316 = vector.load %arg4[%c2_285, %c0_286, %c0_287] : memref<3x128x128xf32, #tpu.memory_space<vmem>>, vector<1x128x128xf32>
    %317 = vector.shape_cast %316 : vector<1x128x128xf32> to vector<128x128xf32>
    %cst_288 = arith.constant dense<0.000000e+00> : vector<13x128xf32>
    %318 = tpu.matmul %315, %317, %cst_288 {dimension_numbers = #tpu.dot_dimension_numbers<[1], [0], [0], [1], [0, 0, 1, 1], [], []>} : vector<13x128xf32>, vector<128x128xf32>, vector<13x128xf32> -> vector<13x128xf32>
    %319 = arith.addf %314, %318 : vector<13x128xf32>
    %320 = arith.addf %319, %5 : vector<13x128xf32>
    %cst_289 = arith.constant 0.000000e+00 : f32
    %321 = vector.broadcast %cst_289 : f32 to vector<13x128xf32>
    %322 = arith.maximumf %320, %321 : vector<13x128xf32>
    %c4_290 = arith.constant 4 : index
    %c0_291 = arith.constant 0 : index
    %c0_292 = arith.constant 0 : index
    %323 = vector.load %arg11[%c4_290, %c0_291, %c0_292] : memref<8x13x128xf32, #tpu.memory_space<vmem>>, vector<1x13x128xf32>
    %324 = vector.shape_cast %323 : vector<1x13x128xf32> to vector<13x128xf32>
    %325 = vector.shape_cast %322 : vector<13x128xf32> to vector<1x13x128xf32>
    tpu.vector_store %arg11[%c4_290, %c0_291, %c0_292], %325 {strides = array<i32>} : memref<8x13x128xf32, #tpu.memory_space<vmem>>, vector<1x13x128xf32>,
    %cst_293 = arith.constant 0.000000e+00 : f32
    %326 = vector.broadcast %cst_293 : f32 to vector<15x256xf32>
    %cst_294 = arith.constant 0.000000e+00 : f32
    %327 = vector.broadcast %cst_294 : f32 to vector<15x256xf32>
    %c0_295 = arith.constant 0 : index
    %c0_296 = arith.constant 0 : index
    %c0_297 = arith.constant 0 : index
    %328 = vector.load %arg2[%c0_295, %c0_296, %c0_297] : memref<3x128x256xf32, #tpu.memory_space<vmem>>, vector<1x128x256xf32>
    %329 = vector.shape_cast %328 : vector<1x128x256xf32> to vector<128x256xf32>
    %c5 = arith.constant 5 : index
    %c0_298 = arith.constant 0 : index
    %c0_299 = arith.constant 0 : index
    %c0_300 = arith.constant 0 : index
    %330 = vector.load %arg1[%c5, %c0_298, %c0_299, %c0_300] : memref<8x2x16x128xf32, #tpu.memory_space<vmem>>, vector<1x1x15x128xf32>
    %331 = vector.shape_cast %330 : vector<1x1x15x128xf32> to vector<15x128xf32>
    %c5_301 = arith.constant 5 : index
    %c1_302 = arith.constant 1 : index
    %c0_303 = arith.constant 0 : index
    %c0_304 = arith.constant 0 : index
    %332 = vector.load %arg1[%c5_301, %c1_302, %c0_303, %c0_304] : memref<8x2x16x128xf32, #tpu.memory_space<vmem>>, vector<1x1x15x128xf32>
    %333 = vector.shape_cast %332 : vector<1x1x15x128xf32> to vector<15x128xf32>
    %cst_305 = arith.constant dense<0.000000e+00> : vector<15x256xf32>
    %334 = tpu.matmul %331, %329, %cst_305 {dimension_numbers = #tpu.dot_dimension_numbers<[1], [0], [0], [1], [0, 0, 1, 1], [], []>} : vector<15x128xf32>, vector<128x256xf32>, vector<15x256xf32> -> vector<15x256xf32>
    %335 = arith.addf %326, %334 : vector<15x256xf32>
    %cst_306 = arith.constant dense<0.000000e+00> : vector<15x256xf32>
    %336 = tpu.matmul %333, %329, %cst_306 {dimension_numbers = #tpu.dot_dimension_numbers<[1], [0], [0], [1], [0, 0, 1, 1], [], []>} : vector<15x128xf32>, vector<128x256xf32>, vector<15x256xf32> -> vector<15x256xf32>
    %337 = arith.addf %327, %336 : vector<15x256xf32>
    %c1_307 = arith.constant 1 : index
    %c0_308 = arith.constant 0 : index
    %c0_309 = arith.constant 0 : index
    %338 = vector.load %arg2[%c1_307, %c0_308, %c0_309] : memref<3x128x256xf32, #tpu.memory_space<vmem>>, vector<1x128x256xf32>
    %339 = vector.shape_cast %338 : vector<1x128x256xf32> to vector<128x256xf32>
    %c5_310 = arith.constant 5 : index
    %c1_311 = arith.constant 1 : index
    %c0_312 = arith.constant 0 : index
    %c0_313 = arith.constant 0 : index
    %340 = vector.load %arg1[%c5_310, %c1_311, %c0_312, %c0_313] : memref<8x2x16x128xf32, #tpu.memory_space<vmem>>, vector<1x1x15x128xf32>
    %341 = vector.shape_cast %340 : vector<1x1x15x128xf32> to vector<15x128xf32>
    %c5_314 = arith.constant 5 : index
    %c0_315 = arith.constant 0 : index
    %c1_316 = arith.constant 1 : index
    %c0_317 = arith.constant 0 : index
    %342 = vector.load %arg1[%c5_314, %c0_315, %c1_316, %c0_317] : memref<8x2x16x128xf32, #tpu.memory_space<vmem>>, vector<1x1x15x128xf32>
    %343 = vector.shape_cast %342 : vector<1x1x15x128xf32> to vector<15x128xf32>
    %cst_318 = arith.constant dense<0.000000e+00> : vector<15x256xf32>
    %344 = tpu.matmul %341, %339, %cst_318 {dimension_numbers = #tpu.dot_dimension_numbers<[1], [0], [0], [1], [0, 0, 1, 1], [], []>} : vector<15x128xf32>, vector<128x256xf32>, vector<15x256xf32> -> vector<15x256xf32>
    %345 = arith.addf %335, %344 : vector<15x256xf32>
    %cst_319 = arith.constant dense<0.000000e+00> : vector<15x256xf32>
    %346 = tpu.matmul %343, %339, %cst_319 {dimension_numbers = #tpu.dot_dimension_numbers<[1], [0], [0], [1], [0, 0, 1, 1], [], []>} : vector<15x128xf32>, vector<128x256xf32>, vector<15x256xf32> -> vector<15x256xf32>
    %347 = arith.addf %337, %346 : vector<15x256xf32>
    %c2_320 = arith.constant 2 : index
    %c0_321 = arith.constant 0 : index
    %c0_322 = arith.constant 0 : index
    %348 = vector.load %arg2[%c2_320, %c0_321, %c0_322] : memref<3x128x256xf32, #tpu.memory_space<vmem>>, vector<1x128x256xf32>
    %349 = vector.shape_cast %348 : vector<1x128x256xf32> to vector<128x256xf32>
    %c5_323 = arith.constant 5 : index
    %c0_324 = arith.constant 0 : index
    %c1_325 = arith.constant 1 : index
    %c0_326 = arith.constant 0 : index
    %350 = vector.load %arg1[%c5_323, %c0_324, %c1_325, %c0_326] : memref<8x2x16x128xf32, #tpu.memory_space<vmem>>, vector<1x1x15x128xf32>
    %351 = vector.shape_cast %350 : vector<1x1x15x128xf32> to vector<15x128xf32>
    %c5_327 = arith.constant 5 : index
    %c1_328 = arith.constant 1 : index
    %c1_329 = arith.constant 1 : index
    %c0_330 = arith.constant 0 : index
    %352 = vector.load %arg1[%c5_327, %c1_328, %c1_329, %c0_330] : memref<8x2x16x128xf32, #tpu.memory_space<vmem>>, vector<1x1x15x128xf32>
    %353 = vector.shape_cast %352 : vector<1x1x15x128xf32> to vector<15x128xf32>
    %cst_331 = arith.constant dense<0.000000e+00> : vector<15x256xf32>
    %354 = tpu.matmul %351, %349, %cst_331 {dimension_numbers = #tpu.dot_dimension_numbers<[1], [0], [0], [1], [0, 0, 1, 1], [], []>} : vector<15x128xf32>, vector<128x256xf32>, vector<15x256xf32> -> vector<15x256xf32>
    %355 = arith.addf %345, %354 : vector<15x256xf32>
    %cst_332 = arith.constant dense<0.000000e+00> : vector<15x256xf32>
    %356 = tpu.matmul %353, %349, %cst_332 {dimension_numbers = #tpu.dot_dimension_numbers<[1], [0], [0], [1], [0, 0, 1, 1], [], []>} : vector<15x128xf32>, vector<128x256xf32>, vector<15x256xf32> -> vector<15x256xf32>
    %357 = arith.addf %347, %356 : vector<15x256xf32>
    %358 = vector.extract_strided_slice %355 {offsets = [0, 0], sizes = [15, 128], strides = [1, 1]} : vector<15x256xf32> to vector<15x128xf32>
    %359 = vector.extract_strided_slice %355 {offsets = [0, 128], sizes = [15, 128], strides = [1, 1]} : vector<15x256xf32> to vector<15x128xf32>
    %360 = arith.maximumf %358, %359 : vector<15x128xf32>
    %361 = vector.extract_strided_slice %357 {offsets = [0, 0], sizes = [15, 128], strides = [1, 1]} : vector<15x256xf32> to vector<15x128xf32>
    %362 = vector.extract_strided_slice %357 {offsets = [0, 128], sizes = [15, 128], strides = [1, 1]} : vector<15x256xf32> to vector<15x128xf32>
    %363 = arith.maximumf %361, %362 : vector<15x128xf32>
    %364 = arith.maximumf %360, %363 : vector<15x128xf32>
    %365 = arith.addf %364, %2 : vector<15x128xf32>
    %cst_333 = arith.constant 0.000000e+00 : f32
    %366 = vector.broadcast %cst_333 : f32 to vector<15x128xf32>
    %367 = arith.maximumf %365, %366 : vector<15x128xf32>
    %cst_334 = arith.constant 0.000000e+00 : f32
    %368 = vector.broadcast %cst_334 : f32 to vector<13x128xf32>
    %369 = vector.extract_strided_slice %367 {offsets = [0, 0], sizes = [13, 128], strides = [1, 1]} : vector<15x128xf32> to vector<13x128xf32>
    %c0_335 = arith.constant 0 : index
    %c0_336 = arith.constant 0 : index
    %c0_337 = arith.constant 0 : index
    %370 = vector.load %arg4[%c0_335, %c0_336, %c0_337] : memref<3x128x128xf32, #tpu.memory_space<vmem>>, vector<1x128x128xf32>
    %371 = vector.shape_cast %370 : vector<1x128x128xf32> to vector<128x128xf32>
    %cst_338 = arith.constant dense<0.000000e+00> : vector<13x128xf32>
    %372 = tpu.matmul %369, %371, %cst_338 {dimension_numbers = #tpu.dot_dimension_numbers<[1], [0], [0], [1], [0, 0, 1, 1], [], []>} : vector<13x128xf32>, vector<128x128xf32>, vector<13x128xf32> -> vector<13x128xf32>
    %373 = arith.addf %368, %372 : vector<13x128xf32>
    %374 = vector.extract_strided_slice %367 {offsets = [1, 0], sizes = [13, 128], strides = [1, 1]} : vector<15x128xf32> to vector<13x128xf32>
    %c1_339 = arith.constant 1 : index
    %c0_340 = arith.constant 0 : index
    %c0_341 = arith.constant 0 : index
    %375 = vector.load %arg4[%c1_339, %c0_340, %c0_341] : memref<3x128x128xf32, #tpu.memory_space<vmem>>, vector<1x128x128xf32>
    %376 = vector.shape_cast %375 : vector<1x128x128xf32> to vector<128x128xf32>
    %cst_342 = arith.constant dense<0.000000e+00> : vector<13x128xf32>
    %377 = tpu.matmul %374, %376, %cst_342 {dimension_numbers = #tpu.dot_dimension_numbers<[1], [0], [0], [1], [0, 0, 1, 1], [], []>} : vector<13x128xf32>, vector<128x128xf32>, vector<13x128xf32> -> vector<13x128xf32>
    %378 = arith.addf %373, %377 : vector<13x128xf32>
    %379 = vector.extract_strided_slice %367 {offsets = [2, 0], sizes = [13, 128], strides = [1, 1]} : vector<15x128xf32> to vector<13x128xf32>
    %c2_343 = arith.constant 2 : index
    %c0_344 = arith.constant 0 : index
    %c0_345 = arith.constant 0 : index
    %380 = vector.load %arg4[%c2_343, %c0_344, %c0_345] : memref<3x128x128xf32, #tpu.memory_space<vmem>>, vector<1x128x128xf32>
    %381 = vector.shape_cast %380 : vector<1x128x128xf32> to vector<128x128xf32>
    %cst_346 = arith.constant dense<0.000000e+00> : vector<13x128xf32>
    %382 = tpu.matmul %379, %381, %cst_346 {dimension_numbers = #tpu.dot_dimension_numbers<[1], [0], [0], [1], [0, 0, 1, 1], [], []>} : vector<13x128xf32>, vector<128x128xf32>, vector<13x128xf32> -> vector<13x128xf32>
    %383 = arith.addf %378, %382 : vector<13x128xf32>
    %384 = arith.addf %383, %5 : vector<13x128xf32>
    %cst_347 = arith.constant 0.000000e+00 : f32
    %385 = vector.broadcast %cst_347 : f32 to vector<13x128xf32>
    %386 = arith.maximumf %384, %385 : vector<13x128xf32>
    %c5_348 = arith.constant 5 : index
    %c0_349 = arith.constant 0 : index
    %c0_350 = arith.constant 0 : index
    %387 = vector.load %arg11[%c5_348, %c0_349, %c0_350] : memref<8x13x128xf32, #tpu.memory_space<vmem>>, vector<1x13x128xf32>
    %388 = vector.shape_cast %387 : vector<1x13x128xf32> to vector<13x128xf32>
    %389 = vector.shape_cast %386 : vector<13x128xf32> to vector<1x13x128xf32>
    tpu.vector_store %arg11[%c5_348, %c0_349, %c0_350], %389 {strides = array<i32>} : memref<8x13x128xf32, #tpu.memory_space<vmem>>, vector<1x13x128xf32>,
    %cst_351 = arith.constant 0.000000e+00 : f32
    %390 = vector.broadcast %cst_351 : f32 to vector<15x256xf32>
    %cst_352 = arith.constant 0.000000e+00 : f32
    %391 = vector.broadcast %cst_352 : f32 to vector<15x256xf32>
    %c0_353 = arith.constant 0 : index
    %c0_354 = arith.constant 0 : index
    %c0_355 = arith.constant 0 : index
    %392 = vector.load %arg2[%c0_353, %c0_354, %c0_355] : memref<3x128x256xf32, #tpu.memory_space<vmem>>, vector<1x128x256xf32>
    %393 = vector.shape_cast %392 : vector<1x128x256xf32> to vector<128x256xf32>
    %c6 = arith.constant 6 : index
    %c0_356 = arith.constant 0 : index
    %c0_357 = arith.constant 0 : index
    %c0_358 = arith.constant 0 : index
    %394 = vector.load %arg1[%c6, %c0_356, %c0_357, %c0_358] : memref<8x2x16x128xf32, #tpu.memory_space<vmem>>, vector<1x1x15x128xf32>
    %395 = vector.shape_cast %394 : vector<1x1x15x128xf32> to vector<15x128xf32>
    %c6_359 = arith.constant 6 : index
    %c1_360 = arith.constant 1 : index
    %c0_361 = arith.constant 0 : index
    %c0_362 = arith.constant 0 : index
    %396 = vector.load %arg1[%c6_359, %c1_360, %c0_361, %c0_362] : memref<8x2x16x128xf32, #tpu.memory_space<vmem>>, vector<1x1x15x128xf32>
    %397 = vector.shape_cast %396 : vector<1x1x15x128xf32> to vector<15x128xf32>
    %cst_363 = arith.constant dense<0.000000e+00> : vector<15x256xf32>
    %398 = tpu.matmul %395, %393, %cst_363 {dimension_numbers = #tpu.dot_dimension_numbers<[1], [0], [0], [1], [0, 0, 1, 1], [], []>} : vector<15x128xf32>, vector<128x256xf32>, vector<15x256xf32> -> vector<15x256xf32>
    %399 = arith.addf %390, %398 : vector<15x256xf32>
    %cst_364 = arith.constant dense<0.000000e+00> : vector<15x256xf32>
    %400 = tpu.matmul %397, %393, %cst_364 {dimension_numbers = #tpu.dot_dimension_numbers<[1], [0], [0], [1], [0, 0, 1, 1], [], []>} : vector<15x128xf32>, vector<128x256xf32>, vector<15x256xf32> -> vector<15x256xf32>
    %401 = arith.addf %391, %400 : vector<15x256xf32>
    %c1_365 = arith.constant 1 : index
    %c0_366 = arith.constant 0 : index
    %c0_367 = arith.constant 0 : index
    %402 = vector.load %arg2[%c1_365, %c0_366, %c0_367] : memref<3x128x256xf32, #tpu.memory_space<vmem>>, vector<1x128x256xf32>
    %403 = vector.shape_cast %402 : vector<1x128x256xf32> to vector<128x256xf32>
    %c6_368 = arith.constant 6 : index
    %c1_369 = arith.constant 1 : index
    %c0_370 = arith.constant 0 : index
    %c0_371 = arith.constant 0 : index
    %404 = vector.load %arg1[%c6_368, %c1_369, %c0_370, %c0_371] : memref<8x2x16x128xf32, #tpu.memory_space<vmem>>, vector<1x1x15x128xf32>
    %405 = vector.shape_cast %404 : vector<1x1x15x128xf32> to vector<15x128xf32>
    %c6_372 = arith.constant 6 : index
    %c0_373 = arith.constant 0 : index
    %c1_374 = arith.constant 1 : index
    %c0_375 = arith.constant 0 : index
    %406 = vector.load %arg1[%c6_372, %c0_373, %c1_374, %c0_375] : memref<8x2x16x128xf32, #tpu.memory_space<vmem>>, vector<1x1x15x128xf32>
    %407 = vector.shape_cast %406 : vector<1x1x15x128xf32> to vector<15x128xf32>
    %cst_376 = arith.constant dense<0.000000e+00> : vector<15x256xf32>
    %408 = tpu.matmul %405, %403, %cst_376 {dimension_numbers = #tpu.dot_dimension_numbers<[1], [0], [0], [1], [0, 0, 1, 1], [], []>} : vector<15x128xf32>, vector<128x256xf32>, vector<15x256xf32> -> vector<15x256xf32>
    %409 = arith.addf %399, %408 : vector<15x256xf32>
    %cst_377 = arith.constant dense<0.000000e+00> : vector<15x256xf32>
    %410 = tpu.matmul %407, %403, %cst_377 {dimension_numbers = #tpu.dot_dimension_numbers<[1], [0], [0], [1], [0, 0, 1, 1], [], []>} : vector<15x128xf32>, vector<128x256xf32>, vector<15x256xf32> -> vector<15x256xf32>
    %411 = arith.addf %401, %410 : vector<15x256xf32>
    %c2_378 = arith.constant 2 : index
    %c0_379 = arith.constant 0 : index
    %c0_380 = arith.constant 0 : index
    %412 = vector.load %arg2[%c2_378, %c0_379, %c0_380] : memref<3x128x256xf32, #tpu.memory_space<vmem>>, vector<1x128x256xf32>
    %413 = vector.shape_cast %412 : vector<1x128x256xf32> to vector<128x256xf32>
    %c6_381 = arith.constant 6 : index
    %c0_382 = arith.constant 0 : index
    %c1_383 = arith.constant 1 : index
    %c0_384 = arith.constant 0 : index
    %414 = vector.load %arg1[%c6_381, %c0_382, %c1_383, %c0_384] : memref<8x2x16x128xf32, #tpu.memory_space<vmem>>, vector<1x1x15x128xf32>
    %415 = vector.shape_cast %414 : vector<1x1x15x128xf32> to vector<15x128xf32>
    %c6_385 = arith.constant 6 : index
    %c1_386 = arith.constant 1 : index
    %c1_387 = arith.constant 1 : index
    %c0_388 = arith.constant 0 : index
    %416 = vector.load %arg1[%c6_385, %c1_386, %c1_387, %c0_388] : memref<8x2x16x128xf32, #tpu.memory_space<vmem>>, vector<1x1x15x128xf32>
    %417 = vector.shape_cast %416 : vector<1x1x15x128xf32> to vector<15x128xf32>
    %cst_389 = arith.constant dense<0.000000e+00> : vector<15x256xf32>
    %418 = tpu.matmul %415, %413, %cst_389 {dimension_numbers = #tpu.dot_dimension_numbers<[1], [0], [0], [1], [0, 0, 1, 1], [], []>} : vector<15x128xf32>, vector<128x256xf32>, vector<15x256xf32> -> vector<15x256xf32>
    %419 = arith.addf %409, %418 : vector<15x256xf32>
    %cst_390 = arith.constant dense<0.000000e+00> : vector<15x256xf32>
    %420 = tpu.matmul %417, %413, %cst_390 {dimension_numbers = #tpu.dot_dimension_numbers<[1], [0], [0], [1], [0, 0, 1, 1], [], []>} : vector<15x128xf32>, vector<128x256xf32>, vector<15x256xf32> -> vector<15x256xf32>
    %421 = arith.addf %411, %420 : vector<15x256xf32>
    %422 = vector.extract_strided_slice %419 {offsets = [0, 0], sizes = [15, 128], strides = [1, 1]} : vector<15x256xf32> to vector<15x128xf32>
    %423 = vector.extract_strided_slice %419 {offsets = [0, 128], sizes = [15, 128], strides = [1, 1]} : vector<15x256xf32> to vector<15x128xf32>
    %424 = arith.maximumf %422, %423 : vector<15x128xf32>
    %425 = vector.extract_strided_slice %421 {offsets = [0, 0], sizes = [15, 128], strides = [1, 1]} : vector<15x256xf32> to vector<15x128xf32>
    %426 = vector.extract_strided_slice %421 {offsets = [0, 128], sizes = [15, 128], strides = [1, 1]} : vector<15x256xf32> to vector<15x128xf32>
    %427 = arith.maximumf %425, %426 : vector<15x128xf32>
    %428 = arith.maximumf %424, %427 : vector<15x128xf32>
    %429 = arith.addf %428, %2 : vector<15x128xf32>
    %cst_391 = arith.constant 0.000000e+00 : f32
    %430 = vector.broadcast %cst_391 : f32 to vector<15x128xf32>
    %431 = arith.maximumf %429, %430 : vector<15x128xf32>
    %cst_392 = arith.constant 0.000000e+00 : f32
    %432 = vector.broadcast %cst_392 : f32 to vector<13x128xf32>
    %433 = vector.extract_strided_slice %431 {offsets = [0, 0], sizes = [13, 128], strides = [1, 1]} : vector<15x128xf32> to vector<13x128xf32>
    %c0_393 = arith.constant 0 : index
    %c0_394 = arith.constant 0 : index
    %c0_395 = arith.constant 0 : index
    %434 = vector.load %arg4[%c0_393, %c0_394, %c0_395] : memref<3x128x128xf32, #tpu.memory_space<vmem>>, vector<1x128x128xf32>
    %435 = vector.shape_cast %434 : vector<1x128x128xf32> to vector<128x128xf32>
    %cst_396 = arith.constant dense<0.000000e+00> : vector<13x128xf32>
    %436 = tpu.matmul %433, %435, %cst_396 {dimension_numbers = #tpu.dot_dimension_numbers<[1], [0], [0], [1], [0, 0, 1, 1], [], []>} : vector<13x128xf32>, vector<128x128xf32>, vector<13x128xf32> -> vector<13x128xf32>
    %437 = arith.addf %432, %436 : vector<13x128xf32>
    %438 = vector.extract_strided_slice %431 {offsets = [1, 0], sizes = [13, 128], strides = [1, 1]} : vector<15x128xf32> to vector<13x128xf32>
    %c1_397 = arith.constant 1 : index
    %c0_398 = arith.constant 0 : index
    %c0_399 = arith.constant 0 : index
    %439 = vector.load %arg4[%c1_397, %c0_398, %c0_399] : memref<3x128x128xf32, #tpu.memory_space<vmem>>, vector<1x128x128xf32>
    %440 = vector.shape_cast %439 : vector<1x128x128xf32> to vector<128x128xf32>
    %cst_400 = arith.constant dense<0.000000e+00> : vector<13x128xf32>
    %441 = tpu.matmul %438, %440, %cst_400 {dimension_numbers = #tpu.dot_dimension_numbers<[1], [0], [0], [1], [0, 0, 1, 1], [], []>} : vector<13x128xf32>, vector<128x128xf32>, vector<13x128xf32> -> vector<13x128xf32>
    %442 = arith.addf %437, %441 : vector<13x128xf32>
    %443 = vector.extract_strided_slice %431 {offsets = [2, 0], sizes = [13, 128], strides = [1, 1]} : vector<15x128xf32> to vector<13x128xf32>
    %c2_401 = arith.constant 2 : index
    %c0_402 = arith.constant 0 : index
    %c0_403 = arith.constant 0 : index
    %444 = vector.load %arg4[%c2_401, %c0_402, %c0_403] : memref<3x128x128xf32, #tpu.memory_space<vmem>>, vector<1x128x128xf32>
    %445 = vector.shape_cast %444 : vector<1x128x128xf32> to vector<128x128xf32>
    %cst_404 = arith.constant dense<0.000000e+00> : vector<13x128xf32>
    %446 = tpu.matmul %443, %445, %cst_404 {dimension_numbers = #tpu.dot_dimension_numbers<[1], [0], [0], [1], [0, 0, 1, 1], [], []>} : vector<13x128xf32>, vector<128x128xf32>, vector<13x128xf32> -> vector<13x128xf32>
    %447 = arith.addf %442, %446 : vector<13x128xf32>
    %448 = arith.addf %447, %5 : vector<13x128xf32>
    %cst_405 = arith.constant 0.000000e+00 : f32
    %449 = vector.broadcast %cst_405 : f32 to vector<13x128xf32>
    %450 = arith.maximumf %448, %449 : vector<13x128xf32>
    %c6_406 = arith.constant 6 : index
    %c0_407 = arith.constant 0 : index
    %c0_408 = arith.constant 0 : index
    %451 = vector.load %arg11[%c6_406, %c0_407, %c0_408] : memref<8x13x128xf32, #tpu.memory_space<vmem>>, vector<1x13x128xf32>
    %452 = vector.shape_cast %451 : vector<1x13x128xf32> to vector<13x128xf32>
    %453 = vector.shape_cast %450 : vector<13x128xf32> to vector<1x13x128xf32>
    tpu.vector_store %arg11[%c6_406, %c0_407, %c0_408], %453 {strides = array<i32>} : memref<8x13x128xf32, #tpu.memory_space<vmem>>, vector<1x13x128xf32>,
    %cst_409 = arith.constant 0.000000e+00 : f32
    %454 = vector.broadcast %cst_409 : f32 to vector<15x256xf32>
    %cst_410 = arith.constant 0.000000e+00 : f32
    %455 = vector.broadcast %cst_410 : f32 to vector<15x256xf32>
    %c0_411 = arith.constant 0 : index
    %c0_412 = arith.constant 0 : index
    %c0_413 = arith.constant 0 : index
    %456 = vector.load %arg2[%c0_411, %c0_412, %c0_413] : memref<3x128x256xf32, #tpu.memory_space<vmem>>, vector<1x128x256xf32>
    %457 = vector.shape_cast %456 : vector<1x128x256xf32> to vector<128x256xf32>
    %c7 = arith.constant 7 : index
    %c0_414 = arith.constant 0 : index
    %c0_415 = arith.constant 0 : index
    %c0_416 = arith.constant 0 : index
    %458 = vector.load %arg1[%c7, %c0_414, %c0_415, %c0_416] : memref<8x2x16x128xf32, #tpu.memory_space<vmem>>, vector<1x1x15x128xf32>
    %459 = vector.shape_cast %458 : vector<1x1x15x128xf32> to vector<15x128xf32>
    %c7_417 = arith.constant 7 : index
    %c1_418 = arith.constant 1 : index
    %c0_419 = arith.constant 0 : index
    %c0_420 = arith.constant 0 : index
    %460 = vector.load %arg1[%c7_417, %c1_418, %c0_419, %c0_420] : memref<8x2x16x128xf32, #tpu.memory_space<vmem>>, vector<1x1x15x128xf32>
    %461 = vector.shape_cast %460 : vector<1x1x15x128xf32> to vector<15x128xf32>
    %cst_421 = arith.constant dense<0.000000e+00> : vector<15x256xf32>
    %462 = tpu.matmul %459, %457, %cst_421 {dimension_numbers = #tpu.dot_dimension_numbers<[1], [0], [0], [1], [0, 0, 1, 1], [], []>} : vector<15x128xf32>, vector<128x256xf32>, vector<15x256xf32> -> vector<15x256xf32>
    %463 = arith.addf %454, %462 : vector<15x256xf32>
    %cst_422 = arith.constant dense<0.000000e+00> : vector<15x256xf32>
    %464 = tpu.matmul %461, %457, %cst_422 {dimension_numbers = #tpu.dot_dimension_numbers<[1], [0], [0], [1], [0, 0, 1, 1], [], []>} : vector<15x128xf32>, vector<128x256xf32>, vector<15x256xf32> -> vector<15x256xf32>
    %465 = arith.addf %455, %464 : vector<15x256xf32>
    %c1_423 = arith.constant 1 : index
    %c0_424 = arith.constant 0 : index
    %c0_425 = arith.constant 0 : index
    %466 = vector.load %arg2[%c1_423, %c0_424, %c0_425] : memref<3x128x256xf32, #tpu.memory_space<vmem>>, vector<1x128x256xf32>
    %467 = vector.shape_cast %466 : vector<1x128x256xf32> to vector<128x256xf32>
    %c7_426 = arith.constant 7 : index
    %c1_427 = arith.constant 1 : index
    %c0_428 = arith.constant 0 : index
    %c0_429 = arith.constant 0 : index
    %468 = vector.load %arg1[%c7_426, %c1_427, %c0_428, %c0_429] : memref<8x2x16x128xf32, #tpu.memory_space<vmem>>, vector<1x1x15x128xf32>
    %469 = vector.shape_cast %468 : vector<1x1x15x128xf32> to vector<15x128xf32>
    %c7_430 = arith.constant 7 : index
    %c0_431 = arith.constant 0 : index
    %c1_432 = arith.constant 1 : index
    %c0_433 = arith.constant 0 : index
    %470 = vector.load %arg1[%c7_430, %c0_431, %c1_432, %c0_433] : memref<8x2x16x128xf32, #tpu.memory_space<vmem>>, vector<1x1x15x128xf32>
    %471 = vector.shape_cast %470 : vector<1x1x15x128xf32> to vector<15x128xf32>
    %cst_434 = arith.constant dense<0.000000e+00> : vector<15x256xf32>
    %472 = tpu.matmul %469, %467, %cst_434 {dimension_numbers = #tpu.dot_dimension_numbers<[1], [0], [0], [1], [0, 0, 1, 1], [], []>} : vector<15x128xf32>, vector<128x256xf32>, vector<15x256xf32> -> vector<15x256xf32>
    %473 = arith.addf %463, %472 : vector<15x256xf32>
    %cst_435 = arith.constant dense<0.000000e+00> : vector<15x256xf32>
    %474 = tpu.matmul %471, %467, %cst_435 {dimension_numbers = #tpu.dot_dimension_numbers<[1], [0], [0], [1], [0, 0, 1, 1], [], []>} : vector<15x128xf32>, vector<128x256xf32>, vector<15x256xf32> -> vector<15x256xf32>
    %475 = arith.addf %465, %474 : vector<15x256xf32>
    %c2_436 = arith.constant 2 : index
    %c0_437 = arith.constant 0 : index
    %c0_438 = arith.constant 0 : index
    %476 = vector.load %arg2[%c2_436, %c0_437, %c0_438] : memref<3x128x256xf32, #tpu.memory_space<vmem>>, vector<1x128x256xf32>
    %477 = vector.shape_cast %476 : vector<1x128x256xf32> to vector<128x256xf32>
    %c7_439 = arith.constant 7 : index
    %c0_440 = arith.constant 0 : index
    %c1_441 = arith.constant 1 : index
    %c0_442 = arith.constant 0 : index
    %478 = vector.load %arg1[%c7_439, %c0_440, %c1_441, %c0_442] : memref<8x2x16x128xf32, #tpu.memory_space<vmem>>, vector<1x1x15x128xf32>
    %479 = vector.shape_cast %478 : vector<1x1x15x128xf32> to vector<15x128xf32>
    %c7_443 = arith.constant 7 : index
    %c1_444 = arith.constant 1 : index
    %c1_445 = arith.constant 1 : index
    %c0_446 = arith.constant 0 : index
    %480 = vector.load %arg1[%c7_443, %c1_444, %c1_445, %c0_446] : memref<8x2x16x128xf32, #tpu.memory_space<vmem>>, vector<1x1x15x128xf32>
    %481 = vector.shape_cast %480 : vector<1x1x15x128xf32> to vector<15x128xf32>
    %cst_447 = arith.constant dense<0.000000e+00> : vector<15x256xf32>
    %482 = tpu.matmul %479, %477, %cst_447 {dimension_numbers = #tpu.dot_dimension_numbers<[1], [0], [0], [1], [0, 0, 1, 1], [], []>} : vector<15x128xf32>, vector<128x256xf32>, vector<15x256xf32> -> vector<15x256xf32>
    %483 = arith.addf %473, %482 : vector<15x256xf32>
    %cst_448 = arith.constant dense<0.000000e+00> : vector<15x256xf32>
    %484 = tpu.matmul %481, %477, %cst_448 {dimension_numbers = #tpu.dot_dimension_numbers<[1], [0], [0], [1], [0, 0, 1, 1], [], []>} : vector<15x128xf32>, vector<128x256xf32>, vector<15x256xf32> -> vector<15x256xf32>
    %485 = arith.addf %475, %484 : vector<15x256xf32>
    %486 = vector.extract_strided_slice %483 {offsets = [0, 0], sizes = [15, 128], strides = [1, 1]} : vector<15x256xf32> to vector<15x128xf32>
    %487 = vector.extract_strided_slice %483 {offsets = [0, 128], sizes = [15, 128], strides = [1, 1]} : vector<15x256xf32> to vector<15x128xf32>
    %488 = arith.maximumf %486, %487 : vector<15x128xf32>
    %489 = vector.extract_strided_slice %485 {offsets = [0, 0], sizes = [15, 128], strides = [1, 1]} : vector<15x256xf32> to vector<15x128xf32>
    %490 = vector.extract_strided_slice %485 {offsets = [0, 128], sizes = [15, 128], strides = [1, 1]} : vector<15x256xf32> to vector<15x128xf32>
    %491 = arith.maximumf %489, %490 : vector<15x128xf32>
    %492 = arith.maximumf %488, %491 : vector<15x128xf32>
    %493 = arith.addf %492, %2 : vector<15x128xf32>
    %cst_449 = arith.constant 0.000000e+00 : f32
    %494 = vector.broadcast %cst_449 : f32 to vector<15x128xf32>
    %495 = arith.maximumf %493, %494 : vector<15x128xf32>
    %cst_450 = arith.constant 0.000000e+00 : f32
    %496 = vector.broadcast %cst_450 : f32 to vector<13x128xf32>
    %497 = vector.extract_strided_slice %495 {offsets = [0, 0], sizes = [13, 128], strides = [1, 1]} : vector<15x128xf32> to vector<13x128xf32>
    %c0_451 = arith.constant 0 : index
    %c0_452 = arith.constant 0 : index
    %c0_453 = arith.constant 0 : index
    %498 = vector.load %arg4[%c0_451, %c0_452, %c0_453] : memref<3x128x128xf32, #tpu.memory_space<vmem>>, vector<1x128x128xf32>
    %499 = vector.shape_cast %498 : vector<1x128x128xf32> to vector<128x128xf32>
    %cst_454 = arith.constant dense<0.000000e+00> : vector<13x128xf32>
    %500 = tpu.matmul %497, %499, %cst_454 {dimension_numbers = #tpu.dot_dimension_numbers<[1], [0], [0], [1], [0, 0, 1, 1], [], []>} : vector<13x128xf32>, vector<128x128xf32>, vector<13x128xf32> -> vector<13x128xf32>
    %501 = arith.addf %496, %500 : vector<13x128xf32>
    %502 = vector.extract_strided_slice %495 {offsets = [1, 0], sizes = [13, 128], strides = [1, 1]} : vector<15x128xf32> to vector<13x128xf32>
    %c1_455 = arith.constant 1 : index
    %c0_456 = arith.constant 0 : index
    %c0_457 = arith.constant 0 : index
    %503 = vector.load %arg4[%c1_455, %c0_456, %c0_457] : memref<3x128x128xf32, #tpu.memory_space<vmem>>, vector<1x128x128xf32>
    %504 = vector.shape_cast %503 : vector<1x128x128xf32> to vector<128x128xf32>
    %cst_458 = arith.constant dense<0.000000e+00> : vector<13x128xf32>
    %505 = tpu.matmul %502, %504, %cst_458 {dimension_numbers = #tpu.dot_dimension_numbers<[1], [0], [0], [1], [0, 0, 1, 1], [], []>} : vector<13x128xf32>, vector<128x128xf32>, vector<13x128xf32> -> vector<13x128xf32>
    %506 = arith.addf %501, %505 : vector<13x128xf32>
    %507 = vector.extract_strided_slice %495 {offsets = [2, 0], sizes = [13, 128], strides = [1, 1]} : vector<15x128xf32> to vector<13x128xf32>
    %c2_459 = arith.constant 2 : index
    %c0_460 = arith.constant 0 : index
    %c0_461 = arith.constant 0 : index
    %508 = vector.load %arg4[%c2_459, %c0_460, %c0_461] : memref<3x128x128xf32, #tpu.memory_space<vmem>>, vector<1x128x128xf32>
    %509 = vector.shape_cast %508 : vector<1x128x128xf32> to vector<128x128xf32>
    %cst_462 = arith.constant dense<0.000000e+00> : vector<13x128xf32>
    %510 = tpu.matmul %507, %509, %cst_462 {dimension_numbers = #tpu.dot_dimension_numbers<[1], [0], [0], [1], [0, 0, 1, 1], [], []>} : vector<13x128xf32>, vector<128x128xf32>, vector<13x128xf32> -> vector<13x128xf32>
    %511 = arith.addf %506, %510 : vector<13x128xf32>
    %512 = arith.addf %511, %5 : vector<13x128xf32>
    %cst_463 = arith.constant 0.000000e+00 : f32
    %513 = vector.broadcast %cst_463 : f32 to vector<13x128xf32>
    %514 = arith.maximumf %512, %513 : vector<13x128xf32>
    %c7_464 = arith.constant 7 : index
    %c0_465 = arith.constant 0 : index
    %c0_466 = arith.constant 0 : index
    %515 = vector.load %arg11[%c7_464, %c0_465, %c0_466] : memref<8x13x128xf32, #tpu.memory_space<vmem>>, vector<1x13x128xf32>
    %516 = vector.shape_cast %515 : vector<1x13x128xf32> to vector<13x128xf32>
    %517 = vector.shape_cast %514 : vector<13x128xf32> to vector<1x13x128xf32>
    tpu.vector_store %arg11[%c7_464, %c0_465, %c0_466], %517 {strides = array<i32>} : memref<8x13x128xf32, #tpu.memory_space<vmem>>, vector<1x13x128xf32>,
    %cst_467 = arith.constant 0.000000e+00 : f32
    %518 = vector.broadcast %cst_467 : f32 to vector<8x128xf32>
    %c0_468 = arith.constant 0 : index
    %c0_469 = arith.constant 0 : index
    %c0_470 = arith.constant 0 : index
    %519 = vector.load %arg11[%c0_468, %c0_469, %c0_470] : memref<8x13x128xf32, #tpu.memory_space<vmem>>, vector<8x1x128xf32>
    %520 = vector.shape_cast %519 : vector<8x1x128xf32> to vector<8x128xf32>
    %c0_471 = arith.constant 0 : index
    %c0_472 = arith.constant 0 : index
    %c0_473 = arith.constant 0 : index
    %521 = vector.load %arg6[%c0_471, %c0_472, %c0_473] : memref<13x128x128xf32, #tpu.memory_space<vmem>>, vector<1x128x128xf32>
    %522 = vector.shape_cast %521 : vector<1x128x128xf32> to vector<128x128xf32>
    %cst_474 = arith.constant dense<0.000000e+00> : vector<8x128xf32>
    %523 = tpu.matmul %520, %522, %cst_474 {dimension_numbers = #tpu.dot_dimension_numbers<[1], [0], [0], [1], [0, 0, 1, 1], [], []>} : vector<8x128xf32>, vector<128x128xf32>, vector<8x128xf32> -> vector<8x128xf32>
    %524 = arith.addf %518, %523 : vector<8x128xf32>
    %c0_475 = arith.constant 0 : index
    %c1_476 = arith.constant 1 : index
    %c0_477 = arith.constant 0 : index
    %525 = vector.load %arg11[%c0_475, %c1_476, %c0_477] : memref<8x13x128xf32, #tpu.memory_space<vmem>>, vector<8x1x128xf32>
    %526 = vector.shape_cast %525 : vector<8x1x128xf32> to vector<8x128xf32>
    %c1_478 = arith.constant 1 : index
    %c0_479 = arith.constant 0 : index
    %c0_480 = arith.constant 0 : index
    %527 = vector.load %arg6[%c1_478, %c0_479, %c0_480] : memref<13x128x128xf32, #tpu.memory_space<vmem>>, vector<1x128x128xf32>
    %528 = vector.shape_cast %527 : vector<1x128x128xf32> to vector<128x128xf32>
    %cst_481 = arith.constant dense<0.000000e+00> : vector<8x128xf32>
    %529 = tpu.matmul %526, %528, %cst_481 {dimension_numbers = #tpu.dot_dimension_numbers<[1], [0], [0], [1], [0, 0, 1, 1], [], []>} : vector<8x128xf32>, vector<128x128xf32>, vector<8x128xf32> -> vector<8x128xf32>
    %530 = arith.addf %524, %529 : vector<8x128xf32>
    %c0_482 = arith.constant 0 : index
    %c2_483 = arith.constant 2 : index
    %c0_484 = arith.constant 0 : index
    %531 = vector.load %arg11[%c0_482, %c2_483, %c0_484] : memref<8x13x128xf32, #tpu.memory_space<vmem>>, vector<8x1x128xf32>
    %532 = vector.shape_cast %531 : vector<8x1x128xf32> to vector<8x128xf32>
    %c2_485 = arith.constant 2 : index
    %c0_486 = arith.constant 0 : index
    %c0_487 = arith.constant 0 : index
    %533 = vector.load %arg6[%c2_485, %c0_486, %c0_487] : memref<13x128x128xf32, #tpu.memory_space<vmem>>, vector<1x128x128xf32>
    %534 = vector.shape_cast %533 : vector<1x128x128xf32> to vector<128x128xf32>
    %cst_488 = arith.constant dense<0.000000e+00> : vector<8x128xf32>
    %535 = tpu.matmul %532, %534, %cst_488 {dimension_numbers = #tpu.dot_dimension_numbers<[1], [0], [0], [1], [0, 0, 1, 1], [], []>} : vector<8x128xf32>, vector<128x128xf32>, vector<8x128xf32> -> vector<8x128xf32>
    %536 = arith.addf %530, %535 : vector<8x128xf32>
    %c0_489 = arith.constant 0 : index
    %c3_490 = arith.constant 3 : index
    %c0_491 = arith.constant 0 : index
    %537 = vector.load %arg11[%c0_489, %c3_490, %c0_491] : memref<8x13x128xf32, #tpu.memory_space<vmem>>, vector<8x1x128xf32>
    %538 = vector.shape_cast %537 : vector<8x1x128xf32> to vector<8x128xf32>
    %c3_492 = arith.constant 3 : index
    %c0_493 = arith.constant 0 : index
    %c0_494 = arith.constant 0 : index
    %539 = vector.load %arg6[%c3_492, %c0_493, %c0_494] : memref<13x128x128xf32, #tpu.memory_space<vmem>>, vector<1x128x128xf32>
    %540 = vector.shape_cast %539 : vector<1x128x128xf32> to vector<128x128xf32>
    %cst_495 = arith.constant dense<0.000000e+00> : vector<8x128xf32>
    %541 = tpu.matmul %538, %540, %cst_495 {dimension_numbers = #tpu.dot_dimension_numbers<[1], [0], [0], [1], [0, 0, 1, 1], [], []>} : vector<8x128xf32>, vector<128x128xf32>, vector<8x128xf32> -> vector<8x128xf32>
    %542 = arith.addf %536, %541 : vector<8x128xf32>
    %c0_496 = arith.constant 0 : index
    %c4_497 = arith.constant 4 : index
    %c0_498 = arith.constant 0 : index
    %543 = vector.load %arg11[%c0_496, %c4_497, %c0_498] : memref<8x13x128xf32, #tpu.memory_space<vmem>>, vector<8x1x128xf32>
    %544 = vector.shape_cast %543 : vector<8x1x128xf32> to vector<8x128xf32>
    %c4_499 = arith.constant 4 : index
    %c0_500 = arith.constant 0 : index
    %c0_501 = arith.constant 0 : index
    %545 = vector.load %arg6[%c4_499, %c0_500, %c0_501] : memref<13x128x128xf32, #tpu.memory_space<vmem>>, vector<1x128x128xf32>
    %546 = vector.shape_cast %545 : vector<1x128x128xf32> to vector<128x128xf32>
    %cst_502 = arith.constant dense<0.000000e+00> : vector<8x128xf32>
    %547 = tpu.matmul %544, %546, %cst_502 {dimension_numbers = #tpu.dot_dimension_numbers<[1], [0], [0], [1], [0, 0, 1, 1], [], []>} : vector<8x128xf32>, vector<128x128xf32>, vector<8x128xf32> -> vector<8x128xf32>
    %548 = arith.addf %542, %547 : vector<8x128xf32>
    %c0_503 = arith.constant 0 : index
    %c5_504 = arith.constant 5 : index
    %c0_505 = arith.constant 0 : index
    %549 = vector.load %arg11[%c0_503, %c5_504, %c0_505] : memref<8x13x128xf32, #tpu.memory_space<vmem>>, vector<8x1x128xf32>
    %550 = vector.shape_cast %549 : vector<8x1x128xf32> to vector<8x128xf32>
    %c5_506 = arith.constant 5 : index
    %c0_507 = arith.constant 0 : index
    %c0_508 = arith.constant 0 : index
    %551 = vector.load %arg6[%c5_506, %c0_507, %c0_508] : memref<13x128x128xf32, #tpu.memory_space<vmem>>, vector<1x128x128xf32>
    %552 = vector.shape_cast %551 : vector<1x128x128xf32> to vector<128x128xf32>
    %cst_509 = arith.constant dense<0.000000e+00> : vector<8x128xf32>
    %553 = tpu.matmul %550, %552, %cst_509 {dimension_numbers = #tpu.dot_dimension_numbers<[1], [0], [0], [1], [0, 0, 1, 1], [], []>} : vector<8x128xf32>, vector<128x128xf32>, vector<8x128xf32> -> vector<8x128xf32>
    %554 = arith.addf %548, %553 : vector<8x128xf32>
    %c0_510 = arith.constant 0 : index
    %c6_511 = arith.constant 6 : index
    %c0_512 = arith.constant 0 : index
    %555 = vector.load %arg11[%c0_510, %c6_511, %c0_512] : memref<8x13x128xf32, #tpu.memory_space<vmem>>, vector<8x1x128xf32>
    %556 = vector.shape_cast %555 : vector<8x1x128xf32> to vector<8x128xf32>
    %c6_513 = arith.constant 6 : index
    %c0_514 = arith.constant 0 : index
    %c0_515 = arith.constant 0 : index
    %557 = vector.load %arg6[%c6_513, %c0_514, %c0_515] : memref<13x128x128xf32, #tpu.memory_space<vmem>>, vector<1x128x128xf32>
    %558 = vector.shape_cast %557 : vector<1x128x128xf32> to vector<128x128xf32>
    %cst_516 = arith.constant dense<0.000000e+00> : vector<8x128xf32>
    %559 = tpu.matmul %556, %558, %cst_516 {dimension_numbers = #tpu.dot_dimension_numbers<[1], [0], [0], [1], [0, 0, 1, 1], [], []>} : vector<8x128xf32>, vector<128x128xf32>, vector<8x128xf32> -> vector<8x128xf32>
    %560 = arith.addf %554, %559 : vector<8x128xf32>
    %c0_517 = arith.constant 0 : index
    %c7_518 = arith.constant 7 : index
    %c0_519 = arith.constant 0 : index
    %561 = vector.load %arg11[%c0_517, %c7_518, %c0_519] : memref<8x13x128xf32, #tpu.memory_space<vmem>>, vector<8x1x128xf32>
    %562 = vector.shape_cast %561 : vector<8x1x128xf32> to vector<8x128xf32>
    %c7_520 = arith.constant 7 : index
    %c0_521 = arith.constant 0 : index
    %c0_522 = arith.constant 0 : index
    %563 = vector.load %arg6[%c7_520, %c0_521, %c0_522] : memref<13x128x128xf32, #tpu.memory_space<vmem>>, vector<1x128x128xf32>
    %564 = vector.shape_cast %563 : vector<1x128x128xf32> to vector<128x128xf32>
    %cst_523 = arith.constant dense<0.000000e+00> : vector<8x128xf32>
    %565 = tpu.matmul %562, %564, %cst_523 {dimension_numbers = #tpu.dot_dimension_numbers<[1], [0], [0], [1], [0, 0, 1, 1], [], []>} : vector<8x128xf32>, vector<128x128xf32>, vector<8x128xf32> -> vector<8x128xf32>
    %566 = arith.addf %560, %565 : vector<8x128xf32>
    %c0_524 = arith.constant 0 : index
    %c8 = arith.constant 8 : index
    %c0_525 = arith.constant 0 : index
    %567 = vector.load %arg11[%c0_524, %c8, %c0_525] : memref<8x13x128xf32, #tpu.memory_space<vmem>>, vector<8x1x128xf32>
    %568 = vector.shape_cast %567 : vector<8x1x128xf32> to vector<8x128xf32>
    %c8_526 = arith.constant 8 : index
    %c0_527 = arith.constant 0 : index
    %c0_528 = arith.constant 0 : index
    %569 = vector.load %arg6[%c8_526, %c0_527, %c0_528] : memref<13x128x128xf32, #tpu.memory_space<vmem>>, vector<1x128x128xf32>
    %570 = vector.shape_cast %569 : vector<1x128x128xf32> to vector<128x128xf32>
    %cst_529 = arith.constant dense<0.000000e+00> : vector<8x128xf32>
    %571 = tpu.matmul %568, %570, %cst_529 {dimension_numbers = #tpu.dot_dimension_numbers<[1], [0], [0], [1], [0, 0, 1, 1], [], []>} : vector<8x128xf32>, vector<128x128xf32>, vector<8x128xf32> -> vector<8x128xf32>
    %572 = arith.addf %566, %571 : vector<8x128xf32>
    %c0_530 = arith.constant 0 : index
    %c9 = arith.constant 9 : index
    %c0_531 = arith.constant 0 : index
    %573 = vector.load %arg11[%c0_530, %c9, %c0_531] : memref<8x13x128xf32, #tpu.memory_space<vmem>>, vector<8x1x128xf32>
    %574 = vector.shape_cast %573 : vector<8x1x128xf32> to vector<8x128xf32>
    %c9_532 = arith.constant 9 : index
    %c0_533 = arith.constant 0 : index
    %c0_534 = arith.constant 0 : index
    %575 = vector.load %arg6[%c9_532, %c0_533, %c0_534] : memref<13x128x128xf32, #tpu.memory_space<vmem>>, vector<1x128x128xf32>
    %576 = vector.shape_cast %575 : vector<1x128x128xf32> to vector<128x128xf32>
    %cst_535 = arith.constant dense<0.000000e+00> : vector<8x128xf32>
    %577 = tpu.matmul %574, %576, %cst_535 {dimension_numbers = #tpu.dot_dimension_numbers<[1], [0], [0], [1], [0, 0, 1, 1], [], []>} : vector<8x128xf32>, vector<128x128xf32>, vector<8x128xf32> -> vector<8x128xf32>
    %578 = arith.addf %572, %577 : vector<8x128xf32>
    %c0_536 = arith.constant 0 : index
    %c10 = arith.constant 10 : index
    %c0_537 = arith.constant 0 : index
    %579 = vector.load %arg11[%c0_536, %c10, %c0_537] : memref<8x13x128xf32, #tpu.memory_space<vmem>>, vector<8x1x128xf32>
    %580 = vector.shape_cast %579 : vector<8x1x128xf32> to vector<8x128xf32>
    %c10_538 = arith.constant 10 : index
    %c0_539 = arith.constant 0 : index
    %c0_540 = arith.constant 0 : index
    %581 = vector.load %arg6[%c10_538, %c0_539, %c0_540] : memref<13x128x128xf32, #tpu.memory_space<vmem>>, vector<1x128x128xf32>
    %582 = vector.shape_cast %581 : vector<1x128x128xf32> to vector<128x128xf32>
    %cst_541 = arith.constant dense<0.000000e+00> : vector<8x128xf32>
    %583 = tpu.matmul %580, %582, %cst_541 {dimension_numbers = #tpu.dot_dimension_numbers<[1], [0], [0], [1], [0, 0, 1, 1], [], []>} : vector<8x128xf32>, vector<128x128xf32>, vector<8x128xf32> -> vector<8x128xf32>
    %584 = arith.addf %578, %583 : vector<8x128xf32>
    %c0_542 = arith.constant 0 : index
    %c11 = arith.constant 11 : index
    %c0_543 = arith.constant 0 : index
    %585 = vector.load %arg11[%c0_542, %c11, %c0_543] : memref<8x13x128xf32, #tpu.memory_space<vmem>>, vector<8x1x128xf32>
    %586 = vector.shape_cast %585 : vector<8x1x128xf32> to vector<8x128xf32>
    %c11_544 = arith.constant 11 : index
    %c0_545 = arith.constant 0 : index
    %c0_546 = arith.constant 0 : index
    %587 = vector.load %arg6[%c11_544, %c0_545, %c0_546] : memref<13x128x128xf32, #tpu.memory_space<vmem>>, vector<1x128x128xf32>
    %588 = vector.shape_cast %587 : vector<1x128x128xf32> to vector<128x128xf32>
    %cst_547 = arith.constant dense<0.000000e+00> : vector<8x128xf32>
    %589 = tpu.matmul %586, %588, %cst_547 {dimension_numbers = #tpu.dot_dimension_numbers<[1], [0], [0], [1], [0, 0, 1, 1], [], []>} : vector<8x128xf32>, vector<128x128xf32>, vector<8x128xf32> -> vector<8x128xf32>
    %590 = arith.addf %584, %589 : vector<8x128xf32>
    %c0_548 = arith.constant 0 : index
    %c12 = arith.constant 12 : index
    %c0_549 = arith.constant 0 : index
    %591 = vector.load %arg11[%c0_548, %c12, %c0_549] : memref<8x13x128xf32, #tpu.memory_space<vmem>>, vector<8x1x128xf32>
    %592 = vector.shape_cast %591 : vector<8x1x128xf32> to vector<8x128xf32>
    %c12_550 = arith.constant 12 : index
    %c0_551 = arith.constant 0 : index
    %c0_552 = arith.constant 0 : index
    %593 = vector.load %arg6[%c12_550, %c0_551, %c0_552] : memref<13x128x128xf32, #tpu.memory_space<vmem>>, vector<1x128x128xf32>
    %594 = vector.shape_cast %593 : vector<1x128x128xf32> to vector<128x128xf32>
    %cst_553 = arith.constant dense<0.000000e+00> : vector<8x128xf32>
    %595 = tpu.matmul %592, %594, %cst_553 {dimension_numbers = #tpu.dot_dimension_numbers<[1], [0], [0], [1], [0, 0, 1, 1], [], []>} : vector<8x128xf32>, vector<128x128xf32>, vector<8x128xf32> -> vector<8x128xf32>
    %596 = arith.addf %590, %595 : vector<8x128xf32>
    %c0_554 = arith.constant 0 : index
    %c0_555 = arith.constant 0 : index
    %597 = vector.load %arg7[%c0_554, %c0_555] : memref<1x128xf32, #tpu.memory_space<vmem>>, vector<1x128xf32>
    %598 = vector.broadcast %597 : vector<1x128xf32> to vector<8x128xf32>
    %599 = arith.addf %596, %598 : vector<8x128xf32>
    %cst_556 = arith.constant 0.000000e+00 : f32
    %600 = vector.broadcast %cst_556 : f32 to vector<8x128xf32>
    %601 = arith.maximumf %599, %600 : vector<8x128xf32>
    %c0_557 = arith.constant 0 : index
    %c0_558 = arith.constant 0 : index
    %602 = vector.load %arg8[%c0_557, %c0_558] : memref<128x128xf32, #tpu.memory_space<vmem>>, vector<128x128xf32>
    %cst_559 = arith.constant dense<0.000000e+00> : vector<8x128xf32>
    %603 = tpu.matmul %601, %602, %cst_559 {dimension_numbers = #tpu.dot_dimension_numbers<[1], [0], [0], [1], [0, 0, 1, 1], [], []>} : vector<8x128xf32>, vector<128x128xf32>, vector<8x128xf32> -> vector<8x128xf32>
    %c0_560 = arith.constant 0 : index
    %c0_561 = arith.constant 0 : index
    %604 = vector.load %arg9[%c0_560, %c0_561] : memref<1x128xf32, #tpu.memory_space<vmem>>, vector<1x128xf32>
    %605 = vector.broadcast %604 : vector<1x128xf32> to vector<8x128xf32>
    %606 = arith.addf %603, %605 : vector<8x128xf32>
    %c0_562 = arith.constant 0 : index
    %c0_563 = arith.constant 0 : index
    %607 = vector.load %arg10[%c0_562, %c0_563] : memref<8x128xf32, #tpu.memory_space<vmem>>, vector<8x128xf32>
    tpu.vector_store %arg10[%c0_562, %c0_563], %606 {strides = array<i32>} : memref<8x128xf32, #tpu.memory_space<vmem>>, vector<8x128xf32>,
    return
  }
  func.func @transform_0(%arg0: i32) -> (i32, i32, i32, i32) {
    %c0_i32 = arith.constant 0 : i32
    %c0_i32_0 = arith.constant 0 : i32
    %c0_i32_1 = arith.constant 0 : i32
    %c0_i32_2 = arith.constant 0 : i32
    return %arg0, %c0_i32, %c0_i32_0, %c0_i32_1 : i32, i32, i32, i32
  }
  func.func @transform_1(%arg0: i32) -> (i32, i32, i32) {
    %c0_i32 = arith.constant 0 : i32
    %c0_i32_0 = arith.constant 0 : i32
    %c0_i32_1 = arith.constant 0 : i32
    %c0_i32_2 = arith.constant 0 : i32
    return %c0_i32, %c0_i32_0, %c0_i32_1 : i32, i32, i32
  }
  func.func @transform_2(%arg0: i32) -> (i32, i32) {
    %c0_i32 = arith.constant 0 : i32
    %c0_i32_0 = arith.constant 0 : i32
    %c0_i32_1 = arith.constant 0 : i32
    return %c0_i32, %c0_i32_0 : i32, i32
  }
  func.func @transform_3(%arg0: i32) -> (i32, i32, i32) {
    %c0_i32 = arith.constant 0 : i32
    %c0_i32_0 = arith.constant 0 : i32
    %c0_i32_1 = arith.constant 0 : i32
    %c0_i32_2 = arith.constant 0 : i32
    return %c0_i32, %c0_i32_0, %c0_i32_1 : i32, i32, i32
  }
  func.func @transform_4(%arg0: i32) -> (i32, i32) {
    %c0_i32 = arith.constant 0 : i32
    %c0_i32_0 = arith.constant 0 : i32
    %c0_i32_1 = arith.constant 0 : i32
    return %c0_i32, %c0_i32_0 : i32, i32
  }
  func.func @transform_5(%arg0: i32) -> (i32, i32, i32) {
    %c0_i32 = arith.constant 0 : i32
    %c0_i32_0 = arith.constant 0 : i32
    %c0_i32_1 = arith.constant 0 : i32
    %c0_i32_2 = arith.constant 0 : i32
    return %c0_i32, %c0_i32_0, %c0_i32_1 : i32, i32, i32
  }
  func.func @transform_6(%arg0: i32) -> (i32, i32) {
    %c0_i32 = arith.constant 0 : i32
    %c0_i32_0 = arith.constant 0 : i32
    %c0_i32_1 = arith.constant 0 : i32
    return %c0_i32, %c0_i32_0 : i32, i32
  }
  func.func @transform_7(%arg0: i32) -> (i32, i32) {
    %c0_i32 = arith.constant 0 : i32
    %c0_i32_0 = arith.constant 0 : i32
    %c0_i32_1 = arith.constant 0 : i32
    return %c0_i32, %c0_i32_0 : i32, i32
  }
  func.func @transform_8(%arg0: i32) -> (i32, i32) {
    %c0_i32 = arith.constant 0 : i32
    %c0_i32_0 = arith.constant 0 : i32
    %c0_i32_1 = arith.constant 0 : i32
    return %c0_i32, %c0_i32_0 : i32, i32
  }
  func.func @transform_9(%arg0: i32) -> (i32, i32) {
    %c0_i32 = arith.constant 0 : i32
    %c0_i32_0 = arith.constant 0 : i32
    return %arg0, %c0_i32 : i32, i32
  }
}

</mosaic_0001>

<bundles_post_ra>
// kernel: convnet_forward.1
= control target key start
LH: loop header
LB: loop body
LE: loop exit
PB: predicated region body
PF: predicated region fallthrough
CT: control target
= control target key end

     0   :  { %14 = vsyncpa [#allocation4], 0  ;;  %s20309_s0 = inlined_call_operand.vmem [shape: f32[16,2,16,128], index: 0, kind: input, shape index: {}]   ;;  %s20310_s1 = inlined_call_operand.vmem [shape: f32[3,128,256], index: 1, kind: input, shape index: {}]   ;;  %s20311_s2 = inlined_call_operand.vmem [shape: f32[1,128], index: 2, kind: input, shape index: {}]   ;;  %s20312_s3 = inlined_call_operand.vmem [shape: f32[3,128,128], index: 3, kind: input, shape index: {}]   ;;  %s20313_s4 = inlined_call_operand.vmem [shape: f32[1,128], index: 4, kind: input, shape index: {}]   ;;  %s20314_s5 = inlined_call_operand.vmem [shape: f32[13,128,128], index: 5, kind: input, shape index: {}]   ;;  %s20315_s6 = inlined_call_operand.vmem [shape: f32[1,128], index: 6, kind: input, shape index: {}]   ;;  %s20316_s7 = inlined_call_operand.vmem [shape: f32[128,128], index: 7, kind: input, shape index: {}]   ;;  %s20317_s8 = inlined_call_operand.vmem [shape: f32[1,128], index: 8, kind: input, shape index: {}]   ;;  %s20318_s9 = inlined_call_operand.hbm [shape: f32[16,128], index: 9, kind: output, shape index: {}]  }
   0x1   :  { %16 = vsyncpa [#allocation4 + $0x1], 0  ;;  %s12381_s30 = smov 0   ;;  %s12383_s10 = smov 0  }
   0x2   :  { %s12385_s11 = smov 0   ;;  %s12387_s12 = smov 0  }
   0x3 LB: > { %s12402_s13 = sadd.s32 4294967295, %s12326_s12   ;;  %s9121_s14 = sadd.s32 4294967294, %s12326_s12   ;;  %s12326_s12 = sphi %s12387_s12, %s20469_s12   ;;  %s12322_s11 = sphi %s12385_s11, %s20468_s11   ;;  %s12318_s10 = sphi %s12383_s10, %s20467_s10   ;;  %s12314_s30 = sphi %s12381_s30, %s20466_s30  }
   0x4   : > { %s12406_s15 = sadd.s32 1, %s12326_s12   ;;  %s223_s16 = sadd.s32 1, %s12322_s11 }
   0x5   : > { %s220_s17 = ssub.s32 %s12326_s12, %s12406_s15  ;;  %p233_p0 = scmp.ne.s32.totalorder %s12322_s11, %s12318_s10 }
   0x6   : > { %p221_p1 = scmp.eq.s32.totalorder %s220_s17, 0  ;;  %p234_p2 = scmp.eq.s32.totalorder %s12402_s13, 1 }
   0x7   : > { %p239_p3 = scmp.ne.s32.totalorder %s12318_s10, %s12314_s30  ;;  %p240_p4 = scmp.eq.s32.totalorder %s9121_s14, 1 }
   0x8   : > { %s12417_s18 = scalar_select %p221_p1, %s12322_s11, %s223_s16  }
   0x9   : > { %p12419_p5 = por %p234_p2, %p233_p0  ;;  %p12423_p6 = por %p240_p4, %p239_p3 }
   0xa   : > { %p9124_p7 = scmp.ge.s32.totalorder %s12326_s12, 1  ;;  %p292_p8 = scmp.lt.s32.totalorder %s12326_s12, 3 }
   0xc   : > { %p293_p9 = pnand %p9124_p7, %p292_p8 }
   0xe   : > { %296 = sbr.rel (%p293_p9) target bundleno = 3635 (0xe33), region = 56 }
  0x13   : > { %v12432_v0 = vld [vmem:[%s20310_s1 + $0x1f8] sm:$0xff]  ;;  %v12442_v2 = vld [vmem:[%s20310_s1 + $0x1f0] sm:$0xff]  ;;  %v12454_v4 = vld [vmem:[%s20310_s1 + $0x1e8] sm:$0xff]  ;;  %s9126_s29 = sshll.u32 %s12402_s13, 3  ;;  %vm972_vm0 = vcmask 1046528   ;;  %vm1145_vm1 = vcmask 1045504  }
  0x14   : > { %v12437_v1 = vld [vmem:[%s20310_s1 + $0xf8] sm:$0xff]  ;;  %422 = vmatprep.subr.mxu0 %v12432_v0  ;;  %v12449_v3 = vld [vmem:[%s20310_s1 + $0xf0] sm:$0xff]  ;;  %v12459_v5 = vld [vmem:[%s20310_s1 + $0xe8] sm:$0xff]  ;;  %p12666_p10 = scmp.lt.s32.totalorder %s9126_s29, 15  ;;  %vm7452_vm2 = vcmask 1041409   ;;  %vm7455_vm3 = vcmask 1042434  }
  0x15   : > { %499 = vmatprep.subr.mxu1 %v12437_v1  ;;  %423 = vmatpush1.msra.mxu0 %v12442_v2  ;;  %v12466_v6 = vld [vmem:[%s20310_s1 + $0x1e0] sm:$0xff]  ;;  %v12476_v8 = vld [vmem:[%s20310_s1 + $0x1d8] sm:$0xff]  ;;  %v12488_v10 = vld [vmem:[%s20310_s1 + $0x1d0] sm:$0xff]  ;;  %vm7458_vm4 = vcmask 1043459   ;;  %vm7461_vm5 = vcmask 1044484   ;;  %vm7464_vm6 = vcmask 1045509  }
  0x16   : > { %500 = vmatpush1.msra.mxu1 %v12449_v3  ;;  %v12471_v7 = vld [vmem:[%s20310_s1 + $0xe0] sm:$0xff]  ;;  %424 = vmatprep.subr.mxu0 %v12454_v4  ;;  %v12483_v9 = vld [vmem:[%s20310_s1 + $0xd8] sm:$0xff]  ;;  %v12493_v11 = vld [vmem:[%s20310_s1 + $0xd0] sm:$0xff]  ;;  %s20471_s29 = smov (!%p12666_p10, %s9126_s29), 15  ;;  %vm7467_vm7 = vcmask 1046534   ;;  %vm12329_vm8 = vmmov 0  }
  0x17   : > { %501 = vmatprep.subr.mxu1 %v12459_v5  ;;  %425 = vmatpush1.msra.mxu0 %v12466_v6  ;;  %v12500_v12 = vld [vmem:[%s20310_s1 + $0x1c8] sm:$0xff]  ;;  %v12512_v14 = vld [vmem:[%s20310_s1 + $0x1c0] sm:$0xff]  ;;  %v12524_v16 = vld [vmem:[%s20310_s1 + $0x1b8] sm:$0xff]  ;;  %s10157_s17 = sshll.u32 %s20471_s29, 5  ;;  %vm7470_vm9 = vcmask 1047559   ;;  %s326_s29 = sand.u32 1, %s12318_s10  }
  0x18   : > { %502 = vmatpush1.msra.mxu1 %v12471_v7  ;;  %v12505_v13 = vld [vmem:[%s20310_s1 + $0xc8] sm:$0xff]  ;;  %426 = vmatprep.subr.mxu0 %v12476_v8  ;;  %v12517_v15 = vld [vmem:[%s20310_s1 + $0xc0] sm:$0xff]  ;;  %v12529_v17 = vld [vmem:[%s20310_s1 + $0xb8] sm:$0xff]  ;;  %s12812_s24 = scalar_lea.vmem %s20309_s0, %s10157_s17  ;;  %s9125_s26 = sshll.u32 %s326_s29, 3 }
  0x19   : > { %503 = vmatprep.subr.mxu1 %v12483_v9  ;;  %427 = vmatpush1.msra.mxu0 %v12488_v10  ;;  %v12536_v18 = vld [vmem:[%s20310_s1 + $0x1b0] sm:$0xff]  ;;  %v12548_v20 = vld [vmem:[%s20310_s1 + $0x1a8] sm:$0xff]  ;;  %v12560_v22 = vld [vmem:[%s20310_s1 + $0x1a0] sm:$0xff]  ;;  %s328_s28 = scalar_lea.vmem [#allocation3], %s9125_s26  ;;  %s9049_s23 = scalar_lea.sflag [#allocation4], %s326_s29 }
  0x1a   : > { %504 = vmatpush1.msra.mxu1 %v12493_v11  ;;  %428 = vmatprep.subr.mxu0 %v12500_v12  ;;  %v12541_v19 = vld [vmem:[%s20310_s1 + $0xb0] sm:$0xff]  ;;  %v12553_v21 = vld [vmem:[%s20310_s1 + $0xa8] sm:$0xff]  ;;  %v12565_v23 = vld [vmem:[%s20310_s1 + $0xa0] sm:$0xff]  ;;  %s9062_s14 = sshll.u32 %s328_s28, 4  ;;  %s12330_s27 = smov [#allocation3]   ;;  %s9063_s14 = int_to_ptr.vmem [resolvable:$true] %s9062_s14 }
  0x1b   : > { %505 = vmatprep.subr.mxu1 %v12505_v13  ;;  %429 = vmatpush1.msra.mxu0 %v12512_v14  ;;  %v12572_v24 = vld [vmem:[%s20310_s1 + $0x198] sm:$0xff]  ;;  %v12584_v26 = vld [vmem:[%s20310_s1 + $0x190] sm:$0xff]  ;;  %v12596_v28 = vld [vmem:[%s20310_s1 + $0x188] sm:$0xff]  ;;  %s12266_s25 = scalar_lea.vmem %s9063_s14, 128 }
  0x1c   : > { %506 = vmatpush1.msra.mxu1 %v12517_v15  ;;  %430 = vmatprep.subr.mxu0 %v12524_v16  ;;  %v12577_v25 = vld [vmem:[%s20310_s1 + $0x98] sm:$0xff]  ;;  %v12589_v27 = vld [vmem:[%s20310_s1 + $0x90] sm:$0xff]  ;;  %v12601_v29 = vld [vmem:[%s20310_s1 + $0x88] sm:$0xff]  ;;  %p12267_p11 = scmp.ne.s32.totalorder %s9063_s14, %s12266_s25 }
  0x1d   : > { %507 = vmatprep.subr.mxu1 %v12529_v17  ;;  %431 = vmatpush1.msra.mxu0 %v12536_v18  ;;  %v12608_v30 = vld [vmem:[%s20310_s1 + $0x180] sm:$0xff]  ;;  %v12620_v32 = vld [vmem:[%s20310_s1 + $0x178] sm:$0xff]  ;;  %v12633_v34 = vld [vmem:[%s20310_s1 + $0x170] sm:$0xff] }
  0x1e   : > { %508 = vmatpush1.msra.mxu1 %v12541_v19  ;;  %432 = vmatprep.subr.mxu0 %v12548_v20  ;;  %v12613_v31 = vld [vmem:[%s20310_s1 + $0x80] sm:$0xff]  ;;  %v12625_v33 = vld [vmem:[%s20310_s1 + $0x78] sm:$0xff]  ;;  %v12638_v35 = vld [vmem:[%s20310_s1 + $0x70] sm:$0xff]  ;;  %p12268_p12 = pnand %p12267_p11, %p12419_p5 }
  0x1f   : > { %509 = vmatprep.subr.mxu1 %v12553_v21  ;;  %433 = vmatpush1.msra.mxu0 %v12560_v22  ;;  %v12645_v36 = vld [vmem:[%s20310_s1 + $0x168] sm:$0xff]  ;;  %v12657_v38 = vld [vmem:[%s20310_s1 + $0x160] sm:$0xff]  ;;  %v12675_v40 = vld [vmem:[%s20310_s1 + $0x158] sm:$0xff] }
  0x20   : > { %510 = vmatpush1.msra.mxu1 %v12565_v23  ;;  %434 = vmatprep.subr.mxu0 %v12572_v24  ;;  %v12650_v37 = vld [vmem:[%s20310_s1 + $0x68] sm:$0xff]  ;;  %v12662_v39 = vld [vmem:[%s20310_s1 + $0x60] sm:$0xff]  ;;  %v12680_v41 = vld [vmem:[%s20310_s1 + $0x58] sm:$0xff]  ;;  %p12269_p13 = pneg %p12268_p12 }
  0x21   : > { %511 = vmatprep.subr.mxu1 %v12577_v25  ;;  %435 = vmatpush1.msra.mxu0 %v12584_v26  ;;  %v12687_v42 = vld [vmem:[%s20310_s1 + $0x150] sm:$0xff]  ;;  %v12699_v44 = vld [vmem:[%s20310_s1 + $0x148] sm:$0xff]  ;;  %v12711_v46 = vld [vmem:[%s20310_s1 + $0x140] sm:$0xff] }
  0x22   : > { %512 = vmatpush1.msra.mxu1 %v12589_v27  ;;  %436 = vmatprep.subr.mxu0 %v12596_v28  ;;  %v12692_v43 = vld [vmem:[%s20310_s1 + $0x50] sm:$0xff]  ;;  %v12704_v45 = vld [vmem:[%s20310_s1 + $0x48] sm:$0xff]  ;;  %v12716_v47 = vld [vmem:[%s20310_s1 + $0x40] sm:$0xff] }
  0x23   : > { %513 = vmatprep.subr.mxu1 %v12601_v29  ;;  %437 = vmatpush1.msra.mxu0 %v12608_v30  ;;  %v12729_v48 = vld [vmem:[%s20310_s1 + $0x138] sm:$0xff]  ;;  %v12741_v50 = vld [vmem:[%s20310_s1 + $0x130] sm:$0xff]  ;;  %v12753_v52 = vld [vmem:[%s20310_s1 + $0x128] sm:$0xff] }
  0x24   : > { %514 = vmatpush1.msra.mxu1 %v12613_v31  ;;  %438 = vmatprep.subr.mxu0 %v12620_v32  ;;  %v12734_v49 = vld [vmem:[%s20310_s1 + $0x38] sm:$0xff]  ;;  %20382 = vst [vmem:[#allocation6_spill] sm:$0xff] %v12741_v50  ;;  %v12746_v51 = vld [vmem:[%s20310_s1 + $0x30] sm:$0xff]  ;;  %20383 = vst [vmem:[#allocation7_spill] sm:$0xff] %v12753_v52 }
  0x25   : > { %515 = vmatprep.subr.mxu1 %v12625_v33  ;;  %439 = vmatpush1.msra.mxu0 %v12633_v34  ;;  %v12758_v53 = vld [vmem:[%s20310_s1 + $0x28] sm:$0xff]  ;;  %v12765_v54 = vld [vmem:[%s20310_s1 + $0x120] sm:$0xff]  ;;  %v12778_v56 = vld [vmem:[%s20310_s1 + $0x118] sm:$0xff] }
  0x26   : > { %516 = vmatpush1.msra.mxu1 %v12638_v35  ;;  %440 = vmatprep.subr.mxu0 %v12645_v36  ;;  %20384 = vst [vmem:[#allocation8_spill] sm:$0xff] %v12765_v54  ;;  %v12770_v55 = vld [vmem:[%s20310_s1 + $0x20] sm:$0xff]  ;;  %20386 = vst [vmem:[#allocation10_spill] sm:$0xff] %v12778_v56  ;;  %v12783_v57 = vld [vmem:[%s20310_s1 + $0x18] sm:$0xff] }
  0x27   : > { %517 = vmatprep.subr.mxu1 %v12650_v37  ;;  %441 = vmatpush1.msra.mxu0 %v12657_v38  ;;  %20385 = vst [vmem:[#allocation9_spill] sm:$0xff] %v12770_v55  ;;  %20387 = vst [vmem:[#allocation11_spill] sm:$0xff] %v12783_v57  ;;  %v12790_v58 = vld [vmem:[%s20310_s1 + $0x110] sm:$0xff]  ;;  %v12802_v60 = vld [vmem:[%s20310_s1 + $0x108] sm:$0xff] }
  0x28   : > { %518 = vmatpush1.msra.mxu1 %v12662_v39  ;;  %442 = vmatprep.subr.mxu0 %v12675_v40  ;;  %20388 = vst [vmem:[#allocation12_spill] sm:$0xff] %v12790_v58  ;;  %v12795_v59 = vld [vmem:[%s20310_s1 + $0x10] sm:$0xff]  ;;  %20389 = vst [vmem:[#allocation13_spill] sm:$0xff] %v12802_v60  ;;  %v12807_v61 = vld [vmem:[%s20310_s1 + $0x8] sm:$0xff] }
  0x29   : > { %519 = vmatprep.subr.mxu1 %v12680_v41  ;;  %443 = vmatpush1.msra.mxu0 %v12687_v42  ;;  %v12819_v62 = vld [vmem:[%s20310_s1 + $0x100] sm:$0xff] }
  0x2a   : > { %520 = vmatpush1.msra.mxu1 %v12692_v43  ;;  %444 = vmatprep.subr.mxu0 %v12699_v44  ;;  %20390 = vst [vmem:[#allocation14_spill] sm:$0xff] %v12819_v62  ;;  %v12826_v63 = vld [vmem:[%s20310_s1] sm:$0xff] }
  0x2b   : > { %521 = vmatprep.subr.mxu1 %v12704_v45  ;;  %445 = vmatpush1.msra.mxu0 %v12711_v46 }
  0x2c   : > { %522 = vmatpush1.msra.mxu1 %v12716_v47  ;;  %446 = vmatprep.subr.mxu0 %v12729_v48 }
  0x2d   : > { %523 = vmatprep.subr.mxu1 %v12734_v49  ;;  %447 = vmatpush1.msra.mxu0 %v12741_v50 }
  0x2e   : > { %524 = vmatpush1.msra.mxu1 %v12746_v51  ;;  %448 = vmatprep.subr.mxu0 %v12753_v52 }
  0x2f   : > { %525 = vmatprep.subr.mxu1 %v12758_v53  ;;  %449 = vmatpush1.msra.mxu0 %v12765_v54 }
  0x30   : > { %526 = vmatpush1.msra.mxu1 %v12770_v55  ;;  %450 = vmatprep.subr.mxu0 %v12778_v56  ;;  %v12831_v56 = vld [vmem:[%s12812_s24 + $0x10] sm:$0xff]  ;;  %v20323_v55 = vmov 0.0  }
  0x31   : > { %527 = vmatprep.subr.mxu1 %v12783_v57  ;;  %451 = vmatpush1.msra.mxu0 %v12790_v58  ;;  %v382_v57 = vld [vmem:[%s12812_s24] sm:$0xff] }
  0x32   : > { %528 = vmatpush1.msra.mxu1 %v12795_v59  ;;  %452 = vmatprep.subr.mxu0 %v12802_v60 }
  0x33   : > { %529 = vmatprep.subr.mxu1 %v12807_v61  ;;  %453 = vmatpush1.msra.mxu0 %v12819_v62 }
  0x34   : > { %486 = vmatprep.mubr.f32.mxu0 %v20323_v55  ;;  %530 = vmatpush1.msra.mxu1 %v12826_v63 }
  0x35   : > { %563 = vmatprep.mubr.f32.mxu1 %v20323_v55  ;;  %487 = vmatmul.mubr.f32.vlgmr.msra.gmra.mxu0 %v12831_v56 }
  0x36   : > { %564 = vmatmul.mubr.f32.vlgmr.msra.gmra.mxu1 %v382_v57  ;;  %576 = vmatprep.subr.mxu0 %v12432_v0  ;;  %v13070_v57 = vld [vmem:[%s20310_s1 + $0x248] sm:$0xff] }
  0x37   : > { %653 = vmatprep.subr.mxu1 %v12437_v1  ;;  %577 = vmatpush1.msra.mxu0 %v12442_v2  ;;  %v12892_v1 = vld [vmem:[%s12812_s24 + $0x18] sm:$0x7f]  ;;  %20416 = vst [vmem:[#allocation35_spill] sm:$0xff] %v13070_v57 }
  0x38   : > { %654 = vmatpush1.msra.mxu1 %v12449_v3  ;;  %578 = vmatprep.subr.mxu0 %v12454_v4  ;;  %v383_v3 = vld [vmem:[%s12812_s24 + $0x8] sm:$0x7f] }
  0x39   : > { %655 = vmatprep.subr.mxu1 %v12459_v5  ;;  %579 = vmatpush1.msra.mxu0 %v12466_v6  ;;  %v20391_v5 = vld [vmem:[#allocation9_spill] sm:$0xff] }
  0x3a   : > { %656 = vmatpush1.msra.mxu1 %v12471_v7  ;;  %580 = vmatprep.subr.mxu0 %v12476_v8  ;;  %v20392_v7 = vld [vmem:[#allocation10_spill] sm:$0xff] }
  0x3b   : > { %657 = vmatprep.subr.mxu1 %v12483_v9  ;;  %581 = vmatpush1.msra.mxu0 %v12488_v10  ;;  %v20393_v9 = vld [vmem:[#allocation11_spill] sm:$0xff] }
  0x3c   : > { %658 = vmatpush1.msra.mxu1 %v12493_v11  ;;  %582 = vmatprep.subr.mxu0 %v12500_v12  ;;  %v12909_v11 = vld [vmem:[%s12812_s24 + $0x1] sm:$0xff] }
  0x3d   : > { %659 = vmatprep.subr.mxu1 %v12505_v13  ;;  %583 = vmatpush1.msra.mxu0 %v12512_v14  ;;  %v12916_v13 = vld [vmem:[%s20310_s1 + $0x2f8] sm:$0xff] }
  0x3e   : > { %660 = vmatpush1.msra.mxu1 %v12517_v15  ;;  %584 = vmatprep.subr.mxu0 %v12524_v16  ;;  %20394 = vst [vmem:[#allocation9_spill] sm:$0xff] %v12916_v13  ;;  %v12923_v15 = vld [vmem:[%s20310_s1 + $0x2f0] sm:$0xff] }
  0x3f   : > { %661 = vmatprep.subr.mxu1 %v12529_v17  ;;  %585 = vmatpush1.msra.mxu0 %v12536_v18  ;;  %20395 = vst [vmem:[#allocation11_spill] sm:$0xff] %v12923_v15  ;;  %v12930_v17 = vld [vmem:[%s20310_s1 + $0x2e8] sm:$0xff] }
  0x40   : > { %662 = vmatpush1.msra.mxu1 %v12541_v19  ;;  %586 = vmatprep.subr.mxu0 %v12548_v20  ;;  %20396 = vst [vmem:[#allocation15_spill] sm:$0xff] %v12930_v17  ;;  %v12937_v19 = vld [vmem:[%s20310_s1 + $0x2e0] sm:$0xff] }
  0x41   : > { %663 = vmatprep.subr.mxu1 %v12553_v21  ;;  %587 = vmatpush1.msra.mxu0 %v12560_v22  ;;  %20397 = vst [vmem:[#allocation16_spill] sm:$0xff] %v12937_v19  ;;  %v12944_v21 = vld [vmem:[%s20310_s1 + $0x2d8] sm:$0xff] }
  0x42   : > { %664 = vmatpush1.msra.mxu1 %v12565_v23  ;;  %588 = vmatprep.subr.mxu0 %v12572_v24  ;;  %20398 = vst [vmem:[#allocation17_spill] sm:$0xff] %v12944_v21  ;;  %v12951_v23 = vld [vmem:[%s20310_s1 + $0x2d0] sm:$0xff] }
  0x43   : > { %665 = vmatprep.subr.mxu1 %v12577_v25  ;;  %589 = vmatpush1.msra.mxu0 %v12584_v26  ;;  %20399 = vst [vmem:[#allocation18_spill] sm:$0xff] %v12951_v23  ;;  %v12958_v25 = vld [vmem:[%s20310_s1 + $0x2c8] sm:$0xff] }
  0x44   : > { %666 = vmatpush1.msra.mxu1 %v12589_v27  ;;  %590 = vmatprep.subr.mxu0 %v12596_v28  ;;  %20400 = vst [vmem:[#allocation19_spill] sm:$0xff] %v12958_v25  ;;  %v12965_v27 = vld [vmem:[%s20310_s1 + $0x2c0] sm:$0xff] }
  0x45   : > { %667 = vmatprep.subr.mxu1 %v12601_v29  ;;  %591 = vmatpush1.msra.mxu0 %v12608_v30  ;;  %20401 = vst [vmem:[#allocation20_spill] sm:$0xff] %v12965_v27  ;;  %v12972_v29 = vld [vmem:[%s20310_s1 + $0x2b8] sm:$0xff] }
  0x46   : > { %668 = vmatpush1.msra.mxu1 %v12613_v31  ;;  %592 = vmatprep.subr.mxu0 %v12620_v32  ;;  %20402 = vst [vmem:[#allocation21_spill] sm:$0xff] %v12972_v29  ;;  %v12979_v31 = vld [vmem:[%s20310_s1 + $0x2b0] sm:$0xff] }
  0x47   : > { %669 = vmatprep.subr.mxu1 %v12625_v33  ;;  %593 = vmatpush1.msra.mxu0 %v12633_v34  ;;  %20403 = vst [vmem:[#allocation22_spill] sm:$0xff] %v12979_v31  ;;  %v12986_v33 = vld [vmem:[%s20310_s1 + $0x2a8] sm:$0xff] }
  0x48   : > { %670 = vmatpush1.msra.mxu1 %v12638_v35  ;;  %594 = vmatprep.subr.mxu0 %v12645_v36  ;;  %20404 = vst [vmem:[#allocation23_spill] sm:$0xff] %v12986_v33  ;;  %v12993_v35 = vld [vmem:[%s20310_s1 + $0x2a0] sm:$0xff] }
  0x49   : > { %671 = vmatprep.subr.mxu1 %v12650_v37  ;;  %595 = vmatpush1.msra.mxu0 %v12657_v38  ;;  %20405 = vst [vmem:[#allocation24_spill] sm:$0xff] %v12993_v35  ;;  %v13000_v37 = vld [vmem:[%s20310_s1 + $0x298] sm:$0xff] }
  0x4a   : > { %672 = vmatpush1.msra.mxu1 %v12662_v39  ;;  %596 = vmatprep.subr.mxu0 %v12675_v40  ;;  %20406 = vst [vmem:[#allocation25_spill] sm:$0xff] %v13000_v37  ;;  %v13007_v39 = vld [vmem:[%s20310_s1 + $0x290] sm:$0xff] }
  0x4b   : > { %673 = vmatprep.subr.mxu1 %v12680_v41  ;;  %597 = vmatpush1.msra.mxu0 %v12687_v42  ;;  %20407 = vst [vmem:[#allocation26_spill] sm:$0xff] %v13007_v39  ;;  %v13014_v41 = vld [vmem:[%s20310_s1 + $0x288] sm:$0xff] }
  0x4c   : > { %674 = vmatpush1.msra.mxu1 %v12692_v43  ;;  %598 = vmatprep.subr.mxu0 %v12699_v44  ;;  %20408 = vst [vmem:[#allocation27_spill] sm:$0xff] %v13014_v41  ;;  %v13021_v43 = vld [vmem:[%s20310_s1 + $0x280] sm:$0xff] }
  0x4d   : > { %675 = vmatprep.subr.mxu1 %v12704_v45  ;;  %599 = vmatpush1.msra.mxu0 %v12711_v46  ;;  %20409 = vst [vmem:[#allocation28_spill] sm:$0xff] %v13021_v43  ;;  %v13028_v45 = vld [vmem:[%s20310_s1 + $0x278] sm:$0xff] }
  0x4e   : > { %676 = vmatpush1.msra.mxu1 %v12716_v47  ;;  %600 = vmatprep.subr.mxu0 %v12729_v48  ;;  %20410 = vst [vmem:[#allocation29_spill] sm:$0xff] %v13028_v45  ;;  %v13035_v47 = vld [vmem:[%s20310_s1 + $0x270] sm:$0xff] }
  0x4f   : > { %677 = vmatprep.subr.mxu1 %v12734_v49  ;;  %601 = vmatpush1.msra.mxu0 %v12741_v50  ;;  %20411 = vst [vmem:[#allocation30_spill] sm:$0xff] %v13035_v47  ;;  %v13042_v49 = vld [vmem:[%s20310_s1 + $0x268] sm:$0xff] }
  0x50   : > { %678 = vmatpush1.msra.mxu1 %v12746_v51  ;;  %492 = vmatprep.mubr.f32.mxu0 %v20323_v55  ;;  %20412 = vst [vmem:[#allocation31_spill] sm:$0xff] %v13042_v49  ;;  %v13049_v51 = vld [vmem:[%s20310_s1 + $0x260] sm:$0xff] }
  0x51   : > { %569 = vmatprep.mubr.f32.mxu1 %v20323_v55  ;;  %602 = vmatprep.subr.mxu0 %v12753_v52  ;;  %20413 = vst [vmem:[#allocation32_spill] sm:$0xff] %v13049_v51 }
  0x52   : > { %679 = vmatprep.subr.mxu1 %v12758_v53  ;;  %493 = vmatmul.mubr.f32.gmra.mxu0 %v12892_v1  ;;  %v13056_v53 = vld [vmem:[%s20310_s1 + $0x258] sm:$0xff] }
  0x53   : > { %570 = vmatmul.mubr.f32.gmra.mxu1 %v383_v3  ;;  %603 = vmatpush1.msra.mxu0 %v12765_v54  ;;  %20414 = vst [vmem:[#allocation33_spill] sm:$0xff] %v13056_v53  ;;  %v421_v3 = vld [vmem:[%s12812_s24 + $0x9] sm:$0x7f] }
  0x54   : > { %680 = vmatpush1.msra.mxu1 %v20391_v5  ;;  %604 = vmatprep.subr.mxu0 %v20392_v7  ;;  %v13103_v5 = vld [vmem:[%s20310_s1 + $0x228] sm:$0xff] }
  0x55   : > { %681 = vmatprep.subr.mxu1 %v20393_v9  ;;  %605 = vmatpush1.msra.mxu0 %v12790_v58  ;;  %20420 = vst [vmem:[#allocation39_spill] sm:$0xff] %v13103_v5  ;;  %v13110_v9 = vld [vmem:[%s20310_s1 + $0x220] sm:$0xff] }
  0x56   : > { %682 = vmatpush1.msra.mxu1 %v12795_v59  ;;  %606 = vmatprep.subr.mxu0 %v12802_v60  ;;  %v13077_v59 = vld [vmem:[%s20310_s1 + $0x240] sm:$0xff]  ;;  %20421 = vst [vmem:[#allocation40_spill] sm:$0xff] %v13110_v9 }
  0x57   : > { %683 = vmatprep.subr.mxu1 %v12807_v61  ;;  %607 = vmatpush1.msra.mxu0 %v12819_v62  ;;  %20417 = vst [vmem:[#allocation36_spill] sm:$0xff] %v13077_v59  ;;  %v13084_v61 = vld [vmem:[%s20310_s1 + $0x238] sm:$0xff] }
  0x58   : > { %640 = vmatprep.mubr.f32.mxu0 %v20323_v55  ;;  %684 = vmatpush1.msra.mxu1 %v12826_v63  ;;  %20418 = vst [vmem:[#allocation37_spill] sm:$0xff] %v13084_v61  ;;  %v13093_v63 = vld [vmem:[%s20310_s1 + $0x230] sm:$0xff] }
  0x59   : > { %717 = vmatprep.mubr.f32.mxu1 %v20323_v55  ;;  %641 = vmatmul.mubr.f32.vlgmr.msra.gmra.mxu0 %v12909_v11  ;;  %20419 = vst [vmem:[#allocation38_spill] sm:$0xff] %v13093_v63 }
  0x5a   : > { %718 = vmatmul.mubr.f32.vlgmr.msra.gmra.mxu1 %v12831_v56  ;;  %765 = vmatprep.subr.mxu0 %v12916_v13  ;;  %v13063_v56 = vld [vmem:[%s20310_s1 + $0x250] sm:$0xff] }
  0x5b   : > { %846 = vmatprep.subr.mxu1 %v12916_v13  ;;  %766 = vmatpush1.msra.mxu0 %v12923_v15  ;;  %20415 = vst [vmem:[#allocation34_spill] sm:$0xff] %v13063_v56 }
  0x5c   : > { %847 = vmatpush1.msra.mxu1 %v12923_v15  ;;  %767 = vmatprep.subr.mxu0 %v12930_v17 }
  0x5d   : > { %848 = vmatprep.subr.mxu1 %v12930_v17  ;;  %768 = vmatpush1.msra.mxu0 %v12937_v19 }
  0x5e   : > { %849 = vmatpush1.msra.mxu1 %v12937_v19  ;;  %769 = vmatprep.subr.mxu0 %v12944_v21 }
  0x5f   : > { %850 = vmatprep.subr.mxu1 %v12944_v21  ;;  %770 = vmatpush1.msra.mxu0 %v12951_v23 }
  0x60   : > { %851 = vmatpush1.msra.mxu1 %v12951_v23  ;;  %771 = vmatprep.subr.mxu0 %v12958_v25 }
  0x61   : > { %852 = vmatprep.subr.mxu1 %v12958_v25  ;;  %772 = vmatpush1.msra.mxu0 %v12965_v27 }
  0x62   : > { %853 = vmatpush1.msra.mxu1 %v12965_v27  ;;  %773 = vmatprep.subr.mxu0 %v12972_v29 }
  0x63   : > { %854 = vmatprep.subr.mxu1 %v12972_v29  ;;  %774 = vmatpush1.msra.mxu0 %v12979_v31 }
  0x64   : > { %855 = vmatpush1.msra.mxu1 %v12979_v31  ;;  %775 = vmatprep.subr.mxu0 %v12986_v33 }
  0x65   : > { %856 = vmatprep.subr.mxu1 %v12986_v33  ;;  %776 = vmatpush1.msra.mxu0 %v12993_v35 }
  0x66   : > { %857 = vmatpush1.msra.mxu1 %v12993_v35  ;;  %777 = vmatprep.subr.mxu0 %v13000_v37 }
  0x67   : > { %858 = vmatprep.subr.mxu1 %v13000_v37  ;;  %778 = vmatpush1.msra.mxu0 %v13007_v39 }
  0x68   : > { %859 = vmatpush1.msra.mxu1 %v13007_v39  ;;  %779 = vmatprep.subr.mxu0 %v13014_v41 }
  0x69   : > { %860 = vmatprep.subr.mxu1 %v13014_v41  ;;  %780 = vmatpush1.msra.mxu0 %v13021_v43 }
  0x6a   : > { %861 = vmatpush1.msra.mxu1 %v13021_v43  ;;  %781 = vmatprep.subr.mxu0 %v13028_v45 }
  0x6b   : > { %862 = vmatprep.subr.mxu1 %v13028_v45  ;;  %782 = vmatpush1.msra.mxu0 %v13035_v47 }
  0x6c   : > { %863 = vmatpush1.msra.mxu1 %v13035_v47  ;;  %783 = vmatprep.subr.mxu0 %v13042_v49 }
  0x6d   : > { %864 = vmatprep.subr.mxu1 %v13042_v49  ;;  %784 = vmatpush1.msra.mxu0 %v13049_v51 }
  0x6e   : > { %865 = vmatpush1.msra.mxu1 %v13049_v51  ;;  %785 = vmatprep.subr.mxu0 %v13056_v53 }
  0x6f   : > { %866 = vmatprep.subr.mxu1 %v13056_v53  ;;  %786 = vmatpush1.msra.mxu0 %v13063_v56 }
  0x70   : > { %867 = vmatpush1.msra.mxu1 %v13063_v56  ;;  %787 = vmatprep.subr.mxu0 %v13070_v57 }
  0x71   : > { %868 = vmatprep.subr.mxu1 %v13070_v57  ;;  %788 = vmatpush1.msra.mxu0 %v13077_v59 }
  0x72   : > { %869 = vmatpush1.msra.mxu1 %v13077_v59  ;;  %789 = vmatprep.subr.mxu0 %v13084_v61 }
  0x73   : > { %870 = vmatprep.subr.mxu1 %v13084_v61  ;;  %646 = vmatprep.mubr.f32.mxu0 %v20323_v55  ;;  %v20426_v61 = vmov 0.0  }
  0x74   : > { %723 = vmatprep.mubr.f32.mxu1 %v20323_v55  ;;  %790 = vmatpush1.msra.mxu0 %v13093_v63  ;;  %v13116_v55 = vld [vmem:[%s20310_s1 + $0x218] sm:$0xff] }
  0x75   : > { %871 = vmatpush1.msra.mxu1 %v13093_v63  ;;  %647 = vmatmul.mubr.f32.gmra.mxu0 %v421_v3  ;;  %20422 = vst [vmem:[#allocation41_spill] sm:$0xff] %v13116_v55  ;;  %v13123_v63 = vld [vmem:[%s20310_s1 + $0x210] sm:$0xff] }
  0x76   : > { %724 = vmatmul.mubr.f32.gmra.mxu1 %v12892_v1  ;;  %791 = vmatprep.subr.mxu0 %v13103_v5  ;;  %20423 = vst [vmem:[#allocation42_spill] sm:$0xff] %v13123_v63  ;;  %v13130_v1 = vld [vmem:[%s20310_s1 + $0x208] sm:$0xff] }
  0x77   : > { %872 = vmatprep.subr.mxu1 %v13103_v5  ;;  %792 = vmatpush1.msra.mxu0 %v13110_v9  ;;  %20424 = vst [vmem:[#allocation43_spill] sm:$0xff] %v13130_v1  ;;  %v13137_v5 = vld [vmem:[%s20310_s1 + $0x200] sm:$0xff] }
  0x78   : > { %873 = vmatpush1.msra.mxu1 %v13110_v9  ;;  %793 = vmatprep.subr.mxu0 %v13116_v55  ;;  %20425 = vst [vmem:[#allocation44_spill] sm:$0xff] %v13137_v5  ;;  %v9197_v9 = vld [vmem:[%s12812_s24 + $0x11] sm:$0xff] }
  0x79   : > { %874 = vmatprep.subr.mxu1 %v13116_v55  ;;  %794 = vmatpush1.msra.mxu0 %v13123_v63  ;;  %v949_v55 = vld [vmem:[%s20312_s3 + $0x60] sm:$0xff] }
  0x7a   : > { %875 = vmatpush1.msra.mxu1 %v13123_v63  ;;  %795 = vmatprep.subr.mxu0 %v13130_v1  ;;  %v9198_v63 = vld [vmem:[%s12812_s24 + $0x19] sm:$0x7f] }
  0x7b   : > { %876 = vmatprep.subr.mxu1 %v13130_v1  ;;  %796 = vmatpush1.msra.mxu0 %v13137_v5  ;;  %v952_v1 = vld [vmem:[%s20312_s3 + $0x78] sm:$0xff] }
  0x7c   : > { %829 = vmatprep.mubr.f32.mxu0 %v20426_v61  ;;  %877 = vmatpush1.msra.mxu1 %v13137_v5  ;;  %v951_v5 = vld [vmem:[%s20312_s3 + $0x70] sm:$0xff] }
  0x7d   : > { %910 = vmatprep.mubr.f32.mxu1 %v20426_v61  ;;  %830 = vmatmul.mubr.f32.vlgmr.msra.gmra.mxu0 %v12909_v11  ;;  %v9214_v11 = vld [vmem:[%s20312_s3 + $0xf8] sm:$0xff] }
  0x7e   : > { %911 = vmatmul.mubr.f32.vlgmr.msra.gmra.mxu1 %v9197_v9  ;;  %835 = vmatprep.mubr.f32.mxu0 %v20426_v61  ;;  %v9213_v9 = vld [vmem:[%s20312_s3 + $0xf0] sm:$0xff] }
  0x7f   : > { %916 = vmatprep.mubr.f32.mxu1 %v20426_v61  ;;  %10863 = vmatprep.subr.mxu1 %v952_v1 }
  0x80   : > { %10828 = vmatprep.subr.mxu0 %v9214_v11  ;;  %10864 = vmatpush3.msra.mxu1 %v952_v1  ;;  %v948_v1 = vld [vmem:[%s20312_s3 + $0x58] sm:$0xff] }
  0x81   : > { %836 = vmatmul.mubr.f32.gmra.mxu0 %v421_v3  ;;  %v9212_v3 = vld [vmem:[%s20312_s3 + $0xe8] sm:$0xff]  ;;  %10865 = vmatprep.subr.mxu1 %v951_v5 }
  0x82   : > { %917 = vmatmul.mubr.f32.gmra.mxu1 %v9198_v63  ;;  %v950_v63 = vld [vmem:[%s20312_s3 + $0x68] sm:$0xff]  ;;  %10829 = vmatpush3.msra.mxu0 %v9214_v11  ;;  %v947_v11 = vld [vmem:[%s20312_s3 + $0x50] sm:$0xff] }
  0x83   : > { %10830 = vmatprep.subr.mxu0 %v9213_v9  ;;  %10866 = vmatpush3.msra.mxu1 %v951_v5  ;;  %v9211_v5 = vld [vmem:[%s20312_s3 + $0xe0] sm:$0xff] }
  0x84   : > { %10831 = vmatpush3.msra.mxu0 %v9213_v9  ;;  %10867 = vmatprep.subr.mxu1 %v950_v63  ;;  %v9210_v9 = vld [vmem:[%s20312_s3 + $0xd8] sm:$0xff] }
  0x85   : > { %10832 = vmatprep.subr.mxu0 %v9212_v3  ;;  %10868 = vmatpush3.msra.mxu1 %v950_v63  ;;  %v9209_v63 = vld [vmem:[%s20312_s3 + $0xd0] sm:$0xff] }
  0x86   : > { %10833 = vmatpush3.msra.mxu0 %v9212_v3  ;;  %10869 = vmatprep.subr.mxu1 %v949_v55  ;;  %v945_v3 = vld [vmem:[%s20312_s3 + $0x40] sm:$0xff] }
  0x87   : > { %10870 = vmatpush3.msra.mxu1 %v949_v55  ;;  %10834 = vmatprep.subr.mxu0 %v9211_v5  ;;  %v946_v55 = vld [vmem:[%s20312_s3 + $0x48] sm:$0xff] }
  0x88   : > { %10871 = vmatprep.subr.mxu1 %v948_v1  ;;  %10835 = vmatpush3.msra.mxu0 %v9211_v5  ;;  %v944_v5 = vld [vmem:[%s20312_s3 + $0x38] sm:$0xff] }
  0x89   : > { %10872 = vmatpush3.msra.mxu1 %v948_v1  ;;  %10836 = vmatprep.subr.mxu0 %v9210_v9  ;;  %v9208_v1 = vld [vmem:[%s20312_s3 + $0xc8] sm:$0xff] }
  0x8a   : > { %10873 = vmatprep.subr.mxu1 %v947_v11  ;;  %10837 = vmatpush3.msra.mxu0 %v9210_v9  ;;  %v943_v9 = vld [vmem:[%s20312_s3 + $0x30] sm:$0xff] }
  0x8b   : > { %10874 = vmatpush3.msra.mxu1 %v947_v11  ;;  %10838 = vmatprep.subr.mxu0 %v9209_v63  ;;  %v9207_v11 = vld [vmem:[%s20312_s3 + $0xc0] sm:$0xff] }
  0x8c   : > { %10875 = vmatprep.subr.mxu1 %v946_v55  ;;  %10839 = vmatpush3.msra.mxu0 %v9209_v63  ;;  %v942_v63 = vld [vmem:[%s20312_s3 + $0x28] sm:$0xff] }
  0x8d   : > { %10876 = vmatpush3.msra.mxu1 %v946_v55  ;;  %10840 = vmatprep.subr.mxu0 %v9208_v1  ;;  %v9206_v55 = vld [vmem:[%s20312_s3 + $0xb8] sm:$0xff] }
  0x8e   : > { %10877 = vmatprep.subr.mxu1 %v945_v3  ;;  %10841 = vmatpush3.msra.mxu0 %v9208_v1  ;;  %v941_v1 = vld [vmem:[%s20312_s3 + $0x20] sm:$0xff] }
  0x8f   : > { %10878 = vmatpush3.msra.mxu1 %v945_v3  ;;  %10842 = vmatprep.subr.mxu0 %v9207_v11  ;;  %v9205_v3 = vld [vmem:[%s20312_s3 + $0xb0] sm:$0xff] }
  0x90   : > { %10879 = vmatprep.subr.mxu1 %v944_v5  ;;  %10843 = vmatpush3.msra.mxu0 %v9207_v11  ;;  %v940_v11 = vld [vmem:[%s20312_s3 + $0x18] sm:$0xff] }
  0x91   : > { %10880 = vmatpush3.msra.mxu1 %v944_v5  ;;  %10844 = vmatprep.subr.mxu0 %v9206_v55  ;;  %v9204_v5 = vld [vmem:[%s20312_s3 + $0xa8] sm:$0xff] }
  0x92   : > { %10881 = vmatprep.subr.mxu1 %v943_v9  ;;  %10845 = vmatpush3.msra.mxu0 %v9206_v55  ;;  %v939_v55 = vld [vmem:[%s20312_s3 + $0x10] sm:$0xff] }
  0x93   : > { %10882 = vmatpush3.msra.mxu1 %v943_v9  ;;  %10846 = vmatprep.subr.mxu0 %v9205_v3  ;;  %v9203_v9 = vld [vmem:[%s20312_s3 + $0xa0] sm:$0xff] }
  0x94   : > { %10883 = vmatprep.subr.mxu1 %v942_v63  ;;  %10847 = vmatpush3.msra.mxu0 %v9205_v3  ;;  %v938_v3 = vld [vmem:[%s20312_s3 + $0x8] sm:$0xff] }
  0x95   : > { %10884 = vmatpush3.msra.mxu1 %v942_v63  ;;  %10848 = vmatprep.subr.mxu0 %v9204_v5  ;;  %v9202_v63 = vld [vmem:[%s20312_s3 + $0x98] sm:$0xff] }
  0x96   : > { %10885 = vmatprep.subr.mxu1 %v941_v1  ;;  %10849 = vmatpush3.msra.mxu0 %v9204_v5  ;;  %v937_v5 = vld [vmem:[%s20312_s3] sm:$0xff] }
  0x97   : > { %10886 = vmatpush3.msra.mxu1 %v941_v1  ;;  %10850 = vmatprep.subr.mxu0 %v9203_v9  ;;  %v9201_v1 = vld [vmem:[%s20312_s3 + $0x90] sm:$0xff] }
  0x98   : > { %10887 = vmatprep.subr.mxu1 %v940_v11  ;;  %10851 = vmatpush3.msra.mxu0 %v9203_v9  ;;  %v9199_v9 = vld [vmem:[%s20312_s3 + $0x80] sm:$0xff] }
  0x99   : > { %10888 = vmatpush3.msra.mxu1 %v940_v11  ;;  %10852 = vmatprep.subr.mxu0 %v9202_v63  ;;  %v9200_v11 = vld [vmem:[%s20312_s3 + $0x88] sm:$0xff] }
  0x9a   : > { %10889 = vmatprep.subr.mxu1 %v939_v55  ;;  %10853 = vmatpush3.msra.mxu0 %v9202_v63 }
  0x9b   : > { %10890 = vmatpush3.msra.mxu1 %v939_v55  ;;  %10854 = vmatprep.subr.mxu0 %v9201_v1  ;;  %v13252_v55 = vld [vmem:[%s20312_s3 + $0x178] sm:$0xff] }
  0x9c   : > { %10891 = vmatprep.subr.mxu1 %v938_v3  ;;  %10855 = vmatpush3.msra.mxu0 %v9201_v1 }
  0x9d   : > { %10892 = vmatpush3.msra.mxu1 %v938_v3  ;;  %10856 = vmatprep.subr.mxu0 %v9200_v11 }
  0x9e   : > { %10893 = vmatprep.subr.mxu1 %v937_v5  ;;  %10857 = vmatpush3.msra.mxu0 %v9200_v11 }
  0x9f   : > { %10894 = vmatpush3.msra.mxu1 %v937_v5  ;;  %10858 = vmatprep.subr.mxu0 %v9199_v9 }
  0xa0   : > { %1306 = vmatprep.subr.mxu1 %v12432_v0  ;;  %10859 = vmatpush3.msra.mxu0 %v9199_v9 }
  0xa1   : > { %10898 = vmatprep.subr.mxu0 %v13252_v55 }
  0xf5   : > { %v488_v63 = vpop.f32.mrf.mxu0 }
  0xf6   : > { %v565_v3 = vpop.f32.mrf.mxu1 }
  0xf7   : > { %v490_v1 = vpop.f32.mrf.mxu0  ;;  %v566_v37 = vadd.f32 %v565_v3, %v488_v63  ;;  %v12206_v63 = vld [vmem:[%s20310_s1 + $0x1c0] sm:$0xff] }
  0xf8   : > { %v567_v5 = vpop.f32.mrf.mxu1  ;;  %v13422_v3 = vld [vmem:[%s20310_s1 + $0xc0] sm:$0xff] }
  0xf9   : > { %v568_v35 = vadd.f32 %v567_v5, %v490_v1  ;;  %v12207_v1 = vld [vmem:[%s20310_s1 + $0x1b8] sm:$0xff] }
  0xfa   : > { %v13431_v5 = vld [vmem:[%s20310_s1 + $0xb8] sm:$0xff] }
 0x112   : > { %v494_v59 = vpop.f32.mrf.mxu0 }
 0x113   : > { %v571_v0 = vpop.f32.mrf.mxu1 }
 0x114   : > { %v496_v11 = vpop.f32.mrf.mxu0  ;;  %v572_v17 = vadd.f32 %v571_v0, %v494_v59  ;;  %v12205_v59 = vld [vmem:[%s20310_s1 + $0x1c8] sm:$0xff]  ;;  %v12208_v0 = vld [vmem:[%s20310_s1 + $0x1b0] sm:$0xff] }
 0x115   : > { %v573_v57 = vpop.f32.mrf.mxu1 }
 0x116   : > { %v574_v15 = vadd.f32 %v573_v57, %v496_v11  ;;  %v13404_v57 = vld [vmem:[%s20310_s1 + $0xd0] sm:$0xff] }
 0x117   : > { %v13440_v11 = vld [vmem:[%s20310_s1 + $0xb0] sm:$0xff] }
 0x119   : > { %v642_v56 = vpop.f32.mrf.mxu0 }
 0x11a   : > { %v719_v53 = vpop.f32.mrf.mxu1 }
 0x11b   : > { %v644_v51 = vpop.f32.mrf.mxu0  ;;  %v720_v33 = vadd.f32 %v719_v53, %v642_v56  ;;  %v13395_v53 = vld [vmem:[%s20310_s1 + $0xd8] sm:$0xff]  ;;  %v12204_v56 = vld [vmem:[%s20310_s1 + $0x1d0] sm:$0xff] }
 0x11c   : > { %v721_v49 = vpop.f32.mrf.mxu1 }
 0x11d   : > { %v722_v31 = vadd.f32 %v721_v49, %v644_v51  ;;  %v13258_v49 = vld [vmem:[%s20311_s2] ss:$0 sm:$0xff] }
 0x135   : > { %v648_v9 = vpop.f32.mrf.mxu0 }
 0x136   : > { %v725_v47 = vpop.f32.mrf.mxu1 }
 0x137   : > { %v650_v45 = vpop.f32.mrf.mxu0  ;;  %v726_v60 = vadd.f32 %v725_v47, %v648_v9  ;;  %v12203_v47 = vld [vmem:[%s20310_s1 + $0x1d8] sm:$0xff]  ;;  %v12209_v9 = vld [vmem:[%s20310_s1 + $0x1a8] sm:$0xff] }
 0x138   : > { %v727_v43 = vpop.f32.mrf.mxu1 }
 0x139   : > { %v728_v58 = vadd.f32 %v727_v43, %v650_v45  ;;  %v13386_v45 = vld [vmem:[%s20310_s1 + $0xe0] sm:$0xff] }
 0x13d   : > { %v831_v41 = vpop.f32.mrf.mxu0 }
 0x13e   : > { %v912_v39 = vpop.f32.mrf.mxu1  ;;  %v842_v25 = vadd.f32 %v831_v41, %v566_v37 }
 0x13f   : > { %v833_v29 = vpop.f32.mrf.mxu0  ;;  %v923_v23 = vadd.f32 %v912_v39, %v720_v33 }
 0x140   : > { %v914_v27 = vpop.f32.mrf.mxu1  ;;  %v843_v21 = vadd.f32 %v833_v29, %v568_v35 }
 0x141   : > { %v924_v19 = vadd.f32 %v914_v27, %v722_v31  ;;  %v837_v13 = vpop.f32.mrf.mxu0 }
 0x142   : > { %v918_v62 = vpop.f32.mrf.mxu1  ;;  %v927_v7 = vmax.f32 %v842_v25, %v843_v21  ;;  %v844_v52 = vadd.f32 %v837_v13, %v572_v17  ;;  %v12201_v21 = vld [vmem:[%s20310_s1 + $0x1e8] sm:$0xff]  ;;  %v12202_v25 = vld [vmem:[%s20310_s1 + $0x1e0] sm:$0xff] }
 0x143   : > { %v929_v54 = vmax.f32 %v923_v23, %v924_v19  ;;  %v839_v50 = vpop.f32.mrf.mxu0  ;;  %v925_v33 = vadd.f32 %v918_v62, %v726_v60  ;;  %v13359_v62 = vld [vmem:[%s20310_s1 + $0xf8] sm:$0xff]  ;;  %v13377_v23 = vld [vmem:[%s20310_s1 + $0xe8] sm:$0xff] }
 0x144   : > { %v920_v51 = vpop.f32.mrf.mxu1  ;;  %v845_v29 = vadd.f32 %v839_v50, %v574_v15  ;;  %v13367_v15 = vld [vmem:[%s20310_s1 + $0xf0] sm:$0xff] }
 0x145   : > { %v931_v37 = vmax.f32 %v927_v7, %v929_v54  ;;  %v926_v27 = vadd.f32 %v920_v51, %v728_v58  ;;  %v9229_v58 = vld [vmem:[%s20312_s3 + $0x170] sm:$0xff]  ;;  %v13449_v51 = vld [vmem:[%s20310_s1 + $0xa8] sm:$0xff] }
 0x146   : > { %v928_v31 = vmax.f32 %v844_v52, %v845_v29  ;;  %v12200_v7 = vld [vmem:[%s20310_s1 + $0x1f0] sm:$0xff]  ;;  %v12211_v29 = vld [vmem:[%s20310_s1 + $0x198] sm:$0xff] }
 0x147   : > { %v930_v35 = vmax.f32 %v925_v33, %v926_v27  ;;  %v933_v39 = vadd.f32 %v13258_v49, %v931_v37  ;;  %v12210_v37 = vld [vmem:[%s20310_s1 + $0x1a0] sm:$0xff]  ;;  %v13467_v27 = vld [vmem:[%s20310_s1 + $0x98] sm:$0xff] }
 0x148   : > { %v13458_v33 = vld [vmem:[%s20310_s1 + $0xa0] sm:$0xff] }
 0x149   : > { %v932_v41 = vmax.f32 %v928_v31, %v930_v35  ;;  %v935_v43 = vmax.f32 %v933_v39, 0.0  ;;  %v12212_v31 = vld [vmem:[%s20310_s1 + $0x190] sm:$0xff]  ;;  %v12213_v39 = vld [vmem:[%s20310_s1 + $0x188] sm:$0xff] }
 0x14a   : > { %v13476_v35 = vld [vmem:[%s20310_s1 + $0x90] sm:$0xff] }
 0x14b   : > { %v934_v19 = vadd.f32 %v13258_v49, %v932_v41  ;;  %10895 = vmatprep.mubr.f32.mxu1 %v935_v43  ;;  %v973_v17 = vrot.slane %v935_v43, 1  ;;  %v1146_v60 = vrot.slane %v935_v43, 2  ;;  %v13485_v41 = vld [vmem:[%s20310_s1 + $0x88] sm:$0xff]  ;;  %v12214_v43 = vld [vmem:[%s20310_s1 + $0x180] sm:$0xff] }
 0x14d   : > { %v13262_v13 = vmax.f32 %v934_v19, 0.0  ;;  %v13494_v19 = vld [vmem:[%s20310_s1 + $0x80] sm:$0xff] }
 0x14f   : > { %10896 = vmatmul.mubr.f32.vlgmr.msra.gmra.mxu1 %v13262_v13  ;;  %v974_v54 = vrot.slane %v13262_v13, 1  ;;  %v1147_v50 = vrot.slane %v13262_v13, 2  ;;  %v12215_v13 = vld [vmem:[%s20310_s1 + $0x178] sm:$0xff] }
 0x150   : > { %1307 = vmatpush1.msra.mxu1 %v12442_v2  ;;  %1370 = vmatprep.mubr.f32.mxu1 %v20426_v61 }
 0x151   : > { %1308 = vmatprep.subr.mxu1 %v12454_v4  ;;  %v975_v52 = vsel %vm972_vm0, %v973_v17, %v974_v54  ;;  %v1148_v2 = vsel %vm1145_vm1, %v1146_v60, %v1147_v50  ;;  %v9228_v4 = vld [vmem:[%s20312_s3 + $0x168] sm:$0xff]  ;;  %v13503_v17 = vld [vmem:[%s20310_s1 + $0x78] sm:$0xff]  ;;  %v12218_v60 = vld [vmem:[%s20310_s1 + $0x160] sm:$0xff] }
 0x152   : > { %1309 = vmatpush1.msra.mxu1 %v12466_v6  ;;  %10860 = vmatprep.mubr.f32.mxu0 %v975_v52  ;;  %v9227_v6 = vld [vmem:[%s20312_s3 + $0x160] sm:$0xff]  ;;  %v12217_v52 = vld [vmem:[%s20310_s1 + $0x168] sm:$0xff] }
 0x153   : > { %1310 = vmatprep.subr.mxu1 %v12476_v8  ;;  %10861 = vmatmul.mubr.f32.vlgmr.msra.gmra.mxu0 %v974_v54  ;;  %v9226_v8 = vld [vmem:[%s20312_s3 + $0x158] sm:$0xff]  ;;  %v12216_v54 = vld [vmem:[%s20310_s1 + $0x170] sm:$0xff] }
 0x154   : > { %10899 = vmatpush3.msra.mxu0 %v13252_v55  ;;  %1311 = vmatpush1.msra.mxu1 %v12488_v10  ;;  %v9225_v10 = vld [vmem:[%s20312_s3 + $0x150] sm:$0xff]  ;;  %v13413_v55 = vld [vmem:[%s20310_s1 + $0xc8] sm:$0xff] }
 0x155   : > { %10900 = vmatprep.subr.mxu0 %v9229_v58  ;;  %10930 = vmatprep.mubr.f32.mxu0 %v1148_v2  ;;  %v13530_v2 = vld [vmem:[%s20310_s1 + $0x60] sm:$0xff] }
 0x156   : > { %1312 = vmatprep.subr.mxu1 %v12500_v12  ;;  %10901 = vmatpush3.msra.mxu0 %v9229_v58  ;;  %v9224_v12 = vld [vmem:[%s20312_s3 + $0x148] sm:$0xff] }
 0x157   : > { %1313 = vmatpush1.msra.mxu1 %v12512_v14  ;;  %10902 = vmatprep.subr.mxu0 %v9228_v4  ;;  %v9223_v14 = vld [vmem:[%s20312_s3 + $0x140] sm:$0xff]  ;;  %v13521_v58 = vld [vmem:[%s20310_s1 + $0x68] sm:$0xff] }
 0x158   : > { %1314 = vmatprep.subr.mxu1 %v12524_v16  ;;  %10903 = vmatpush3.msra.mxu0 %v9228_v4  ;;  %v9222_v16 = vld [vmem:[%s20312_s3 + $0x138] sm:$0xff] }
 0x159   : > { %1315 = vmatpush1.msra.mxu1 %v12536_v18  ;;  %10904 = vmatprep.subr.mxu0 %v9227_v6  ;;  %v9221_v18 = vld [vmem:[%s20312_s3 + $0x130] sm:$0xff]  ;;  %v12219_v4 = vld [vmem:[%s20310_s1 + $0x158] sm:$0xff] }
 0x15a   : > { %1316 = vmatprep.subr.mxu1 %v12548_v20  ;;  %10905 = vmatpush3.msra.mxu0 %v9227_v6  ;;  %v9220_v20 = vld [vmem:[%s20312_s3 + $0x128] sm:$0xff]  ;;  %v13539_v6 = vld [vmem:[%s20310_s1 + $0x58] sm:$0xff] }
 0x15b   : > { %1317 = vmatpush1.msra.mxu1 %v12560_v22  ;;  %10906 = vmatprep.subr.mxu0 %v9226_v8  ;;  %v9219_v22 = vld [vmem:[%s20312_s3 + $0x120] sm:$0xff] }
 0x15c   : > { %1318 = vmatprep.subr.mxu1 %v12572_v24  ;;  %10907 = vmatpush3.msra.mxu0 %v9226_v8  ;;  %v9218_v24 = vld [vmem:[%s20312_s3 + $0x118] sm:$0xff]  ;;  %v12220_v8 = vld [vmem:[%s20310_s1 + $0x150] sm:$0xff] }
 0x15d   : > { %1319 = vmatpush1.msra.mxu1 %v12584_v26  ;;  %10908 = vmatprep.subr.mxu0 %v9225_v10  ;;  %v20427_v26 = vld [vmem:[#allocation6_spill] sm:$0xff] }
 0x15e   : > { %1320 = vmatprep.subr.mxu1 %v12596_v28  ;;  %10909 = vmatpush3.msra.mxu0 %v9225_v10  ;;  %v20428_v28 = vld [vmem:[#allocation7_spill] sm:$0xff]  ;;  %v13548_v10 = vld [vmem:[%s20310_s1 + $0x50] sm:$0xff] }
 0x15f   : > { %1321 = vmatpush1.msra.mxu1 %v12608_v30  ;;  %10910 = vmatprep.subr.mxu0 %v9224_v12  ;;  %v9217_v30 = vld [vmem:[%s20312_s3 + $0x110] sm:$0xff] }
 0x160   : > { %1322 = vmatprep.subr.mxu1 %v12620_v32  ;;  %10911 = vmatpush3.msra.mxu0 %v9224_v12  ;;  %v20429_v32 = vld [vmem:[#allocation8_spill] sm:$0xff]  ;;  %v12221_v12 = vld [vmem:[%s20310_s1 + $0x148] sm:$0xff] }
 0x161   : > { %1323 = vmatpush1.msra.mxu1 %v12633_v34  ;;  %10912 = vmatprep.subr.mxu0 %v9223_v14  ;;  %v20430_v34 = vld [vmem:[#allocation10_spill] sm:$0xff] }
 0x162   : > { %1324 = vmatprep.subr.mxu1 %v12645_v36  ;;  %10913 = vmatpush3.msra.mxu0 %v9223_v14  ;;  %v9216_v36 = vld [vmem:[%s20312_s3 + $0x108] sm:$0xff] }
 0x163   : > { %1325 = vmatpush1.msra.mxu1 %v12657_v38  ;;  %10914 = vmatprep.subr.mxu0 %v9222_v16  ;;  %v20431_v38 = vld [vmem:[#allocation12_spill] sm:$0xff]  ;;  %v13557_v14 = vld [vmem:[%s20310_s1 + $0x48] sm:$0xff] }
 0x164   : > { %1326 = vmatprep.subr.mxu1 %v12675_v40  ;;  %10915 = vmatpush3.msra.mxu0 %v9222_v16  ;;  %v20432_v40 = vld [vmem:[#allocation13_spill] sm:$0xff]  ;;  %v12222_v16 = vld [vmem:[%s20310_s1 + $0x140] sm:$0xff] }
 0x165   : > { %1327 = vmatpush1.msra.mxu1 %v12687_v42  ;;  %10916 = vmatprep.subr.mxu0 %v9221_v18  ;;  %v13346_v42 = vld [vmem:[%s12812_s24 + $0x30] sm:$0xff] }
 0x166   : > { %1328 = vmatprep.subr.mxu1 %v12699_v44  ;;  %10917 = vmatpush3.msra.mxu0 %v9221_v18  ;;  %v9215_v44 = vld [vmem:[%s20312_s3 + $0x100] sm:$0xff] }
 0x167   : > { %1329 = vmatpush1.msra.mxu1 %v12711_v46  ;;  %10918 = vmatprep.subr.mxu0 %v9220_v20  ;;  %v20433_v46 = vld [vmem:[#allocation14_spill] sm:$0xff]  ;;  %v13566_v18 = vld [vmem:[%s20310_s1 + $0x40] sm:$0xff] }
 0x168   : > { %1330 = vmatprep.subr.mxu1 %v12729_v48  ;;  %10919 = vmatpush3.msra.mxu0 %v9220_v20  ;;  %v12199_v48 = vld [vmem:[%s20310_s1 + $0x1f8] sm:$0xff] }
 0x169   : > { %1331 = vmatpush1.msra.mxu1 %v20427_v26  ;;  %10920 = vmatprep.subr.mxu0 %v9219_v22  ;;  %v12223_v20 = vld [vmem:[%s20310_s1 + $0x138] sm:$0xff]  ;;  %v12225_v26 = vld [vmem:[%s20310_s1 + $0x128] sm:$0xff] }
 0x16a   : > { %1332 = vmatprep.subr.mxu1 %v20428_v28  ;;  %10921 = vmatpush3.msra.mxu0 %v9219_v22  ;;  %v12224_v22 = vld [vmem:[%s20310_s1 + $0x130] sm:$0xff]  ;;  %v13586_v28 = vld [vmem:[%s12812_s24 + $0x38] sm:$0x7f] }
 0x16b   : > { %1333 = vmatpush1.msra.mxu1 %v20429_v32  ;;  %10922 = vmatprep.subr.mxu0 %v9218_v24  ;;  %v12226_v32 = vld [vmem:[%s20310_s1 + $0x120] sm:$0xff] }
 0x16c   : > { %1334 = vmatprep.subr.mxu1 %v20430_v34  ;;  %10923 = vmatpush3.msra.mxu0 %v9218_v24  ;;  %v13579_v24 = vld [vmem:[%s20310_s1 + $0x38] sm:$0xff]  ;;  %v13600_v34 = vld [vmem:[%s20310_s1 + $0x28] sm:$0xff] }
 0x16d   : > { %1335 = vmatpush1.msra.mxu1 %v20431_v38  ;;  %10924 = vmatprep.subr.mxu0 %v9217_v30  ;;  %v13609_v38 = vld [vmem:[%s20310_s1 + $0x20] sm:$0xff] }
 0x16e   : > { %1336 = vmatprep.subr.mxu1 %v20432_v40  ;;  %10925 = vmatpush3.msra.mxu0 %v9217_v30  ;;  %v13591_v30 = vld [vmem:[%s20310_s1 + $0x30] sm:$0xff]  ;;  %v13616_v40 = vld [vmem:[%s20310_s1 + $0x18] sm:$0xff] }
 0x16f   : > { %1337 = vmatpush1.msra.mxu1 %v20433_v46  ;;  %10926 = vmatprep.subr.mxu0 %v9216_v36  ;;  %v12229_v46 = vld [vmem:[%s20310_s1 + $0x108] sm:$0xff] }
 0x170   : > { %1460 = vmatprep.subr.mxu1 %v12199_v48  ;;  %10927 = vmatpush3.msra.mxu0 %v9216_v36  ;;  %v12227_v36 = vld [vmem:[%s20310_s1 + $0x118] sm:$0xff]  ;;  %v13629_v48 = vld [vmem:[%s20310_s1 + $0x10] sm:$0xff] }
 0x171   : > { %1371 = vmatmul.mubr.f32.vlgmr.msra.gmra.mxu1 %v13346_v42  ;;  %10928 = vmatprep.subr.mxu0 %v9215_v44 }
 0x172   : > { %1461 = vmatpush1.msra.mxu1 %v12200_v7  ;;  %10929 = vmatpush3.msra.mxu0 %v9215_v44  ;;  %v12228_v44 = vld [vmem:[%s20310_s1 + $0x110] sm:$0xff]  ;;  %v13632_v7 = vld [vmem:[%s12812_s24 + $0x21] sm:$0xff] }
 0x173   : > { %1462 = vmatprep.subr.mxu1 %v12201_v21  ;;  %10931 = vmatmul.mubr.f32.vlgmr.msra.gmra.mxu0 %v1147_v50  ;;  %v13512_v50 = vld [vmem:[%s20310_s1 + $0x70] sm:$0xff]  ;;  %v12230_v21 = vld [vmem:[%s20310_s1 + $0x100] sm:$0xff] }
 0x174   : > { %1463 = vmatpush1.msra.mxu1 %v12202_v25  ;;  %1383 = vmatprep.subr.mxu0 %v13359_v62  ;;  %v13641_v25 = vld [vmem:[%s20310_s1 + $0x8] sm:$0xff] }
 0x175   : > { %1464 = vmatprep.subr.mxu1 %v12203_v47  ;;  %1384 = vmatpush1.msra.mxu0 %v13367_v15  ;;  %v20434_v47 = vld [vmem:[#allocation9_spill] sm:$0xff] }
 0x176   : > { %1465 = vmatpush1.msra.mxu1 %v12204_v56  ;;  %1385 = vmatprep.subr.mxu0 %v13377_v23  ;;  %v13648_v56 = vld [vmem:[%s20310_s1] sm:$0xff] }
 0x177   : > { %1466 = vmatprep.subr.mxu1 %v12205_v59  ;;  %1386 = vmatpush1.msra.mxu0 %v13386_v45  ;;  %v20435_v59 = vld [vmem:[#allocation11_spill] sm:$0xff] }
 0x178   : > { %1467 = vmatpush1.msra.mxu1 %v12206_v63  ;;  %1387 = vmatprep.subr.mxu0 %v13395_v53  ;;  %v9231_v63 = vld [vmem:[%s12812_s24 + $0x20] sm:$0xff] }
 0x179   : > { %1468 = vmatprep.subr.mxu1 %v12207_v1  ;;  %1388 = vmatpush1.msra.mxu0 %v13404_v57  ;;  %v20436_v1 = vld [vmem:[#allocation15_spill] sm:$0xff] }
 0x17a   : > { %1469 = vmatpush1.msra.mxu1 %v12208_v0  ;;  %1389 = vmatprep.subr.mxu0 %v13413_v55  ;;  %v20437_v0 = vld [vmem:[#allocation16_spill] sm:$0xff] }
 0x17b   : > { %1470 = vmatprep.subr.mxu1 %v12209_v9  ;;  %1390 = vmatpush1.msra.mxu0 %v13422_v3  ;;  %v20438_v9 = vld [vmem:[#allocation17_spill] sm:$0xff] }
 0x17c   : > { %1471 = vmatpush1.msra.mxu1 %v12210_v37  ;;  %1391 = vmatprep.subr.mxu0 %v13431_v5  ;;  %v20439_v37 = vld [vmem:[#allocation18_spill] sm:$0xff] }
 0x17d   : > { %1472 = vmatprep.subr.mxu1 %v12211_v29  ;;  %1392 = vmatpush1.msra.mxu0 %v13440_v11  ;;  %v20440_v29 = vld [vmem:[#allocation19_spill] sm:$0xff] }
 0x17e   : > { %1473 = vmatpush1.msra.mxu1 %v12212_v31  ;;  %1393 = vmatprep.subr.mxu0 %v13449_v51  ;;  %v20441_v31 = vld [vmem:[#allocation20_spill] sm:$0xff] }
 0x17f   : > { %1474 = vmatprep.subr.mxu1 %v12213_v39  ;;  %1394 = vmatpush1.msra.mxu0 %v13458_v33  ;;  %v20442_v39 = vld [vmem:[#allocation21_spill] sm:$0xff] }
 0x180   : > { %1475 = vmatpush1.msra.mxu1 %v12214_v43  ;;  %1395 = vmatprep.subr.mxu0 %v13467_v27  ;;  %v20458_v43 = vld [vmem:[#allocation37_spill] sm:$0xff] }
 0x181   : > { %1476 = vmatprep.subr.mxu1 %v12215_v13  ;;  %1396 = vmatpush1.msra.mxu0 %v13476_v35  ;;  %v9268_v13 = vld [vmem:[%s12812_s24 + $0x29] sm:$0x7f] }
 0x182   : > { %1477 = vmatpush1.msra.mxu1 %v12216_v54  ;;  %1397 = vmatprep.subr.mxu0 %v13485_v41  ;;  %v20461_v54 = vld [vmem:[#allocation40_spill] sm:$0xff] }
 0x183   : > { %1478 = vmatprep.subr.mxu1 %v12217_v52  ;;  %1398 = vmatpush1.msra.mxu0 %v13494_v19  ;;  %v9232_v52 = vld [vmem:[%s12812_s24 + $0x28] sm:$0x7f] }
 0x184   : > { %1479 = vmatpush1.msra.mxu1 %v12218_v60  ;;  %1399 = vmatprep.subr.mxu0 %v13503_v17  ;;  %v20464_v60 = vld [vmem:[#allocation43_spill] sm:$0xff] }
 0x185   : > { %1480 = vmatprep.subr.mxu1 %v12219_v4  ;;  %1400 = vmatpush1.msra.mxu0 %v13512_v50  ;;  %v12231_v4 = vld [vmem:[%s20310_s1 + $0x2f8] sm:$0xff] }
 0x186   : > { %1481 = vmatpush1.msra.mxu1 %v12220_v8  ;;  %1401 = vmatprep.subr.mxu0 %v13521_v58  ;;  %v12233_v8 = vld [vmem:[%s20310_s1 + $0x2e8] sm:$0xff] }
 0x187   : > { %1482 = vmatprep.subr.mxu1 %v12221_v12  ;;  %1402 = vmatpush1.msra.mxu0 %v13530_v2  ;;  %v12236_v12 = vld [vmem:[%s20310_s1 + $0x2d0] sm:$0xff] }
 0x188   : > { %1483 = vmatpush1.msra.mxu1 %v12222_v16  ;;  %1403 = vmatprep.subr.mxu0 %v13539_v6  ;;  %v12238_v16 = vld [vmem:[%s20310_s1 + $0x2c0] sm:$0xff] }
 0x189   : > { %1484 = vmatprep.subr.mxu1 %v12223_v20  ;;  %1404 = vmatpush1.msra.mxu0 %v13548_v10  ;;  %v12240_v20 = vld [vmem:[%s20310_s1 + $0x2b0] sm:$0xff] }
 0x18a   : > { %1485 = vmatpush1.msra.mxu1 %v12224_v22  ;;  %1405 = vmatprep.subr.mxu0 %v13557_v14  ;;  %v12241_v22 = vld [vmem:[%s20310_s1 + $0x2a8] sm:$0xff] }
 0x18b   : > { %1486 = vmatprep.subr.mxu1 %v12225_v26  ;;  %1406 = vmatpush1.msra.mxu0 %v13566_v18  ;;  %v12243_v26 = vld [vmem:[%s20310_s1 + $0x298] sm:$0xff] }
 0x18c   : > { %1487 = vmatpush1.msra.mxu1 %v12226_v32  ;;  %1376 = vmatprep.mubr.f32.mxu1 %v20426_v61  ;;  %v12246_v32 = vld [vmem:[%s20310_s1 + $0x280] sm:$0xff] }
 0x18d   : > { %1407 = vmatprep.subr.mxu0 %v13579_v24  ;;  %1488 = vmatprep.subr.mxu1 %v12227_v36  ;;  %v9302_v36 = vld [vmem:[%s12812_s24 + $0x39] sm:$0x7f] }
 0x18e   : > { %1377 = vmatmul.mubr.f32.gmra.mxu1 %v13586_v28  ;;  %1408 = vmatpush1.msra.mxu0 %v13591_v30 }
 0x18f   : > { %1489 = vmatpush1.msra.mxu1 %v12228_v44  ;;  %1409 = vmatprep.subr.mxu0 %v13600_v34  ;;  %v9318_v44 = vld [vmem:[%s20312_s3 + $0xf8] sm:$0xff] }
 0x190   : > { %1490 = vmatprep.subr.mxu1 %v12229_v46  ;;  %1410 = vmatpush1.msra.mxu0 %v13609_v38  ;;  %v9317_v46 = vld [vmem:[%s20312_s3 + $0xf0] sm:$0xff] }
 0x191   : > { %1491 = vmatpush1.msra.mxu1 %v12230_v21  ;;  %1411 = vmatprep.subr.mxu0 %v13616_v40  ;;  %v1832_v21 = vld [vmem:[%s20312_s3 + $0x60] sm:$0xff] }
 0x192   : > { %1524 = vmatprep.mubr.f32.mxu1 %v20426_v61  ;;  %1648 = vmatprep.subr.mxu1 %v20434_v47  ;;  %v1831_v47 = vld [vmem:[%s20312_s3 + $0x58] sm:$0xff] }
 0x193   : > { %1412 = vmatpush1.msra.mxu0 %v13629_v48  ;;  %1525 = vmatmul.mubr.f32.vlgmr.msra.gmra.mxu1 %v13632_v7 }
 0x194   : > { %1649 = vmatpush1.msra.mxu1 %v20435_v59  ;;  %1413 = vmatprep.subr.mxu0 %v13641_v25  ;;  %v1830_v59 = vld [vmem:[%s20312_s3 + $0x50] sm:$0xff] }
 0x195   : > { %1650 = vmatprep.subr.mxu1 %v20436_v1  ;;  %1414 = vmatpush1.msra.mxu0 %v13648_v56  ;;  %v1829_v1 = vld [vmem:[%s20312_s3 + $0x48] sm:$0xff] }
 0x196   : > { %1447 = vmatprep.mubr.f32.mxu0 %v20426_v61  ;;  %1651 = vmatpush1.msra.mxu1 %v20437_v0  ;;  %v1828_v0 = vld [vmem:[%s20312_s3 + $0x40] sm:$0xff] }
 0x197   : > { %1448 = vmatmul.mubr.f32.vlgmr.msra.gmra.mxu0 %v9231_v63  ;;  %1537 = vmatprep.subr.mxu0 %v13359_v62  ;;  %v20443_v62 = vld [vmem:[#allocation22_spill] sm:$0xff] }
 0x198   : > { %1652 = vmatprep.subr.mxu1 %v20438_v9  ;;  %1538 = vmatpush1.msra.mxu0 %v13367_v15  ;;  %v20444_v15 = vld [vmem:[#allocation23_spill] sm:$0xff]  ;;  %v9313_v63 = vld [vmem:[%s20312_s3 + $0xd0] sm:$0xff]  ;;  %v9312_v9 = vld [vmem:[%s20312_s3 + $0xc8] sm:$0xff] }
 0x199   : > { %1653 = vmatpush1.msra.mxu1 %v20439_v37  ;;  %1539 = vmatprep.subr.mxu0 %v13377_v23  ;;  %v20445_v23 = vld [vmem:[#allocation24_spill] sm:$0xff]  ;;  %v1827_v37 = vld [vmem:[%s20312_s3 + $0x38] sm:$0xff] }
 0x19a   : > { %1654 = vmatprep.subr.mxu1 %v20440_v29  ;;  %1540 = vmatpush1.msra.mxu0 %v13386_v45  ;;  %v20446_v45 = vld [vmem:[#allocation25_spill] sm:$0xff]  ;;  %v9311_v29 = vld [vmem:[%s20312_s3 + $0xc0] sm:$0xff] }
 0x19b   : > { %1655 = vmatpush1.msra.mxu1 %v20441_v31  ;;  %1541 = vmatprep.subr.mxu0 %v13395_v53  ;;  %v20447_v53 = vld [vmem:[#allocation26_spill] sm:$0xff] }
 0x19c   : > { %1656 = vmatprep.subr.mxu1 %v20442_v39  ;;  %1542 = vmatpush1.msra.mxu0 %v13404_v57  ;;  %v20448_v57 = vld [vmem:[#allocation27_spill] sm:$0xff]  ;;  %v1826_v31 = vld [vmem:[%s20312_s3 + $0x30] sm:$0xff] }
 0x19d   : > { %1657 = vmatpush1.msra.mxu1 %v20443_v62  ;;  %1543 = vmatprep.subr.mxu0 %v13413_v55  ;;  %v20449_v55 = vld [vmem:[#allocation28_spill] sm:$0xff]  ;;  %v9310_v39 = vld [vmem:[%s20312_s3 + $0xb8] sm:$0xff]  ;;  %v1825_v62 = vld [vmem:[%s20312_s3 + $0x28] sm:$0xff] }
 0x19e   : > { %1658 = vmatprep.subr.mxu1 %v20444_v15  ;;  %1544 = vmatpush1.msra.mxu0 %v13422_v3  ;;  %v20450_v3 = vld [vmem:[#allocation29_spill] sm:$0xff]  ;;  %v9309_v15 = vld [vmem:[%s20312_s3 + $0xb0] sm:$0xff] }
 0x19f   : > { %1659 = vmatpush1.msra.mxu1 %v20445_v23  ;;  %1545 = vmatprep.subr.mxu0 %v13431_v5  ;;  %v20451_v5 = vld [vmem:[#allocation30_spill] sm:$0xff]  ;;  %v1824_v23 = vld [vmem:[%s20312_s3 + $0x20] sm:$0xff] }
 0x1a0   : > { %1660 = vmatprep.subr.mxu1 %v20446_v45  ;;  %1546 = vmatpush1.msra.mxu0 %v13440_v11  ;;  %v20452_v11 = vld [vmem:[#allocation31_spill] sm:$0xff]  ;;  %v9308_v45 = vld [vmem:[%s20312_s3 + $0xa8] sm:$0xff] }
 0x1a1   : > { %1661 = vmatpush1.msra.mxu1 %v20447_v53  ;;  %1547 = vmatprep.subr.mxu0 %v13449_v51  ;;  %v20453_v51 = vld [vmem:[#allocation32_spill] sm:$0xff]  ;;  %v1823_v53 = vld [vmem:[%s20312_s3 + $0x18] sm:$0xff] }
 0x1a2   : > { %1662 = vmatprep.subr.mxu1 %v20448_v57  ;;  %1548 = vmatpush1.msra.mxu0 %v13458_v33  ;;  %v20454_v33 = vld [vmem:[#allocation33_spill] sm:$0xff]  ;;  %v9307_v57 = vld [vmem:[%s20312_s3 + $0xa0] sm:$0xff] }
 0x1a3   : > { %1663 = vmatpush1.msra.mxu1 %v20449_v55  ;;  %1549 = vmatprep.subr.mxu0 %v13467_v27  ;;  %v20455_v27 = vld [vmem:[#allocation34_spill] sm:$0xff] }
 0x1a4   : > { %1664 = vmatprep.subr.mxu1 %v20450_v3  ;;  %1550 = vmatpush1.msra.mxu0 %v13476_v35  ;;  %v20456_v35 = vld [vmem:[#allocation35_spill] sm:$0xff]  ;;  %v1822_v55 = vld [vmem:[%s20312_s3 + $0x10] sm:$0xff] }
 0x1a5   : > { %1665 = vmatpush1.msra.mxu1 %v20451_v5  ;;  %1551 = vmatprep.subr.mxu0 %v13485_v41  ;;  %v20457_v41 = vld [vmem:[#allocation36_spill] sm:$0xff] }
 0x1a6   : > { %1666 = vmatprep.subr.mxu1 %v20452_v11  ;;  %1552 = vmatpush1.msra.mxu0 %v13494_v19  ;;  %v20459_v19 = vld [vmem:[#allocation38_spill] sm:$0xff] }
 0x1a7   : > { %1667 = vmatpush1.msra.mxu1 %v20453_v51  ;;  %1553 = vmatprep.subr.mxu0 %v13503_v17  ;;  %v20460_v17 = vld [vmem:[#allocation39_spill] sm:$0xff] }
 0x1a8   : > { %1668 = vmatprep.subr.mxu1 %v20454_v33  ;;  %1554 = vmatpush1.msra.mxu0 %v13512_v50  ;;  %v20462_v50 = vld [vmem:[#allocation41_spill] sm:$0xff] }
 0x1a9   : > { %1669 = vmatpush1.msra.mxu1 %v20455_v27  ;;  %1555 = vmatprep.subr.mxu0 %v13521_v58  ;;  %v20463_v58 = vld [vmem:[#allocation42_spill] sm:$0xff] }
 0x1aa   : > { %1670 = vmatprep.subr.mxu1 %v20456_v35  ;;  %1556 = vmatpush1.msra.mxu0 %v13530_v2  ;;  %v20465_v2 = vld [vmem:[#allocation44_spill] sm:$0xff] }
 0x1ab   : > { %1671 = vmatpush1.msra.mxu1 %v20457_v41  ;;  %1557 = vmatprep.subr.mxu0 %v13539_v6  ;;  %v12232_v6 = vld [vmem:[%s20310_s1 + $0x2f0] sm:$0xff] }
 0x1ac   : > { %1672 = vmatprep.subr.mxu1 %v20458_v43  ;;  %1558 = vmatpush1.msra.mxu0 %v13548_v10  ;;  %v12235_v10 = vld [vmem:[%s20310_s1 + $0x2d8] sm:$0xff] }
 0x1ad   : > { %1673 = vmatpush1.msra.mxu1 %v20459_v19  ;;  %1559 = vmatprep.subr.mxu0 %v13557_v14  ;;  %v12237_v14 = vld [vmem:[%s20310_s1 + $0x2c8] sm:$0xff] }
 0x1ae   : > { %1674 = vmatprep.subr.mxu1 %v20460_v17  ;;  %1530 = vmatprep.mubr.f32.mxu1 %v20426_v61 }
 0x1af   : > { %1560 = vmatpush1.msra.mxu0 %v13566_v18  ;;  %1675 = vmatpush1.msra.mxu1 %v20461_v54  ;;  %v12239_v18 = vld [vmem:[%s20310_s1 + $0x2b8] sm:$0xff] }
 0x1b0   : > { %1531 = vmatmul.mubr.f32.gmra.mxu1 %v9268_v13  ;;  %1561 = vmatprep.subr.mxu0 %v13579_v24  ;;  %v12242_v24 = vld [vmem:[%s20310_s1 + $0x2a0] sm:$0xff] }
 0x1b1   : > { %1676 = vmatprep.subr.mxu1 %v20462_v50  ;;  %1562 = vmatpush1.msra.mxu0 %v13591_v30  ;;  %v12245_v30 = vld [vmem:[%s20310_s1 + $0x288] sm:$0xff] }
 0x1b2   : > { %1677 = vmatpush1.msra.mxu1 %v20463_v58  ;;  %1453 = vmatprep.mubr.f32.mxu0 %v20426_v61 }
 0x1b3   : > { %1563 = vmatprep.subr.mxu0 %v13600_v34  ;;  %1678 = vmatprep.subr.mxu1 %v20464_v60  ;;  %v9301_v34 = vld [vmem:[%s12812_s24 + $0x31] sm:$0xff] }
 0x1b4   : > { %1454 = vmatmul.mubr.f32.gmra.mxu0 %v9232_v52  ;;  %1679 = vmatpush1.msra.mxu1 %v20465_v2 }
 0x1b5   : > { %1564 = vmatpush1.msra.mxu0 %v13609_v38  ;;  %1712 = vmatprep.mubr.f32.mxu1 %v20426_v61  ;;  %v1835_v38 = vld [vmem:[%s20312_s3 + $0x78] sm:$0xff] }
 0x1b6   : > { %1565 = vmatprep.subr.mxu0 %v13616_v40  ;;  %1713 = vmatmul.mubr.f32.vlgmr.msra.gmra.mxu1 %v13632_v7  ;;  %v1834_v40 = vld [vmem:[%s20312_s3 + $0x70] sm:$0xff]  ;;  %v9316_v7 = vld [vmem:[%s20312_s3 + $0xe8] sm:$0xff] }
 0x1b7   : > { %1566 = vmatpush1.msra.mxu0 %v13629_v48  ;;  %1601 = vmatprep.mubr.f32.mxu0 %v20426_v61  ;;  %v1833_v48 = vld [vmem:[%s20312_s3 + $0x68] sm:$0xff] }
 0x1b8   : > { %1567 = vmatprep.subr.mxu0 %v13641_v25  ;;  %1718 = vmatprep.mubr.f32.mxu1 %v20426_v61  ;;  %v9315_v25 = vld [vmem:[%s20312_s3 + $0xe0] sm:$0xff] }
 0x1b9   : > { %1568 = vmatpush1.msra.mxu0 %v13648_v56  ;;  %10933 = vmatprep.subr.mxu1 %v9318_v44  ;;  %v9314_v56 = vld [vmem:[%s20312_s3 + $0xd8] sm:$0xff] }
 0x1ba   : > { %1602 = vmatmul.mubr.f32.vlgmr.msra.gmra.mxu0 %v13346_v42  ;;  %1719 = vmatmul.mubr.f32.gmra.mxu1 %v9268_v13  ;;  %v12234_v42 = vld [vmem:[%s20310_s1 + $0x2e0] sm:$0xff] }
 0x1bb   : > { %1729 = vmatprep.subr.mxu0 %v12231_v4  ;;  %1607 = vmatprep.mubr.f32.mxu0 %v20426_v61 }
 0x1bc   : > { %1730 = vmatpush1.msra.mxu0 %v12232_v6  ;;  %10934 = vmatpush3.msra.mxu1 %v9318_v44 }
 0x1bd   : > { %1731 = vmatprep.subr.mxu0 %v12233_v8  ;;  %10935 = vmatprep.subr.mxu1 %v9317_v46 }
 0x1be   : > { %1732 = vmatpush1.msra.mxu0 %v12234_v42  ;;  %10936 = vmatpush3.msra.mxu1 %v9317_v46 }
 0x1bf   : > { %1733 = vmatprep.subr.mxu0 %v12235_v10  ;;  %1608 = vmatmul.mubr.f32.gmra.mxu0 %v13586_v28  ;;  %v12244_v28 = vld [vmem:[%s20310_s1 + $0x290] sm:$0xff] }
 0x1c0   : > { %1734 = vmatpush1.msra.mxu0 %v12236_v12  ;;  %1793 = vmatprep.mubr.f32.mxu0 %v20426_v61 }
 0x1c1   : > { %1735 = vmatprep.subr.mxu0 %v12237_v14  ;;  %10937 = vmatprep.subr.mxu1 %v9316_v7 }
 0x1c2   : > { %1736 = vmatpush1.msra.mxu0 %v12238_v16  ;;  %10938 = vmatpush3.msra.mxu1 %v9316_v7 }
 0x1c3   : > { %1737 = vmatprep.subr.mxu0 %v12239_v18  ;;  %10939 = vmatprep.subr.mxu1 %v9315_v25 }
 0x1c4   : > { %1738 = vmatpush1.msra.mxu0 %v12240_v20  ;;  %10940 = vmatpush3.msra.mxu1 %v9315_v25 }
 0x1c5   : > { %1739 = vmatprep.subr.mxu0 %v12241_v22  ;;  %10941 = vmatprep.subr.mxu1 %v9314_v56 }
 0x1c6   : > { %1740 = vmatpush1.msra.mxu0 %v12242_v24  ;;  %10942 = vmatpush3.msra.mxu1 %v9314_v56 }
 0x1c7   : > { %1741 = vmatprep.subr.mxu0 %v12243_v26  ;;  %10943 = vmatprep.subr.mxu1 %v9313_v63 }
 0x1c8   : > { %1742 = vmatpush1.msra.mxu0 %v12244_v28  ;;  %10944 = vmatpush3.msra.mxu1 %v9313_v63 }
 0x1c9   : > { %1743 = vmatprep.subr.mxu0 %v12245_v30  ;;  %10945 = vmatprep.subr.mxu1 %v9312_v9 }
 0x1ca   : > { %1744 = vmatpush1.msra.mxu0 %v12246_v32  ;;  %10946 = vmatpush3.msra.mxu1 %v9312_v9 }
 0x1cb   : > { %1745 = vmatprep.subr.mxu0 %v20450_v3  ;;  %10947 = vmatprep.subr.mxu1 %v9311_v29  ;;  %v9306_v3 = vld [vmem:[%s20312_s3 + $0x98] sm:$0xff] }
 0x1cc   : > { %1746 = vmatpush1.msra.mxu0 %v20451_v5  ;;  %10948 = vmatpush3.msra.mxu1 %v9311_v29  ;;  %v1821_v5 = vld [vmem:[%s20312_s3 + $0x8] sm:$0xff] }
 0x1cd   : > { %1747 = vmatprep.subr.mxu0 %v20452_v11  ;;  %10949 = vmatprep.subr.mxu1 %v9310_v39  ;;  %v9305_v11 = vld [vmem:[%s20312_s3 + $0x90] sm:$0xff] }
 0x1ce   : > { %1748 = vmatpush1.msra.mxu0 %v20453_v51  ;;  %10950 = vmatpush3.msra.mxu1 %v9310_v39  ;;  %v1820_v51 = vld [vmem:[%s20312_s3] sm:$0xff] }
 0x1cf   : > { %1749 = vmatprep.subr.mxu0 %v20454_v33  ;;  %10951 = vmatprep.subr.mxu1 %v9309_v15  ;;  %v9304_v33 = vld [vmem:[%s20312_s3 + $0x88] sm:$0xff] }
 0x1d0   : > { %1750 = vmatpush1.msra.mxu0 %v20455_v27  ;;  %10952 = vmatpush3.msra.mxu1 %v9309_v15  ;;  %v13894_v27 = vld [vmem:[%s20310_s1 + $0x1f8] sm:$0xff] }
 0x1d1   : > { %1751 = vmatprep.subr.mxu0 %v20456_v35  ;;  %10953 = vmatprep.subr.mxu1 %v9308_v45 }
 0x1d2   : > { %1752 = vmatpush1.msra.mxu0 %v20457_v41  ;;  %10954 = vmatpush3.msra.mxu1 %v9308_v45  ;;  %v9303_v41 = vld [vmem:[%s20312_s3 + $0x80] sm:$0xff] }
 0x1d3   : > { %1753 = vmatprep.subr.mxu0 %v20458_v43  ;;  %10955 = vmatprep.subr.mxu1 %v9307_v57 }
 0x1d4   : > { %1754 = vmatpush1.msra.mxu0 %v20459_v19  ;;  %10956 = vmatpush3.msra.mxu1 %v9307_v57  ;;  %v13903_v19 = vld [vmem:[%s20312_s3 + $0x178] sm:$0xff] }
 0x1d5   : > { %1755 = vmatprep.subr.mxu0 %v20460_v17  ;;  %10957 = vmatprep.subr.mxu1 %v9306_v3 }
 0x1d6   : > { %1756 = vmatpush1.msra.mxu0 %v20461_v54  ;;  %10958 = vmatpush3.msra.mxu1 %v9306_v3 }
 0x1d7   : > { %1757 = vmatprep.subr.mxu0 %v20462_v50  ;;  %10959 = vmatprep.subr.mxu1 %v9305_v11  ;;  %v9130_v50 = vld [vmem:[%s20313_s4] ss:$0 sm:$0xff] }
 0x1d8   : > { %1758 = vmatpush1.msra.mxu0 %v20463_v58  ;;  %10960 = vmatpush3.msra.mxu1 %v9305_v11 }
 0x1d9   : > { %1759 = vmatprep.subr.mxu0 %v20464_v60  ;;  %10961 = vmatprep.subr.mxu1 %v9304_v33 }
 0x1da   : > { %1760 = vmatpush1.msra.mxu0 %v20465_v2  ;;  %10962 = vmatpush3.msra.mxu1 %v9304_v33 }
 0x1db   : > { %1794 = vmatmul.mubr.f32.vlgmr.msra.gmra.mxu0 %v9301_v34  ;;  %10968 = vmatprep.subr.mxu0 %v1835_v38 }
 0x1dc   : > { %1799 = vmatprep.mubr.f32.mxu0 %v20426_v61  ;;  %10969 = vmatpush3.msra.mxu0 %v1835_v38 }
 0x1dd   : > { %10970 = vmatprep.subr.mxu0 %v1834_v40  ;;  %10963 = vmatprep.subr.mxu1 %v9303_v41 }
 0x1de   : > { %10971 = vmatpush3.msra.mxu0 %v1834_v40  ;;  %10964 = vmatpush3.msra.mxu1 %v9303_v41 }
 0x1df   : > { %1800 = vmatmul.mubr.f32.gmra.mxu0 %v9302_v36  ;;  %10972 = vmatprep.subr.mxu0 %v1833_v48 }
 0x1e0   : > { %10973 = vmatpush3.msra.mxu0 %v1833_v48  ;;  %11003 = vmatprep.subr.mxu1 %v13903_v19 }
 0x1e1   : > { %10974 = vmatprep.subr.mxu0 %v1832_v21 }
 0x1e2   : > { %10975 = vmatpush3.msra.mxu0 %v1832_v21 }
 0x1e3   : > { %10976 = vmatprep.subr.mxu0 %v1831_v47 }
 0x1e4   : > { %10977 = vmatpush3.msra.mxu0 %v1831_v47 }
 0x1e5   : > { %10978 = vmatprep.subr.mxu0 %v1830_v59 }
 0x1e6   : > { %10979 = vmatpush3.msra.mxu0 %v1830_v59 }
 0x1e7   : > { %10980 = vmatprep.subr.mxu0 %v1829_v1 }
 0x1e8   : > { %10981 = vmatpush3.msra.mxu0 %v1829_v1 }
 0x1e9   : > { %10982 = vmatprep.subr.mxu0 %v1828_v0 }
 0x1ea   : > { %10983 = vmatpush3.msra.mxu0 %v1828_v0 }
 0x1eb   : > { %10984 = vmatprep.subr.mxu0 %v1827_v37 }
 0x1ec   : > { %10985 = vmatpush3.msra.mxu0 %v1827_v37 }
 0x1ed   : > { %10986 = vmatprep.subr.mxu0 %v1826_v31 }
 0x1ee   : > { %10987 = vmatpush3.msra.mxu0 %v1826_v31 }
 0x1ef   : > { %10988 = vmatprep.subr.mxu0 %v1825_v62 }
 0x1f0   : > { %10989 = vmatpush3.msra.mxu0 %v1825_v62 }
 0x1f1   : > { %10990 = vmatprep.subr.mxu0 %v1824_v23 }
 0x1f2   : > { %10991 = vmatpush3.msra.mxu0 %v1824_v23 }
 0x1f3   : > { %10992 = vmatprep.subr.mxu0 %v1823_v53 }
 0x1f4   : > { %10993 = vmatpush3.msra.mxu0 %v1823_v53 }
 0x1f5   : > { %10994 = vmatprep.subr.mxu0 %v1822_v55 }
 0x1f6   : > { %10995 = vmatpush3.msra.mxu0 %v1822_v55 }
 0x1f7   : > { %10996 = vmatprep.subr.mxu0 %v1821_v5 }
 0x1f8   : > { %10997 = vmatpush3.msra.mxu0 %v1821_v5 }
 0x1f9   : > { %10998 = vmatprep.subr.mxu0 %v1820_v51 }
 0x1fa   : > { %10999 = vmatpush3.msra.mxu0 %v1820_v51 }
 0x1fb   : > { %2186 = vmatprep.subr.mxu0 %v13894_v27 }
 0x20f   : > { %v10897_v43 = vpop.f32.mrf.mxu1 }
 0x211   : > { %v1119_v54 = vpop.f32.mrf.mxu1 }
 0x213   : > { %v10862_v35 = vpop.f32.mrf.mxu0 }
 0x214   : > { %v1125_v17 = vadd.f32 %v10897_v43, %v10862_v35 }
 0x215   : > { %v1044_v13 = vpop.f32.mrf.mxu0 }
 0x216   : > { %v1120_v58 = vadd.f32 %v1119_v54, %v1044_v13 }
 0x231   : > { %v1372_v12 = vpop.f32.mrf.mxu1 }
 0x233   : > { %v10932_v52 = vpop.f32.mrf.mxu0  ;;  %v1374_v14 = vpop.f32.mrf.mxu1 }
 0x234   : > { %v1227_v60 = vadd.f32 %v10932_v52, %v1125_v17  ;;  %v13921_v52 = vld [vmem:[%s20310_s1 + $0x1e8] sm:$0xff] }
 0x235   : > { %v1217_v2 = vpop.f32.mrf.mxu0 }
 0x236   : > { %v1229_v4 = vadd.f32 %v9130_v50, %v1227_v60  ;;  %v1226_v6 = vadd.f32 %v1217_v2, %v1120_v58  ;;  %v13927_v58 = vld [vmem:[%s20310_s1 + $0x1e0] sm:$0xff]  ;;  %v13934_v2 = vld [vmem:[%s20310_s1 + $0x1d8] sm:$0xff] }
 0x238   : > { %v1231_v8 = vmax.f32 %v1229_v4, 0.0  ;;  %v1228_v42 = vadd.f32 %v9130_v50, %v1226_v6  ;;  %v13916_v50 = vld [vmem:[%s20310_s1 + $0x1f0] sm:$0xff] }
 0x23a   : > { %1233 = vst [vmem:[#allocation2 + $0x8] sm:$0x1f] %v1231_v8  ;;  %v1230_v10 = vmax.f32 %v1228_v42, 0.0  ;;  %v13943_v8 = vld [vmem:[%s20310_s1 + $0x1d0] sm:$0xff] }
 0x23b   : > { %v9333_v42 = vld [vmem:[%s20312_s3 + $0x170] sm:$0xff] }
 0x23c   : > { %1232 = vst [vmem:[#allocation2] sm:$0xff] %v1230_v10 }
 0x24e   : > { %v1378_v16 = vpop.f32.mrf.mxu1 }
 0x250   : > { %v1380_v18 = vpop.f32.mrf.mxu1 }
 0x253   : > { %v1526_v22 = vpop.f32.mrf.mxu1 }
 0x255   : > { %v1528_v26 = vpop.f32.mrf.mxu1 }
 0x257   : > { %v1449_v20 = vpop.f32.mrf.mxu0 }
 0x258   : > { %v1450_v25 = vadd.f32 %v1449_v20, %v1372_v12  ;;  %v13953_v12 = vld [vmem:[%s20310_s1 + $0x1c8] sm:$0xff]  ;;  %v13977_v20 = vld [vmem:[%s20310_s1 + $0x1b0] sm:$0xff] }
 0x259   : > { %v1451_v24 = vpop.f32.mrf.mxu0 }
 0x25a   : > { %v1452_v48 = vadd.f32 %v1451_v24, %v1374_v14  ;;  %v13986_v24 = vld [vmem:[%s20310_s1 + $0x1a8] sm:$0xff] }
 0x270   : > { %v1532_v30 = vpop.f32.mrf.mxu1 }
 0x272   : > { %v1534_v34 = vpop.f32.mrf.mxu1 }
 0x274   : > { %v1455_v28 = vpop.f32.mrf.mxu0 }
 0x275   : > { %v1456_v37 = vadd.f32 %v1455_v28, %v1378_v16  ;;  %v13963_v16 = vld [vmem:[%s20310_s1 + $0x1c0] sm:$0xff]  ;;  %v9330_v28 = vld [vmem:[%s20312_s3 + $0x158] sm:$0xff] }
 0x276   : > { %v1457_v32 = vpop.f32.mrf.mxu0  ;;  %v1714_v38 = vpop.f32.mrf.mxu1 }
 0x277   : > { %v1725_v1 = vadd.f32 %v1714_v38, %v1450_v25  ;;  %v1458_v29 = vadd.f32 %v1457_v32, %v1380_v18  ;;  %v9332_v18 = vld [vmem:[%s20312_s3 + $0x168] sm:$0xff]  ;;  %v14007_v32 = vld [vmem:[%s20310_s1 + $0x190] sm:$0xff]  ;;  %v14022_v38 = vld [vmem:[%s20310_s1 + $0x180] sm:$0xff] }
 0x278   : > { %v1716_v44 = vpop.f32.mrf.mxu1  ;;  %v9326_v25 = vld [vmem:[%s20312_s3 + $0x138] sm:$0xff] }
 0x279   : > { %v1726_v47 = vadd.f32 %v1716_v44, %v1452_v48  ;;  %v14031_v44 = vld [vmem:[%s20310_s1 + $0x178] sm:$0xff]  ;;  %v9327_v48 = vld [vmem:[%s20312_s3 + $0x140] sm:$0xff] }
 0x27a   : > { %v1603_v36 = vpop.f32.mrf.mxu0  ;;  %v1720_v7 = vpop.f32.mrf.mxu1 }
 0x27b   : > { %v1604_v59 = vadd.f32 %v1603_v36, %v1526_v22  ;;  %v1810_v62 = vmax.f32 %v1725_v1, %v1726_v47  ;;  %v1727_v3 = vadd.f32 %v1720_v7, %v1456_v37  ;;  %v9331_v22 = vld [vmem:[%s20312_s3 + $0x160] sm:$0xff]  ;;  %v14016_v36 = vld [vmem:[%s20310_s1 + $0x188] sm:$0xff]  ;;  %v14061_v47 = vld [vmem:[%s20310_s1 + $0x158] sm:$0xff] }
 0x27c   : > { %v1605_v40 = vpop.f32.mrf.mxu0  ;;  %v1722_v0 = vpop.f32.mrf.mxu1  ;;  %v14046_v7 = vld [vmem:[%s20310_s1 + $0x168] sm:$0xff]  ;;  %v14082_v1 = vld [vmem:[%s20310_s1 + $0x140] sm:$0xff]  ;;  %v14097_v37 = vld [vmem:[%s20310_s1 + $0x130] sm:$0xff] }
 0x27d   : > { %v1606_v63 = vadd.f32 %v1605_v40, %v1528_v26  ;;  %v1728_v23 = vadd.f32 %v1722_v0, %v1458_v29  ;;  %v13992_v26 = vld [vmem:[%s20310_s1 + $0x1a0] sm:$0xff]  ;;  %v9328_v40 = vld [vmem:[%s20312_s3 + $0x148] sm:$0xff] }
 0x27e   : > { %v9324_v0 = vld [vmem:[%s20312_s3 + $0x128] sm:$0xff]  ;;  %v9323_v29 = vld [vmem:[%s20312_s3 + $0x120] sm:$0xff] }
 0x27f   : > { %v1609_v46 = vpop.f32.mrf.mxu0  ;;  %v1811_v33 = vmax.f32 %v1727_v3, %v1728_v23  ;;  %v14127_v23 = vld [vmem:[%s20310_s1 + $0x110] sm:$0xff] }
 0x280   : > { %v1610_v45 = vadd.f32 %v1609_v46, %v1532_v30  ;;  %v14001_v30 = vld [vmem:[%s20310_s1 + $0x198] sm:$0xff]  ;;  %v14037_v46 = vld [vmem:[%s20310_s1 + $0x170] sm:$0xff] }
 0x281   : > { %v1611_v21 = vpop.f32.mrf.mxu0  ;;  %v14150_v3 = vld [vmem:[%s12812_s24 + $0x50] sm:$0xff] }
 0x282   : > { %v1612_v53 = vadd.f32 %v1611_v21, %v1534_v34  ;;  %v9329_v34 = vld [vmem:[%s20312_s3 + $0x150] sm:$0xff]  ;;  %v14052_v21 = vld [vmem:[%s20310_s1 + $0x160] sm:$0xff] }
 0x29b   : > { %v1795_v56 = vpop.f32.mrf.mxu0 }
 0x29c   : > { %v1806_v31 = vadd.f32 %v1795_v56, %v1604_v59  ;;  %v14067_v56 = vld [vmem:[%s20310_s1 + $0x150] sm:$0xff] }
 0x29d   : > { %v1797_v9 = vpop.f32.mrf.mxu0  ;;  %v9325_v59 = vld [vmem:[%s20312_s3 + $0x130] sm:$0xff] }
 0x29e   : > { %v1807_v39 = vadd.f32 %v1797_v9, %v1606_v63  ;;  %v14076_v63 = vld [vmem:[%s20310_s1 + $0x148] sm:$0xff]  ;;  %v14091_v9 = vld [vmem:[%s20310_s1 + $0x138] sm:$0xff] }
 0x29f   : > { %v1801_v15 = vpop.f32.mrf.mxu0 }
 0x2a0   : > { %v1812_v57 = vmax.f32 %v1806_v31, %v1807_v39  ;;  %v1808_v11 = vadd.f32 %v1801_v15, %v1610_v45  ;;  %v14106_v31 = vld [vmem:[%s20310_s1 + $0x128] sm:$0xff]  ;;  %v14112_v39 = vld [vmem:[%s20310_s1 + $0x120] sm:$0xff]  ;;  %v14121_v15 = vld [vmem:[%s20310_s1 + $0x118] sm:$0xff] }
 0x2a1   : > { %v1803_v55 = vpop.f32.mrf.mxu0  ;;  %v9321_v45 = vld [vmem:[%s20312_s3 + $0x110] sm:$0xff] }
 0x2a2   : > { %v1814_v5 = vmax.f32 %v1810_v62, %v1812_v57  ;;  %v1809_v51 = vadd.f32 %v1803_v55, %v1612_v53  ;;  %v9322_v62 = vld [vmem:[%s20312_s3 + $0x118] sm:$0xff]  ;;  %v14136_v53 = vld [vmem:[%s20310_s1 + $0x108] sm:$0xff]  ;;  %v14142_v57 = vld [vmem:[%s20310_s1 + $0x100] sm:$0xff] }
 0x2a3   : > { %v9320_v55 = vld [vmem:[%s20312_s3 + $0x108] sm:$0xff] }
 0x2a4   : > { %v1813_v35 = vmax.f32 %v1808_v11, %v1809_v51  ;;  %v1816_v41 = vadd.f32 %v13258_v49, %v1814_v5  ;;  %v9319_v5 = vld [vmem:[%s20312_s3 + $0x100] sm:$0xff]  ;;  %v14161_v11 = vld [vmem:[%s20310_s1 + $0xf8] sm:$0xff]  ;;  %v14167_v51 = vld [vmem:[%s20310_s1 + $0xf0] sm:$0xff] }
 0x2a6   : > { %v1815_v43 = vmax.f32 %v1811_v33, %v1813_v35  ;;  %v1818_v13 = vmax.f32 %v1816_v41, 0.0  ;;  %v14182_v33 = vld [vmem:[%s20310_s1 + $0xe0] sm:$0xff]  ;;  %v14189_v35 = vld [vmem:[%s20310_s1 + $0xd8] sm:$0xff]  ;;  %v14196_v41 = vld [vmem:[%s20310_s1 + $0xd0] sm:$0xff] }
 0x2a8   : > { %v1817_v17 = vadd.f32 %v13258_v49, %v1815_v43  ;;  %11000 = vmatprep.mubr.f32.mxu0 %v1818_v13  ;;  %v1854_v49 = vrot.slane %v1818_v13, 1  ;;  %v2025_v10 = vrot.slane %v1818_v13, 2  ;;  %v14203_v43 = vld [vmem:[%s20310_s1 + $0xc8] sm:$0xff]  ;;  %v14210_v13 = vld [vmem:[%s20310_s1 + $0xc0] sm:$0xff] }
 0x2aa   : > { %v13911_v54 = vmax.f32 %v1817_v17, 0.0  ;;  %v14217_v17 = vld [vmem:[%s20310_s1 + $0xb8] sm:$0xff] }
 0x2ac   : > { %11001 = vmatmul.mubr.f32.vlgmr.msra.gmra.mxu0 %v13911_v54  ;;  %v1855_v60 = vrot.slane %v13911_v54, 1  ;;  %v2026_v4 = vrot.slane %v13911_v54, 2  ;;  %v14224_v54 = vld [vmem:[%s20310_s1 + $0xb0] sm:$0xff] }
 0x2ad   : > { %2187 = vmatpush1.msra.mxu0 %v13916_v50  ;;  %2250 = vmatprep.mubr.f32.mxu0 %v20426_v61 }
 0x2ae   : > { %2188 = vmatprep.subr.mxu0 %v13921_v52  ;;  %v1856_v6 = vsel %vm972_vm0, %v1854_v49, %v1855_v60  ;;  %v2027_v14 = vsel %vm1145_vm1, %v2025_v10, %v2026_v4  ;;  %v14252_v49 = vld [vmem:[%s20310_s1 + $0x90] sm:$0xff]  ;;  %v14301_v10 = vld [vmem:[%s20310_s1 + $0x58] sm:$0xff] }
 0x2af   : > { %2189 = vmatpush1.msra.mxu0 %v13927_v58  ;;  %10965 = vmatprep.mubr.f32.mxu1 %v1856_v6  ;;  %v14280_v6 = vld [vmem:[%s20310_s1 + $0x70] sm:$0xff] }
 0x2b0   : > { %2190 = vmatprep.subr.mxu0 %v13934_v2  ;;  %10966 = vmatmul.mubr.f32.vlgmr.msra.gmra.mxu1 %v1855_v60  ;;  %v14259_v60 = vld [vmem:[%s20310_s1 + $0x88] sm:$0xff] }
 0x2b1   : > { %11004 = vmatpush3.msra.mxu1 %v13903_v19  ;;  %2191 = vmatpush1.msra.mxu0 %v13943_v8  ;;  %v13971_v19 = vld [vmem:[%s20310_s1 + $0x1b8] sm:$0xff] }
 0x2b2   : > { %11005 = vmatprep.subr.mxu1 %v9333_v42  ;;  %11035 = vmatprep.mubr.f32.mxu1 %v2027_v14  ;;  %v14315_v14 = vld [vmem:[%s20310_s1 + $0x48] sm:$0xff] }
 0x2b3   : > { %2192 = vmatprep.subr.mxu0 %v13953_v12  ;;  %11006 = vmatpush3.msra.mxu1 %v9333_v42  ;;  %v14294_v42 = vld [vmem:[%s20310_s1 + $0x60] sm:$0xff] }
 0x2b4   : > { %2193 = vmatpush1.msra.mxu0 %v13963_v16  ;;  %11007 = vmatprep.subr.mxu1 %v9332_v18 }
 0x2b5   : > { %2194 = vmatprep.subr.mxu0 %v13971_v19  ;;  %11008 = vmatpush3.msra.mxu1 %v9332_v18  ;;  %v14331_v18 = vld [vmem:[%s20310_s1 + $0x38] sm:$0xff] }
 0x2b6   : > { %2195 = vmatpush1.msra.mxu0 %v13977_v20  ;;  %11009 = vmatprep.subr.mxu1 %v9331_v22 }
 0x2b7   : > { %2196 = vmatprep.subr.mxu0 %v13986_v24  ;;  %11010 = vmatpush3.msra.mxu1 %v9331_v22  ;;  %v14348_v22 = vld [vmem:[%s20310_s1 + $0x28] sm:$0xff] }
 0x2b8   : > { %2197 = vmatpush1.msra.mxu0 %v13992_v26  ;;  %11011 = vmatprep.subr.mxu1 %v9330_v28 }
 0x2b9   : > { %2198 = vmatprep.subr.mxu0 %v14001_v30  ;;  %11012 = vmatpush3.msra.mxu1 %v9330_v28  ;;  %v14369_v28 = vld [vmem:[%s20310_s1 + $0x2f8] sm:$0xff] }
 0x2ba   : > { %2199 = vmatpush1.msra.mxu0 %v14007_v32  ;;  %11013 = vmatprep.subr.mxu1 %v9329_v34 }
 0x2bb   : > { %2200 = vmatprep.subr.mxu0 %v14016_v36  ;;  %11014 = vmatpush3.msra.mxu1 %v9329_v34  ;;  %v14386_v34 = vld [vmem:[%s20310_s1 + $0x2f0] sm:$0xff] }
 0x2bc   : > { %2201 = vmatpush1.msra.mxu0 %v14022_v38  ;;  %11015 = vmatprep.subr.mxu1 %v9328_v40 }
 0x2bd   : > { %2202 = vmatprep.subr.mxu0 %v14031_v44  ;;  %11016 = vmatpush3.msra.mxu1 %v9328_v40  ;;  %v14403_v40 = vld [vmem:[%s20310_s1] sm:$0xff] }
 0x2be   : > { %2203 = vmatpush1.msra.mxu0 %v14037_v46  ;;  %11017 = vmatprep.subr.mxu1 %v9327_v48 }
 0x2bf   : > { %2204 = vmatprep.subr.mxu0 %v14046_v7  ;;  %11018 = vmatpush3.msra.mxu1 %v9327_v48  ;;  %v14420_v48 = vld [vmem:[%s20310_s1 + $0x2d8] sm:$0xff] }
 0x2c0   : > { %2205 = vmatpush1.msra.mxu0 %v14052_v21  ;;  %11019 = vmatprep.subr.mxu1 %v9326_v25 }
 0x2c1   : > { %2206 = vmatprep.subr.mxu0 %v14061_v47  ;;  %11020 = vmatpush3.msra.mxu1 %v9326_v25  ;;  %v14440_v25 = vld [vmem:[%s20310_s1 + $0x2c0] sm:$0xff] }
 0x2c2   : > { %2207 = vmatpush1.msra.mxu0 %v14067_v56  ;;  %11021 = vmatprep.subr.mxu1 %v9325_v59 }
 0x2c3   : > { %2208 = vmatprep.subr.mxu0 %v14076_v63  ;;  %11022 = vmatpush3.msra.mxu1 %v9325_v59  ;;  %v14461_v59 = vld [vmem:[%s20310_s1 + $0x2a8] sm:$0xff] }
 0x2c4   : > { %2209 = vmatpush1.msra.mxu0 %v14082_v1  ;;  %11023 = vmatprep.subr.mxu1 %v9324_v0 }
 0x2c5   : > { %2210 = vmatprep.subr.mxu0 %v14091_v9  ;;  %11024 = vmatpush3.msra.mxu1 %v9324_v0  ;;  %v14482_v0 = vld [vmem:[%s20310_s1 + $0x290] sm:$0xff] }
 0x2c6   : > { %2211 = vmatpush1.msra.mxu0 %v14097_v37  ;;  %11025 = vmatprep.subr.mxu1 %v9323_v29 }
 0x2c7   : > { %2212 = vmatprep.subr.mxu0 %v14106_v31  ;;  %11026 = vmatpush3.msra.mxu1 %v9323_v29  ;;  %v14503_v29 = vld [vmem:[%s20310_s1 + $0x278] sm:$0xff] }
 0x2c8   : > { %2213 = vmatpush1.msra.mxu0 %v14112_v39  ;;  %11027 = vmatprep.subr.mxu1 %v9322_v62 }
 0x2c9   : > { %2214 = vmatprep.subr.mxu0 %v14121_v15  ;;  %11028 = vmatpush3.msra.mxu1 %v9322_v62  ;;  %v14524_v62 = vld [vmem:[%s20310_s1 + $0x260] sm:$0xff] }
 0x2ca   : > { %2215 = vmatpush1.msra.mxu0 %v14127_v23  ;;  %11029 = vmatprep.subr.mxu1 %v9321_v45 }
 0x2cb   : > { %2216 = vmatprep.subr.mxu0 %v14136_v53  ;;  %11030 = vmatpush3.msra.mxu1 %v9321_v45  ;;  %v14545_v45 = vld [vmem:[%s20310_s1 + $0x248] sm:$0xff] }
 0x2cc   : > { %2217 = vmatpush1.msra.mxu0 %v14142_v57  ;;  %11031 = vmatprep.subr.mxu1 %v9320_v55 }
 0x2cd   : > { %2340 = vmatprep.subr.mxu0 %v13894_v27  ;;  %11032 = vmatpush3.msra.mxu1 %v9320_v55  ;;  %v14175_v27 = vld [vmem:[%s20310_s1 + $0xe8] sm:$0xff]  ;;  %v14566_v55 = vld [vmem:[%s20310_s1 + $0x230] sm:$0xff] }
 0x2ce   : > { %2251 = vmatmul.mubr.f32.vlgmr.msra.gmra.mxu0 %v14150_v3  ;;  %11033 = vmatprep.subr.mxu1 %v9319_v5 }
 0x2cf   : > { %2341 = vmatpush1.msra.mxu0 %v13916_v50  ;;  %11034 = vmatpush3.msra.mxu1 %v9319_v5  ;;  %v14231_v50 = vld [vmem:[%s20310_s1 + $0xa8] sm:$0xff] }
 0x2d0   : > { %2342 = vmatprep.subr.mxu0 %v13921_v52  ;;  %11036 = vmatmul.mubr.f32.vlgmr.msra.gmra.mxu1 %v2026_v4  ;;  %v14238_v52 = vld [vmem:[%s20310_s1 + $0xa0] sm:$0xff]  ;;  %v14273_v4 = vld [vmem:[%s20310_s1 + $0x78] sm:$0xff]  ;;  %v14573_v5 = vld [vmem:[%s20310_s1 + $0x228] sm:$0xff] }
 0x2d1   : > { %2343 = vmatpush1.msra.mxu0 %v13927_v58  ;;  %2263 = vmatprep.subr.mxu1 %v14161_v11  ;;  %v14245_v58 = vld [vmem:[%s20310_s1 + $0x98] sm:$0xff] }
 0x2d2   : > { %2344 = vmatprep.subr.mxu0 %v13934_v2  ;;  %2264 = vmatpush1.msra.mxu1 %v14167_v51  ;;  %v14266_v2 = vld [vmem:[%s20310_s1 + $0x80] sm:$0xff] }
 0x2d3   : > { %2345 = vmatpush1.msra.mxu0 %v13943_v8  ;;  %2265 = vmatprep.subr.mxu1 %v14175_v27  ;;  %v14287_v8 = vld [vmem:[%s20310_s1 + $0x68] sm:$0xff] }
 0x2d4   : > { %2346 = vmatprep.subr.mxu0 %v13953_v12  ;;  %2266 = vmatpush1.msra.mxu1 %v14182_v33  ;;  %v14308_v12 = vld [vmem:[%s20310_s1 + $0x50] sm:$0xff] }
 0x2d5   : > { %2347 = vmatpush1.msra.mxu0 %v13963_v16  ;;  %2267 = vmatprep.subr.mxu1 %v14189_v35  ;;  %v14322_v16 = vld [vmem:[%s20310_s1 + $0x40] sm:$0xff] }
 0x2d6   : > { %2348 = vmatprep.subr.mxu0 %v13971_v19  ;;  %2268 = vmatpush1.msra.mxu1 %v14196_v41  ;;  %v14336_v19 = vld [vmem:[%s12812_s24 + $0x58] sm:$0x7f] }
 0x2d7   : > { %2349 = vmatpush1.msra.mxu0 %v13977_v20  ;;  %2269 = vmatprep.subr.mxu1 %v14203_v43  ;;  %v14341_v20 = vld [vmem:[%s20310_s1 + $0x30] sm:$0xff] }
 0x2d8   : > { %2350 = vmatprep.subr.mxu0 %v13986_v24  ;;  %2270 = vmatpush1.msra.mxu1 %v14210_v13  ;;  %v14355_v24 = vld [vmem:[%s20310_s1 + $0x20] sm:$0xff] }
 0x2d9   : > { %2351 = vmatpush1.msra.mxu0 %v13992_v26  ;;  %2271 = vmatprep.subr.mxu1 %v14217_v17  ;;  %v14362_v26 = vld [vmem:[%s20310_s1 + $0x18] sm:$0xff] }
 0x2da   : > { %2352 = vmatprep.subr.mxu0 %v14001_v30  ;;  %2272 = vmatpush1.msra.mxu1 %v14224_v54  ;;  %v14376_v30 = vld [vmem:[%s20310_s1 + $0x10] sm:$0xff] }
 0x2db   : > { %2353 = vmatpush1.msra.mxu0 %v14007_v32  ;;  %2273 = vmatprep.subr.mxu1 %v14231_v50  ;;  %v14379_v32 = vld [vmem:[%s12812_s24 + $0x41] sm:$0xff] }
 0x2dc   : > { %2354 = vmatprep.subr.mxu0 %v14016_v36  ;;  %2274 = vmatpush1.msra.mxu1 %v14238_v52  ;;  %v14391_v36 = vld [vmem:[%s20310_s1 + $0x8] sm:$0xff] }
 0x2dd   : > { %2355 = vmatpush1.msra.mxu0 %v14022_v38  ;;  %2275 = vmatprep.subr.mxu1 %v14245_v58  ;;  %v14398_v38 = vld [vmem:[%s20310_s1 + $0x2e8] sm:$0xff] }
 0x2de   : > { %2356 = vmatprep.subr.mxu0 %v14031_v44  ;;  %2276 = vmatpush1.msra.mxu1 %v14252_v49  ;;  %v14410_v44 = vld [vmem:[%s20310_s1 + $0x2e0] sm:$0xff] }
 0x2df   : > { %2357 = vmatpush1.msra.mxu0 %v14037_v46  ;;  %2277 = vmatprep.subr.mxu1 %v14259_v60  ;;  %v9335_v46 = vld [vmem:[%s12812_s24 + $0x40] sm:$0xff] }
 0x2e0   : > { %2358 = vmatprep.subr.mxu0 %v14046_v7  ;;  %2278 = vmatpush1.msra.mxu1 %v14266_v2  ;;  %v14427_v7 = vld [vmem:[%s20310_s1 + $0x2d0] sm:$0xff] }
 0x2e1   : > { %2359 = vmatpush1.msra.mxu0 %v14052_v21  ;;  %2279 = vmatprep.subr.mxu1 %v14273_v4  ;;  %v14433_v21 = vld [vmem:[%s20310_s1 + $0x2c8] sm:$0xff] }
 0x2e2   : > { %2360 = vmatprep.subr.mxu0 %v14061_v47  ;;  %2280 = vmatpush1.msra.mxu1 %v14280_v6  ;;  %v14447_v47 = vld [vmem:[%s20310_s1 + $0x2b8] sm:$0xff] }
 0x2e3   : > { %2361 = vmatpush1.msra.mxu0 %v14067_v56  ;;  %2281 = vmatprep.subr.mxu1 %v14287_v8  ;;  %v14454_v56 = vld [vmem:[%s20310_s1 + $0x2b0] sm:$0xff] }
 0x2e4   : > { %2362 = vmatprep.subr.mxu0 %v14076_v63  ;;  %2282 = vmatpush1.msra.mxu1 %v14294_v42  ;;  %v14468_v63 = vld [vmem:[%s20310_s1 + $0x2a0] sm:$0xff] }
 0x2e5   : > { %2363 = vmatpush1.msra.mxu0 %v14082_v1  ;;  %2283 = vmatprep.subr.mxu1 %v14301_v10  ;;  %v14475_v1 = vld [vmem:[%s20310_s1 + $0x298] sm:$0xff] }
 0x2e6   : > { %2364 = vmatprep.subr.mxu0 %v14091_v9  ;;  %2284 = vmatpush1.msra.mxu1 %v14308_v12  ;;  %v14489_v9 = vld [vmem:[%s20310_s1 + $0x288] sm:$0xff] }
 0x2e7   : > { %2365 = vmatpush1.msra.mxu0 %v14097_v37  ;;  %2285 = vmatprep.subr.mxu1 %v14315_v14  ;;  %v14496_v37 = vld [vmem:[%s20310_s1 + $0x280] sm:$0xff] }
 0x2e8   : > { %2366 = vmatprep.subr.mxu0 %v14106_v31  ;;  %2286 = vmatpush1.msra.mxu1 %v14322_v16  ;;  %v14510_v31 = vld [vmem:[%s20310_s1 + $0x270] sm:$0xff] }
 0x2e9   : > { %2367 = vmatpush1.msra.mxu0 %v14112_v39  ;;  %2256 = vmatprep.mubr.f32.mxu0 %v20426_v61  ;;  %v14517_v39 = vld [vmem:[%s20310_s1 + $0x268] sm:$0xff] }
 0x2ea   : > { %2287 = vmatprep.subr.mxu1 %v14331_v18  ;;  %2368 = vmatprep.subr.mxu0 %v14121_v15  ;;  %v14531_v15 = vld [vmem:[%s20310_s1 + $0x258] sm:$0xff] }
 0x2eb   : > { %2257 = vmatmul.mubr.f32.gmra.mxu0 %v14336_v19  ;;  %2288 = vmatpush1.msra.mxu1 %v14341_v20 }
 0x2ec   : > { %2369 = vmatpush1.msra.mxu0 %v14127_v23  ;;  %2289 = vmatprep.subr.mxu1 %v14348_v22  ;;  %v14538_v23 = vld [vmem:[%s20310_s1 + $0x250] sm:$0xff] }
 0x2ed   : > { %2370 = vmatprep.subr.mxu0 %v14136_v53  ;;  %2290 = vmatpush1.msra.mxu1 %v14355_v24  ;;  %v14552_v53 = vld [vmem:[%s20310_s1 + $0x240] sm:$0xff] }
 0x2ee   : > { %2371 = vmatpush1.msra.mxu0 %v14142_v57  ;;  %2291 = vmatprep.subr.mxu1 %v14362_v26  ;;  %v14559_v57 = vld [vmem:[%s20310_s1 + $0x238] sm:$0xff] }
 0x2ef   : > { %2404 = vmatprep.mubr.f32.mxu0 %v20426_v61  ;;  %2528 = vmatprep.subr.mxu0 %v14369_v28 }
 0x2f0   : > { %2292 = vmatpush1.msra.mxu1 %v14376_v30  ;;  %2405 = vmatmul.mubr.f32.vlgmr.msra.gmra.mxu0 %v14379_v32 }
 0x2f1   : > { %2529 = vmatpush1.msra.mxu0 %v14386_v34  ;;  %2293 = vmatprep.subr.mxu1 %v14391_v36 }
 0x2f2   : > { %2530 = vmatprep.subr.mxu0 %v14398_v38  ;;  %2294 = vmatpush1.msra.mxu1 %v14403_v40 }
 0x2f3   : > { %2327 = vmatprep.mubr.f32.mxu1 %v20426_v61  ;;  %2531 = vmatpush1.msra.mxu0 %v14410_v44 }
 0x2f4   : > { %2328 = vmatmul.mubr.f32.vlgmr.msra.gmra.mxu1 %v9335_v46  ;;  %2417 = vmatprep.subr.mxu1 %v14161_v11  ;;  %v14580_v11 = vld [vmem:[%s20310_s1 + $0x220] sm:$0xff]  ;;  %v9408_v46 = vld [vmem:[%s20312_s3 + $0x88] sm:$0xff] }
 0x2f5   : > { %2532 = vmatprep.subr.mxu0 %v14420_v48  ;;  %2418 = vmatpush1.msra.mxu1 %v14167_v51  ;;  %v9372_v51 = vld [vmem:[%s12812_s24 + $0x49] sm:$0x7f] }
 0x2f6   : > { %2533 = vmatpush1.msra.mxu0 %v14427_v7  ;;  %2419 = vmatprep.subr.mxu1 %v14175_v27  ;;  %v9376_v27 = vld [vmem:[%s20310_s1 + $0x218] sm:$0xff] }
 0x2f7   : > { %2534 = vmatprep.subr.mxu0 %v14433_v21  ;;  %2420 = vmatpush1.msra.mxu1 %v14182_v33  ;;  %v9375_v33 = vld [vmem:[%s20310_s1 + $0x210] sm:$0xff] }
 0x2f8   : > { %2535 = vmatpush1.msra.mxu0 %v14440_v25  ;;  %2421 = vmatprep.subr.mxu1 %v14189_v35  ;;  %v9374_v35 = vld [vmem:[%s20310_s1 + $0x208] sm:$0xff] }
 0x2f9   : > { %2536 = vmatprep.subr.mxu0 %v14447_v47  ;;  %2422 = vmatpush1.msra.mxu1 %v14196_v41  ;;  %v9336_v41 = vld [vmem:[%s12812_s24 + $0x48] sm:$0x7f] }
 0x2fa   : > { %2537 = vmatpush1.msra.mxu0 %v14454_v56  ;;  %2423 = vmatprep.subr.mxu1 %v14203_v43  ;;  %v9373_v43 = vld [vmem:[%s20310_s1 + $0x200] sm:$0xff] }
 0x2fb   : > { %2538 = vmatprep.subr.mxu0 %v14461_v59  ;;  %2424 = vmatpush1.msra.mxu1 %v14210_v13  ;;  %v9406_v13 = vld [vmem:[%s12812_s24 + $0x59] sm:$0x7f] }
 0x2fc   : > { %2539 = vmatpush1.msra.mxu0 %v14468_v63  ;;  %2425 = vmatprep.subr.mxu1 %v14217_v17  ;;  %v2715_v17 = vld [vmem:[%s20312_s3 + $0x78] sm:$0xff] }
 0x2fd   : > { %2540 = vmatprep.subr.mxu0 %v14475_v1  ;;  %2426 = vmatpush1.msra.mxu1 %v14224_v54  ;;  %v2714_v54 = vld [vmem:[%s20312_s3 + $0x70] sm:$0xff] }
 0x2fe   : > { %2541 = vmatpush1.msra.mxu0 %v14482_v0  ;;  %2427 = vmatprep.subr.mxu1 %v14231_v50  ;;  %v9422_v50 = vld [vmem:[%s20312_s3 + $0xf8] sm:$0xff] }
 0x2ff   : > { %2542 = vmatprep.subr.mxu0 %v14489_v9  ;;  %2428 = vmatpush1.msra.mxu1 %v14238_v52  ;;  %v9421_v52 = vld [vmem:[%s20312_s3 + $0xf0] sm:$0xff] }
 0x300   : > { %2543 = vmatpush1.msra.mxu0 %v14496_v37  ;;  %2429 = vmatprep.subr.mxu1 %v14245_v58  ;;  %v2713_v58 = vld [vmem:[%s20312_s3 + $0x68] sm:$0xff] }
 0x301   : > { %2544 = vmatprep.subr.mxu0 %v14503_v29  ;;  %2430 = vmatpush1.msra.mxu1 %v14252_v49  ;;  %v9420_v49 = vld [vmem:[%s20312_s3 + $0xe8] sm:$0xff] }
 0x302   : > { %2545 = vmatpush1.msra.mxu0 %v14510_v31  ;;  %2431 = vmatprep.subr.mxu1 %v14259_v60  ;;  %v2712_v60 = vld [vmem:[%s20312_s3 + $0x60] sm:$0xff] }
 0x303   : > { %2546 = vmatprep.subr.mxu0 %v14517_v39  ;;  %2432 = vmatpush1.msra.mxu1 %v14266_v2  ;;  %v9419_v2 = vld [vmem:[%s20312_s3 + $0xe0] sm:$0xff] }
 0x304   : > { %2547 = vmatpush1.msra.mxu0 %v14524_v62  ;;  %2433 = vmatprep.subr.mxu1 %v14273_v4  ;;  %v2711_v4 = vld [vmem:[%s20312_s3 + $0x58] sm:$0xff] }
 0x305   : > { %2548 = vmatprep.subr.mxu0 %v14531_v15  ;;  %2434 = vmatpush1.msra.mxu1 %v14280_v6  ;;  %v9418_v6 = vld [vmem:[%s20312_s3 + $0xd8] sm:$0xff] }
 0x306   : > { %2549 = vmatpush1.msra.mxu0 %v14538_v23  ;;  %2435 = vmatprep.subr.mxu1 %v14287_v8  ;;  %v2710_v8 = vld [vmem:[%s20312_s3 + $0x50] sm:$0xff] }
 0x307   : > { %2550 = vmatprep.subr.mxu0 %v14545_v45  ;;  %2436 = vmatpush1.msra.mxu1 %v14294_v42  ;;  %v9417_v42 = vld [vmem:[%s20312_s3 + $0xd0] sm:$0xff] }
 0x308   : > { %2551 = vmatpush1.msra.mxu0 %v14552_v53  ;;  %2437 = vmatprep.subr.mxu1 %v14301_v10  ;;  %v2709_v10 = vld [vmem:[%s20312_s3 + $0x48] sm:$0xff] }
 0x309   : > { %2552 = vmatprep.subr.mxu0 %v14559_v57  ;;  %2438 = vmatpush1.msra.mxu1 %v14308_v12  ;;  %v2708_v12 = vld [vmem:[%s20312_s3 + $0x40] sm:$0xff] }
 0x30a   : > { %2553 = vmatpush1.msra.mxu0 %v14566_v55  ;;  %2439 = vmatprep.subr.mxu1 %v14315_v14  ;;  %v9416_v14 = vld [vmem:[%s20312_s3 + $0xc8] sm:$0xff] }
 0x30b   : > { %2554 = vmatprep.subr.mxu0 %v14573_v5  ;;  %2410 = vmatprep.mubr.f32.mxu0 %v20426_v61 }
 0x30c   : > { %2440 = vmatpush1.msra.mxu1 %v14322_v16  ;;  %2555 = vmatpush1.msra.mxu0 %v14580_v11  ;;  %v2707_v16 = vld [vmem:[%s20312_s3 + $0x38] sm:$0xff] }
 0x30d   : > { %2411 = vmatmul.mubr.f32.gmra.mxu0 %v9372_v51  ;;  %2441 = vmatprep.subr.mxu1 %v14331_v18  ;;  %v9415_v18 = vld [vmem:[%s20312_s3 + $0xc0] sm:$0xff] }
 0x30e   : > { %2556 = vmatprep.subr.mxu0 %v9376_v27  ;;  %2442 = vmatpush1.msra.mxu1 %v14341_v20  ;;  %v9414_v20 = vld [vmem:[%s20312_s3 + $0xb8] sm:$0xff] }
 0x30f   : > { %2557 = vmatpush1.msra.mxu0 %v9375_v33  ;;  %2333 = vmatprep.mubr.f32.mxu1 %v20426_v61 }
 0x310   : > { %2443 = vmatprep.subr.mxu1 %v14348_v22  ;;  %2558 = vmatprep.subr.mxu0 %v9374_v35  ;;  %v2705_v22 = vld [vmem:[%s20312_s3 + $0x28] sm:$0xff] }
 0x311   : > { %2334 = vmatmul.mubr.f32.gmra.mxu1 %v9336_v41  ;;  %2559 = vmatpush1.msra.mxu0 %v9373_v43 }
 0x312   : > { %2444 = vmatpush1.msra.mxu1 %v14355_v24  ;;  %2592 = vmatprep.mubr.f32.mxu0 %v20426_v61  ;;  %v9413_v24 = vld [vmem:[%s20312_s3 + $0xb0] sm:$0xff] }
 0x313   : > { %2445 = vmatprep.subr.mxu1 %v14362_v26  ;;  %2593 = vmatmul.mubr.f32.vlgmr.msra.gmra.mxu0 %v14379_v32  ;;  %v2704_v26 = vld [vmem:[%s20312_s3 + $0x20] sm:$0xff] }
 0x314   : > { %2446 = vmatpush1.msra.mxu1 %v14376_v30  ;;  %2481 = vmatprep.mubr.f32.mxu1 %v20426_v61  ;;  %v2703_v30 = vld [vmem:[%s20312_s3 + $0x18] sm:$0xff]  ;;  %v9411_v32 = vld [vmem:[%s20312_s3 + $0xa0] sm:$0xff] }
 0x315   : > { %2447 = vmatprep.subr.mxu1 %v14391_v36  ;;  %2598 = vmatprep.mubr.f32.mxu0 %v20426_v61  ;;  %v9410_v36 = vld [vmem:[%s20312_s3 + $0x98] sm:$0xff] }
 0x316   : > { %2448 = vmatpush1.msra.mxu1 %v14403_v40  ;;  %11038 = vmatprep.subr.mxu0 %v9422_v50  ;;  %v9409_v40 = vld [vmem:[%s20312_s3 + $0x90] sm:$0xff] }
 0x317   : > { %2482 = vmatmul.mubr.f32.vlgmr.msra.gmra.mxu1 %v14150_v3  ;;  %2599 = vmatmul.mubr.f32.gmra.mxu0 %v9372_v51  ;;  %v9405_v3 = vld [vmem:[%s12812_s24 + $0x51] sm:$0xff] }
 0x318   : > { %2609 = vmatprep.subr.mxu1 %v14369_v28  ;;  %2487 = vmatprep.mubr.f32.mxu1 %v20426_v61  ;;  %v9412_v28 = vld [vmem:[%s20312_s3 + $0xa8] sm:$0xff] }
 0x319   : > { %2610 = vmatpush1.msra.mxu1 %v14386_v34  ;;  %11039 = vmatpush3.msra.mxu0 %v9422_v50  ;;  %v2702_v34 = vld [vmem:[%s20312_s3 + $0x10] sm:$0xff] }
 0x31a   : > { %2611 = vmatprep.subr.mxu1 %v14398_v38  ;;  %11040 = vmatprep.subr.mxu0 %v9421_v52  ;;  %v2701_v38 = vld [vmem:[%s20312_s3 + $0x8] sm:$0xff] }
 0x31b   : > { %2612 = vmatpush1.msra.mxu1 %v14410_v44  ;;  %11041 = vmatpush3.msra.mxu0 %v9421_v52  ;;  %v2700_v44 = vld [vmem:[%s20312_s3] sm:$0xff] }
 0x31c   : > { %2613 = vmatprep.subr.mxu1 %v14420_v48  ;;  %2488 = vmatmul.mubr.f32.gmra.mxu1 %v14336_v19  ;;  %v2706_v19 = vld [vmem:[%s20312_s3 + $0x30] sm:$0xff]  ;;  %v14746_v48 = vld [vmem:[%s20310_s1 + $0x1f8] sm:$0xff] }
 0x31d   : > { %2614 = vmatpush1.msra.mxu1 %v14427_v7  ;;  %2673 = vmatprep.mubr.f32.mxu1 %v20426_v61 }
 0x31e   : > { %2615 = vmatprep.subr.mxu1 %v14433_v21  ;;  %11042 = vmatprep.subr.mxu0 %v9420_v49  ;;  %v9407_v21 = vld [vmem:[%s20312_s3 + $0x80] sm:$0xff] }
 0x31f   : > { %2616 = vmatpush1.msra.mxu1 %v14440_v25  ;;  %11043 = vmatpush3.msra.mxu0 %v9420_v49 }
 0x320   : > { %2617 = vmatprep.subr.mxu1 %v14447_v47  ;;  %11044 = vmatprep.subr.mxu0 %v9419_v2  ;;  %v14755_v47 = vld [vmem:[%s20312_s3 + $0x178] sm:$0xff] }
 0x321   : > { %2618 = vmatpush1.msra.mxu1 %v14454_v56  ;;  %11045 = vmatpush3.msra.mxu0 %v9419_v2 }
 0x322   : > { %2619 = vmatprep.subr.mxu1 %v14461_v59  ;;  %11046 = vmatprep.subr.mxu0 %v9418_v6 }
 0x323   : > { %2620 = vmatpush1.msra.mxu1 %v14468_v63  ;;  %11047 = vmatpush3.msra.mxu0 %v9418_v6 }
 0x324   : > { %2621 = vmatprep.subr.mxu1 %v14475_v1  ;;  %11048 = vmatprep.subr.mxu0 %v9417_v42 }
 0x325   : > { %2622 = vmatpush1.msra.mxu1 %v14482_v0  ;;  %11049 = vmatpush3.msra.mxu0 %v9417_v42 }
 0x326   : > { %2623 = vmatprep.subr.mxu1 %v14489_v9  ;;  %11050 = vmatprep.subr.mxu0 %v9416_v14 }
 0x327   : > { %2624 = vmatpush1.msra.mxu1 %v14496_v37  ;;  %11051 = vmatpush3.msra.mxu0 %v9416_v14 }
 0x328   : > { %2625 = vmatprep.subr.mxu1 %v14503_v29  ;;  %11052 = vmatprep.subr.mxu0 %v9415_v18  ;;  %v12247_v29 = vld [vmem:[%s20313_s4] ss:$0 sm:$0xff] }
 0x329   : > { %2626 = vmatpush1.msra.mxu1 %v14510_v31  ;;  %11053 = vmatpush3.msra.mxu0 %v9415_v18 }
 0x32a   : > { %2627 = vmatprep.subr.mxu1 %v14517_v39  ;;  %11054 = vmatprep.subr.mxu0 %v9414_v20 }
 0x32b   : > { %2628 = vmatpush1.msra.mxu1 %v14524_v62  ;;  %11055 = vmatpush3.msra.mxu0 %v9414_v20 }
 0x32c   : > { %2629 = vmatprep.subr.mxu1 %v14531_v15  ;;  %11056 = vmatprep.subr.mxu0 %v9413_v24 }
 0x32d   : > { %2630 = vmatpush1.msra.mxu1 %v14538_v23  ;;  %11057 = vmatpush3.msra.mxu0 %v9413_v24 }
 0x32e   : > { %2631 = vmatprep.subr.mxu1 %v14545_v45  ;;  %11058 = vmatprep.subr.mxu0 %v9412_v28 }
 0x32f   : > { %2632 = vmatpush1.msra.mxu1 %v14552_v53  ;;  %11059 = vmatpush3.msra.mxu0 %v9412_v28 }
 0x330   : > { %2633 = vmatprep.subr.mxu1 %v14559_v57  ;;  %11060 = vmatprep.subr.mxu0 %v9411_v32 }
 0x331   : > { %2634 = vmatpush1.msra.mxu1 %v14566_v55  ;;  %11061 = vmatpush3.msra.mxu0 %v9411_v32 }
 0x332   : > { %2635 = vmatprep.subr.mxu1 %v14573_v5  ;;  %11062 = vmatprep.subr.mxu0 %v9410_v36 }
 0x333   : > { %2636 = vmatpush1.msra.mxu1 %v14580_v11  ;;  %11063 = vmatpush3.msra.mxu0 %v9410_v36 }
 0x334   : > { %2637 = vmatprep.subr.mxu1 %v9376_v27  ;;  %11064 = vmatprep.subr.mxu0 %v9409_v40 }
 0x335   : > { %2638 = vmatpush1.msra.mxu1 %v9375_v33  ;;  %11065 = vmatpush3.msra.mxu0 %v9409_v40 }
 0x336   : > { %2639 = vmatprep.subr.mxu1 %v9374_v35  ;;  %11066 = vmatprep.subr.mxu0 %v9408_v46 }
 0x337   : > { %2640 = vmatpush1.msra.mxu1 %v9373_v43  ;;  %11067 = vmatpush3.msra.mxu0 %v9408_v46 }
 0x338   : > { %2674 = vmatmul.mubr.f32.vlgmr.msra.gmra.mxu1 %v9405_v3  ;;  %11073 = vmatprep.subr.mxu1 %v2715_v17 }
 0x339   : > { %2679 = vmatprep.mubr.f32.mxu1 %v20426_v61  ;;  %11074 = vmatpush3.msra.mxu1 %v2715_v17 }
 0x33a   : > { %11075 = vmatprep.subr.mxu1 %v2714_v54  ;;  %11068 = vmatprep.subr.mxu0 %v9407_v21 }
 0x33b   : > { %11076 = vmatpush3.msra.mxu1 %v2714_v54  ;;  %11069 = vmatpush3.msra.mxu0 %v9407_v21 }
 0x33c   : > { %2680 = vmatmul.mubr.f32.gmra.mxu1 %v9406_v13  ;;  %11077 = vmatprep.subr.mxu1 %v2713_v58 }
 0x33d   : > { %11078 = vmatpush3.msra.mxu1 %v2713_v58  ;;  %11108 = vmatprep.subr.mxu0 %v14755_v47 }
 0x33e   : > { %11079 = vmatprep.subr.mxu1 %v2712_v60 }
 0x33f   : > { %11080 = vmatpush3.msra.mxu1 %v2712_v60 }
 0x340   : > { %11081 = vmatprep.subr.mxu1 %v2711_v4 }
 0x341   : > { %11082 = vmatpush3.msra.mxu1 %v2711_v4 }
 0x342   : > { %11083 = vmatprep.subr.mxu1 %v2710_v8 }
 0x343   : > { %11084 = vmatpush3.msra.mxu1 %v2710_v8 }
 0x344   : > { %11085 = vmatprep.subr.mxu1 %v2709_v10 }
 0x345   : > { %11086 = vmatpush3.msra.mxu1 %v2709_v10 }
 0x346   : > { %11087 = vmatprep.subr.mxu1 %v2708_v12 }
 0x347   : > { %11088 = vmatpush3.msra.mxu1 %v2708_v12 }
 0x348   : > { %11089 = vmatprep.subr.mxu1 %v2707_v16 }
 0x349   : > { %11090 = vmatpush3.msra.mxu1 %v2707_v16 }
 0x34a   : > { %11091 = vmatprep.subr.mxu1 %v2706_v19 }
 0x34b   : > { %11092 = vmatpush3.msra.mxu1 %v2706_v19 }
 0x34c   : > { %11093 = vmatprep.subr.mxu1 %v2705_v22 }
 0x34d   : > { %11094 = vmatpush3.msra.mxu1 %v2705_v22 }
 0x34e   : > { %11095 = vmatprep.subr.mxu1 %v2704_v26 }
 0x34f   : > { %11096 = vmatpush3.msra.mxu1 %v2704_v26 }
 0x350   : > { %11097 = vmatprep.subr.mxu1 %v2703_v30 }
 0x351   : > { %11098 = vmatpush3.msra.mxu1 %v2703_v30 }
 0x352   : > { %11099 = vmatprep.subr.mxu1 %v2702_v34 }
 0x353   : > { %11100 = vmatpush3.msra.mxu1 %v2702_v34 }
 0x354   : > { %11101 = vmatprep.subr.mxu1 %v2701_v38 }
 0x355   : > { %11102 = vmatpush3.msra.mxu1 %v2701_v38 }
 0x356   : > { %11103 = vmatprep.subr.mxu1 %v2700_v44 }
 0x357   : > { %11104 = vmatpush3.msra.mxu1 %v2700_v44 }
 0x358   : > { %3066 = vmatprep.subr.mxu1 %v14746_v48 }
 0x36c   : > { %v11002_v25 = vpop.f32.mrf.mxu0 }
 0x36e   : > { %v2000_v63 = vpop.f32.mrf.mxu0 }
 0x370   : > { %v10967_v7 = vpop.f32.mrf.mxu1 }
 0x371   : > { %v2006_v59 = vadd.f32 %v11002_v25, %v10967_v7  ;;  %v12248_v7 = vld [vmem:[%s20311_s2] ss:$0 sm:$0xff] }
 0x372   : > { %v1925_v56 = vpop.f32.mrf.mxu1 }
 0x373   : > { %v2001_v0 = vadd.f32 %v2000_v63, %v1925_v56 }
 0x38e   : > { %v2252_v45 = vpop.f32.mrf.mxu0 }
 0x390   : > { %v11037_v1 = vpop.f32.mrf.mxu1  ;;  %v2254_v53 = vpop.f32.mrf.mxu0 }
 0x391   : > { %v2106_v9 = vadd.f32 %v11037_v1, %v2006_v59  ;;  %v14769_v1 = vld [vmem:[%s20310_s1 + $0x1f0] sm:$0xff] }
 0x392   : > { %v2096_v37 = vpop.f32.mrf.mxu1 }
 0x393   : > { %v2108_v31 = vadd.f32 %v12247_v29, %v2106_v9  ;;  %v2105_v39 = vadd.f32 %v2096_v37, %v2001_v0  ;;  %v14774_v0 = vld [vmem:[%s20310_s1 + $0x1e8] sm:$0xff]  ;;  %v14780_v9 = vld [vmem:[%s20310_s1 + $0x1e0] sm:$0xff] }
 0x395   : > { %v2110_v62 = vmax.f32 %v2108_v31, 0.0  ;;  %v2107_v15 = vadd.f32 %v12247_v29, %v2105_v39  ;;  %v14787_v31 = vld [vmem:[%s20310_s1 + $0x1d8] sm:$0xff] }
 0x397   : > { %2113 = vst [vmem:[#allocation2 + $0x18] sm:$0x1f] %v2110_v62  ;;  %v2109_v23 = vmax.f32 %v2107_v15, 0.0  ;;  %v14796_v15 = vld [vmem:[%s20310_s1 + $0x1d0] sm:$0xff] }
 0x399   : > { %2112 = vst [vmem:[#allocation2 + $0x10] sm:$0xff] %v2109_v23  ;;  %v9437_v23 = vld [vmem:[%s20312_s3 + $0x170] sm:$0xff] }
 0x3ab   : > { %v2258_v57 = vpop.f32.mrf.mxu0 }
 0x3ad   : > { %v2260_v55 = vpop.f32.mrf.mxu0 }
 0x3b0   : > { %v2406_v11 = vpop.f32.mrf.mxu0 }
 0x3b2   : > { %v2408_v27 = vpop.f32.mrf.mxu0 }
 0x3b4   : > { %v2329_v5 = vpop.f32.mrf.mxu1 }
 0x3b5   : > { %v2330_v60 = vadd.f32 %v2329_v5, %v2252_v45  ;;  %v9436_v5 = vld [vmem:[%s20312_s3 + $0x168] sm:$0xff] }
 0x3b6   : > { %v2331_v51 = vpop.f32.mrf.mxu1 }
 0x3b7   : > { %v2332_v52 = vadd.f32 %v2331_v51, %v2254_v53  ;;  %v14806_v53 = vld [vmem:[%s20310_s1 + $0x1c8] sm:$0xff]  ;;  %v9435_v51 = vld [vmem:[%s20312_s3 + $0x160] sm:$0xff] }
 0x3cd   : > { %v2412_v35 = vpop.f32.mrf.mxu0 }
 0x3cf   : > { %v2414_v43 = vpop.f32.mrf.mxu0 }
 0x3d1   : > { %v2335_v33 = vpop.f32.mrf.mxu1 }
 0x3d2   : > { %v2336_v14 = vadd.f32 %v2335_v33, %v2258_v57  ;;  %v14845_v33 = vld [vmem:[%s20310_s1 + $0x1a0] sm:$0xff] }
 0x3d3   : > { %v2337_v41 = vpop.f32.mrf.mxu1  ;;  %v2594_v13 = vpop.f32.mrf.mxu0 }
 0x3d4   : > { %v2605_v42 = vadd.f32 %v2594_v13, %v2330_v60  ;;  %v2338_v16 = vadd.f32 %v2337_v41, %v2260_v55  ;;  %v14816_v55 = vld [vmem:[%s20310_s1 + $0x1c0] sm:$0xff]  ;;  %v14854_v41 = vld [vmem:[%s20310_s1 + $0x198] sm:$0xff]  ;;  %v14869_v13 = vld [vmem:[%s20310_s1 + $0x188] sm:$0xff] }
 0x3d5   : > { %v2596_v54 = vpop.f32.mrf.mxu0  ;;  %v14905_v60 = vld [vmem:[%s20310_s1 + $0x160] sm:$0xff] }
 0x3d6   : > { %v2606_v2 = vadd.f32 %v2596_v54, %v2332_v52  ;;  %v9432_v54 = vld [vmem:[%s20312_s3 + $0x148] sm:$0xff]  ;;  %v14890_v52 = vld [vmem:[%s20310_s1 + $0x170] sm:$0xff] }
 0x3d7   : > { %v2483_v3 = vpop.f32.mrf.mxu1  ;;  %v2600_v58 = vpop.f32.mrf.mxu0 }
 0x3d8   : > { %v2484_v6 = vadd.f32 %v2483_v3, %v2406_v11  ;;  %v2690_v20 = vmax.f32 %v2605_v42, %v2606_v2  ;;  %v2607_v34 = vadd.f32 %v2600_v58, %v2336_v14  ;;  %v14830_v11 = vld [vmem:[%s20310_s1 + $0x1b0] sm:$0xff]  ;;  %v9431_v58 = vld [vmem:[%s20312_s3 + $0x140] sm:$0xff]  ;;  %v9430_v2 = vld [vmem:[%s20312_s3 + $0x138] sm:$0xff] }
 0x3d9   : > { %v2485_v17 = vpop.f32.mrf.mxu1  ;;  %v2602_v10 = vpop.f32.mrf.mxu0  ;;  %v9433_v3 = vld [vmem:[%s20312_s3 + $0x150] sm:$0xff]  ;;  %v14929_v42 = vld [vmem:[%s20310_s1 + $0x148] sm:$0xff]  ;;  %v14944_v14 = vld [vmem:[%s20310_s1 + $0x138] sm:$0xff] }
 0x3da   : > { %v2486_v8 = vadd.f32 %v2485_v17, %v2408_v27  ;;  %v2608_v24 = vadd.f32 %v2602_v10, %v2338_v16  ;;  %v14839_v27 = vld [vmem:[%s20310_s1 + $0x1a8] sm:$0xff]  ;;  %v14875_v17 = vld [vmem:[%s20310_s1 + $0x180] sm:$0xff]  ;;  %v14950_v16 = vld [vmem:[%s20310_s1 + $0x130] sm:$0xff] }
 0x3db   : > { %v14935_v10 = vld [vmem:[%s20310_s1 + $0x140] sm:$0xff] }
 0x3dc   : > { %v2489_v50 = vpop.f32.mrf.mxu1  ;;  %v2691_v44 = vmax.f32 %v2607_v34, %v2608_v24  ;;  %v14974_v24 = vld [vmem:[%s20310_s1 + $0x118] sm:$0xff]  ;;  %v9424_v34 = vld [vmem:[%s20312_s3 + $0x108] sm:$0xff] }
 0x3dd   : > { %v2490_v26 = vadd.f32 %v2489_v50, %v2412_v35  ;;  %v9434_v35 = vld [vmem:[%s20312_s3 + $0x158] sm:$0xff] }
 0x3de   : > { %v2491_v49 = vpop.f32.mrf.mxu1  ;;  %v14884_v50 = vld [vmem:[%s20310_s1 + $0x178] sm:$0xff] }
 0x3df   : > { %v2492_v28 = vadd.f32 %v2491_v49, %v2414_v43  ;;  %v14860_v43 = vld [vmem:[%s20310_s1 + $0x190] sm:$0xff]  ;;  %v14899_v49 = vld [vmem:[%s20310_s1 + $0x168] sm:$0xff] }
 0x3f8   : > { %v2675_v4 = vpop.f32.mrf.mxu1 }
 0x3f9   : > { %v2686_v18 = vadd.f32 %v2675_v4, %v2484_v6  ;;  %v14914_v4 = vld [vmem:[%s20310_s1 + $0x158] sm:$0xff]  ;;  %v14920_v6 = vld [vmem:[%s20310_s1 + $0x150] sm:$0xff] }
 0x3fa   : > { %v2677_v12 = vpop.f32.mrf.mxu1 }
 0x3fb   : > { %v2687_v19 = vadd.f32 %v2677_v12, %v2486_v8  ;;  %v9429_v8 = vld [vmem:[%s20312_s3 + $0x130] sm:$0xff]  ;;  %v9428_v12 = vld [vmem:[%s20312_s3 + $0x128] sm:$0xff] }
 0x3fc   : > { %v2681_v22 = vpop.f32.mrf.mxu1 }
 0x3fd   : > { %v2692_v30 = vmax.f32 %v2686_v18, %v2687_v19  ;;  %v2688_v38 = vadd.f32 %v2681_v22, %v2490_v26  ;;  %v9427_v18 = vld [vmem:[%s20312_s3 + $0x120] sm:$0xff]  ;;  %v14959_v19 = vld [vmem:[%s20310_s1 + $0x128] sm:$0xff]  ;;  %v9426_v22 = vld [vmem:[%s20312_s3 + $0x118] sm:$0xff] }
 0x3fe   : > { %v2683_v32 = vpop.f32.mrf.mxu1  ;;  %v14980_v26 = vld [vmem:[%s20310_s1 + $0x110] sm:$0xff] }
 0x3ff   : > { %v2694_v36 = vmax.f32 %v2690_v20, %v2692_v30  ;;  %v2689_v40 = vadd.f32 %v2683_v32, %v2492_v28  ;;  %v14965_v20 = vld [vmem:[%s20310_s1 + $0x120] sm:$0xff]  ;;  %v9425_v28 = vld [vmem:[%s20312_s3 + $0x110] sm:$0xff]  ;;  %v14989_v30 = vld [vmem:[%s20310_s1 + $0x108] sm:$0xff] }
 0x400   : > { %v14995_v32 = vld [vmem:[%s20310_s1 + $0x100] sm:$0xff] }
 0x401   : > { %v2693_v46 = vmax.f32 %v2688_v38, %v2689_v40  ;;  %v2696_v21 = vadd.f32 %v12248_v7, %v2694_v36  ;;  %v15003_v36 = vld [vmem:[%s12812_s24 + $0x70] sm:$0xff]  ;;  %v9423_v38 = vld [vmem:[%s20312_s3 + $0x100] sm:$0xff]  ;;  %v15014_v40 = vld [vmem:[%s20310_s1 + $0xf8] sm:$0xff] }
 0x403   : > { %v2695_v25 = vmax.f32 %v2691_v44, %v2693_v46  ;;  %v2698_v56 = vmax.f32 %v2696_v21, 0.0  ;;  %v15020_v44 = vld [vmem:[%s20310_s1 + $0xf0] sm:$0xff]  ;;  %v15035_v46 = vld [vmem:[%s20310_s1 + $0xe0] sm:$0xff] }
 0x404   : > { %v15049_v21 = vld [vmem:[%s20310_s1 + $0xd0] sm:$0xff] }
 0x405   : > { %v2697_v59 = vadd.f32 %v12248_v7, %v2695_v25  ;;  %11105 = vmatprep.mubr.f32.mxu1 %v2698_v56  ;;  %v2734_v37 = vrot.slane %v2698_v56, 1  ;;  %v2905_v45 = vrot.slane %v2698_v56, 2  ;;  %v15042_v7 = vld [vmem:[%s20310_s1 + $0xd8] sm:$0xff]  ;;  %v15056_v25 = vld [vmem:[%s20310_s1 + $0xc8] sm:$0xff]  ;;  %v15063_v56 = vld [vmem:[%s20310_s1 + $0xc0] sm:$0xff] }
 0x407   : > { %v14764_v63 = vmax.f32 %v2697_v59, 0.0  ;;  %v15070_v59 = vld [vmem:[%s20310_s1 + $0xb8] sm:$0xff] }
 0x409   : > { %11106 = vmatmul.mubr.f32.vlgmr.msra.gmra.mxu1 %v14764_v63  ;;  %v2735_v29 = vrot.slane %v14764_v63, 1  ;;  %v2906_v39 = vrot.slane %v14764_v63, 2  ;;  %v15077_v63 = vld [vmem:[%s20310_s1 + $0xb0] sm:$0xff] }
 0x40a   : > { %3067 = vmatpush1.msra.mxu1 %v14769_v1  ;;  %3130 = vmatprep.mubr.f32.mxu1 %v20426_v61 }
 0x40b   : > { %3068 = vmatprep.subr.mxu1 %v14774_v0  ;;  %v2736_v62 = vsel %vm972_vm0, %v2734_v37, %v2735_v29  ;;  %v2907_v57 = vsel %vm1145_vm1, %v2905_v45, %v2906_v39  ;;  %v15105_v37 = vld [vmem:[%s20310_s1 + $0x90] sm:$0xff]  ;;  %v15154_v45 = vld [vmem:[%s20310_s1 + $0x58] sm:$0xff] }
 0x40c   : > { %3069 = vmatpush1.msra.mxu1 %v14780_v9  ;;  %11070 = vmatprep.mubr.f32.mxu0 %v2736_v62  ;;  %v15133_v62 = vld [vmem:[%s20310_s1 + $0x70] sm:$0xff] }
 0x40d   : > { %3070 = vmatprep.subr.mxu1 %v14787_v31  ;;  %11071 = vmatmul.mubr.f32.vlgmr.msra.gmra.mxu0 %v2735_v29  ;;  %v15112_v29 = vld [vmem:[%s20310_s1 + $0x88] sm:$0xff] }
 0x40e   : > { %11109 = vmatpush3.msra.mxu0 %v14755_v47  ;;  %3071 = vmatpush1.msra.mxu1 %v14796_v15  ;;  %v14824_v47 = vld [vmem:[%s20310_s1 + $0x1b8] sm:$0xff] }
 0x40f   : > { %11110 = vmatprep.subr.mxu0 %v9437_v23  ;;  %11140 = vmatprep.mubr.f32.mxu0 %v2907_v57  ;;  %v15168_v57 = vld [vmem:[%s20310_s1 + $0x48] sm:$0xff] }
 0x410   : > { %3072 = vmatprep.subr.mxu1 %v14806_v53  ;;  %11111 = vmatpush3.msra.mxu0 %v9437_v23  ;;  %v15147_v23 = vld [vmem:[%s20310_s1 + $0x60] sm:$0xff] }
 0x411   : > { %3073 = vmatpush1.msra.mxu1 %v14816_v55  ;;  %11112 = vmatprep.subr.mxu0 %v9436_v5 }
 0x412   : > { %3074 = vmatprep.subr.mxu1 %v14824_v47  ;;  %11113 = vmatpush3.msra.mxu0 %v9436_v5  ;;  %v15184_v5 = vld [vmem:[%s20310_s1 + $0x38] sm:$0xff] }
 0x413   : > { %3075 = vmatpush1.msra.mxu1 %v14830_v11  ;;  %11114 = vmatprep.subr.mxu0 %v9435_v51 }
 0x414   : > { %3076 = vmatprep.subr.mxu1 %v14839_v27  ;;  %11115 = vmatpush3.msra.mxu0 %v9435_v51  ;;  %v15201_v51 = vld [vmem:[%s20310_s1 + $0x28] sm:$0xff] }
 0x415   : > { %3077 = vmatpush1.msra.mxu1 %v14845_v33  ;;  %11116 = vmatprep.subr.mxu0 %v9434_v35 }
 0x416   : > { %3078 = vmatprep.subr.mxu1 %v14854_v41  ;;  %11117 = vmatpush3.msra.mxu0 %v9434_v35  ;;  %v15222_v35 = vld [vmem:[%s20310_s1 + $0x2f8] sm:$0xff] }
 0x417   : > { %3079 = vmatpush1.msra.mxu1 %v14860_v43  ;;  %11118 = vmatprep.subr.mxu0 %v9433_v3 }
 0x418   : > { %3080 = vmatprep.subr.mxu1 %v14869_v13  ;;  %11119 = vmatpush3.msra.mxu0 %v9433_v3  ;;  %v15239_v3 = vld [vmem:[%s20310_s1 + $0x2f0] sm:$0xff] }
 0x419   : > { %3081 = vmatpush1.msra.mxu1 %v14875_v17  ;;  %11120 = vmatprep.subr.mxu0 %v9432_v54 }
 0x41a   : > { %3082 = vmatprep.subr.mxu1 %v14884_v50  ;;  %11121 = vmatpush3.msra.mxu0 %v9432_v54  ;;  %v15256_v54 = vld [vmem:[%s20310_s1] sm:$0xff] }
 0x41b   : > { %3083 = vmatpush1.msra.mxu1 %v14890_v52  ;;  %11122 = vmatprep.subr.mxu0 %v9431_v58 }
 0x41c   : > { %3084 = vmatprep.subr.mxu1 %v14899_v49  ;;  %11123 = vmatpush3.msra.mxu0 %v9431_v58  ;;  %v15273_v58 = vld [vmem:[%s20310_s1 + $0x2d8] sm:$0xff] }
 0x41d   : > { %3085 = vmatpush1.msra.mxu1 %v14905_v60  ;;  %11124 = vmatprep.subr.mxu0 %v9430_v2 }
 0x41e   : > { %3086 = vmatprep.subr.mxu1 %v14914_v4  ;;  %11125 = vmatpush3.msra.mxu0 %v9430_v2  ;;  %v15293_v2 = vld [vmem:[%s20310_s1 + $0x2c0] sm:$0xff] }
 0x41f   : > { %3087 = vmatpush1.msra.mxu1 %v14920_v6  ;;  %11126 = vmatprep.subr.mxu0 %v9429_v8 }
 0x420   : > { %3088 = vmatprep.subr.mxu1 %v14929_v42  ;;  %11127 = vmatpush3.msra.mxu0 %v9429_v8  ;;  %v15314_v8 = vld [vmem:[%s20310_s1 + $0x2a8] sm:$0xff] }
 0x421   : > { %3089 = vmatpush1.msra.mxu1 %v14935_v10  ;;  %11128 = vmatprep.subr.mxu0 %v9428_v12 }
 0x422   : > { %3090 = vmatprep.subr.mxu1 %v14944_v14  ;;  %11129 = vmatpush3.msra.mxu0 %v9428_v12  ;;  %v15335_v12 = vld [vmem:[%s20310_s1 + $0x290] sm:$0xff] }
 0x423   : > { %3091 = vmatpush1.msra.mxu1 %v14950_v16  ;;  %11130 = vmatprep.subr.mxu0 %v9427_v18 }
 0x424   : > { %3092 = vmatprep.subr.mxu1 %v14959_v19  ;;  %11131 = vmatpush3.msra.mxu0 %v9427_v18  ;;  %v15356_v18 = vld [vmem:[%s20310_s1 + $0x278] sm:$0xff] }
 0x425   : > { %3093 = vmatpush1.msra.mxu1 %v14965_v20  ;;  %11132 = vmatprep.subr.mxu0 %v9426_v22 }
 0x426   : > { %3094 = vmatprep.subr.mxu1 %v14974_v24  ;;  %11133 = vmatpush3.msra.mxu0 %v9426_v22  ;;  %v15377_v22 = vld [vmem:[%s20310_s1 + $0x260] sm:$0xff] }
 0x427   : > { %3095 = vmatpush1.msra.mxu1 %v14980_v26  ;;  %11134 = vmatprep.subr.mxu0 %v9425_v28 }
 0x428   : > { %3096 = vmatprep.subr.mxu1 %v14989_v30  ;;  %11135 = vmatpush3.msra.mxu0 %v9425_v28  ;;  %v15398_v28 = vld [vmem:[%s20310_s1 + $0x248] sm:$0xff] }
 0x429   : > { %3097 = vmatpush1.msra.mxu1 %v14995_v32  ;;  %11136 = vmatprep.subr.mxu0 %v9424_v34 }
 0x42a   : > { %3220 = vmatprep.subr.mxu1 %v14746_v48  ;;  %11137 = vmatpush3.msra.mxu0 %v9424_v34  ;;  %v15028_v48 = vld [vmem:[%s20310_s1 + $0xe8] sm:$0xff]  ;;  %v15419_v34 = vld [vmem:[%s20310_s1 + $0x230] sm:$0xff] }
 0x42b   : > { %3131 = vmatmul.mubr.f32.vlgmr.msra.gmra.mxu1 %v15003_v36  ;;  %11138 = vmatprep.subr.mxu0 %v9423_v38 }
 0x42c   : > { %3221 = vmatpush1.msra.mxu1 %v14769_v1  ;;  %11139 = vmatpush3.msra.mxu0 %v9423_v38  ;;  %v15084_v1 = vld [vmem:[%s20310_s1 + $0xa8] sm:$0xff] }
 0x42d   : > { %3222 = vmatprep.subr.mxu1 %v14774_v0  ;;  %11141 = vmatmul.mubr.f32.vlgmr.msra.gmra.mxu0 %v2906_v39  ;;  %v15091_v0 = vld [vmem:[%s20310_s1 + $0xa0] sm:$0xff]  ;;  %v15126_v39 = vld [vmem:[%s20310_s1 + $0x78] sm:$0xff]  ;;  %v15426_v38 = vld [vmem:[%s20310_s1 + $0x228] sm:$0xff] }
 0x42e   : > { %3223 = vmatpush1.msra.mxu1 %v14780_v9  ;;  %3143 = vmatprep.subr.mxu0 %v15014_v40  ;;  %v15098_v9 = vld [vmem:[%s20310_s1 + $0x98] sm:$0xff] }
 0x42f   : > { %3224 = vmatprep.subr.mxu1 %v14787_v31  ;;  %3144 = vmatpush1.msra.mxu0 %v15020_v44  ;;  %v15119_v31 = vld [vmem:[%s20310_s1 + $0x80] sm:$0xff] }
 0x430   : > { %3225 = vmatpush1.msra.mxu1 %v14796_v15  ;;  %3145 = vmatprep.subr.mxu0 %v15028_v48  ;;  %v15140_v15 = vld [vmem:[%s20310_s1 + $0x68] sm:$0xff] }
 0x431   : > { %3226 = vmatprep.subr.mxu1 %v14806_v53  ;;  %3146 = vmatpush1.msra.mxu0 %v15035_v46  ;;  %v15161_v53 = vld [vmem:[%s20310_s1 + $0x50] sm:$0xff] }
 0x432   : > { %3227 = vmatpush1.msra.mxu1 %v14816_v55  ;;  %3147 = vmatprep.subr.mxu0 %v15042_v7  ;;  %v15175_v55 = vld [vmem:[%s20310_s1 + $0x40] sm:$0xff] }
 0x433   : > { %3228 = vmatprep.subr.mxu1 %v14824_v47  ;;  %3148 = vmatpush1.msra.mxu0 %v15049_v21  ;;  %v15189_v47 = vld [vmem:[%s12812_s24 + $0x78] sm:$0x7f] }
 0x434   : > { %3229 = vmatpush1.msra.mxu1 %v14830_v11  ;;  %3149 = vmatprep.subr.mxu0 %v15056_v25  ;;  %v15194_v11 = vld [vmem:[%s20310_s1 + $0x30] sm:$0xff] }
 0x435   : > { %3230 = vmatprep.subr.mxu1 %v14839_v27  ;;  %3150 = vmatpush1.msra.mxu0 %v15063_v56  ;;  %v15208_v27 = vld [vmem:[%s20310_s1 + $0x20] sm:$0xff] }
 0x436   : > { %3231 = vmatpush1.msra.mxu1 %v14845_v33  ;;  %3151 = vmatprep.subr.mxu0 %v15070_v59  ;;  %v15215_v33 = vld [vmem:[%s20310_s1 + $0x18] sm:$0xff] }
 0x437   : > { %3232 = vmatprep.subr.mxu1 %v14854_v41  ;;  %3152 = vmatpush1.msra.mxu0 %v15077_v63  ;;  %v15229_v41 = vld [vmem:[%s20310_s1 + $0x10] sm:$0xff] }
 0x438   : > { %3233 = vmatpush1.msra.mxu1 %v14860_v43  ;;  %3153 = vmatprep.subr.mxu0 %v15084_v1  ;;  %v15232_v43 = vld [vmem:[%s12812_s24 + $0x61] sm:$0xff] }
 0x439   : > { %3234 = vmatprep.subr.mxu1 %v14869_v13  ;;  %3154 = vmatpush1.msra.mxu0 %v15091_v0  ;;  %v15244_v13 = vld [vmem:[%s20310_s1 + $0x8] sm:$0xff] }
 0x43a   : > { %3235 = vmatpush1.msra.mxu1 %v14875_v17  ;;  %3155 = vmatprep.subr.mxu0 %v15098_v9  ;;  %v15251_v17 = vld [vmem:[%s20310_s1 + $0x2e8] sm:$0xff] }
 0x43b   : > { %3236 = vmatprep.subr.mxu1 %v14884_v50  ;;  %3156 = vmatpush1.msra.mxu0 %v15105_v37  ;;  %v15263_v50 = vld [vmem:[%s20310_s1 + $0x2e0] sm:$0xff] }
 0x43c   : > { %3237 = vmatpush1.msra.mxu1 %v14890_v52  ;;  %3157 = vmatprep.subr.mxu0 %v15112_v29  ;;  %v9439_v52 = vld [vmem:[%s12812_s24 + $0x60] sm:$0xff] }
 0x43d   : > { %3238 = vmatprep.subr.mxu1 %v14899_v49  ;;  %3158 = vmatpush1.msra.mxu0 %v15119_v31  ;;  %v15280_v49 = vld [vmem:[%s20310_s1 + $0x2d0] sm:$0xff] }
 0x43e   : > { %3239 = vmatpush1.msra.mxu1 %v14905_v60  ;;  %3159 = vmatprep.subr.mxu0 %v15126_v39  ;;  %v15286_v60 = vld [vmem:[%s20310_s1 + $0x2c8] sm:$0xff] }
 0x43f   : > { %3240 = vmatprep.subr.mxu1 %v14914_v4  ;;  %3160 = vmatpush1.msra.mxu0 %v15133_v62  ;;  %v15300_v4 = vld [vmem:[%s20310_s1 + $0x2b8] sm:$0xff] }
 0x440   : > { %3241 = vmatpush1.msra.mxu1 %v14920_v6  ;;  %3161 = vmatprep.subr.mxu0 %v15140_v15  ;;  %v15307_v6 = vld [vmem:[%s20310_s1 + $0x2b0] sm:$0xff] }
 0x441   : > { %3242 = vmatprep.subr.mxu1 %v14929_v42  ;;  %3162 = vmatpush1.msra.mxu0 %v15147_v23  ;;  %v15321_v42 = vld [vmem:[%s20310_s1 + $0x2a0] sm:$0xff] }
 0x442   : > { %3243 = vmatpush1.msra.mxu1 %v14935_v10  ;;  %3163 = vmatprep.subr.mxu0 %v15154_v45  ;;  %v15328_v10 = vld [vmem:[%s20310_s1 + $0x298] sm:$0xff] }
 0x443   : > { %3244 = vmatprep.subr.mxu1 %v14944_v14  ;;  %3164 = vmatpush1.msra.mxu0 %v15161_v53  ;;  %v15342_v14 = vld [vmem:[%s20310_s1 + $0x288] sm:$0xff] }
 0x444   : > { %3245 = vmatpush1.msra.mxu1 %v14950_v16  ;;  %3165 = vmatprep.subr.mxu0 %v15168_v57  ;;  %v15349_v16 = vld [vmem:[%s20310_s1 + $0x280] sm:$0xff] }
 0x445   : > { %3246 = vmatprep.subr.mxu1 %v14959_v19  ;;  %3166 = vmatpush1.msra.mxu0 %v15175_v55  ;;  %v15363_v19 = vld [vmem:[%s20310_s1 + $0x270] sm:$0xff] }
 0x446   : > { %3247 = vmatpush1.msra.mxu1 %v14965_v20  ;;  %3136 = vmatprep.mubr.f32.mxu1 %v20426_v61  ;;  %v15370_v20 = vld [vmem:[%s20310_s1 + $0x268] sm:$0xff] }
 0x447   : > { %3167 = vmatprep.subr.mxu0 %v15184_v5  ;;  %3248 = vmatprep.subr.mxu1 %v14974_v24  ;;  %v15384_v24 = vld [vmem:[%s20310_s1 + $0x258] sm:$0xff] }
 0x448   : > { %3137 = vmatmul.mubr.f32.gmra.mxu1 %v15189_v47  ;;  %3168 = vmatpush1.msra.mxu0 %v15194_v11 }
 0x449   : > { %3249 = vmatpush1.msra.mxu1 %v14980_v26  ;;  %3169 = vmatprep.subr.mxu0 %v15201_v51  ;;  %v15391_v26 = vld [vmem:[%s20310_s1 + $0x250] sm:$0xff] }
 0x44a   : > { %3250 = vmatprep.subr.mxu1 %v14989_v30  ;;  %3170 = vmatpush1.msra.mxu0 %v15208_v27  ;;  %v15405_v30 = vld [vmem:[%s20310_s1 + $0x240] sm:$0xff] }
 0x44b   : > { %3251 = vmatpush1.msra.mxu1 %v14995_v32  ;;  %3171 = vmatprep.subr.mxu0 %v15215_v33  ;;  %v15412_v32 = vld [vmem:[%s20310_s1 + $0x238] sm:$0xff] }
 0x44c   : > { %3284 = vmatprep.mubr.f32.mxu1 %v20426_v61  ;;  %3408 = vmatprep.subr.mxu1 %v15222_v35 }
 0x44d   : > { %3172 = vmatpush1.msra.mxu0 %v15229_v41  ;;  %3285 = vmatmul.mubr.f32.vlgmr.msra.gmra.mxu1 %v15232_v43 }
 0x44e   : > { %3409 = vmatpush1.msra.mxu1 %v15239_v3  ;;  %3173 = vmatprep.subr.mxu0 %v15244_v13 }
 0x44f   : > { %3410 = vmatprep.subr.mxu1 %v15251_v17  ;;  %3174 = vmatpush1.msra.mxu0 %v15256_v54 }
 0x450   : > { %3207 = vmatprep.mubr.f32.mxu0 %v20426_v61  ;;  %3411 = vmatpush1.msra.mxu1 %v15263_v50 }
 0x451   : > { %3208 = vmatmul.mubr.f32.vlgmr.msra.gmra.mxu0 %v9439_v52  ;;  %3297 = vmatprep.subr.mxu0 %v15014_v40  ;;  %v15433_v40 = vld [vmem:[%s20310_s1 + $0x220] sm:$0xff]  ;;  %v9512_v52 = vld [vmem:[%s20312_s3 + $0x88] sm:$0xff] }
 0x452   : > { %3412 = vmatprep.subr.mxu1 %v15273_v58  ;;  %3298 = vmatpush1.msra.mxu0 %v15020_v44  ;;  %v9476_v44 = vld [vmem:[%s12812_s24 + $0x69] sm:$0x7f] }
 0x453   : > { %3413 = vmatpush1.msra.mxu1 %v15280_v49  ;;  %3299 = vmatprep.subr.mxu0 %v15028_v48  ;;  %v9480_v48 = vld [vmem:[%s20310_s1 + $0x218] sm:$0xff] }
 0x454   : > { %3414 = vmatprep.subr.mxu1 %v15286_v60  ;;  %3300 = vmatpush1.msra.mxu0 %v15035_v46  ;;  %v9479_v46 = vld [vmem:[%s20310_s1 + $0x210] sm:$0xff] }
 0x455   : > { %3415 = vmatpush1.msra.mxu1 %v15293_v2  ;;  %3301 = vmatprep.subr.mxu0 %v15042_v7  ;;  %v9478_v7 = vld [vmem:[%s20310_s1 + $0x208] sm:$0xff] }
 0x456   : > { %3416 = vmatprep.subr.mxu1 %v15300_v4  ;;  %3302 = vmatpush1.msra.mxu0 %v15049_v21  ;;  %v9440_v21 = vld [vmem:[%s12812_s24 + $0x68] sm:$0x7f] }
 0x457   : > { %3417 = vmatpush1.msra.mxu1 %v15307_v6  ;;  %3303 = vmatprep.subr.mxu0 %v15056_v25  ;;  %v9477_v25 = vld [vmem:[%s20310_s1 + $0x200] sm:$0xff] }
 0x458   : > { %3418 = vmatprep.subr.mxu1 %v15314_v8  ;;  %3304 = vmatpush1.msra.mxu0 %v15063_v56  ;;  %v9510_v56 = vld [vmem:[%s12812_s24 + $0x79] sm:$0x7f] }
 0x459   : > { %3419 = vmatpush1.msra.mxu1 %v15321_v42  ;;  %3305 = vmatprep.subr.mxu0 %v15070_v59  ;;  %v3595_v59 = vld [vmem:[%s20312_s3 + $0x78] sm:$0xff] }
 0x45a   : > { %3420 = vmatprep.subr.mxu1 %v15328_v10  ;;  %3306 = vmatpush1.msra.mxu0 %v15077_v63  ;;  %v3594_v63 = vld [vmem:[%s20312_s3 + $0x70] sm:$0xff] }
 0x45b   : > { %3421 = vmatpush1.msra.mxu1 %v15335_v12  ;;  %3307 = vmatprep.subr.mxu0 %v15084_v1  ;;  %v9526_v1 = vld [vmem:[%s20312_s3 + $0xf8] sm:$0xff] }
 0x45c   : > { %3422 = vmatprep.subr.mxu1 %v15342_v14  ;;  %3308 = vmatpush1.msra.mxu0 %v15091_v0  ;;  %v9525_v0 = vld [vmem:[%s20312_s3 + $0xf0] sm:$0xff] }
 0x45d   : > { %3423 = vmatpush1.msra.mxu1 %v15349_v16  ;;  %3309 = vmatprep.subr.mxu0 %v15098_v9  ;;  %v3593_v9 = vld [vmem:[%s20312_s3 + $0x68] sm:$0xff] }
 0x45e   : > { %3424 = vmatprep.subr.mxu1 %v15356_v18  ;;  %3310 = vmatpush1.msra.mxu0 %v15105_v37  ;;  %v9524_v37 = vld [vmem:[%s20312_s3 + $0xe8] sm:$0xff] }
 0x45f   : > { %3425 = vmatpush1.msra.mxu1 %v15363_v19  ;;  %3311 = vmatprep.subr.mxu0 %v15112_v29  ;;  %v3592_v29 = vld [vmem:[%s20312_s3 + $0x60] sm:$0xff] }
 0x460   : > { %3426 = vmatprep.subr.mxu1 %v15370_v20  ;;  %3312 = vmatpush1.msra.mxu0 %v15119_v31  ;;  %v9523_v31 = vld [vmem:[%s20312_s3 + $0xe0] sm:$0xff] }
 0x461   : > { %3427 = vmatpush1.msra.mxu1 %v15377_v22  ;;  %3313 = vmatprep.subr.mxu0 %v15126_v39  ;;  %v3591_v39 = vld [vmem:[%s20312_s3 + $0x58] sm:$0xff] }
 0x462   : > { %3428 = vmatprep.subr.mxu1 %v15384_v24  ;;  %3314 = vmatpush1.msra.mxu0 %v15133_v62  ;;  %v9522_v62 = vld [vmem:[%s20312_s3 + $0xd8] sm:$0xff] }
 0x463   : > { %3429 = vmatpush1.msra.mxu1 %v15391_v26  ;;  %3315 = vmatprep.subr.mxu0 %v15140_v15  ;;  %v3590_v15 = vld [vmem:[%s20312_s3 + $0x50] sm:$0xff] }
 0x464   : > { %3430 = vmatprep.subr.mxu1 %v15398_v28  ;;  %3316 = vmatpush1.msra.mxu0 %v15147_v23  ;;  %v9521_v23 = vld [vmem:[%s20312_s3 + $0xd0] sm:$0xff] }
 0x465   : > { %3431 = vmatpush1.msra.mxu1 %v15405_v30  ;;  %3317 = vmatprep.subr.mxu0 %v15154_v45  ;;  %v3589_v45 = vld [vmem:[%s20312_s3 + $0x48] sm:$0xff] }
 0x466   : > { %3432 = vmatprep.subr.mxu1 %v15412_v32  ;;  %3318 = vmatpush1.msra.mxu0 %v15161_v53  ;;  %v3588_v53 = vld [vmem:[%s20312_s3 + $0x40] sm:$0xff] }
 0x467   : > { %3433 = vmatpush1.msra.mxu1 %v15419_v34  ;;  %3319 = vmatprep.subr.mxu0 %v15168_v57  ;;  %v9520_v57 = vld [vmem:[%s20312_s3 + $0xc8] sm:$0xff] }
 0x468   : > { %3434 = vmatprep.subr.mxu1 %v15426_v38  ;;  %3290 = vmatprep.mubr.f32.mxu1 %v20426_v61 }
 0x469   : > { %3320 = vmatpush1.msra.mxu0 %v15175_v55  ;;  %3435 = vmatpush1.msra.mxu1 %v15433_v40  ;;  %v3587_v55 = vld [vmem:[%s20312_s3 + $0x38] sm:$0xff] }
 0x46a   : > { %3291 = vmatmul.mubr.f32.gmra.mxu1 %v9476_v44  ;;  %3321 = vmatprep.subr.mxu0 %v15184_v5  ;;  %v9519_v5 = vld [vmem:[%s20312_s3 + $0xc0] sm:$0xff] }
 0x46b   : > { %3436 = vmatprep.subr.mxu1 %v9480_v48  ;;  %3322 = vmatpush1.msra.mxu0 %v15194_v11  ;;  %v9518_v11 = vld [vmem:[%s20312_s3 + $0xb8] sm:$0xff] }
 0x46c   : > { %3437 = vmatpush1.msra.mxu1 %v9479_v46  ;;  %3213 = vmatprep.mubr.f32.mxu0 %v20426_v61 }
 0x46d   : > { %3323 = vmatprep.subr.mxu0 %v15201_v51  ;;  %3438 = vmatprep.subr.mxu1 %v9478_v7  ;;  %v3585_v51 = vld [vmem:[%s20312_s3 + $0x28] sm:$0xff] }
 0x46e   : > { %3214 = vmatmul.mubr.f32.gmra.mxu0 %v9440_v21  ;;  %3439 = vmatpush1.msra.mxu1 %v9477_v25  ;;  %v8469_v21 = vld [vmem:[#allocation2 + $0x9] sm:$0x1] }
 0x46f   : > { %3324 = vmatpush1.msra.mxu0 %v15208_v27  ;;  %3472 = vmatprep.mubr.f32.mxu1 %v20426_v61  ;;  %v9517_v27 = vld [vmem:[%s20312_s3 + $0xb0] sm:$0xff] }
 0x470   : > { %3325 = vmatprep.subr.mxu0 %v15215_v33  ;;  %3473 = vmatmul.mubr.f32.vlgmr.msra.gmra.mxu1 %v15232_v43  ;;  %v3584_v33 = vld [vmem:[%s20312_s3 + $0x20] sm:$0xff] }
 0x471   : > { %3326 = vmatpush1.msra.mxu0 %v15229_v41  ;;  %3361 = vmatprep.mubr.f32.mxu0 %v20426_v61  ;;  %v3583_v41 = vld [vmem:[%s20312_s3 + $0x18] sm:$0xff]  ;;  %v9515_v43 = vld [vmem:[%s20312_s3 + $0xa0] sm:$0xff] }
 0x472   : > { %3327 = vmatprep.subr.mxu0 %v15244_v13  ;;  %3478 = vmatprep.mubr.f32.mxu1 %v20426_v61  ;;  %v9514_v13 = vld [vmem:[%s20312_s3 + $0x98] sm:$0xff] }
 0x473   : > { %3328 = vmatpush1.msra.mxu0 %v15256_v54  ;;  %11143 = vmatprep.subr.mxu1 %v9526_v1  ;;  %v9513_v54 = vld [vmem:[%s20312_s3 + $0x90] sm:$0xff] }
 0x474   : > { %3362 = vmatmul.mubr.f32.vlgmr.msra.gmra.mxu0 %v15003_v36  ;;  %3479 = vmatmul.mubr.f32.gmra.mxu1 %v9476_v44  ;;  %v9509_v36 = vld [vmem:[%s12812_s24 + $0x71] sm:$0xff] }
 0x475   : > { %3489 = vmatprep.subr.mxu0 %v15222_v35  ;;  %3367 = vmatprep.mubr.f32.mxu0 %v20426_v61  ;;  %v9516_v35 = vld [vmem:[%s20312_s3 + $0xa8] sm:$0xff]  ;;  %v7875_v44 = vld [vmem:[#allocation2 + $0x14] sm:$0x1] }
 0x476   : > { %3490 = vmatpush1.msra.mxu0 %v15239_v3  ;;  %11144 = vmatpush3.msra.mxu1 %v9526_v1  ;;  %v3582_v3 = vld [vmem:[%s20312_s3 + $0x10] sm:$0xff] }
 0x477   : > { %3491 = vmatprep.subr.mxu0 %v15251_v17  ;;  %11145 = vmatprep.subr.mxu1 %v9525_v0  ;;  %v3581_v17 = vld [vmem:[%s20312_s3 + $0x8] sm:$0xff] }
 0x478   : > { %3492 = vmatpush1.msra.mxu0 %v15263_v50  ;;  %11146 = vmatpush3.msra.mxu1 %v9525_v0  ;;  %v3580_v50 = vld [vmem:[%s20312_s3] sm:$0xff]  ;;  %v7907_v0 = vrot.slane %v7875_v44, 7 }
 0x479   : > { %3493 = vmatprep.subr.mxu0 %v15273_v58  ;;  %3368 = vmatmul.mubr.f32.gmra.mxu0 %v15189_v47  ;;  %v3586_v47 = vld [vmem:[%s20312_s3 + $0x30] sm:$0xff]  ;;  %v15599_v58 = vld [vmem:[%s20310_s1 + $0x1f8] sm:$0xff] }
 0x47a   : > { %3494 = vmatpush1.msra.mxu0 %v15280_v49  ;;  %3553 = vmatprep.mubr.f32.mxu0 %v20426_v61 }
 0x47b   : > { %3495 = vmatprep.subr.mxu0 %v15286_v60  ;;  %11147 = vmatprep.subr.mxu1 %v9524_v37  ;;  %v9511_v60 = vld [vmem:[%s20312_s3 + $0x80] sm:$0xff] }
 0x47c   : > { %3496 = vmatpush1.msra.mxu0 %v15293_v2  ;;  %11148 = vmatpush3.msra.mxu1 %v9524_v37 }
 0x47d   : > { %3497 = vmatprep.subr.mxu0 %v15300_v4  ;;  %11149 = vmatprep.subr.mxu1 %v9523_v31  ;;  %v15608_v4 = vld [vmem:[%s20312_s3 + $0x178] sm:$0xff] }
 0x47e   : > { %3498 = vmatpush1.msra.mxu0 %v15307_v6  ;;  %11150 = vmatpush3.msra.mxu1 %v9523_v31 }
 0x47f   : > { %3499 = vmatprep.subr.mxu0 %v15314_v8  ;;  %11151 = vmatprep.subr.mxu1 %v9522_v62 }
 0x480   : > { %3500 = vmatpush1.msra.mxu0 %v15321_v42  ;;  %11152 = vmatpush3.msra.mxu1 %v9522_v62  ;;  %v7874_v62 = vld [vmem:[#allocation2 + $0x4] sm:$0x1] }
 0x481   : > { %3501 = vmatprep.subr.mxu0 %v15328_v10  ;;  %11153 = vmatprep.subr.mxu1 %v9521_v23 }
 0x482   : > { %3502 = vmatpush1.msra.mxu0 %v15335_v12  ;;  %11154 = vmatpush3.msra.mxu1 %v9521_v23 }
 0x483   : > { %3503 = vmatprep.subr.mxu0 %v15342_v14  ;;  %11155 = vmatprep.subr.mxu1 %v9520_v57 }
 0x484   : > { %3504 = vmatpush1.msra.mxu0 %v15349_v16  ;;  %11156 = vmatpush3.msra.mxu1 %v9520_v57  ;;  %v8827_v57 = vld [vmem:[#allocation2 + $0x1c] sm:$0x1] }
 0x485   : > { %3505 = vmatprep.subr.mxu0 %v15356_v18  ;;  %11157 = vmatprep.subr.mxu1 %v9519_v5  ;;  %v12249_v18 = vld [vmem:[%s20313_s4] ss:$0 sm:$0xff] }
 0x486   : > { %3506 = vmatpush1.msra.mxu0 %v15363_v19  ;;  %11158 = vmatpush3.msra.mxu1 %v9519_v5  ;;  %v7993_v5 = vld [vmem:[#allocation2 + $0x5] sm:$0x1] }
 0x487   : > { %3507 = vmatprep.subr.mxu0 %v15370_v20  ;;  %11159 = vmatprep.subr.mxu1 %v9518_v11 }
 0x488   : > { %3508 = vmatpush1.msra.mxu0 %v15377_v22  ;;  %11160 = vmatpush3.msra.mxu1 %v9518_v11 }
 0x489   : > { %3509 = vmatprep.subr.mxu0 %v15384_v24  ;;  %11161 = vmatprep.subr.mxu1 %v9517_v27 }
 0x48a   : > { %3510 = vmatpush1.msra.mxu0 %v15391_v26  ;;  %11162 = vmatpush3.msra.mxu1 %v9517_v27 }
 0x48b   : > { %3511 = vmatprep.subr.mxu0 %v15398_v28  ;;  %11163 = vmatprep.subr.mxu1 %v9516_v35  ;;  %v8351_v28 = vld [vmem:[#allocation2 + $0x18] sm:$0x1] }
 0x48c   : > { %3512 = vmatpush1.msra.mxu0 %v15405_v30  ;;  %11164 = vmatpush3.msra.mxu1 %v9516_v35  ;;  %v8470_v30 = vld [vmem:[#allocation2 + $0x19] sm:$0x1]  ;;  %v8112_v35 = vld [vmem:[#allocation2 + $0x6] sm:$0x1] }
 0x48d   : > { %3513 = vmatprep.subr.mxu0 %v15412_v32  ;;  %11165 = vmatprep.subr.mxu1 %v9515_v43  ;;  %v8589_v32 = vld [vmem:[#allocation2 + $0x1a] sm:$0x1] }
 0x48e   : > { %3514 = vmatpush1.msra.mxu0 %v15419_v34  ;;  %11166 = vmatpush3.msra.mxu1 %v9515_v43  ;;  %v8383_v34 = vrot.slane %v8351_v28, 7  ;;  %v7908_v43 = vsel %vm7452_vm2, %v7907_v0, %v7874_v62 }
 0x48f   : > { %3515 = vmatprep.subr.mxu0 %v15426_v38  ;;  %11167 = vmatprep.subr.mxu1 %v9514_v13  ;;  %v8502_v38 = vrot.slane %v8470_v30, 7 }
 0x490   : > { %3516 = vmatpush1.msra.mxu0 %v15433_v40  ;;  %11168 = vmatpush3.msra.mxu1 %v9514_v13  ;;  %v8621_v40 = vrot.slane %v8589_v32, 7 }
 0x491   : > { %3517 = vmatprep.subr.mxu0 %v9480_v48  ;;  %11169 = vmatprep.subr.mxu1 %v9513_v54  ;;  %v7994_v48 = vld [vmem:[#allocation2 + $0x15] sm:$0x1]  ;;  %v8503_v37 = vsel %vm7452_vm2, %v8502_v38, %v8469_v21 }
 0x492   : > { %3518 = vmatpush1.msra.mxu0 %v9479_v46  ;;  %11170 = vmatpush3.msra.mxu1 %v9513_v54  ;;  %v8113_v46 = vld [vmem:[#allocation2 + $0x16] sm:$0x1]  ;;  %v8859_v54 = vrot.slane %v8827_v57, 7 }
 0x493   : > { %3519 = vmatprep.subr.mxu0 %v9478_v7  ;;  %11171 = vmatprep.subr.mxu1 %v9512_v52  ;;  %v8350_v7 = vld [vmem:[#allocation2 + $0x8] sm:$0x1] }
 0x494   : > { %3520 = vmatpush1.msra.mxu0 %v9477_v25  ;;  %11172 = vmatpush3.msra.mxu1 %v9512_v52 }
 0x495   : > { %3554 = vmatmul.mubr.f32.vlgmr.msra.gmra.mxu0 %v9509_v36  ;;  %11178 = vmatprep.subr.mxu0 %v3595_v59 }
 0x496   : > { %3559 = vmatprep.mubr.f32.mxu0 %v20426_v61  ;;  %11179 = vmatpush3.msra.mxu0 %v3595_v59 }
 0x497   : > { %11180 = vmatprep.subr.mxu0 %v3594_v63  ;;  %11173 = vmatprep.subr.mxu1 %v9511_v60 }
 0x498   : > { %11181 = vmatpush3.msra.mxu0 %v3594_v63  ;;  %11174 = vmatpush3.msra.mxu1 %v9511_v60  ;;  %v8231_v60 = vld [vmem:[#allocation2 + $0x7] sm:$0x1] }
 0x499   : > { %3560 = vmatmul.mubr.f32.gmra.mxu0 %v9510_v56  ;;  %11182 = vmatprep.subr.mxu0 %v3593_v9  ;;  %v8232_v56 = vld [vmem:[#allocation2 + $0x17] sm:$0x1] }
 0x49a   : > { %11183 = vmatpush3.msra.mxu0 %v3593_v9  ;;  %11213 = vmatprep.subr.mxu1 %v15608_v4  ;;  %v8384_v9 = vsel %vm7452_vm2, %v8383_v34, %v8350_v7  ;;  %v8264_v11 = vrot.slane %v8232_v56, 7 }
 0x49b   : > { %11184 = vmatprep.subr.mxu0 %v3592_v29 }
 0x49c   : > { %11185 = vmatpush3.msra.mxu0 %v3592_v29  ;;  %v8588_v29 = vld [vmem:[#allocation2 + $0xa] sm:$0x1] }
 0x49d   : > { %11186 = vmatprep.subr.mxu0 %v3591_v39 }
 0x49e   : > { %11187 = vmatpush3.msra.mxu0 %v3591_v39  ;;  %v8708_v39 = vld [vmem:[#allocation2 + $0x1b] sm:$0x1] }
 0x49f   : > { %11188 = vmatprep.subr.mxu0 %v3590_v15 }
 0x4a0   : > { %11189 = vmatpush3.msra.mxu0 %v3590_v15  ;;  %v8026_v15 = vrot.slane %v7994_v48, 7 }
 0x4a1   : > { %11190 = vmatprep.subr.mxu0 %v3589_v45 }
 0x4a2   : > { %11191 = vmatpush3.msra.mxu0 %v3589_v45  ;;  %v8027_v52 = vsel %vm7452_vm2, %v8026_v15, %v7993_v5 }
 0x4a3   : > { %11192 = vmatprep.subr.mxu0 %v3588_v53 }
 0x4a4   : > { %11193 = vmatpush3.msra.mxu0 %v3588_v53  ;;  %v8622_v53 = vsel %vm7452_vm2, %v8621_v40, %v8588_v29 }
 0x4a5   : > { %11194 = vmatprep.subr.mxu0 %v3587_v55 }
 0x4a6   : > { %11195 = vmatpush3.msra.mxu0 %v3587_v55 }
 0x4a7   : > { %11196 = vmatprep.subr.mxu0 %v3586_v47 }
 0x4a8   : > { %11197 = vmatpush3.msra.mxu0 %v3586_v47  ;;  %v8145_v47 = vrot.slane %v8113_v46, 7 }
 0x4a9   : > { %11198 = vmatprep.subr.mxu0 %v3585_v51 }
 0x4aa   : > { %11199 = vmatpush3.msra.mxu0 %v3585_v51 }
 0x4ab   : > { %11200 = vmatprep.subr.mxu0 %v3584_v33 }
 0x4ac   : > { %11201 = vmatpush3.msra.mxu0 %v3584_v33 }
 0x4ad   : > { %11202 = vmatprep.subr.mxu0 %v3583_v41 }
 0x4ae   : > { %11203 = vmatpush3.msra.mxu0 %v3583_v41  ;;  %v8740_v41 = vrot.slane %v8708_v39, 7 }
 0x4af   : > { %11204 = vmatprep.subr.mxu0 %v3582_v3 }
 0x4b0   : > { %11205 = vmatpush3.msra.mxu0 %v3582_v3 }
 0x4b1   : > { %11206 = vmatprep.subr.mxu0 %v3581_v17 }
 0x4b2   : > { %11207 = vmatpush3.msra.mxu0 %v3581_v17 }
 0x4b3   : > { %11208 = vmatprep.subr.mxu0 %v3580_v50 }
 0x4b4   : > { %11209 = vmatpush3.msra.mxu0 %v3580_v50 }
 0x4b5   : > { %3946 = vmatprep.subr.mxu0 %v15599_v58 }
 0x4c9   : > { %v11107_v2 = vpop.f32.mrf.mxu1 }
 0x4cb   : > { %v2880_v42 = vpop.f32.mrf.mxu1 }
 0x4cd   : > { %v11072_v49 = vpop.f32.mrf.mxu0 }
 0x4ce   : > { %v2886_v8 = vadd.f32 %v11107_v2, %v11072_v49 }
 0x4cf   : > { %v2805_v6 = vpop.f32.mrf.mxu0 }
 0x4d0   : > { %v2881_v12 = vadd.f32 %v2880_v42, %v2805_v6  ;;  %v8146_v42 = vsel %vm7452_vm2, %v8145_v47, %v8112_v35 }
 0x4eb   : > { %v3132_v32 = vpop.f32.mrf.mxu1 }
 0x4ed   : > { %v11142_v10 = vpop.f32.mrf.mxu0  ;;  %v3134_v34 = vpop.f32.mrf.mxu1 }
 0x4ee   : > { %v2986_v14 = vadd.f32 %v11142_v10, %v2886_v8  ;;  %v8265_v10 = vsel %vm7452_vm2, %v8264_v11, %v8231_v60 }
 0x4ef   : > { %v2976_v16 = vpop.f32.mrf.mxu0 }
 0x4f0   : > { %v2988_v19 = vadd.f32 %v12249_v18, %v2986_v14  ;;  %v2985_v20 = vadd.f32 %v2976_v16, %v2881_v12  ;;  %v8707_v12 = vld [vmem:[#allocation2 + $0xb] sm:$0x1] }
 0x4f2   : > { %v2990_v22 = vmax.f32 %v2988_v19, 0.0  ;;  %v2987_v24 = vadd.f32 %v12249_v18, %v2985_v20  ;;  %v8741_v20 = vsel %vm7452_vm2, %v8740_v41, %v8707_v12  ;;  %v12250_v12 = vld [vmem:[%s20311_s2] ss:$0 sm:$0xff] }
 0x4f4   : > { %2993 = vst [vmem:[#allocation2 + $0x28] sm:$0x1f] %v2990_v22  ;;  %v2989_v26 = vmax.f32 %v2987_v24, 0.0  ;;  %v8826_v22 = vld [vmem:[#allocation2 + $0xc] sm:$0x1] }
 0x4f5   : > { %v8860_v28 = vsel %vm7452_vm2, %v8859_v54, %v8826_v22 }
 0x4f6   : > { %2992 = vst [vmem:[#allocation2 + $0x20] sm:$0xff] %v2989_v26 }
 0x4fb   : > { %v8352_v25 = vld [vmem:[#allocation2 + $0x28] sm:$0x1]  ;;  %v8471_v36 = vld [vmem:[#allocation2 + $0x29] sm:$0x1]  ;;  %v8590_v1 = vld [vmem:[#allocation2 + $0x2a] sm:$0x1] }
 0x4fc   : > { %v8385_v59 = vrot.slane %v8352_v25, 6  ;;  %v8504_v63 = vrot.slane %v8471_v36, 6  ;;  %v8623_v31 = vrot.slane %v8590_v1, 6  ;;  %v8709_v6 = vld [vmem:[#allocation2 + $0x2b] sm:$0x1] }
 0x4fd   : > { %v7876_v55 = vld [vmem:[#allocation2 + $0x24] sm:$0x1]  ;;  %v7995_v33 = vld [vmem:[#allocation2 + $0x25] sm:$0x1]  ;;  %v8114_v13 = vld [vmem:[#allocation2 + $0x26] sm:$0x1] }
 0x4fe   : > { %v15617_v23 = vsel %vm7455_vm3, %v8385_v59, %v8384_v9  ;;  %v15620_v45 = vsel %vm7455_vm3, %v8504_v63, %v8503_v37  ;;  %v15624_v51 = vsel %vm7455_vm3, %v8623_v31, %v8622_v53  ;;  %v7909_v27 = vrot.slane %v7876_v55, 6  ;;  %v8233_v17 = vld [vmem:[#allocation2 + $0x27] sm:$0x1]  ;;  %v8828_v16 = vld [vmem:[#allocation2 + $0x2c] sm:$0x1] }
 0x4ff   : > { %v8028_v3 = vrot.slane %v7995_v33, 6  ;;  %v8147_v49 = vrot.slane %v8114_v13, 6  ;;  %v8266_v2 = vrot.slane %v8233_v17, 6  ;;  %v8742_v14 = vrot.slane %v8709_v6, 6 }
 0x500   : > { %v15628_v50 = vsel %vm7455_vm3, %v7909_v27, %v7908_v43  ;;  %v8861_v24 = vrot.slane %v8828_v16, 6 }
 0x501   : > { %v15632_v8 = vsel %vm7455_vm3, %v8028_v3, %v8027_v52  ;;  %v15637_v18 = vsel %vm7455_vm3, %v8147_v49, %v8146_v42  ;;  %v15640_v19 = vsel %vm7455_vm3, %v8266_v2, %v8265_v10  ;;  %v15644_v26 = vsel %vm7455_vm3, %v8742_v14, %v8741_v20 }
 0x502   : > { %v15648_v30 = vsel %vm7455_vm3, %v8861_v24, %v8860_v28  ;;  %v15658_v28 = vld [vmem:[%s20310_s1 + $0x1f0] sm:$0xff] }
 0x508   : > { %v3138_v38 = vpop.f32.mrf.mxu1 }
 0x50a   : > { %v3140_v40 = vpop.f32.mrf.mxu1 }
 0x50d   : > { %v3286_v48 = vpop.f32.mrf.mxu1 }
 0x50f   : > { %v3288_v7 = vpop.f32.mrf.mxu1 }
 0x511   : > { %v3209_v44 = vpop.f32.mrf.mxu0 }
 0x512   : > { %v3210_v39 = vadd.f32 %v3209_v44, %v3132_v32  ;;  %v15663_v32 = vld [vmem:[%s20310_s1 + $0x1e8] sm:$0xff]  ;;  %v15676_v44 = vld [vmem:[%s20310_s1 + $0x1d8] sm:$0xff] }
 0x513   : > { %v3211_v46 = vpop.f32.mrf.mxu0 }
 0x514   : > { %v3212_v37 = vadd.f32 %v3211_v46, %v3134_v34  ;;  %v15669_v34 = vld [vmem:[%s20310_s1 + $0x1e0] sm:$0xff] }
 0x52a   : > { %v3292_v25 = vpop.f32.mrf.mxu1 }
 0x52c   : > { %v3294_v56 = vpop.f32.mrf.mxu1 }
 0x52e   : > { %v3215_v21 = vpop.f32.mrf.mxu0 }
 0x52f   : > { %v3216_v11 = vadd.f32 %v3215_v21, %v3138_v38  ;;  %v9541_v21 = vld [vmem:[%s20312_s3 + $0x170] sm:$0xff] }
 0x530   : > { %v3217_v36 = vpop.f32.mrf.mxu0  ;;  %v3474_v63 = vpop.f32.mrf.mxu1 }
 0x531   : > { %v3485_v55 = vadd.f32 %v3474_v63, %v3210_v39  ;;  %v3218_v27 = vadd.f32 %v3217_v36, %v3140_v40  ;;  %v15695_v36 = vld [vmem:[%s20310_s1 + $0x1c8] sm:$0xff]  ;;  %v15749_v39 = vld [vmem:[%s20310_s1 + $0x190] sm:$0xff] }
 0x532   : > { %v3476_v0 = vpop.f32.mrf.mxu1  ;;  %v9540_v63 = vld [vmem:[%s20312_s3 + $0x168] sm:$0xff] }
 0x533   : > { %v3486_v62 = vadd.f32 %v3476_v0, %v3212_v37  ;;  %v9539_v0 = vld [vmem:[%s20312_s3 + $0x160] sm:$0xff] }
 0x534   : > { %v3363_v59 = vpop.f32.mrf.mxu0  ;;  %v3480_v29 = vpop.f32.mrf.mxu1  ;;  %v15734_v37 = vld [vmem:[%s20310_s1 + $0x1a0] sm:$0xff] }
 0x535   : > { %v3364_v53 = vadd.f32 %v3363_v59, %v3286_v48  ;;  %v3570_v41 = vmax.f32 %v3485_v55, %v3486_v62  ;;  %v3487_v49 = vadd.f32 %v3480_v29, %v3216_v11  ;;  %v15705_v59 = vld [vmem:[%s20310_s1 + $0x1c0] sm:$0xff]  ;;  %v9538_v29 = vld [vmem:[%s20312_s3 + $0x158] sm:$0xff]  ;;  %v9537_v62 = vld [vmem:[%s20312_s3 + $0x150] sm:$0xff] }
 0x536   : > { %v3365_v1 = vpop.f32.mrf.mxu0  ;;  %v3482_v5 = vpop.f32.mrf.mxu1  ;;  %v15773_v55 = vld [vmem:[%s20310_s1 + $0x178] sm:$0xff]  ;;  %v15788_v11 = vld [vmem:[%s20310_s1 + $0x168] sm:$0xff] }
 0x537   : > { %v3366_v57 = vadd.f32 %v3365_v1, %v3288_v7  ;;  %v3488_v3 = vadd.f32 %v3482_v5, %v3218_v27  ;;  %v15685_v7 = vld [vmem:[%s20310_s1 + $0x1d0] sm:$0xff]  ;;  %v15794_v27 = vld [vmem:[%s20310_s1 + $0x160] sm:$0xff] }
 0x538   : > { %v15719_v1 = vld [vmem:[%s20310_s1 + $0x1b0] sm:$0xff] }
 0x539   : > { %v3369_v9 = vpop.f32.mrf.mxu0  ;;  %v3571_v42 = vmax.f32 %v3487_v49, %v3488_v3  ;;  %v15779_v5 = vld [vmem:[%s20310_s1 + $0x170] sm:$0xff]  ;;  %v15818_v3 = vld [vmem:[%s20310_s1 + $0x148] sm:$0xff]  ;;  %v9531_v49 = vld [vmem:[%s20312_s3 + $0x120] sm:$0xff] }
 0x53a   : > { %v3370_v13 = vadd.f32 %v3369_v9, %v3292_v25  ;;  %v15728_v9 = vld [vmem:[%s20310_s1 + $0x1a8] sm:$0xff] }
 0x53b   : > { %v3371_v31 = vpop.f32.mrf.mxu0 }
 0x53c   : > { %v3372_v17 = vadd.f32 %v3371_v31, %v3294_v56  ;;  %v15743_v31 = vld [vmem:[%s20310_s1 + $0x198] sm:$0xff] }
 0x555   : > { %v3555_v15 = vpop.f32.mrf.mxu0 }
 0x556   : > { %v3566_v33 = vadd.f32 %v3555_v15, %v3364_v53  ;;  %v15758_v15 = vld [vmem:[%s20310_s1 + $0x188] sm:$0xff]  ;;  %v15764_v53 = vld [vmem:[%s20310_s1 + $0x180] sm:$0xff] }
 0x557   : > { %v3557_v47 = vpop.f32.mrf.mxu0 }
 0x558   : > { %v3567_v35 = vadd.f32 %v3557_v47, %v3366_v57  ;;  %v9536_v57 = vld [vmem:[%s20312_s3 + $0x148] sm:$0xff]  ;;  %v9535_v47 = vld [vmem:[%s20312_s3 + $0x140] sm:$0xff] }
 0x559   : > { %v3561_v43 = vpop.f32.mrf.mxu0 }
 0x55a   : > { %v3572_v54 = vmax.f32 %v3566_v33, %v3567_v35  ;;  %v3568_v2 = vadd.f32 %v3561_v43, %v3370_v13  ;;  %v9534_v33 = vld [vmem:[%s20312_s3 + $0x138] sm:$0xff]  ;;  %v9533_v43 = vld [vmem:[%s20312_s3 + $0x130] sm:$0xff]  ;;  %v15824_v13 = vld [vmem:[%s20310_s1 + $0x140] sm:$0xff] }
 0x55b   : > { %v3563_v52 = vpop.f32.mrf.mxu0  ;;  %v15803_v35 = vld [vmem:[%s20310_s1 + $0x158] sm:$0xff] }
 0x55c   : > { %v3574_v60 = vmax.f32 %v3570_v41, %v3572_v54  ;;  %v3569_v6 = vadd.f32 %v3563_v52, %v3372_v17  ;;  %v15809_v41 = vld [vmem:[%s20310_s1 + $0x150] sm:$0xff]  ;;  %v9532_v17 = vld [vmem:[%s20312_s3 + $0x128] sm:$0xff]  ;;  %v15833_v54 = vld [vmem:[%s20310_s1 + $0x138] sm:$0xff] }
 0x55d   : > { %v15839_v52 = vld [vmem:[%s20310_s1 + $0x130] sm:$0xff] }
 0x55e   : > { %v3573_v10 = vmax.f32 %v3568_v2, %v3569_v6  ;;  %v3576_v14 = vadd.f32 %v12250_v12, %v3574_v60  ;;  %v15848_v60 = vld [vmem:[%s20310_s1 + $0x128] sm:$0xff]  ;;  %v15854_v2 = vld [vmem:[%s20310_s1 + $0x120] sm:$0xff]  ;;  %v9530_v6 = vld [vmem:[%s20312_s3 + $0x118] sm:$0xff] }
 0x560   : > { %v3575_v16 = vmax.f32 %v3571_v42, %v3573_v10  ;;  %v3578_v20 = vmax.f32 %v3576_v14, 0.0  ;;  %v15863_v42 = vld [vmem:[%s20310_s1 + $0x118] sm:$0xff]  ;;  %v15869_v10 = vld [vmem:[%s20310_s1 + $0x110] sm:$0xff]  ;;  %v15878_v14 = vld [vmem:[%s20310_s1 + $0x108] sm:$0xff] }
 0x562   : > { %v3577_v22 = vadd.f32 %v12250_v12, %v3575_v16  ;;  %11210 = vmatprep.mubr.f32.mxu0 %v3578_v20  ;;  %v3614_v38 = vrot.slane %v3578_v20, 1  ;;  %v3785_v25 = vrot.slane %v3578_v20, 2  ;;  %v9529_v12 = vld [vmem:[%s20312_s3 + $0x110] sm:$0xff]  ;;  %v15884_v16 = vld [vmem:[%s20310_s1 + $0x100] sm:$0xff]  ;;  %v9528_v20 = vld [vmem:[%s20312_s3 + $0x108] sm:$0xff] }
 0x564   : > { %v15653_v24 = vmax.f32 %v3577_v22, 0.0  ;;  %v15892_v22 = vld [vmem:[%s12812_s24 + $0x90] sm:$0xff] }
 0x566   : > { %11211 = vmatmul.mubr.f32.vlgmr.msra.gmra.mxu0 %v15653_v24  ;;  %v3615_v40 = vrot.slane %v15653_v24, 1  ;;  %v3786_v48 = vrot.slane %v15653_v24, 2  ;;  %v15931_v24 = vld [vmem:[%s20310_s1 + $0xd8] sm:$0xff] }
 0x567   : > { %3947 = vmatpush1.msra.mxu0 %v15658_v28  ;;  %4010 = vmatprep.mubr.f32.mxu0 %v20426_v61 }
 0x568   : > { %3948 = vmatprep.subr.mxu0 %v15663_v32  ;;  %v3616_v46 = vsel %vm972_vm0, %v3614_v38, %v3615_v40  ;;  %v3787_v56 = vsel %vm1145_vm1, %v3785_v25, %v3786_v48  ;;  %v9527_v38 = vld [vmem:[%s20312_s3 + $0x100] sm:$0xff] }
 0x569   : > { %3949 = vmatpush1.msra.mxu0 %v15669_v34  ;;  %11175 = vmatprep.mubr.f32.mxu1 %v3616_v46  ;;  %v15909_v46 = vld [vmem:[%s20310_s1 + $0xf0] sm:$0xff]  ;;  %v15980_v25 = vld [vmem:[%s20310_s1 + $0xa0] sm:$0xff] }
 0x56a   : > { %3950 = vmatprep.subr.mxu0 %v15676_v44  ;;  %11176 = vmatmul.mubr.f32.vlgmr.msra.gmra.mxu1 %v3615_v40  ;;  %v15903_v40 = vld [vmem:[%s20310_s1 + $0xf8] sm:$0xff] }
 0x56b   : > { %11214 = vmatpush3.msra.mxu1 %v15608_v4  ;;  %3951 = vmatpush1.msra.mxu0 %v15685_v7  ;;  %v15713_v4 = vld [vmem:[%s20310_s1 + $0x1b8] sm:$0xff] }
 0x56c   : > { %11215 = vmatprep.subr.mxu1 %v9541_v21  ;;  %11245 = vmatprep.mubr.f32.mxu1 %v3787_v56  ;;  %v15994_v56 = vld [vmem:[%s20310_s1 + $0x90] sm:$0xff] }
 0x56d   : > { %3952 = vmatprep.subr.mxu0 %v15695_v36  ;;  %11216 = vmatpush3.msra.mxu1 %v9541_v21  ;;  %v15973_v21 = vld [vmem:[%s20310_s1 + $0xa8] sm:$0xff] }
 0x56e   : > { %3953 = vmatpush1.msra.mxu0 %v15705_v59  ;;  %11217 = vmatprep.subr.mxu1 %v9540_v63 }
 0x56f   : > { %3954 = vmatprep.subr.mxu0 %v15713_v4  ;;  %11218 = vmatpush3.msra.mxu1 %v9540_v63  ;;  %v16008_v63 = vld [vmem:[%s20310_s1 + $0x80] sm:$0xff] }
 0x570   : > { %3955 = vmatpush1.msra.mxu0 %v15719_v1  ;;  %11219 = vmatprep.subr.mxu1 %v9539_v0 }
 0x571   : > { %3956 = vmatprep.subr.mxu0 %v15728_v9  ;;  %11220 = vmatpush3.msra.mxu1 %v9539_v0  ;;  %v16029_v0 = vld [vmem:[%s20310_s1 + $0x68] sm:$0xff] }
 0x572   : > { %3957 = vmatpush1.msra.mxu0 %v15734_v37  ;;  %11221 = vmatprep.subr.mxu1 %v9538_v29 }
 0x573   : > { %3958 = vmatprep.subr.mxu0 %v15743_v31  ;;  %11222 = vmatpush3.msra.mxu1 %v9538_v29  ;;  %v16050_v29 = vld [vmem:[%s20310_s1 + $0x50] sm:$0xff] }
 0x574   : > { %3959 = vmatpush1.msra.mxu0 %v15749_v39  ;;  %11223 = vmatprep.subr.mxu1 %v9537_v62 }
 0x575   : > { %3960 = vmatprep.subr.mxu0 %v15758_v15  ;;  %11224 = vmatpush3.msra.mxu1 %v9537_v62  ;;  %v16073_v62 = vld [vmem:[%s20310_s1 + $0x38] sm:$0xff] }
 0x576   : > { %3961 = vmatpush1.msra.mxu0 %v15764_v53  ;;  %11225 = vmatprep.subr.mxu1 %v9536_v57 }
 0x577   : > { %3962 = vmatprep.subr.mxu0 %v15773_v55  ;;  %11226 = vmatpush3.msra.mxu1 %v9536_v57  ;;  %v16090_v57 = vld [vmem:[%s20310_s1 + $0x28] sm:$0xff] }
 0x578   : > { %3963 = vmatpush1.msra.mxu0 %v15779_v5  ;;  %11227 = vmatprep.subr.mxu1 %v9535_v47 }
 0x579   : > { %3964 = vmatprep.subr.mxu0 %v15788_v11  ;;  %11228 = vmatpush3.msra.mxu1 %v9535_v47  ;;  %v16111_v47 = vld [vmem:[%s20310_s1 + $0x2f8] sm:$0xff] }
 0x57a   : > { %3965 = vmatpush1.msra.mxu0 %v15794_v27  ;;  %11229 = vmatprep.subr.mxu1 %v9534_v33 }
 0x57b   : > { %3966 = vmatprep.subr.mxu0 %v15803_v35  ;;  %11230 = vmatpush3.msra.mxu1 %v9534_v33  ;;  %v16128_v33 = vld [vmem:[%s20310_s1 + $0x2f0] sm:$0xff] }
 0x57c   : > { %3967 = vmatpush1.msra.mxu0 %v15809_v41  ;;  %11231 = vmatprep.subr.mxu1 %v9533_v43 }
 0x57d   : > { %3968 = vmatprep.subr.mxu0 %v15818_v3  ;;  %11232 = vmatpush3.msra.mxu1 %v9533_v43  ;;  %v16145_v43 = vld [vmem:[%s20310_s1] sm:$0xff] }
 0x57e   : > { %3969 = vmatpush1.msra.mxu0 %v15824_v13  ;;  %11233 = vmatprep.subr.mxu1 %v9532_v17 }
 0x57f   : > { %3970 = vmatprep.subr.mxu0 %v15833_v54  ;;  %11234 = vmatpush3.msra.mxu1 %v9532_v17  ;;  %v16162_v17 = vld [vmem:[%s20310_s1 + $0x2d8] sm:$0xff] }
 0x580   : > { %3971 = vmatpush1.msra.mxu0 %v15839_v52  ;;  %11235 = vmatprep.subr.mxu1 %v9531_v49 }
 0x581   : > { %3972 = vmatprep.subr.mxu0 %v15848_v60  ;;  %11236 = vmatpush3.msra.mxu1 %v9531_v49  ;;  %v16182_v49 = vld [vmem:[%s20310_s1 + $0x2c0] sm:$0xff] }
 0x582   : > { %3973 = vmatpush1.msra.mxu0 %v15854_v2  ;;  %11237 = vmatprep.subr.mxu1 %v9530_v6 }
 0x583   : > { %3974 = vmatprep.subr.mxu0 %v15863_v42  ;;  %11238 = vmatpush3.msra.mxu1 %v9530_v6  ;;  %v16203_v6 = vld [vmem:[%s20310_s1 + $0x2a8] sm:$0xff] }
 0x584   : > { %3975 = vmatpush1.msra.mxu0 %v15869_v10  ;;  %11239 = vmatprep.subr.mxu1 %v9529_v12 }
 0x585   : > { %3976 = vmatprep.subr.mxu0 %v15878_v14  ;;  %11240 = vmatpush3.msra.mxu1 %v9529_v12  ;;  %v16224_v12 = vld [vmem:[%s20310_s1 + $0x290] sm:$0xff] }
 0x586   : > { %3977 = vmatpush1.msra.mxu0 %v15884_v16  ;;  %11241 = vmatprep.subr.mxu1 %v9528_v20 }
 0x587   : > { %4100 = vmatprep.subr.mxu0 %v15599_v58  ;;  %11242 = vmatpush3.msra.mxu1 %v9528_v20  ;;  %v15917_v58 = vld [vmem:[%s20310_s1 + $0xe8] sm:$0xff]  ;;  %v16245_v20 = vld [vmem:[%s20310_s1 + $0x278] sm:$0xff] }
 0x588   : > { %4011 = vmatmul.mubr.f32.vlgmr.msra.gmra.mxu0 %v15892_v22  ;;  %11243 = vmatprep.subr.mxu1 %v9527_v38 }
 0x589   : > { %4101 = vmatpush1.msra.mxu0 %v15658_v28  ;;  %11244 = vmatpush3.msra.mxu1 %v9527_v38  ;;  %v15924_v28 = vld [vmem:[%s20310_s1 + $0xe0] sm:$0xff]  ;;  %v16252_v38 = vld [vmem:[%s20310_s1 + $0x270] sm:$0xff] }
 0x58a   : > { %4102 = vmatprep.subr.mxu0 %v15663_v32  ;;  %11246 = vmatmul.mubr.f32.vlgmr.msra.gmra.mxu1 %v3786_v48  ;;  %v15938_v32 = vld [vmem:[%s20310_s1 + $0xd0] sm:$0xff]  ;;  %v15959_v48 = vld [vmem:[%s20310_s1 + $0xb8] sm:$0xff] }
 0x58b   : > { %4103 = vmatpush1.msra.mxu0 %v15669_v34  ;;  %4023 = vmatprep.subr.mxu1 %v15903_v40  ;;  %v15945_v34 = vld [vmem:[%s20310_s1 + $0xc8] sm:$0xff] }
 0x58c   : > { %4104 = vmatprep.subr.mxu0 %v15676_v44  ;;  %4024 = vmatpush1.msra.mxu1 %v15909_v46  ;;  %v15952_v44 = vld [vmem:[%s20310_s1 + $0xc0] sm:$0xff] }
 0x58d   : > { %4105 = vmatpush1.msra.mxu0 %v15685_v7  ;;  %4025 = vmatprep.subr.mxu1 %v15917_v58  ;;  %v15966_v7 = vld [vmem:[%s20310_s1 + $0xb0] sm:$0xff] }
 0x58e   : > { %4106 = vmatprep.subr.mxu0 %v15695_v36  ;;  %4026 = vmatpush1.msra.mxu1 %v15924_v28  ;;  %v15987_v36 = vld [vmem:[%s20310_s1 + $0x98] sm:$0xff] }
 0x58f   : > { %4107 = vmatpush1.msra.mxu0 %v15705_v59  ;;  %4027 = vmatprep.subr.mxu1 %v15931_v24  ;;  %v16001_v59 = vld [vmem:[%s20310_s1 + $0x88] sm:$0xff] }
 0x590   : > { %4108 = vmatprep.subr.mxu0 %v15713_v4  ;;  %4028 = vmatpush1.msra.mxu1 %v15938_v32  ;;  %v16015_v4 = vld [vmem:[%s20310_s1 + $0x78] sm:$0xff] }
 0x591   : > { %4109 = vmatpush1.msra.mxu0 %v15719_v1  ;;  %4029 = vmatprep.subr.mxu1 %v15945_v34  ;;  %v16022_v1 = vld [vmem:[%s20310_s1 + $0x70] sm:$0xff] }
 0x592   : > { %4110 = vmatprep.subr.mxu0 %v15728_v9  ;;  %4030 = vmatpush1.msra.mxu1 %v15952_v44  ;;  %v16036_v9 = vld [vmem:[%s20310_s1 + $0x60] sm:$0xff] }
 0x593   : > { %4111 = vmatpush1.msra.mxu0 %v15734_v37  ;;  %4031 = vmatprep.subr.mxu1 %v15959_v48  ;;  %v16043_v37 = vld [vmem:[%s20310_s1 + $0x58] sm:$0xff] }
 0x594   : > { %4112 = vmatprep.subr.mxu0 %v15743_v31  ;;  %4032 = vmatpush1.msra.mxu1 %v15966_v7  ;;  %v16057_v31 = vld [vmem:[%s20310_s1 + $0x48] sm:$0xff] }
 0x595   : > { %4113 = vmatpush1.msra.mxu0 %v15749_v39  ;;  %4033 = vmatprep.subr.mxu1 %v15973_v21  ;;  %v16064_v39 = vld [vmem:[%s20310_s1 + $0x40] sm:$0xff] }
 0x596   : > { %4114 = vmatprep.subr.mxu0 %v15758_v15  ;;  %4034 = vmatpush1.msra.mxu1 %v15980_v25  ;;  %v16078_v15 = vld [vmem:[%s12812_s24 + $0x98] sm:$0x7f] }
 0x597   : > { %4115 = vmatpush1.msra.mxu0 %v15764_v53  ;;  %4035 = vmatprep.subr.mxu1 %v15987_v36  ;;  %v16083_v53 = vld [vmem:[%s20310_s1 + $0x30] sm:$0xff] }
 0x598   : > { %4116 = vmatprep.subr.mxu0 %v15773_v55  ;;  %4036 = vmatpush1.msra.mxu1 %v15994_v56  ;;  %v16097_v55 = vld [vmem:[%s20310_s1 + $0x20] sm:$0xff] }
 0x599   : > { %4117 = vmatpush1.msra.mxu0 %v15779_v5  ;;  %4037 = vmatprep.subr.mxu1 %v16001_v59  ;;  %v16104_v5 = vld [vmem:[%s20310_s1 + $0x18] sm:$0xff] }
 0x59a   : > { %4118 = vmatprep.subr.mxu0 %v15788_v11  ;;  %4038 = vmatpush1.msra.mxu1 %v16008_v63  ;;  %v16118_v11 = vld [vmem:[%s20310_s1 + $0x10] sm:$0xff] }
 0x59b   : > { %4119 = vmatpush1.msra.mxu0 %v15794_v27  ;;  %4039 = vmatprep.subr.mxu1 %v16015_v4  ;;  %v16121_v27 = vld [vmem:[%s12812_s24 + $0x81] sm:$0xff] }
 0x59c   : > { %4120 = vmatprep.subr.mxu0 %v15803_v35  ;;  %4040 = vmatpush1.msra.mxu1 %v16022_v1  ;;  %v16133_v35 = vld [vmem:[%s20310_s1 + $0x8] sm:$0xff] }
 0x59d   : > { %4121 = vmatpush1.msra.mxu0 %v15809_v41  ;;  %4041 = vmatprep.subr.mxu1 %v16029_v0  ;;  %v16140_v41 = vld [vmem:[%s20310_s1 + $0x2e8] sm:$0xff] }
 0x59e   : > { %4122 = vmatprep.subr.mxu0 %v15818_v3  ;;  %4042 = vmatpush1.msra.mxu1 %v16036_v9  ;;  %v16152_v3 = vld [vmem:[%s20310_s1 + $0x2e0] sm:$0xff] }
 0x59f   : > { %4123 = vmatpush1.msra.mxu0 %v15824_v13  ;;  %4043 = vmatprep.subr.mxu1 %v16043_v37  ;;  %v9543_v13 = vld [vmem:[%s12812_s24 + $0x80] sm:$0xff] }
 0x5a0   : > { %4124 = vmatprep.subr.mxu0 %v15833_v54  ;;  %4044 = vmatpush1.msra.mxu1 %v16050_v29  ;;  %v16169_v54 = vld [vmem:[%s20310_s1 + $0x2d0] sm:$0xff] }
 0x5a1   : > { %4125 = vmatpush1.msra.mxu0 %v15839_v52  ;;  %4045 = vmatprep.subr.mxu1 %v16057_v31  ;;  %v16175_v52 = vld [vmem:[%s20310_s1 + $0x2c8] sm:$0xff] }
 0x5a2   : > { %4126 = vmatprep.subr.mxu0 %v15848_v60  ;;  %4046 = vmatpush1.msra.mxu1 %v16064_v39  ;;  %v16189_v60 = vld [vmem:[%s20310_s1 + $0x2b8] sm:$0xff] }
 0x5a3   : > { %4127 = vmatpush1.msra.mxu0 %v15854_v2  ;;  %4016 = vmatprep.mubr.f32.mxu0 %v20426_v61  ;;  %v16196_v2 = vld [vmem:[%s20310_s1 + $0x2b0] sm:$0xff] }
 0x5a4   : > { %4047 = vmatprep.subr.mxu1 %v16073_v62  ;;  %4128 = vmatprep.subr.mxu0 %v15863_v42  ;;  %v16210_v42 = vld [vmem:[%s20310_s1 + $0x2a0] sm:$0xff] }
 0x5a5   : > { %4017 = vmatmul.mubr.f32.gmra.mxu0 %v16078_v15  ;;  %4048 = vmatpush1.msra.mxu1 %v16083_v53 }
 0x5a6   : > { %4129 = vmatpush1.msra.mxu0 %v15869_v10  ;;  %4049 = vmatprep.subr.mxu1 %v16090_v57  ;;  %v16217_v10 = vld [vmem:[%s20310_s1 + $0x298] sm:$0xff] }
 0x5a7   : > { %4130 = vmatprep.subr.mxu0 %v15878_v14  ;;  %4050 = vmatpush1.msra.mxu1 %v16097_v55  ;;  %v16231_v14 = vld [vmem:[%s20310_s1 + $0x288] sm:$0xff] }
 0x5a8   : > { %4131 = vmatpush1.msra.mxu0 %v15884_v16  ;;  %4051 = vmatprep.subr.mxu1 %v16104_v5  ;;  %v16238_v16 = vld [vmem:[%s20310_s1 + $0x280] sm:$0xff] }
 0x5a9   : > { %4164 = vmatprep.mubr.f32.mxu0 %v20426_v61  ;;  %4288 = vmatprep.subr.mxu0 %v16111_v47 }
 0x5aa   : > { %4052 = vmatpush1.msra.mxu1 %v16118_v11  ;;  %4165 = vmatmul.mubr.f32.vlgmr.msra.gmra.mxu0 %v16121_v27 }
 0x5ab   : > { %4289 = vmatpush1.msra.mxu0 %v16128_v33  ;;  %4053 = vmatprep.subr.mxu1 %v16133_v35 }
 0x5ac   : > { %4290 = vmatprep.subr.mxu0 %v16140_v41  ;;  %4054 = vmatpush1.msra.mxu1 %v16145_v43 }
 0x5ad   : > { %4087 = vmatprep.mubr.f32.mxu1 %v20426_v61  ;;  %4291 = vmatpush1.msra.mxu0 %v16152_v3 }
 0x5ae   : > { %4088 = vmatmul.mubr.f32.vlgmr.msra.gmra.mxu1 %v9543_v13  ;;  %4177 = vmatprep.subr.mxu1 %v15903_v40  ;;  %v16259_v40 = vld [vmem:[%s20310_s1 + $0x268] sm:$0xff]  ;;  %v4464_v13 = vld [vmem:[%s20312_s3 + $0x20] sm:$0xff] }
 0x5af   : > { %4292 = vmatprep.subr.mxu0 %v16162_v17  ;;  %4178 = vmatpush1.msra.mxu1 %v15909_v46  ;;  %v16266_v46 = vld [vmem:[%s20310_s1 + $0x260] sm:$0xff] }
 0x5b0   : > { %4293 = vmatpush1.msra.mxu0 %v16169_v54  ;;  %4179 = vmatprep.subr.mxu1 %v15917_v58  ;;  %v16273_v58 = vld [vmem:[%s20310_s1 + $0x258] sm:$0xff] }
 0x5b1   : > { %4294 = vmatprep.subr.mxu0 %v16175_v52  ;;  %4180 = vmatpush1.msra.mxu1 %v15924_v28  ;;  %v16280_v28 = vld [vmem:[%s20310_s1 + $0x250] sm:$0xff] }
 0x5b2   : > { %4295 = vmatpush1.msra.mxu0 %v16182_v49  ;;  %4181 = vmatprep.subr.mxu1 %v15931_v24  ;;  %v16287_v24 = vld [vmem:[%s20310_s1 + $0x248] sm:$0xff] }
 0x5b3   : > { %4296 = vmatprep.subr.mxu0 %v16189_v60  ;;  %4182 = vmatpush1.msra.mxu1 %v15938_v32  ;;  %v16294_v32 = vld [vmem:[%s20310_s1 + $0x240] sm:$0xff] }
 0x5b4   : > { %4297 = vmatpush1.msra.mxu0 %v16196_v2  ;;  %4183 = vmatprep.subr.mxu1 %v15945_v34  ;;  %v16301_v34 = vld [vmem:[%s20310_s1 + $0x238] sm:$0xff] }
 0x5b5   : > { %4298 = vmatprep.subr.mxu0 %v16203_v6  ;;  %4184 = vmatpush1.msra.mxu1 %v15952_v44  ;;  %v16308_v44 = vld [vmem:[%s20310_s1 + $0x230] sm:$0xff] }
 0x5b6   : > { %4299 = vmatpush1.msra.mxu0 %v16210_v42  ;;  %4185 = vmatprep.subr.mxu1 %v15959_v48  ;;  %v16315_v48 = vld [vmem:[%s20310_s1 + $0x228] sm:$0xff] }
 0x5b7   : > { %4300 = vmatprep.subr.mxu0 %v16217_v10  ;;  %4186 = vmatpush1.msra.mxu1 %v15966_v7  ;;  %v16322_v7 = vld [vmem:[%s20310_s1 + $0x220] sm:$0xff] }
 0x5b8   : > { %4301 = vmatpush1.msra.mxu0 %v16224_v12  ;;  %4187 = vmatprep.subr.mxu1 %v15973_v21  ;;  %v9580_v21 = vld [vmem:[%s12812_s24 + $0x89] sm:$0x7f] }
 0x5b9   : > { %4302 = vmatprep.subr.mxu0 %v16231_v14  ;;  %4188 = vmatpush1.msra.mxu1 %v15980_v25  ;;  %v9584_v25 = vld [vmem:[%s20310_s1 + $0x218] sm:$0xff] }
 0x5ba   : > { %4303 = vmatpush1.msra.mxu0 %v16238_v16  ;;  %4189 = vmatprep.subr.mxu1 %v15987_v36  ;;  %v9583_v36 = vld [vmem:[%s20310_s1 + $0x210] sm:$0xff] }
 0x5bb   : > { %4304 = vmatprep.subr.mxu0 %v16245_v20  ;;  %4190 = vmatpush1.msra.mxu1 %v15994_v56  ;;  %v9582_v56 = vld [vmem:[%s20310_s1 + $0x208] sm:$0xff] }
 0x5bc   : > { %4305 = vmatpush1.msra.mxu0 %v16252_v38  ;;  %4191 = vmatprep.subr.mxu1 %v16001_v59  ;;  %v9544_v59 = vld [vmem:[%s12812_s24 + $0x88] sm:$0x7f] }
 0x5bd   : > { %4306 = vmatprep.subr.mxu0 %v16259_v40  ;;  %4192 = vmatpush1.msra.mxu1 %v16008_v63  ;;  %v9581_v63 = vld [vmem:[%s20310_s1 + $0x200] sm:$0xff] }
 0x5be   : > { %4307 = vmatpush1.msra.mxu0 %v16266_v46  ;;  %4193 = vmatprep.subr.mxu1 %v16015_v4  ;;  %v9614_v4 = vld [vmem:[%s12812_s24 + $0x99] sm:$0x7f] }
 0x5bf   : > { %4308 = vmatprep.subr.mxu0 %v16273_v58  ;;  %4194 = vmatpush1.msra.mxu1 %v16022_v1  ;;  %v4475_v1 = vld [vmem:[%s20312_s3 + $0x78] sm:$0xff] }
 0x5c0   : > { %4309 = vmatpush1.msra.mxu0 %v16280_v28  ;;  %4195 = vmatprep.subr.mxu1 %v16029_v0  ;;  %v4474_v0 = vld [vmem:[%s20312_s3 + $0x70] sm:$0xff] }
 0x5c1   : > { %4310 = vmatprep.subr.mxu0 %v16287_v24  ;;  %4196 = vmatpush1.msra.mxu1 %v16036_v9  ;;  %v9630_v9 = vld [vmem:[%s20312_s3 + $0xf8] sm:$0xff] }
 0x5c2   : > { %4311 = vmatpush1.msra.mxu0 %v16294_v32  ;;  %4197 = vmatprep.subr.mxu1 %v16043_v37  ;;  %v9629_v37 = vld [vmem:[%s20312_s3 + $0xf0] sm:$0xff] }
 0x5c3   : > { %4312 = vmatprep.subr.mxu0 %v16301_v34  ;;  %4198 = vmatpush1.msra.mxu1 %v16050_v29  ;;  %v4473_v29 = vld [vmem:[%s20312_s3 + $0x68] sm:$0xff] }
 0x5c4   : > { %4313 = vmatpush1.msra.mxu0 %v16308_v44  ;;  %4199 = vmatprep.subr.mxu1 %v16057_v31  ;;  %v9628_v31 = vld [vmem:[%s20312_s3 + $0xe8] sm:$0xff] }
 0x5c5   : > { %4314 = vmatprep.subr.mxu0 %v16315_v48  ;;  %4170 = vmatprep.mubr.f32.mxu0 %v20426_v61 }
 0x5c6   : > { %4200 = vmatpush1.msra.mxu1 %v16064_v39  ;;  %4315 = vmatpush1.msra.mxu0 %v16322_v7  ;;  %v4472_v39 = vld [vmem:[%s20312_s3 + $0x60] sm:$0xff] }
 0x5c7   : > { %4171 = vmatmul.mubr.f32.gmra.mxu0 %v9580_v21  ;;  %4201 = vmatprep.subr.mxu1 %v16073_v62  ;;  %v9627_v62 = vld [vmem:[%s20312_s3 + $0xe0] sm:$0xff] }
 0x5c8   : > { %4316 = vmatprep.subr.mxu0 %v9584_v25  ;;  %4202 = vmatpush1.msra.mxu1 %v16083_v53  ;;  %v9626_v53 = vld [vmem:[%s20312_s3 + $0xd8] sm:$0xff] }
 0x5c9   : > { %4317 = vmatpush1.msra.mxu0 %v9583_v36  ;;  %4093 = vmatprep.mubr.f32.mxu1 %v20426_v61 }
 0x5ca   : > { %4203 = vmatprep.subr.mxu1 %v16090_v57  ;;  %4318 = vmatprep.subr.mxu0 %v9582_v56  ;;  %v4470_v57 = vld [vmem:[%s20312_s3 + $0x50] sm:$0xff] }
 0x5cb   : > { %4094 = vmatmul.mubr.f32.gmra.mxu1 %v9544_v59  ;;  %4319 = vmatpush1.msra.mxu0 %v9581_v63 }
 0x5cc   : > { %4204 = vmatpush1.msra.mxu1 %v16097_v55  ;;  %4352 = vmatprep.mubr.f32.mxu0 %v20426_v61  ;;  %v9625_v55 = vld [vmem:[%s20312_s3 + $0xd0] sm:$0xff] }
 0x5cd   : > { %4205 = vmatprep.subr.mxu1 %v16104_v5  ;;  %4353 = vmatmul.mubr.f32.vlgmr.msra.gmra.mxu0 %v16121_v27  ;;  %v4469_v5 = vld [vmem:[%s20312_s3 + $0x48] sm:$0xff]  ;;  %v4467_v27 = vld [vmem:[%s20312_s3 + $0x38] sm:$0xff] }
 0x5ce   : > { %4206 = vmatpush1.msra.mxu1 %v16118_v11  ;;  %4241 = vmatprep.mubr.f32.mxu1 %v20426_v61  ;;  %v9624_v11 = vld [vmem:[%s20312_s3 + $0xc8] sm:$0xff] }
 0x5cf   : > { %4207 = vmatprep.subr.mxu1 %v16133_v35  ;;  %4358 = vmatprep.mubr.f32.mxu0 %v20426_v61  ;;  %v4466_v35 = vld [vmem:[%s20312_s3 + $0x30] sm:$0xff] }
 0x5d0   : > { %4208 = vmatpush1.msra.mxu1 %v16145_v43  ;;  %11248 = vmatprep.subr.mxu0 %v9630_v9  ;;  %v4465_v43 = vld [vmem:[%s20312_s3 + $0x28] sm:$0xff] }
 0x5d1   : > { %4242 = vmatmul.mubr.f32.vlgmr.msra.gmra.mxu1 %v15892_v22  ;;  %4359 = vmatmul.mubr.f32.gmra.mxu0 %v9580_v21  ;;  %v9613_v22 = vld [vmem:[%s12812_s24 + $0x91] sm:$0xff] }
 0x5d2   : > { %4369 = vmatprep.subr.mxu1 %v16111_v47  ;;  %4247 = vmatprep.mubr.f32.mxu1 %v20426_v61  ;;  %v4468_v47 = vld [vmem:[%s20312_s3 + $0x40] sm:$0xff] }
 0x5d3   : > { %4370 = vmatpush1.msra.mxu1 %v16128_v33  ;;  %11249 = vmatpush3.msra.mxu0 %v9630_v9  ;;  %v9623_v33 = vld [vmem:[%s20312_s3 + $0xc0] sm:$0xff] }
 0x5d4   : > { %4371 = vmatprep.subr.mxu1 %v16140_v41  ;;  %11250 = vmatprep.subr.mxu0 %v9629_v37  ;;  %v9622_v41 = vld [vmem:[%s20312_s3 + $0xb8] sm:$0xff] }
 0x5d5   : > { %4372 = vmatpush1.msra.mxu1 %v16152_v3  ;;  %11251 = vmatpush3.msra.mxu0 %v9629_v37  ;;  %v9621_v3 = vld [vmem:[%s20312_s3 + $0xb0] sm:$0xff] }
 0x5d6   : > { %4373 = vmatprep.subr.mxu1 %v16162_v17  ;;  %4248 = vmatmul.mubr.f32.gmra.mxu1 %v16078_v15  ;;  %v4471_v15 = vld [vmem:[%s20312_s3 + $0x58] sm:$0xff]  ;;  %v9620_v17 = vld [vmem:[%s20312_s3 + $0xa8] sm:$0xff] }
 0x5d7   : > { %4374 = vmatpush1.msra.mxu1 %v16169_v54  ;;  %4433 = vmatprep.mubr.f32.mxu1 %v20426_v61  ;;  %v4463_v54 = vld [vmem:[%s20312_s3 + $0x18] sm:$0xff] }
 0x5d8   : > { %4375 = vmatprep.subr.mxu1 %v16175_v52  ;;  %11252 = vmatprep.subr.mxu0 %v9628_v31  ;;  %v9619_v52 = vld [vmem:[%s20312_s3 + $0xa0] sm:$0xff] }
 0x5d9   : > { %4376 = vmatpush1.msra.mxu1 %v16182_v49  ;;  %11253 = vmatpush3.msra.mxu0 %v9628_v31  ;;  %v4462_v49 = vld [vmem:[%s20312_s3 + $0x10] sm:$0xff] }
 0x5da   : > { %4377 = vmatprep.subr.mxu1 %v16189_v60  ;;  %11254 = vmatprep.subr.mxu0 %v9627_v62  ;;  %v9618_v60 = vld [vmem:[%s20312_s3 + $0x98] sm:$0xff] }
 0x5db   : > { %4378 = vmatpush1.msra.mxu1 %v16196_v2  ;;  %11255 = vmatpush3.msra.mxu0 %v9627_v62  ;;  %v4461_v2 = vld [vmem:[%s20312_s3 + $0x8] sm:$0xff] }
 0x5dc   : > { %4379 = vmatprep.subr.mxu1 %v16203_v6  ;;  %11256 = vmatprep.subr.mxu0 %v9626_v53  ;;  %v9617_v6 = vld [vmem:[%s20312_s3 + $0x90] sm:$0xff] }
 0x5dd   : > { %4380 = vmatpush1.msra.mxu1 %v16210_v42  ;;  %11257 = vmatpush3.msra.mxu0 %v9626_v53  ;;  %v4460_v42 = vld [vmem:[%s20312_s3] sm:$0xff] }
 0x5de   : > { %4381 = vmatprep.subr.mxu1 %v16217_v10  ;;  %11258 = vmatprep.subr.mxu0 %v9625_v55  ;;  %v9616_v10 = vld [vmem:[%s20312_s3 + $0x88] sm:$0xff] }
 0x5df   : > { %4382 = vmatpush1.msra.mxu1 %v16224_v12  ;;  %11259 = vmatpush3.msra.mxu0 %v9625_v55  ;;  %v16488_v12 = vld [vmem:[%s20310_s1 + $0x1f8] sm:$0xff] }
 0x5e0   : > { %4383 = vmatprep.subr.mxu1 %v16231_v14  ;;  %11260 = vmatprep.subr.mxu0 %v9624_v11 }
 0x5e1   : > { %4384 = vmatpush1.msra.mxu1 %v16238_v16  ;;  %11261 = vmatpush3.msra.mxu0 %v9624_v11  ;;  %v9615_v16 = vld [vmem:[%s20312_s3 + $0x80] sm:$0xff] }
 0x5e2   : > { %4385 = vmatprep.subr.mxu1 %v16245_v20  ;;  %11262 = vmatprep.subr.mxu0 %v9623_v33 }
 0x5e3   : > { %4386 = vmatpush1.msra.mxu1 %v16252_v38  ;;  %11263 = vmatpush3.msra.mxu0 %v9623_v33  ;;  %v16497_v38 = vld [vmem:[%s20312_s3 + $0x178] sm:$0xff] }
 0x5e4   : > { %4387 = vmatprep.subr.mxu1 %v16259_v40  ;;  %11264 = vmatprep.subr.mxu0 %v9622_v41 }
 0x5e5   : > { %4388 = vmatpush1.msra.mxu1 %v16266_v46  ;;  %11265 = vmatpush3.msra.mxu0 %v9622_v41 }
 0x5e6   : > { %4389 = vmatprep.subr.mxu1 %v16273_v58  ;;  %11266 = vmatprep.subr.mxu0 %v9621_v3 }
 0x5e7   : > { %4390 = vmatpush1.msra.mxu1 %v16280_v28  ;;  %11267 = vmatpush3.msra.mxu0 %v9621_v3 }
 0x5e8   : > { %4391 = vmatprep.subr.mxu1 %v16287_v24  ;;  %11268 = vmatprep.subr.mxu0 %v9620_v17 }
 0x5e9   : > { %4392 = vmatpush1.msra.mxu1 %v16294_v32  ;;  %11269 = vmatpush3.msra.mxu0 %v9620_v17 }
 0x5ea   : > { %4393 = vmatprep.subr.mxu1 %v16301_v34  ;;  %11270 = vmatprep.subr.mxu0 %v9619_v52 }
 0x5eb   : > { %4394 = vmatpush1.msra.mxu1 %v16308_v44  ;;  %11271 = vmatpush3.msra.mxu0 %v9619_v52  ;;  %v12251_v44 = vld [vmem:[%s20313_s4] ss:$0 sm:$0xff] }
 0x5ec   : > { %4395 = vmatprep.subr.mxu1 %v16315_v48  ;;  %11272 = vmatprep.subr.mxu0 %v9618_v60 }
 0x5ed   : > { %4396 = vmatpush1.msra.mxu1 %v16322_v7  ;;  %11273 = vmatpush3.msra.mxu0 %v9618_v60 }
 0x5ee   : > { %4397 = vmatprep.subr.mxu1 %v9584_v25  ;;  %11274 = vmatprep.subr.mxu0 %v9617_v6 }
 0x5ef   : > { %4398 = vmatpush1.msra.mxu1 %v9583_v36  ;;  %11275 = vmatpush3.msra.mxu0 %v9617_v6 }
 0x5f0   : > { %4399 = vmatprep.subr.mxu1 %v9582_v56  ;;  %11276 = vmatprep.subr.mxu0 %v9616_v10 }
 0x5f1   : > { %4400 = vmatpush1.msra.mxu1 %v9581_v63  ;;  %11277 = vmatpush3.msra.mxu0 %v9616_v10 }
 0x5f2   : > { %4434 = vmatmul.mubr.f32.vlgmr.msra.gmra.mxu1 %v9613_v22  ;;  %11283 = vmatprep.subr.mxu1 %v4475_v1 }
 0x5f3   : > { %4439 = vmatprep.mubr.f32.mxu1 %v20426_v61  ;;  %11284 = vmatpush3.msra.mxu1 %v4475_v1 }
 0x5f4   : > { %11285 = vmatprep.subr.mxu1 %v4474_v0  ;;  %11278 = vmatprep.subr.mxu0 %v9615_v16 }
 0x5f5   : > { %11286 = vmatpush3.msra.mxu1 %v4474_v0  ;;  %11279 = vmatpush3.msra.mxu0 %v9615_v16 }
 0x5f6   : > { %4440 = vmatmul.mubr.f32.gmra.mxu1 %v9614_v4  ;;  %11287 = vmatprep.subr.mxu1 %v4473_v29 }
 0x5f7   : > { %11288 = vmatpush3.msra.mxu1 %v4473_v29  ;;  %11318 = vmatprep.subr.mxu0 %v16497_v38 }
 0x5f8   : > { %11289 = vmatprep.subr.mxu1 %v4472_v39 }
 0x5f9   : > { %11290 = vmatpush3.msra.mxu1 %v4472_v39 }
 0x5fa   : > { %11291 = vmatprep.subr.mxu1 %v4471_v15 }
 0x5fb   : > { %11292 = vmatpush3.msra.mxu1 %v4471_v15 }
 0x5fc   : > { %11293 = vmatprep.subr.mxu1 %v4470_v57 }
 0x5fd   : > { %11294 = vmatpush3.msra.mxu1 %v4470_v57 }
 0x5fe   : > { %11295 = vmatprep.subr.mxu1 %v4469_v5 }
 0x5ff   : > { %11296 = vmatpush3.msra.mxu1 %v4469_v5 }
 0x600   : > { %11297 = vmatprep.subr.mxu1 %v4468_v47 }
 0x601   : > { %11298 = vmatpush3.msra.mxu1 %v4468_v47 }
 0x602   : > { %11299 = vmatprep.subr.mxu1 %v4467_v27 }
 0x603   : > { %11300 = vmatpush3.msra.mxu1 %v4467_v27 }
 0x604   : > { %11301 = vmatprep.subr.mxu1 %v4466_v35 }
 0x605   : > { %11302 = vmatpush3.msra.mxu1 %v4466_v35 }
 0x606   : > { %11303 = vmatprep.subr.mxu1 %v4465_v43 }
 0x607   : > { %11304 = vmatpush3.msra.mxu1 %v4465_v43 }
 0x608   : > { %11305 = vmatprep.subr.mxu1 %v4464_v13 }
 0x609   : > { %11306 = vmatpush3.msra.mxu1 %v4464_v13 }
 0x60a   : > { %11307 = vmatprep.subr.mxu1 %v4463_v54 }
 0x60b   : > { %11308 = vmatpush3.msra.mxu1 %v4463_v54 }
 0x60c   : > { %11309 = vmatprep.subr.mxu1 %v4462_v49 }
 0x60d   : > { %11310 = vmatpush3.msra.mxu1 %v4462_v49 }
 0x60e   : > { %11311 = vmatprep.subr.mxu1 %v4461_v2 }
 0x60f   : > { %11312 = vmatpush3.msra.mxu1 %v4461_v2 }
 0x610   : > { %11313 = vmatprep.subr.mxu1 %v4460_v42 }
 0x611   : > { %11314 = vmatpush3.msra.mxu1 %v4460_v42 }
 0x612   : > { %4826 = vmatprep.subr.mxu1 %v16488_v12 }
 0x626   : > { %v11212_v20 = vpop.f32.mrf.mxu0 }
 0x628   : > { %v3760_v58 = vpop.f32.mrf.mxu0 }
 0x62a   : > { %v11177_v14 = vpop.f32.mrf.mxu1 }
 0x62b   : > { %v3766_v46 = vadd.f32 %v11212_v20, %v11177_v14 }
 0x62c   : > { %v3685_v40 = vpop.f32.mrf.mxu1 }
 0x62d   : > { %v3761_v24 = vadd.f32 %v3760_v58, %v3685_v40 }
 0x64a   : > { %v11247_v28 = vpop.f32.mrf.mxu1 }
 0x64b   : > { %v3866_v32 = vadd.f32 %v11247_v28, %v3766_v46 }
 0x64c   : > { %v3856_v34 = vpop.f32.mrf.mxu1 }
 0x64d   : > { %v3868_v48 = vadd.f32 %v12251_v44, %v3866_v32  ;;  %v3865_v7 = vadd.f32 %v3856_v34, %v3761_v24 }
 0x64f   : > { %v3870_v21 = vmax.f32 %v3868_v48, 0.0  ;;  %v3867_v25 = vadd.f32 %v12251_v44, %v3865_v7 }
 0x651   : > { %3873 = vst [vmem:[#allocation2 + $0x38] sm:$0x1f] %v3870_v21  ;;  %v3869_v36 = vmax.f32 %v3867_v25, 0.0 }
 0x653   : > { %3872 = vst [vmem:[#allocation2 + $0x30] sm:$0xff] %v3869_v36 }
 0x658   : > { %v8353_v56 = vld [vmem:[#allocation2 + $0x38] sm:$0x1]  ;;  %v8472_v59 = vld [vmem:[#allocation2 + $0x39] sm:$0x1]  ;;  %v8591_v4 = vld [vmem:[#allocation2 + $0x3a] sm:$0x1] }
 0x659   : > { %v8387_v63 = vrot.slane %v8353_v56, 5  ;;  %v8506_v22 = vrot.slane %v8472_v59, 5  ;;  %v8625_v1 = vrot.slane %v8591_v4, 5  ;;  %v8710_v5 = vld [vmem:[#allocation2 + $0x3b] sm:$0x1] }
 0x65a   : > { %v7877_v37 = vld [vmem:[#allocation2 + $0x34] sm:$0x1]  ;;  %v7996_v39 = vld [vmem:[#allocation2 + $0x35] sm:$0x1]  ;;  %v8115_v15 = vld [vmem:[#allocation2 + $0x36] sm:$0x1] }
 0x65b   : > { %v16505_v0 = vsel %vm7458_vm4, %v8387_v63, %v15617_v23  ;;  %v16509_v9 = vsel %vm7458_vm4, %v8506_v22, %v15620_v45  ;;  %v16513_v29 = vsel %vm7458_vm4, %v8625_v1, %v15624_v51  ;;  %v7911_v31 = vrot.slane %v7877_v37, 5  ;;  %v8234_v53 = vld [vmem:[#allocation2 + $0x37] sm:$0x1]  ;;  %v8829_v11 = vld [vmem:[#allocation2 + $0x3c] sm:$0x1] }
 0x65c   : > { %v8030_v62 = vrot.slane %v7996_v39, 5  ;;  %v8149_v23 = vrot.slane %v8115_v15, 5  ;;  %v8268_v55 = vrot.slane %v8234_v53, 5  ;;  %v8744_v47 = vrot.slane %v8710_v5, 5  ;;  %v12252_v53 = vld [vmem:[%s20311_s2] ss:$0 sm:$0xff] }
 0x65d   : > { %v16517_v57 = vsel %vm7458_vm4, %v7911_v31, %v15628_v50  ;;  %v8863_v33 = vrot.slane %v8829_v11, 5 }
 0x65e   : > { %v16521_v45 = vsel %vm7458_vm4, %v8030_v62, %v15632_v8  ;;  %v16525_v51 = vsel %vm7458_vm4, %v8149_v23, %v15637_v18  ;;  %v16529_v27 = vsel %vm7458_vm4, %v8268_v55, %v15640_v19  ;;  %v16533_v50 = vsel %vm7458_vm4, %v8744_v47, %v15644_v26  ;;  %v4012_v8 = vpop.f32.mrf.mxu0 }
 0x65f   : > { %v16537_v35 = vsel %vm7458_vm4, %v8863_v33, %v15648_v30  ;;  %v16547_v33 = vld [vmem:[%s20310_s1 + $0x1f0] sm:$0xff] }
 0x660   : > { %v4014_v41 = vpop.f32.mrf.mxu0 }
 0x665   : > { %v4018_v43 = vpop.f32.mrf.mxu0 }
 0x667   : > { %v4020_v3 = vpop.f32.mrf.mxu0 }
 0x66a   : > { %v4166_v18 = vpop.f32.mrf.mxu0 }
 0x66c   : > { %v4168_v54 = vpop.f32.mrf.mxu0 }
 0x66e   : > { %v4089_v13 = vpop.f32.mrf.mxu1 }
 0x66f   : > { %v4090_v20 = vadd.f32 %v4089_v13, %v4012_v8  ;;  %v16552_v8 = vld [vmem:[%s20310_s1 + $0x1e8] sm:$0xff]  ;;  %v16565_v13 = vld [vmem:[%s20310_s1 + $0x1d8] sm:$0xff] }
 0x670   : > { %v4091_v17 = vpop.f32.mrf.mxu1 }
 0x671   : > { %v4092_v14 = vadd.f32 %v4091_v17, %v4014_v41  ;;  %v16558_v41 = vld [vmem:[%s20310_s1 + $0x1e0] sm:$0xff] }
 0x687   : > { %v4172_v19 = vpop.f32.mrf.mxu0 }
 0x689   : > { %v4174_v60 = vpop.f32.mrf.mxu0 }
 0x68b   : > { %v4095_v52 = vpop.f32.mrf.mxu1 }
 0x68c   : > { %v4096_v44 = vadd.f32 %v4095_v52, %v4018_v43  ;;  %v9645_v52 = vld [vmem:[%s20312_s3 + $0x170] sm:$0xff] }
 0x68d   : > { %v4097_v49 = vpop.f32.mrf.mxu1  ;;  %v4354_v6 = vpop.f32.mrf.mxu0 }
 0x68e   : > { %v4365_v24 = vadd.f32 %v4354_v6, %v4090_v20  ;;  %v4098_v48 = vadd.f32 %v4097_v49, %v4020_v3  ;;  %v16584_v49 = vld [vmem:[%s20310_s1 + $0x1c8] sm:$0xff]  ;;  %v16638_v20 = vld [vmem:[%s20310_s1 + $0x190] sm:$0xff] }
 0x68f   : > { %v4356_v42 = vpop.f32.mrf.mxu0  ;;  %v9644_v6 = vld [vmem:[%s20312_s3 + $0x168] sm:$0xff] }
 0x690   : > { %v4366_v40 = vadd.f32 %v4356_v42, %v4092_v14  ;;  %v9643_v42 = vld [vmem:[%s20312_s3 + $0x160] sm:$0xff] }
 0x691   : > { %v4243_v2 = vpop.f32.mrf.mxu1  ;;  %v4360_v30 = vpop.f32.mrf.mxu0  ;;  %v16623_v14 = vld [vmem:[%s20310_s1 + $0x1a0] sm:$0xff] }
 0x692   : > { %v4244_v58 = vadd.f32 %v4243_v2, %v4166_v18  ;;  %v4450_v25 = vmax.f32 %v4365_v24, %v4366_v40  ;;  %v4367_v1 = vadd.f32 %v4360_v30, %v4096_v44  ;;  %v16594_v2 = vld [vmem:[%s20310_s1 + $0x1c0] sm:$0xff]  ;;  %v9642_v30 = vld [vmem:[%s20312_s3 + $0x158] sm:$0xff]  ;;  %v9641_v40 = vld [vmem:[%s20312_s3 + $0x150] sm:$0xff] }
 0x693   : > { %v4245_v26 = vpop.f32.mrf.mxu1  ;;  %v4362_v32 = vpop.f32.mrf.mxu0  ;;  %v16662_v24 = vld [vmem:[%s20310_s1 + $0x178] sm:$0xff]  ;;  %v16677_v44 = vld [vmem:[%s20310_s1 + $0x168] sm:$0xff] }
 0x694   : > { %v4246_v28 = vadd.f32 %v4245_v26, %v4168_v54  ;;  %v4368_v56 = vadd.f32 %v4362_v32, %v4098_v48  ;;  %v16574_v54 = vld [vmem:[%s20310_s1 + $0x1d0] sm:$0xff]  ;;  %v16683_v48 = vld [vmem:[%s20310_s1 + $0x160] sm:$0xff] }
 0x695   : > { %v16608_v26 = vld [vmem:[%s20310_s1 + $0x1b0] sm:$0xff] }
 0x696   : > { %v4249_v10 = vpop.f32.mrf.mxu1  ;;  %v4451_v62 = vmax.f32 %v4367_v1, %v4368_v56  ;;  %v16668_v32 = vld [vmem:[%s20310_s1 + $0x170] sm:$0xff]  ;;  %v16707_v56 = vld [vmem:[%s20310_s1 + $0x148] sm:$0xff]  ;;  %v9635_v1 = vld [vmem:[%s20312_s3 + $0x120] sm:$0xff] }
 0x697   : > { %v4250_v59 = vadd.f32 %v4249_v10, %v4172_v19  ;;  %v16617_v10 = vld [vmem:[%s20310_s1 + $0x1a8] sm:$0xff] }
 0x698   : > { %v4251_v16 = vpop.f32.mrf.mxu1 }
 0x699   : > { %v4252_v63 = vadd.f32 %v4251_v16, %v4174_v60  ;;  %v16632_v16 = vld [vmem:[%s20310_s1 + $0x198] sm:$0xff] }
 0x6b2   : > { %v4435_v46 = vpop.f32.mrf.mxu1 }
 0x6b3   : > { %v4446_v7 = vadd.f32 %v4435_v46, %v4244_v58  ;;  %v16647_v46 = vld [vmem:[%s20310_s1 + $0x188] sm:$0xff]  ;;  %v16653_v58 = vld [vmem:[%s20310_s1 + $0x180] sm:$0xff] }
 0x6b4   : > { %v4437_v34 = vpop.f32.mrf.mxu1 }
 0x6b5   : > { %v4447_v21 = vadd.f32 %v4437_v34, %v4246_v28  ;;  %v9640_v28 = vld [vmem:[%s20312_s3 + $0x148] sm:$0xff]  ;;  %v9639_v34 = vld [vmem:[%s20312_s3 + $0x140] sm:$0xff] }
 0x6b6   : > { %v4441_v36 = vpop.f32.mrf.mxu1 }
 0x6b7   : > { %v4452_v22 = vmax.f32 %v4446_v7, %v4447_v21  ;;  %v4448_v31 = vadd.f32 %v4441_v36, %v4250_v59  ;;  %v9638_v7 = vld [vmem:[%s20312_s3 + $0x138] sm:$0xff]  ;;  %v9637_v36 = vld [vmem:[%s20312_s3 + $0x130] sm:$0xff]  ;;  %v16713_v59 = vld [vmem:[%s20310_s1 + $0x140] sm:$0xff] }
 0x6b8   : > { %v4443_v4 = vpop.f32.mrf.mxu1  ;;  %v16692_v21 = vld [vmem:[%s20310_s1 + $0x158] sm:$0xff] }
 0x6b9   : > { %v4454_v37 = vmax.f32 %v4450_v25, %v4452_v22  ;;  %v4449_v39 = vadd.f32 %v4443_v4, %v4252_v63  ;;  %v16698_v25 = vld [vmem:[%s20310_s1 + $0x150] sm:$0xff]  ;;  %v9636_v63 = vld [vmem:[%s20312_s3 + $0x128] sm:$0xff]  ;;  %v16722_v22 = vld [vmem:[%s20310_s1 + $0x138] sm:$0xff] }
 0x6ba   : > { %v16728_v4 = vld [vmem:[%s20310_s1 + $0x130] sm:$0xff] }
 0x6bb   : > { %v4453_v15 = vmax.f32 %v4448_v31, %v4449_v39  ;;  %v4456_v23 = vadd.f32 %v12252_v53, %v4454_v37  ;;  %v16737_v37 = vld [vmem:[%s20310_s1 + $0x128] sm:$0xff]  ;;  %v16743_v31 = vld [vmem:[%s20310_s1 + $0x120] sm:$0xff]  ;;  %v9634_v39 = vld [vmem:[%s20312_s3 + $0x118] sm:$0xff] }
 0x6bd   : > { %v4455_v55 = vmax.f32 %v4451_v62, %v4453_v15  ;;  %v4458_v5 = vmax.f32 %v4456_v23, 0.0  ;;  %v16752_v62 = vld [vmem:[%s20310_s1 + $0x118] sm:$0xff]  ;;  %v16758_v15 = vld [vmem:[%s20310_s1 + $0x110] sm:$0xff]  ;;  %v16767_v23 = vld [vmem:[%s20310_s1 + $0x108] sm:$0xff] }
 0x6bf   : > { %v4457_v47 = vadd.f32 %v12252_v53, %v4455_v55  ;;  %11315 = vmatprep.mubr.f32.mxu1 %v4458_v5  ;;  %v4494_v43 = vrot.slane %v4458_v5, 1  ;;  %v4665_v19 = vrot.slane %v4458_v5, 2  ;;  %v9633_v53 = vld [vmem:[%s20312_s3 + $0x110] sm:$0xff]  ;;  %v16773_v55 = vld [vmem:[%s20310_s1 + $0x100] sm:$0xff]  ;;  %v9632_v5 = vld [vmem:[%s20312_s3 + $0x108] sm:$0xff] }
 0x6c1   : > { %v16542_v11 = vmax.f32 %v4457_v47, 0.0  ;;  %v16781_v47 = vld [vmem:[%s12812_s24 + $0xb0] sm:$0xff] }
 0x6c3   : > { %11316 = vmatmul.mubr.f32.vlgmr.msra.gmra.mxu1 %v16542_v11  ;;  %v4495_v3 = vrot.slane %v16542_v11, 1  ;;  %v4666_v18 = vrot.slane %v16542_v11, 2  ;;  %v16820_v11 = vld [vmem:[%s20310_s1 + $0xd8] sm:$0xff] }
 0x6c4   : > { %4827 = vmatpush1.msra.mxu1 %v16547_v33  ;;  %4890 = vmatprep.mubr.f32.mxu1 %v20426_v61 }
 0x6c5   : > { %4828 = vmatprep.subr.mxu1 %v16552_v8  ;;  %v4496_v17 = vsel %vm972_vm0, %v4494_v43, %v4495_v3  ;;  %v4667_v60 = vsel %vm1145_vm1, %v4665_v19, %v4666_v18  ;;  %v9631_v43 = vld [vmem:[%s20312_s3 + $0x100] sm:$0xff] }
 0x6c6   : > { %4829 = vmatpush1.msra.mxu1 %v16558_v41  ;;  %11280 = vmatprep.mubr.f32.mxu0 %v4496_v17  ;;  %v16798_v17 = vld [vmem:[%s20310_s1 + $0xf0] sm:$0xff]  ;;  %v16869_v19 = vld [vmem:[%s20310_s1 + $0xa0] sm:$0xff] }
 0x6c7   : > { %4830 = vmatprep.subr.mxu1 %v16565_v13  ;;  %11281 = vmatmul.mubr.f32.vlgmr.msra.gmra.mxu0 %v4495_v3  ;;  %v16792_v3 = vld [vmem:[%s20310_s1 + $0xf8] sm:$0xff] }
 0x6c8   : > { %11319 = vmatpush3.msra.mxu0 %v16497_v38  ;;  %4831 = vmatpush1.msra.mxu1 %v16574_v54  ;;  %v16602_v38 = vld [vmem:[%s20310_s1 + $0x1b8] sm:$0xff] }
 0x6c9   : > { %11320 = vmatprep.subr.mxu0 %v9645_v52  ;;  %11350 = vmatprep.mubr.f32.mxu0 %v4667_v60  ;;  %v16883_v60 = vld [vmem:[%s20310_s1 + $0x90] sm:$0xff] }
 0x6ca   : > { %4832 = vmatprep.subr.mxu1 %v16584_v49  ;;  %11321 = vmatpush3.msra.mxu0 %v9645_v52  ;;  %v16862_v52 = vld [vmem:[%s20310_s1 + $0xa8] sm:$0xff] }
 0x6cb   : > { %4833 = vmatpush1.msra.mxu1 %v16594_v2  ;;  %11322 = vmatprep.subr.mxu0 %v9644_v6 }
 0x6cc   : > { %4834 = vmatprep.subr.mxu1 %v16602_v38  ;;  %11323 = vmatpush3.msra.mxu0 %v9644_v6  ;;  %v16897_v6 = vld [vmem:[%s20310_s1 + $0x80] sm:$0xff] }
 0x6cd   : > { %4835 = vmatpush1.msra.mxu1 %v16608_v26  ;;  %11324 = vmatprep.subr.mxu0 %v9643_v42 }
 0x6ce   : > { %4836 = vmatprep.subr.mxu1 %v16617_v10  ;;  %11325 = vmatpush3.msra.mxu0 %v9643_v42  ;;  %v16918_v42 = vld [vmem:[%s20310_s1 + $0x68] sm:$0xff] }
 0x6cf   : > { %4837 = vmatpush1.msra.mxu1 %v16623_v14  ;;  %11326 = vmatprep.subr.mxu0 %v9642_v30 }
 0x6d0   : > { %4838 = vmatprep.subr.mxu1 %v16632_v16  ;;  %11327 = vmatpush3.msra.mxu0 %v9642_v30  ;;  %v16939_v30 = vld [vmem:[%s20310_s1 + $0x50] sm:$0xff] }
 0x6d1   : > { %4839 = vmatpush1.msra.mxu1 %v16638_v20  ;;  %11328 = vmatprep.subr.mxu0 %v9641_v40 }
 0x6d2   : > { %4840 = vmatprep.subr.mxu1 %v16647_v46  ;;  %11329 = vmatpush3.msra.mxu0 %v9641_v40  ;;  %v16962_v40 = vld [vmem:[%s20310_s1 + $0x38] sm:$0xff] }
 0x6d3   : > { %4841 = vmatpush1.msra.mxu1 %v16653_v58  ;;  %11330 = vmatprep.subr.mxu0 %v9640_v28 }
 0x6d4   : > { %4842 = vmatprep.subr.mxu1 %v16662_v24  ;;  %11331 = vmatpush3.msra.mxu0 %v9640_v28  ;;  %v16979_v28 = vld [vmem:[%s20310_s1 + $0x28] sm:$0xff] }
 0x6d5   : > { %4843 = vmatpush1.msra.mxu1 %v16668_v32  ;;  %11332 = vmatprep.subr.mxu0 %v9639_v34 }
 0x6d6   : > { %4844 = vmatprep.subr.mxu1 %v16677_v44  ;;  %11333 = vmatpush3.msra.mxu0 %v9639_v34  ;;  %v17000_v34 = vld [vmem:[%s20310_s1 + $0x2f8] sm:$0xff] }
 0x6d7   : > { %4845 = vmatpush1.msra.mxu1 %v16683_v48  ;;  %11334 = vmatprep.subr.mxu0 %v9638_v7 }
 0x6d8   : > { %4846 = vmatprep.subr.mxu1 %v16692_v21  ;;  %11335 = vmatpush3.msra.mxu0 %v9638_v7  ;;  %v17017_v7 = vld [vmem:[%s20310_s1 + $0x2f0] sm:$0xff] }
 0x6d9   : > { %4847 = vmatpush1.msra.mxu1 %v16698_v25  ;;  %11336 = vmatprep.subr.mxu0 %v9637_v36 }
 0x6da   : > { %4848 = vmatprep.subr.mxu1 %v16707_v56  ;;  %11337 = vmatpush3.msra.mxu0 %v9637_v36  ;;  %v17034_v36 = vld [vmem:[%s20310_s1] sm:$0xff] }
 0x6db   : > { %4849 = vmatpush1.msra.mxu1 %v16713_v59  ;;  %11338 = vmatprep.subr.mxu0 %v9636_v63 }
 0x6dc   : > { %4850 = vmatprep.subr.mxu1 %v16722_v22  ;;  %11339 = vmatpush3.msra.mxu0 %v9636_v63  ;;  %v17051_v63 = vld [vmem:[%s20310_s1 + $0x2d8] sm:$0xff] }
 0x6dd   : > { %4851 = vmatpush1.msra.mxu1 %v16728_v4  ;;  %11340 = vmatprep.subr.mxu0 %v9635_v1 }
 0x6de   : > { %4852 = vmatprep.subr.mxu1 %v16737_v37  ;;  %11341 = vmatpush3.msra.mxu0 %v9635_v1  ;;  %v17071_v1 = vld [vmem:[%s20310_s1 + $0x2c0] sm:$0xff] }
 0x6df   : > { %4853 = vmatpush1.msra.mxu1 %v16743_v31  ;;  %11342 = vmatprep.subr.mxu0 %v9634_v39 }
 0x6e0   : > { %4854 = vmatprep.subr.mxu1 %v16752_v62  ;;  %11343 = vmatpush3.msra.mxu0 %v9634_v39  ;;  %v17092_v39 = vld [vmem:[%s20310_s1 + $0x2a8] sm:$0xff] }
 0x6e1   : > { %4855 = vmatpush1.msra.mxu1 %v16758_v15  ;;  %11344 = vmatprep.subr.mxu0 %v9633_v53 }
 0x6e2   : > { %4856 = vmatprep.subr.mxu1 %v16767_v23  ;;  %11345 = vmatpush3.msra.mxu0 %v9633_v53  ;;  %v17113_v53 = vld [vmem:[%s20310_s1 + $0x290] sm:$0xff] }
 0x6e3   : > { %4857 = vmatpush1.msra.mxu1 %v16773_v55  ;;  %11346 = vmatprep.subr.mxu0 %v9632_v5 }
 0x6e4   : > { %4980 = vmatprep.subr.mxu1 %v16488_v12  ;;  %11347 = vmatpush3.msra.mxu0 %v9632_v5  ;;  %v16806_v12 = vld [vmem:[%s20310_s1 + $0xe8] sm:$0xff]  ;;  %v17134_v5 = vld [vmem:[%s20310_s1 + $0x278] sm:$0xff] }
 0x6e5   : > { %4891 = vmatmul.mubr.f32.vlgmr.msra.gmra.mxu1 %v16781_v47  ;;  %11348 = vmatprep.subr.mxu0 %v9631_v43 }
 0x6e6   : > { %4981 = vmatpush1.msra.mxu1 %v16547_v33  ;;  %11349 = vmatpush3.msra.mxu0 %v9631_v43  ;;  %v16813_v33 = vld [vmem:[%s20310_s1 + $0xe0] sm:$0xff]  ;;  %v17141_v43 = vld [vmem:[%s20310_s1 + $0x270] sm:$0xff] }
 0x6e7   : > { %4982 = vmatprep.subr.mxu1 %v16552_v8  ;;  %11351 = vmatmul.mubr.f32.vlgmr.msra.gmra.mxu0 %v4666_v18  ;;  %v16827_v8 = vld [vmem:[%s20310_s1 + $0xd0] sm:$0xff]  ;;  %v16848_v18 = vld [vmem:[%s20310_s1 + $0xb8] sm:$0xff] }
 0x6e8   : > { %4983 = vmatpush1.msra.mxu1 %v16558_v41  ;;  %4903 = vmatprep.subr.mxu0 %v16792_v3  ;;  %v16834_v41 = vld [vmem:[%s20310_s1 + $0xc8] sm:$0xff] }
 0x6e9   : > { %4984 = vmatprep.subr.mxu1 %v16565_v13  ;;  %4904 = vmatpush1.msra.mxu0 %v16798_v17  ;;  %v16841_v13 = vld [vmem:[%s20310_s1 + $0xc0] sm:$0xff] }
 0x6ea   : > { %4985 = vmatpush1.msra.mxu1 %v16574_v54  ;;  %4905 = vmatprep.subr.mxu0 %v16806_v12  ;;  %v16855_v54 = vld [vmem:[%s20310_s1 + $0xb0] sm:$0xff] }
 0x6eb   : > { %4986 = vmatprep.subr.mxu1 %v16584_v49  ;;  %4906 = vmatpush1.msra.mxu0 %v16813_v33  ;;  %v16876_v49 = vld [vmem:[%s20310_s1 + $0x98] sm:$0xff] }
 0x6ec   : > { %4987 = vmatpush1.msra.mxu1 %v16594_v2  ;;  %4907 = vmatprep.subr.mxu0 %v16820_v11  ;;  %v16890_v2 = vld [vmem:[%s20310_s1 + $0x88] sm:$0xff] }
 0x6ed   : > { %4988 = vmatprep.subr.mxu1 %v16602_v38  ;;  %4908 = vmatpush1.msra.mxu0 %v16827_v8  ;;  %v16904_v38 = vld [vmem:[%s20310_s1 + $0x78] sm:$0xff] }
 0x6ee   : > { %4989 = vmatpush1.msra.mxu1 %v16608_v26  ;;  %4909 = vmatprep.subr.mxu0 %v16834_v41  ;;  %v16911_v26 = vld [vmem:[%s20310_s1 + $0x70] sm:$0xff] }
 0x6ef   : > { %4990 = vmatprep.subr.mxu1 %v16617_v10  ;;  %4910 = vmatpush1.msra.mxu0 %v16841_v13  ;;  %v16925_v10 = vld [vmem:[%s20310_s1 + $0x60] sm:$0xff] }
 0x6f0   : > { %4991 = vmatpush1.msra.mxu1 %v16623_v14  ;;  %4911 = vmatprep.subr.mxu0 %v16848_v18  ;;  %v16932_v14 = vld [vmem:[%s20310_s1 + $0x58] sm:$0xff] }
 0x6f1   : > { %4992 = vmatprep.subr.mxu1 %v16632_v16  ;;  %4912 = vmatpush1.msra.mxu0 %v16855_v54  ;;  %v16946_v16 = vld [vmem:[%s20310_s1 + $0x48] sm:$0xff] }
 0x6f2   : > { %4993 = vmatpush1.msra.mxu1 %v16638_v20  ;;  %4913 = vmatprep.subr.mxu0 %v16862_v52  ;;  %v16953_v20 = vld [vmem:[%s20310_s1 + $0x40] sm:$0xff] }
 0x6f3   : > { %4994 = vmatprep.subr.mxu1 %v16647_v46  ;;  %4914 = vmatpush1.msra.mxu0 %v16869_v19  ;;  %v16967_v46 = vld [vmem:[%s12812_s24 + $0xb8] sm:$0x7f] }
 0x6f4   : > { %4995 = vmatpush1.msra.mxu1 %v16653_v58  ;;  %4915 = vmatprep.subr.mxu0 %v16876_v49  ;;  %v16972_v58 = vld [vmem:[%s20310_s1 + $0x30] sm:$0xff] }
 0x6f5   : > { %4996 = vmatprep.subr.mxu1 %v16662_v24  ;;  %4916 = vmatpush1.msra.mxu0 %v16883_v60  ;;  %v16986_v24 = vld [vmem:[%s20310_s1 + $0x20] sm:$0xff] }
 0x6f6   : > { %4997 = vmatpush1.msra.mxu1 %v16668_v32  ;;  %4917 = vmatprep.subr.mxu0 %v16890_v2  ;;  %v16993_v32 = vld [vmem:[%s20310_s1 + $0x18] sm:$0xff] }
 0x6f7   : > { %4998 = vmatprep.subr.mxu1 %v16677_v44  ;;  %4918 = vmatpush1.msra.mxu0 %v16897_v6  ;;  %v17007_v44 = vld [vmem:[%s20310_s1 + $0x10] sm:$0xff] }
 0x6f8   : > { %4999 = vmatpush1.msra.mxu1 %v16683_v48  ;;  %4919 = vmatprep.subr.mxu0 %v16904_v38  ;;  %v17010_v48 = vld [vmem:[%s12812_s24 + $0xa1] sm:$0xff] }
 0x6f9   : > { %5000 = vmatprep.subr.mxu1 %v16692_v21  ;;  %4920 = vmatpush1.msra.mxu0 %v16911_v26  ;;  %v17022_v21 = vld [vmem:[%s20310_s1 + $0x8] sm:$0xff] }
 0x6fa   : > { %5001 = vmatpush1.msra.mxu1 %v16698_v25  ;;  %4921 = vmatprep.subr.mxu0 %v16918_v42  ;;  %v17029_v25 = vld [vmem:[%s20310_s1 + $0x2e8] sm:$0xff] }
 0x6fb   : > { %5002 = vmatprep.subr.mxu1 %v16707_v56  ;;  %4922 = vmatpush1.msra.mxu0 %v16925_v10  ;;  %v17041_v56 = vld [vmem:[%s20310_s1 + $0x2e0] sm:$0xff] }
 0x6fc   : > { %5003 = vmatpush1.msra.mxu1 %v16713_v59  ;;  %4923 = vmatprep.subr.mxu0 %v16932_v14  ;;  %v9647_v59 = vld [vmem:[%s12812_s24 + $0xa0] sm:$0xff] }
 0x6fd   : > { %5004 = vmatprep.subr.mxu1 %v16722_v22  ;;  %4924 = vmatpush1.msra.mxu0 %v16939_v30  ;;  %v17058_v22 = vld [vmem:[%s20310_s1 + $0x2d0] sm:$0xff] }
 0x6fe   : > { %5005 = vmatpush1.msra.mxu1 %v16728_v4  ;;  %4925 = vmatprep.subr.mxu0 %v16946_v16  ;;  %v17064_v4 = vld [vmem:[%s20310_s1 + $0x2c8] sm:$0xff] }
 0x6ff   : > { %5006 = vmatprep.subr.mxu1 %v16737_v37  ;;  %4926 = vmatpush1.msra.mxu0 %v16953_v20  ;;  %v17078_v37 = vld [vmem:[%s20310_s1 + $0x2b8] sm:$0xff] }
 0x700   : > { %5007 = vmatpush1.msra.mxu1 %v16743_v31  ;;  %4896 = vmatprep.mubr.f32.mxu1 %v20426_v61  ;;  %v17085_v31 = vld [vmem:[%s20310_s1 + $0x2b0] sm:$0xff] }
 0x701   : > { %4927 = vmatprep.subr.mxu0 %v16962_v40  ;;  %5008 = vmatprep.subr.mxu1 %v16752_v62  ;;  %v17099_v62 = vld [vmem:[%s20310_s1 + $0x2a0] sm:$0xff] }
 0x702   : > { %4897 = vmatmul.mubr.f32.gmra.mxu1 %v16967_v46  ;;  %4928 = vmatpush1.msra.mxu0 %v16972_v58 }
 0x703   : > { %5009 = vmatpush1.msra.mxu1 %v16758_v15  ;;  %4929 = vmatprep.subr.mxu0 %v16979_v28  ;;  %v17106_v15 = vld [vmem:[%s20310_s1 + $0x298] sm:$0xff] }
 0x704   : > { %5010 = vmatprep.subr.mxu1 %v16767_v23  ;;  %4930 = vmatpush1.msra.mxu0 %v16986_v24  ;;  %v17120_v23 = vld [vmem:[%s20310_s1 + $0x288] sm:$0xff] }
 0x705   : > { %5011 = vmatpush1.msra.mxu1 %v16773_v55  ;;  %4931 = vmatprep.subr.mxu0 %v16993_v32  ;;  %v17127_v55 = vld [vmem:[%s20310_s1 + $0x280] sm:$0xff] }
 0x706   : > { %5044 = vmatprep.mubr.f32.mxu1 %v20426_v61  ;;  %5168 = vmatprep.subr.mxu1 %v17000_v34 }
 0x707   : > { %4932 = vmatpush1.msra.mxu0 %v17007_v44  ;;  %5045 = vmatmul.mubr.f32.vlgmr.msra.gmra.mxu1 %v17010_v48 }
 0x708   : > { %5169 = vmatpush1.msra.mxu1 %v17017_v7  ;;  %4933 = vmatprep.subr.mxu0 %v17022_v21 }
 0x709   : > { %5170 = vmatprep.subr.mxu1 %v17029_v25  ;;  %4934 = vmatpush1.msra.mxu0 %v17034_v36 }
 0x70a   : > { %4967 = vmatprep.mubr.f32.mxu0 %v20426_v61  ;;  %5171 = vmatpush1.msra.mxu1 %v17041_v56 }
 0x70b   : > { %4968 = vmatmul.mubr.f32.vlgmr.msra.gmra.mxu0 %v9647_v59  ;;  %5057 = vmatprep.subr.mxu0 %v16792_v3  ;;  %v17148_v3 = vld [vmem:[%s20310_s1 + $0x268] sm:$0xff]  ;;  %v5344_v59 = vld [vmem:[%s20312_s3 + $0x20] sm:$0xff] }
 0x70c   : > { %5172 = vmatprep.subr.mxu1 %v17051_v63  ;;  %5058 = vmatpush1.msra.mxu0 %v16798_v17  ;;  %v17155_v17 = vld [vmem:[%s20310_s1 + $0x260] sm:$0xff] }
 0x70d   : > { %5173 = vmatpush1.msra.mxu1 %v17058_v22  ;;  %5059 = vmatprep.subr.mxu0 %v16806_v12  ;;  %v17162_v12 = vld [vmem:[%s20310_s1 + $0x258] sm:$0xff] }
 0x70e   : > { %5174 = vmatprep.subr.mxu1 %v17064_v4  ;;  %5060 = vmatpush1.msra.mxu0 %v16813_v33  ;;  %v17169_v33 = vld [vmem:[%s20310_s1 + $0x250] sm:$0xff] }
 0x70f   : > { %5175 = vmatpush1.msra.mxu1 %v17071_v1  ;;  %5061 = vmatprep.subr.mxu0 %v16820_v11  ;;  %v17176_v11 = vld [vmem:[%s20310_s1 + $0x248] sm:$0xff] }
 0x710   : > { %5176 = vmatprep.subr.mxu1 %v17078_v37  ;;  %5062 = vmatpush1.msra.mxu0 %v16827_v8  ;;  %v17183_v8 = vld [vmem:[%s20310_s1 + $0x240] sm:$0xff] }
 0x711   : > { %5177 = vmatpush1.msra.mxu1 %v17085_v31  ;;  %5063 = vmatprep.subr.mxu0 %v16834_v41  ;;  %v17190_v41 = vld [vmem:[%s20310_s1 + $0x238] sm:$0xff] }
 0x712   : > { %5178 = vmatprep.subr.mxu1 %v17092_v39  ;;  %5064 = vmatpush1.msra.mxu0 %v16841_v13  ;;  %v17197_v13 = vld [vmem:[%s20310_s1 + $0x230] sm:$0xff] }
 0x713   : > { %5179 = vmatpush1.msra.mxu1 %v17099_v62  ;;  %5065 = vmatprep.subr.mxu0 %v16848_v18  ;;  %v17204_v18 = vld [vmem:[%s20310_s1 + $0x228] sm:$0xff] }
 0x714   : > { %5180 = vmatprep.subr.mxu1 %v17106_v15  ;;  %5066 = vmatpush1.msra.mxu0 %v16855_v54  ;;  %v17211_v54 = vld [vmem:[%s20310_s1 + $0x220] sm:$0xff] }
 0x715   : > { %5181 = vmatpush1.msra.mxu1 %v17113_v53  ;;  %5067 = vmatprep.subr.mxu0 %v16862_v52  ;;  %v9684_v52 = vld [vmem:[%s12812_s24 + $0xa9] sm:$0x7f] }
 0x716   : > { %5182 = vmatprep.subr.mxu1 %v17120_v23  ;;  %5068 = vmatpush1.msra.mxu0 %v16869_v19  ;;  %v9688_v19 = vld [vmem:[%s20310_s1 + $0x218] sm:$0xff] }
 0x717   : > { %5183 = vmatpush1.msra.mxu1 %v17127_v55  ;;  %5069 = vmatprep.subr.mxu0 %v16876_v49  ;;  %v9687_v49 = vld [vmem:[%s20310_s1 + $0x210] sm:$0xff] }
 0x718   : > { %5184 = vmatprep.subr.mxu1 %v17134_v5  ;;  %5070 = vmatpush1.msra.mxu0 %v16883_v60  ;;  %v9686_v60 = vld [vmem:[%s20310_s1 + $0x208] sm:$0xff] }
 0x719   : > { %5185 = vmatpush1.msra.mxu1 %v17141_v43  ;;  %5071 = vmatprep.subr.mxu0 %v16890_v2  ;;  %v9648_v2 = vld [vmem:[%s12812_s24 + $0xa8] sm:$0x7f] }
 0x71a   : > { %5186 = vmatprep.subr.mxu1 %v17148_v3  ;;  %5072 = vmatpush1.msra.mxu0 %v16897_v6  ;;  %v9685_v6 = vld [vmem:[%s20310_s1 + $0x200] sm:$0xff] }
 0x71b   : > { %5187 = vmatpush1.msra.mxu1 %v17155_v17  ;;  %5073 = vmatprep.subr.mxu0 %v16904_v38  ;;  %v9718_v38 = vld [vmem:[%s12812_s24 + $0xb9] sm:$0x7f] }
 0x71c   : > { %5188 = vmatprep.subr.mxu1 %v17162_v12  ;;  %5074 = vmatpush1.msra.mxu0 %v16911_v26  ;;  %v5355_v26 = vld [vmem:[%s20312_s3 + $0x78] sm:$0xff] }
 0x71d   : > { %5189 = vmatpush1.msra.mxu1 %v17169_v33  ;;  %5075 = vmatprep.subr.mxu0 %v16918_v42  ;;  %v5354_v42 = vld [vmem:[%s20312_s3 + $0x70] sm:$0xff] }
 0x71e   : > { %5190 = vmatprep.subr.mxu1 %v17176_v11  ;;  %5076 = vmatpush1.msra.mxu0 %v16925_v10  ;;  %v9734_v10 = vld [vmem:[%s20312_s3 + $0xf8] sm:$0xff] }
 0x71f   : > { %5191 = vmatpush1.msra.mxu1 %v17183_v8  ;;  %5077 = vmatprep.subr.mxu0 %v16932_v14  ;;  %v9733_v14 = vld [vmem:[%s20312_s3 + $0xf0] sm:$0xff] }
 0x720   : > { %5192 = vmatprep.subr.mxu1 %v17190_v41  ;;  %5078 = vmatpush1.msra.mxu0 %v16939_v30  ;;  %v5353_v30 = vld [vmem:[%s20312_s3 + $0x68] sm:$0xff] }
 0x721   : > { %5193 = vmatpush1.msra.mxu1 %v17197_v13  ;;  %5079 = vmatprep.subr.mxu0 %v16946_v16  ;;  %v9732_v16 = vld [vmem:[%s20312_s3 + $0xe8] sm:$0xff] }
 0x722   : > { %5194 = vmatprep.subr.mxu1 %v17204_v18  ;;  %5050 = vmatprep.mubr.f32.mxu1 %v20426_v61 }
 0x723   : > { %5080 = vmatpush1.msra.mxu0 %v16953_v20  ;;  %5195 = vmatpush1.msra.mxu1 %v17211_v54  ;;  %v5352_v20 = vld [vmem:[%s20312_s3 + $0x60] sm:$0xff] }
 0x724   : > { %5051 = vmatmul.mubr.f32.gmra.mxu1 %v9684_v52  ;;  %5081 = vmatprep.subr.mxu0 %v16962_v40  ;;  %v9731_v40 = vld [vmem:[%s20312_s3 + $0xe0] sm:$0xff] }
 0x725   : > { %5196 = vmatprep.subr.mxu1 %v9688_v19  ;;  %5082 = vmatpush1.msra.mxu0 %v16972_v58  ;;  %v9730_v58 = vld [vmem:[%s20312_s3 + $0xd8] sm:$0xff] }
 0x726   : > { %5197 = vmatpush1.msra.mxu1 %v9687_v49  ;;  %4973 = vmatprep.mubr.f32.mxu0 %v20426_v61 }
 0x727   : > { %5083 = vmatprep.subr.mxu0 %v16979_v28  ;;  %5198 = vmatprep.subr.mxu1 %v9686_v60  ;;  %v5350_v28 = vld [vmem:[%s20312_s3 + $0x50] sm:$0xff] }
 0x728   : > { %4974 = vmatmul.mubr.f32.gmra.mxu0 %v9648_v2  ;;  %5199 = vmatpush1.msra.mxu1 %v9685_v6 }
 0x729   : > { %5084 = vmatpush1.msra.mxu0 %v16986_v24  ;;  %5232 = vmatprep.mubr.f32.mxu1 %v20426_v61  ;;  %v9729_v24 = vld [vmem:[%s20312_s3 + $0xd0] sm:$0xff] }
 0x72a   : > { %5085 = vmatprep.subr.mxu0 %v16993_v32  ;;  %5233 = vmatmul.mubr.f32.vlgmr.msra.gmra.mxu1 %v17010_v48  ;;  %v5349_v32 = vld [vmem:[%s20312_s3 + $0x48] sm:$0xff]  ;;  %v5347_v48 = vld [vmem:[%s20312_s3 + $0x38] sm:$0xff] }
 0x72b   : > { %5086 = vmatpush1.msra.mxu0 %v17007_v44  ;;  %5121 = vmatprep.mubr.f32.mxu0 %v20426_v61  ;;  %v9728_v44 = vld [vmem:[%s20312_s3 + $0xc8] sm:$0xff] }
 0x72c   : > { %5087 = vmatprep.subr.mxu0 %v17022_v21  ;;  %5238 = vmatprep.mubr.f32.mxu1 %v20426_v61  ;;  %v5346_v21 = vld [vmem:[%s20312_s3 + $0x30] sm:$0xff] }
 0x72d   : > { %5088 = vmatpush1.msra.mxu0 %v17034_v36  ;;  %11353 = vmatprep.subr.mxu1 %v9734_v10  ;;  %v5345_v36 = vld [vmem:[%s20312_s3 + $0x28] sm:$0xff] }
 0x72e   : > { %5122 = vmatmul.mubr.f32.vlgmr.msra.gmra.mxu0 %v16781_v47  ;;  %5239 = vmatmul.mubr.f32.gmra.mxu1 %v9684_v52  ;;  %v9717_v47 = vld [vmem:[%s12812_s24 + $0xb1] sm:$0xff] }
 0x72f   : > { %5249 = vmatprep.subr.mxu0 %v17000_v34  ;;  %5127 = vmatprep.mubr.f32.mxu0 %v20426_v61  ;;  %v5348_v34 = vld [vmem:[%s20312_s3 + $0x40] sm:$0xff] }
 0x730   : > { %5250 = vmatpush1.msra.mxu0 %v17017_v7  ;;  %11354 = vmatpush3.msra.mxu1 %v9734_v10  ;;  %v9727_v7 = vld [vmem:[%s20312_s3 + $0xc0] sm:$0xff] }
 0x731   : > { %5251 = vmatprep.subr.mxu0 %v17029_v25  ;;  %11355 = vmatprep.subr.mxu1 %v9733_v14  ;;  %v9726_v25 = vld [vmem:[%s20312_s3 + $0xb8] sm:$0xff] }
 0x732   : > { %5252 = vmatpush1.msra.mxu0 %v17041_v56  ;;  %11356 = vmatpush3.msra.mxu1 %v9733_v14  ;;  %v9725_v56 = vld [vmem:[%s20312_s3 + $0xb0] sm:$0xff] }
 0x733   : > { %5253 = vmatprep.subr.mxu0 %v17051_v63  ;;  %5128 = vmatmul.mubr.f32.gmra.mxu0 %v16967_v46  ;;  %v5351_v46 = vld [vmem:[%s20312_s3 + $0x58] sm:$0xff]  ;;  %v9724_v63 = vld [vmem:[%s20312_s3 + $0xa8] sm:$0xff] }
 0x734   : > { %5254 = vmatpush1.msra.mxu0 %v17058_v22  ;;  %5313 = vmatprep.mubr.f32.mxu0 %v20426_v61  ;;  %v5343_v22 = vld [vmem:[%s20312_s3 + $0x18] sm:$0xff] }
 0x735   : > { %5255 = vmatprep.subr.mxu0 %v17064_v4  ;;  %11357 = vmatprep.subr.mxu1 %v9732_v16  ;;  %v9723_v4 = vld [vmem:[%s20312_s3 + $0xa0] sm:$0xff] }
 0x736   : > { %5256 = vmatpush1.msra.mxu0 %v17071_v1  ;;  %11358 = vmatpush3.msra.mxu1 %v9732_v16  ;;  %v5342_v1 = vld [vmem:[%s20312_s3 + $0x10] sm:$0xff] }
 0x737   : > { %5257 = vmatprep.subr.mxu0 %v17078_v37  ;;  %11359 = vmatprep.subr.mxu1 %v9731_v40  ;;  %v9722_v37 = vld [vmem:[%s20312_s3 + $0x98] sm:$0xff] }
 0x738   : > { %5258 = vmatpush1.msra.mxu0 %v17085_v31  ;;  %11360 = vmatpush3.msra.mxu1 %v9731_v40  ;;  %v5341_v31 = vld [vmem:[%s20312_s3 + $0x8] sm:$0xff] }
 0x739   : > { %5259 = vmatprep.subr.mxu0 %v17092_v39  ;;  %11361 = vmatprep.subr.mxu1 %v9730_v58  ;;  %v9721_v39 = vld [vmem:[%s20312_s3 + $0x90] sm:$0xff] }
 0x73a   : > { %5260 = vmatpush1.msra.mxu0 %v17099_v62  ;;  %11362 = vmatpush3.msra.mxu1 %v9730_v58  ;;  %v5340_v62 = vld [vmem:[%s20312_s3] sm:$0xff] }
 0x73b   : > { %5261 = vmatprep.subr.mxu0 %v17106_v15  ;;  %11363 = vmatprep.subr.mxu1 %v9729_v24  ;;  %v9720_v15 = vld [vmem:[%s20312_s3 + $0x88] sm:$0xff] }
 0x73c   : > { %5262 = vmatpush1.msra.mxu0 %v17113_v53  ;;  %11364 = vmatpush3.msra.mxu1 %v9729_v24  ;;  %v17377_v53 = vld [vmem:[%s20310_s1 + $0x1f8] sm:$0xff] }
 0x73d   : > { %5263 = vmatprep.subr.mxu0 %v17120_v23  ;;  %11365 = vmatprep.subr.mxu1 %v9728_v44 }
 0x73e   : > { %5264 = vmatpush1.msra.mxu0 %v17127_v55  ;;  %11366 = vmatpush3.msra.mxu1 %v9728_v44  ;;  %v9719_v55 = vld [vmem:[%s20312_s3 + $0x80] sm:$0xff] }
 0x73f   : > { %5265 = vmatprep.subr.mxu0 %v17134_v5  ;;  %11367 = vmatprep.subr.mxu1 %v9727_v7 }
 0x740   : > { %5266 = vmatpush1.msra.mxu0 %v17141_v43  ;;  %11368 = vmatpush3.msra.mxu1 %v9727_v7  ;;  %v17386_v43 = vld [vmem:[%s20312_s3 + $0x178] sm:$0xff] }
 0x741   : > { %5267 = vmatprep.subr.mxu0 %v17148_v3  ;;  %11369 = vmatprep.subr.mxu1 %v9726_v25 }
 0x742   : > { %5268 = vmatpush1.msra.mxu0 %v17155_v17  ;;  %11370 = vmatpush3.msra.mxu1 %v9726_v25 }
 0x743   : > { %5269 = vmatprep.subr.mxu0 %v17162_v12  ;;  %11371 = vmatprep.subr.mxu1 %v9725_v56 }
 0x744   : > { %5270 = vmatpush1.msra.mxu0 %v17169_v33  ;;  %11372 = vmatpush3.msra.mxu1 %v9725_v56 }
 0x745   : > { %5271 = vmatprep.subr.mxu0 %v17176_v11  ;;  %11373 = vmatprep.subr.mxu1 %v9724_v63 }
 0x746   : > { %5272 = vmatpush1.msra.mxu0 %v17183_v8  ;;  %11374 = vmatpush3.msra.mxu1 %v9724_v63 }
 0x747   : > { %5273 = vmatprep.subr.mxu0 %v17190_v41  ;;  %11375 = vmatprep.subr.mxu1 %v9723_v4 }
 0x748   : > { %5274 = vmatpush1.msra.mxu0 %v17197_v13  ;;  %11376 = vmatpush3.msra.mxu1 %v9723_v4  ;;  %v12253_v13 = vld [vmem:[%s20313_s4] ss:$0 sm:$0xff] }
 0x749   : > { %5275 = vmatprep.subr.mxu0 %v17204_v18  ;;  %11377 = vmatprep.subr.mxu1 %v9722_v37 }
 0x74a   : > { %5276 = vmatpush1.msra.mxu0 %v17211_v54  ;;  %11378 = vmatpush3.msra.mxu1 %v9722_v37 }
 0x74b   : > { %5277 = vmatprep.subr.mxu0 %v9688_v19  ;;  %11379 = vmatprep.subr.mxu1 %v9721_v39 }
 0x74c   : > { %5278 = vmatpush1.msra.mxu0 %v9687_v49  ;;  %11380 = vmatpush3.msra.mxu1 %v9721_v39 }
 0x74d   : > { %5279 = vmatprep.subr.mxu0 %v9686_v60  ;;  %11381 = vmatprep.subr.mxu1 %v9720_v15 }
 0x74e   : > { %5280 = vmatpush1.msra.mxu0 %v9685_v6  ;;  %11382 = vmatpush3.msra.mxu1 %v9720_v15 }
 0x74f   : > { %5314 = vmatmul.mubr.f32.vlgmr.msra.gmra.mxu0 %v9717_v47  ;;  %11388 = vmatprep.subr.mxu0 %v5355_v26 }
 0x750   : > { %5319 = vmatprep.mubr.f32.mxu0 %v20426_v61  ;;  %11389 = vmatpush3.msra.mxu0 %v5355_v26 }
 0x751   : > { %11390 = vmatprep.subr.mxu0 %v5354_v42  ;;  %11383 = vmatprep.subr.mxu1 %v9719_v55 }
 0x752   : > { %11391 = vmatpush3.msra.mxu0 %v5354_v42  ;;  %11384 = vmatpush3.msra.mxu1 %v9719_v55 }
 0x753   : > { %5320 = vmatmul.mubr.f32.gmra.mxu0 %v9718_v38  ;;  %11392 = vmatprep.subr.mxu0 %v5353_v30 }
 0x754   : > { %11393 = vmatpush3.msra.mxu0 %v5353_v30  ;;  %11423 = vmatprep.subr.mxu1 %v17386_v43 }
 0x755   : > { %11394 = vmatprep.subr.mxu0 %v5352_v20 }
 0x756   : > { %11395 = vmatpush3.msra.mxu0 %v5352_v20 }
 0x757   : > { %11396 = vmatprep.subr.mxu0 %v5351_v46 }
 0x758   : > { %11397 = vmatpush3.msra.mxu0 %v5351_v46 }
 0x759   : > { %11398 = vmatprep.subr.mxu0 %v5350_v28 }
 0x75a   : > { %11399 = vmatpush3.msra.mxu0 %v5350_v28 }
 0x75b   : > { %11400 = vmatprep.subr.mxu0 %v5349_v32 }
 0x75c   : > { %11401 = vmatpush3.msra.mxu0 %v5349_v32 }
 0x75d   : > { %11402 = vmatprep.subr.mxu0 %v5348_v34 }
 0x75e   : > { %11403 = vmatpush3.msra.mxu0 %v5348_v34 }
 0x75f   : > { %11404 = vmatprep.subr.mxu0 %v5347_v48 }
 0x760   : > { %11405 = vmatpush3.msra.mxu0 %v5347_v48 }
 0x761   : > { %11406 = vmatprep.subr.mxu0 %v5346_v21 }
 0x762   : > { %11407 = vmatpush3.msra.mxu0 %v5346_v21 }
 0x763   : > { %11408 = vmatprep.subr.mxu0 %v5345_v36 }
 0x764   : > { %11409 = vmatpush3.msra.mxu0 %v5345_v36 }
 0x765   : > { %11410 = vmatprep.subr.mxu0 %v5344_v59 }
 0x766   : > { %11411 = vmatpush3.msra.mxu0 %v5344_v59 }
 0x767   : > { %11412 = vmatprep.subr.mxu0 %v5343_v22 }
 0x768   : > { %11413 = vmatpush3.msra.mxu0 %v5343_v22 }
 0x769   : > { %11414 = vmatprep.subr.mxu0 %v5342_v1 }
 0x76a   : > { %11415 = vmatpush3.msra.mxu0 %v5342_v1 }
 0x76b   : > { %11416 = vmatprep.subr.mxu0 %v5341_v31 }
 0x76c   : > { %11417 = vmatpush3.msra.mxu0 %v5341_v31 }
 0x76d   : > { %11418 = vmatprep.subr.mxu0 %v5340_v62 }
 0x76e   : > { %11419 = vmatpush3.msra.mxu0 %v5340_v62 }
 0x76f   : > { %5706 = vmatprep.subr.mxu0 %v17377_v53 }
 0x783   : > { %v11317_v5 = vpop.f32.mrf.mxu1 }
 0x785   : > { %v4640_v12 = vpop.f32.mrf.mxu1 }
 0x787   : > { %v11282_v23 = vpop.f32.mrf.mxu0 }
 0x788   : > { %v4646_v17 = vadd.f32 %v11317_v5, %v11282_v23 }
 0x789   : > { %v4565_v3 = vpop.f32.mrf.mxu0 }
 0x78a   : > { %v4641_v11 = vadd.f32 %v4640_v12, %v4565_v3 }
 0x7a7   : > { %v11352_v33 = vpop.f32.mrf.mxu0 }
 0x7a8   : > { %v4746_v8 = vadd.f32 %v11352_v33, %v4646_v17 }
 0x7a9   : > { %v4736_v41 = vpop.f32.mrf.mxu0 }
 0x7aa   : > { %v4748_v18 = vadd.f32 %v12253_v13, %v4746_v8  ;;  %v4745_v54 = vadd.f32 %v4736_v41, %v4641_v11 }
 0x7ac   : > { %v4750_v52 = vmax.f32 %v4748_v18, 0.0  ;;  %v4747_v19 = vadd.f32 %v12253_v13, %v4745_v54 }
 0x7ae   : > { %4753 = vst [vmem:[#allocation2 + $0x48] sm:$0x1f] %v4750_v52  ;;  %v4749_v49 = vmax.f32 %v4747_v19, 0.0 }
 0x7b0   : > { %4752 = vst [vmem:[#allocation2 + $0x40] sm:$0xff] %v4749_v49 }
 0x7b5   : > { %v8354_v60 = vld [vmem:[#allocation2 + $0x48] sm:$0x1]  ;;  %v8473_v2 = vld [vmem:[#allocation2 + $0x49] sm:$0x1]  ;;  %v8592_v38 = vld [vmem:[#allocation2 + $0x4a] sm:$0x1] }
 0x7b6   : > { %v8389_v6 = vrot.slane %v8354_v60, 4  ;;  %v8508_v47 = vrot.slane %v8473_v2, 4  ;;  %v8627_v26 = vrot.slane %v8592_v38, 4  ;;  %v8711_v32 = vld [vmem:[#allocation2 + $0x4b] sm:$0x1] }
 0x7b7   : > { %v7878_v14 = vld [vmem:[#allocation2 + $0x44] sm:$0x1]  ;;  %v7997_v20 = vld [vmem:[#allocation2 + $0x45] sm:$0x1]  ;;  %v8116_v46 = vld [vmem:[#allocation2 + $0x46] sm:$0x1] }
 0x7b8   : > { %v17394_v42 = vsel %vm7461_vm5, %v8389_v6, %v16505_v0  ;;  %v17398_v10 = vsel %vm7461_vm5, %v8508_v47, %v16509_v9  ;;  %v17402_v30 = vsel %vm7461_vm5, %v8627_v26, %v16513_v29  ;;  %v7913_v16 = vrot.slane %v7878_v14, 4  ;;  %v8235_v58 = vld [vmem:[#allocation2 + $0x47] sm:$0x1]  ;;  %v8830_v44 = vld [vmem:[#allocation2 + $0x4c] sm:$0x1] }
 0x7b9   : > { %v8032_v40 = vrot.slane %v7997_v20, 4  ;;  %v8151_v0 = vrot.slane %v8116_v46, 4  ;;  %v8270_v24 = vrot.slane %v8235_v58, 4  ;;  %v8746_v34 = vrot.slane %v8711_v32, 4  ;;  %v12254_v58 = vld [vmem:[%s20311_s2] ss:$0 sm:$0xff] }
 0x7ba   : > { %v17406_v28 = vsel %vm7461_vm5, %v7913_v16, %v16517_v57  ;;  %v8865_v7 = vrot.slane %v8830_v44, 4 }
 0x7bb   : > { %v17410_v9 = vsel %vm7461_vm5, %v8032_v40, %v16521_v45  ;;  %v17414_v29 = vsel %vm7461_vm5, %v8151_v0, %v16525_v51  ;;  %v17418_v48 = vsel %vm7461_vm5, %v8270_v24, %v16529_v27  ;;  %v17422_v57 = vsel %vm7461_vm5, %v8746_v34, %v16533_v50  ;;  %v4892_v45 = vpop.f32.mrf.mxu1 }
 0x7bc   : > { %v17426_v21 = vsel %vm7461_vm5, %v8865_v7, %v16537_v35  ;;  %v17436_v7 = vld [vmem:[%s20310_s1 + $0x1f0] sm:$0xff] }
 0x7bd   : > { %v4894_v25 = vpop.f32.mrf.mxu1 }
 0x7c2   : > { %v4898_v36 = vpop.f32.mrf.mxu1 }
 0x7c4   : > { %v4900_v56 = vpop.f32.mrf.mxu1 }
 0x7c7   : > { %v5046_v51 = vpop.f32.mrf.mxu1 }
 0x7c9   : > { %v5048_v22 = vpop.f32.mrf.mxu1 }
 0x7cb   : > { %v4969_v59 = vpop.f32.mrf.mxu0 }
 0x7cc   : > { %v4970_v5 = vadd.f32 %v4969_v59, %v4892_v45  ;;  %v17441_v45 = vld [vmem:[%s20310_s1 + $0x1e8] sm:$0xff]  ;;  %v17454_v59 = vld [vmem:[%s20310_s1 + $0x1d8] sm:$0xff] }
 0x7cd   : > { %v4971_v63 = vpop.f32.mrf.mxu0 }
 0x7ce   : > { %v4972_v23 = vadd.f32 %v4971_v63, %v4894_v25  ;;  %v17447_v25 = vld [vmem:[%s20310_s1 + $0x1e0] sm:$0xff] }
 0x7e4   : > { %v5052_v27 = vpop.f32.mrf.mxu1 }
 0x7e6   : > { %v5054_v37 = vpop.f32.mrf.mxu1 }
 0x7e8   : > { %v4975_v4 = vpop.f32.mrf.mxu0 }
 0x7e9   : > { %v4976_v13 = vadd.f32 %v4975_v4, %v4898_v36  ;;  %v9749_v4 = vld [vmem:[%s20312_s3 + $0x170] sm:$0xff] }
 0x7ea   : > { %v4977_v1 = vpop.f32.mrf.mxu0  ;;  %v5234_v39 = vpop.f32.mrf.mxu1 }
 0x7eb   : > { %v5245_v11 = vadd.f32 %v5234_v39, %v4970_v5  ;;  %v4978_v18 = vadd.f32 %v4977_v1, %v4900_v56  ;;  %v17473_v1 = vld [vmem:[%s20310_s1 + $0x1c8] sm:$0xff]  ;;  %v17527_v5 = vld [vmem:[%s20310_s1 + $0x190] sm:$0xff] }
 0x7ec   : > { %v5236_v62 = vpop.f32.mrf.mxu1  ;;  %v9748_v39 = vld [vmem:[%s20312_s3 + $0x168] sm:$0xff] }
 0x7ed   : > { %v5246_v3 = vadd.f32 %v5236_v62, %v4972_v23  ;;  %v9747_v62 = vld [vmem:[%s20312_s3 + $0x160] sm:$0xff] }
 0x7ee   : > { %v5123_v31 = vpop.f32.mrf.mxu0  ;;  %v5240_v35 = vpop.f32.mrf.mxu1  ;;  %v17512_v23 = vld [vmem:[%s20310_s1 + $0x1a0] sm:$0xff] }
 0x7ef   : > { %v5124_v12 = vadd.f32 %v5123_v31, %v5046_v51  ;;  %v5330_v19 = vmax.f32 %v5245_v11, %v5246_v3  ;;  %v5247_v26 = vadd.f32 %v5240_v35, %v4976_v13  ;;  %v17483_v31 = vld [vmem:[%s20310_s1 + $0x1c0] sm:$0xff]  ;;  %v9746_v35 = vld [vmem:[%s20312_s3 + $0x158] sm:$0xff]  ;;  %v9745_v3 = vld [vmem:[%s20312_s3 + $0x150] sm:$0xff] }
 0x7f0   : > { %v5125_v50 = vpop.f32.mrf.mxu0  ;;  %v5242_v8 = vpop.f32.mrf.mxu1  ;;  %v17551_v11 = vld [vmem:[%s20310_s1 + $0x178] sm:$0xff]  ;;  %v17566_v13 = vld [vmem:[%s20310_s1 + $0x168] sm:$0xff] }
 0x7f1   : > { %v5126_v33 = vadd.f32 %v5125_v50, %v5048_v22  ;;  %v5248_v60 = vadd.f32 %v5242_v8, %v4978_v18  ;;  %v17463_v22 = vld [vmem:[%s20310_s1 + $0x1d0] sm:$0xff]  ;;  %v17572_v18 = vld [vmem:[%s20310_s1 + $0x160] sm:$0xff] }
 0x7f2   : > { %v17497_v50 = vld [vmem:[%s20310_s1 + $0x1b0] sm:$0xff] }
 0x7f3   : > { %v5129_v15 = vpop.f32.mrf.mxu0  ;;  %v5331_v40 = vmax.f32 %v5247_v26, %v5248_v60  ;;  %v17557_v8 = vld [vmem:[%s20310_s1 + $0x170] sm:$0xff]  ;;  %v17596_v60 = vld [vmem:[%s20310_s1 + $0x148] sm:$0xff]  ;;  %v9739_v26 = vld [vmem:[%s20312_s3 + $0x120] sm:$0xff] }
 0x7f4   : > { %v5130_v2 = vadd.f32 %v5129_v15, %v5052_v27  ;;  %v17506_v15 = vld [vmem:[%s20310_s1 + $0x1a8] sm:$0xff] }
 0x7f5   : > { %v5131_v55 = vpop.f32.mrf.mxu0 }
 0x7f6   : > { %v5132_v6 = vadd.f32 %v5131_v55, %v5054_v37  ;;  %v17521_v55 = vld [vmem:[%s20310_s1 + $0x198] sm:$0xff] }
 0x80f   : > { %v5315_v17 = vpop.f32.mrf.mxu0 }
 0x810   : > { %v5326_v54 = vadd.f32 %v5315_v17, %v5124_v12  ;;  %v17536_v17 = vld [vmem:[%s20310_s1 + $0x188] sm:$0xff]  ;;  %v17542_v12 = vld [vmem:[%s20310_s1 + $0x180] sm:$0xff] }
 0x811   : > { %v5317_v41 = vpop.f32.mrf.mxu0 }
 0x812   : > { %v5327_v52 = vadd.f32 %v5317_v41, %v5126_v33  ;;  %v9744_v33 = vld [vmem:[%s20312_s3 + $0x148] sm:$0xff]  ;;  %v9743_v41 = vld [vmem:[%s20312_s3 + $0x140] sm:$0xff] }
 0x813   : > { %v5321_v49 = vpop.f32.mrf.mxu0 }
 0x814   : > { %v5332_v47 = vmax.f32 %v5326_v54, %v5327_v52  ;;  %v5328_v16 = vadd.f32 %v5321_v49, %v5130_v2  ;;  %v9742_v54 = vld [vmem:[%s20312_s3 + $0x138] sm:$0xff]  ;;  %v9741_v49 = vld [vmem:[%s20312_s3 + $0x130] sm:$0xff]  ;;  %v17602_v2 = vld [vmem:[%s20310_s1 + $0x140] sm:$0xff] }
 0x815   : > { %v5323_v38 = vpop.f32.mrf.mxu0  ;;  %v17581_v52 = vld [vmem:[%s20310_s1 + $0x158] sm:$0xff] }
 0x816   : > { %v5334_v14 = vmax.f32 %v5330_v19, %v5332_v47  ;;  %v5329_v20 = vadd.f32 %v5323_v38, %v5132_v6  ;;  %v17587_v19 = vld [vmem:[%s20310_s1 + $0x150] sm:$0xff]  ;;  %v9740_v6 = vld [vmem:[%s20312_s3 + $0x128] sm:$0xff]  ;;  %v17611_v47 = vld [vmem:[%s20310_s1 + $0x138] sm:$0xff] }
 0x817   : > { %v17617_v38 = vld [vmem:[%s20310_s1 + $0x130] sm:$0xff] }
 0x818   : > { %v5333_v46 = vmax.f32 %v5328_v16, %v5329_v20  ;;  %v5336_v0 = vadd.f32 %v12254_v58, %v5334_v14  ;;  %v17626_v14 = vld [vmem:[%s20310_s1 + $0x128] sm:$0xff]  ;;  %v17632_v16 = vld [vmem:[%s20310_s1 + $0x120] sm:$0xff]  ;;  %v9738_v20 = vld [vmem:[%s20312_s3 + $0x118] sm:$0xff] }
 0x81a   : > { %v5335_v24 = vmax.f32 %v5331_v40, %v5333_v46  ;;  %v5338_v32 = vmax.f32 %v5336_v0, 0.0  ;;  %v17641_v40 = vld [vmem:[%s20310_s1 + $0x118] sm:$0xff]  ;;  %v17647_v46 = vld [vmem:[%s20310_s1 + $0x110] sm:$0xff]  ;;  %v17656_v0 = vld [vmem:[%s20310_s1 + $0x108] sm:$0xff] }
 0x81c   : > { %v5337_v34 = vadd.f32 %v12254_v58, %v5335_v24  ;;  %11420 = vmatprep.mubr.f32.mxu0 %v5338_v32  ;;  %v5374_v36 = vrot.slane %v5338_v32, 1  ;;  %v5545_v27 = vrot.slane %v5338_v32, 2  ;;  %v9737_v58 = vld [vmem:[%s20312_s3 + $0x110] sm:$0xff]  ;;  %v17662_v24 = vld [vmem:[%s20310_s1 + $0x100] sm:$0xff]  ;;  %v9736_v32 = vld [vmem:[%s20312_s3 + $0x108] sm:$0xff] }
 0x81e   : > { %v17431_v44 = vmax.f32 %v5337_v34, 0.0  ;;  %v17670_v34 = vld [vmem:[%s12812_s24 + $0xd0] sm:$0xff] }
 0x820   : > { %11421 = vmatmul.mubr.f32.vlgmr.msra.gmra.mxu0 %v17431_v44  ;;  %v5375_v56 = vrot.slane %v17431_v44, 1  ;;  %v5546_v51 = vrot.slane %v17431_v44, 2  ;;  %v17709_v44 = vld [vmem:[%s20310_s1 + $0xd8] sm:$0xff] }
 0x821   : > { %5707 = vmatpush1.msra.mxu0 %v17436_v7  ;;  %5770 = vmatprep.mubr.f32.mxu0 %v20426_v61 }
 0x822   : > { %5708 = vmatprep.subr.mxu0 %v17441_v45  ;;  %v5376_v63 = vsel %vm972_vm0, %v5374_v36, %v5375_v56  ;;  %v5547_v37 = vsel %vm1145_vm1, %v5545_v27, %v5546_v51  ;;  %v9735_v36 = vld [vmem:[%s20312_s3 + $0x100] sm:$0xff] }
 0x823   : > { %5709 = vmatpush1.msra.mxu0 %v17447_v25  ;;  %11385 = vmatprep.mubr.f32.mxu1 %v5376_v63  ;;  %v17687_v63 = vld [vmem:[%s20310_s1 + $0xf0] sm:$0xff]  ;;  %v17758_v27 = vld [vmem:[%s20310_s1 + $0xa0] sm:$0xff] }
 0x824   : > { %5710 = vmatprep.subr.mxu0 %v17454_v59  ;;  %11386 = vmatmul.mubr.f32.vlgmr.msra.gmra.mxu1 %v5375_v56  ;;  %v17681_v56 = vld [vmem:[%s20310_s1 + $0xf8] sm:$0xff] }
 0x825   : > { %11424 = vmatpush3.msra.mxu1 %v17386_v43  ;;  %5711 = vmatpush1.msra.mxu0 %v17463_v22  ;;  %v17491_v43 = vld [vmem:[%s20310_s1 + $0x1b8] sm:$0xff] }
 0x826   : > { %11425 = vmatprep.subr.mxu1 %v9749_v4  ;;  %11455 = vmatprep.mubr.f32.mxu1 %v5547_v37  ;;  %v17772_v37 = vld [vmem:[%s20310_s1 + $0x90] sm:$0xff] }
 0x827   : > { %5712 = vmatprep.subr.mxu0 %v17473_v1  ;;  %11426 = vmatpush3.msra.mxu1 %v9749_v4  ;;  %v17751_v4 = vld [vmem:[%s20310_s1 + $0xa8] sm:$0xff] }
 0x828   : > { %5713 = vmatpush1.msra.mxu0 %v17483_v31  ;;  %11427 = vmatprep.subr.mxu1 %v9748_v39 }
 0x829   : > { %5714 = vmatprep.subr.mxu0 %v17491_v43  ;;  %11428 = vmatpush3.msra.mxu1 %v9748_v39  ;;  %v17786_v39 = vld [vmem:[%s20310_s1 + $0x80] sm:$0xff] }
 0x82a   : > { %5715 = vmatpush1.msra.mxu0 %v17497_v50  ;;  %11429 = vmatprep.subr.mxu1 %v9747_v62 }
 0x82b   : > { %5716 = vmatprep.subr.mxu0 %v17506_v15  ;;  %11430 = vmatpush3.msra.mxu1 %v9747_v62  ;;  %v17807_v62 = vld [vmem:[%s20310_s1 + $0x68] sm:$0xff] }
 0x82c   : > { %5717 = vmatpush1.msra.mxu0 %v17512_v23  ;;  %11431 = vmatprep.subr.mxu1 %v9746_v35 }
 0x82d   : > { %5718 = vmatprep.subr.mxu0 %v17521_v55  ;;  %11432 = vmatpush3.msra.mxu1 %v9746_v35  ;;  %v17828_v35 = vld [vmem:[%s20310_s1 + $0x50] sm:$0xff] }
 0x82e   : > { %5719 = vmatpush1.msra.mxu0 %v17527_v5  ;;  %11433 = vmatprep.subr.mxu1 %v9745_v3 }
 0x82f   : > { %5720 = vmatprep.subr.mxu0 %v17536_v17  ;;  %11434 = vmatpush3.msra.mxu1 %v9745_v3  ;;  %v17851_v3 = vld [vmem:[%s20310_s1 + $0x38] sm:$0xff] }
 0x830   : > { %5721 = vmatpush1.msra.mxu0 %v17542_v12  ;;  %11435 = vmatprep.subr.mxu1 %v9744_v33 }
 0x831   : > { %5722 = vmatprep.subr.mxu0 %v17551_v11  ;;  %11436 = vmatpush3.msra.mxu1 %v9744_v33  ;;  %v17868_v33 = vld [vmem:[%s20310_s1 + $0x28] sm:$0xff] }
 0x832   : > { %5723 = vmatpush1.msra.mxu0 %v17557_v8  ;;  %11437 = vmatprep.subr.mxu1 %v9743_v41 }
 0x833   : > { %5724 = vmatprep.subr.mxu0 %v17566_v13  ;;  %11438 = vmatpush3.msra.mxu1 %v9743_v41  ;;  %v17889_v41 = vld [vmem:[%s20310_s1 + $0x2f8] sm:$0xff] }
 0x834   : > { %5725 = vmatpush1.msra.mxu0 %v17572_v18  ;;  %11439 = vmatprep.subr.mxu1 %v9742_v54 }
 0x835   : > { %5726 = vmatprep.subr.mxu0 %v17581_v52  ;;  %11440 = vmatpush3.msra.mxu1 %v9742_v54  ;;  %v17906_v54 = vld [vmem:[%s20310_s1 + $0x2f0] sm:$0xff] }
 0x836   : > { %5727 = vmatpush1.msra.mxu0 %v17587_v19  ;;  %11441 = vmatprep.subr.mxu1 %v9741_v49 }
 0x837   : > { %5728 = vmatprep.subr.mxu0 %v17596_v60  ;;  %11442 = vmatpush3.msra.mxu1 %v9741_v49  ;;  %v17923_v49 = vld [vmem:[%s20310_s1] sm:$0xff] }
 0x838   : > { %5729 = vmatpush1.msra.mxu0 %v17602_v2  ;;  %11443 = vmatprep.subr.mxu1 %v9740_v6 }
 0x839   : > { %5730 = vmatprep.subr.mxu0 %v17611_v47  ;;  %11444 = vmatpush3.msra.mxu1 %v9740_v6  ;;  %v17940_v6 = vld [vmem:[%s20310_s1 + $0x2d8] sm:$0xff] }
 0x83a   : > { %5731 = vmatpush1.msra.mxu0 %v17617_v38  ;;  %11445 = vmatprep.subr.mxu1 %v9739_v26 }
 0x83b   : > { %5732 = vmatprep.subr.mxu0 %v17626_v14  ;;  %11446 = vmatpush3.msra.mxu1 %v9739_v26  ;;  %v17960_v26 = vld [vmem:[%s20310_s1 + $0x2c0] sm:$0xff] }
 0x83c   : > { %5733 = vmatpush1.msra.mxu0 %v17632_v16  ;;  %11447 = vmatprep.subr.mxu1 %v9738_v20 }
 0x83d   : > { %5734 = vmatprep.subr.mxu0 %v17641_v40  ;;  %11448 = vmatpush3.msra.mxu1 %v9738_v20  ;;  %v17981_v20 = vld [vmem:[%s20310_s1 + $0x2a8] sm:$0xff] }
 0x83e   : > { %5735 = vmatpush1.msra.mxu0 %v17647_v46  ;;  %11449 = vmatprep.subr.mxu1 %v9737_v58 }
 0x83f   : > { %5736 = vmatprep.subr.mxu0 %v17656_v0  ;;  %11450 = vmatpush3.msra.mxu1 %v9737_v58  ;;  %v18002_v58 = vld [vmem:[%s20310_s1 + $0x290] sm:$0xff] }
 0x840   : > { %5737 = vmatpush1.msra.mxu0 %v17662_v24  ;;  %11451 = vmatprep.subr.mxu1 %v9736_v32 }
 0x841   : > { %5860 = vmatprep.subr.mxu0 %v17377_v53  ;;  %11452 = vmatpush3.msra.mxu1 %v9736_v32  ;;  %v17695_v53 = vld [vmem:[%s20310_s1 + $0xe8] sm:$0xff]  ;;  %v18023_v32 = vld [vmem:[%s20310_s1 + $0x278] sm:$0xff] }
 0x842   : > { %5771 = vmatmul.mubr.f32.vlgmr.msra.gmra.mxu0 %v17670_v34  ;;  %11453 = vmatprep.subr.mxu1 %v9735_v36 }
 0x843   : > { %5861 = vmatpush1.msra.mxu0 %v17436_v7  ;;  %11454 = vmatpush3.msra.mxu1 %v9735_v36  ;;  %v17702_v7 = vld [vmem:[%s20310_s1 + $0xe0] sm:$0xff]  ;;  %v18030_v36 = vld [vmem:[%s20310_s1 + $0x270] sm:$0xff] }
 0x844   : > { %5862 = vmatprep.subr.mxu0 %v17441_v45  ;;  %11456 = vmatmul.mubr.f32.vlgmr.msra.gmra.mxu1 %v5546_v51  ;;  %v17716_v45 = vld [vmem:[%s20310_s1 + $0xd0] sm:$0xff]  ;;  %v17737_v51 = vld [vmem:[%s20310_s1 + $0xb8] sm:$0xff] }
 0x845   : > { %5863 = vmatpush1.msra.mxu0 %v17447_v25  ;;  %5783 = vmatprep.subr.mxu1 %v17681_v56  ;;  %v17723_v25 = vld [vmem:[%s20310_s1 + $0xc8] sm:$0xff] }
 0x846   : > { %5864 = vmatprep.subr.mxu0 %v17454_v59  ;;  %5784 = vmatpush1.msra.mxu1 %v17687_v63  ;;  %v17730_v59 = vld [vmem:[%s20310_s1 + $0xc0] sm:$0xff] }
 0x847   : > { %5865 = vmatpush1.msra.mxu0 %v17463_v22  ;;  %5785 = vmatprep.subr.mxu1 %v17695_v53  ;;  %v17744_v22 = vld [vmem:[%s20310_s1 + $0xb0] sm:$0xff] }
 0x848   : > { %5866 = vmatprep.subr.mxu0 %v17473_v1  ;;  %5786 = vmatpush1.msra.mxu1 %v17702_v7  ;;  %v17765_v1 = vld [vmem:[%s20310_s1 + $0x98] sm:$0xff] }
 0x849   : > { %5867 = vmatpush1.msra.mxu0 %v17483_v31  ;;  %5787 = vmatprep.subr.mxu1 %v17709_v44  ;;  %v17779_v31 = vld [vmem:[%s20310_s1 + $0x88] sm:$0xff] }
 0x84a   : > { %5868 = vmatprep.subr.mxu0 %v17491_v43  ;;  %5788 = vmatpush1.msra.mxu1 %v17716_v45  ;;  %v17793_v43 = vld [vmem:[%s20310_s1 + $0x78] sm:$0xff] }
 0x84b   : > { %5869 = vmatpush1.msra.mxu0 %v17497_v50  ;;  %5789 = vmatprep.subr.mxu1 %v17723_v25  ;;  %v17800_v50 = vld [vmem:[%s20310_s1 + $0x70] sm:$0xff] }
 0x84c   : > { %5870 = vmatprep.subr.mxu0 %v17506_v15  ;;  %5790 = vmatpush1.msra.mxu1 %v17730_v59  ;;  %v17814_v15 = vld [vmem:[%s20310_s1 + $0x60] sm:$0xff] }
 0x84d   : > { %5871 = vmatpush1.msra.mxu0 %v17512_v23  ;;  %5791 = vmatprep.subr.mxu1 %v17737_v51  ;;  %v17821_v23 = vld [vmem:[%s20310_s1 + $0x58] sm:$0xff] }
 0x84e   : > { %5872 = vmatprep.subr.mxu0 %v17521_v55  ;;  %5792 = vmatpush1.msra.mxu1 %v17744_v22  ;;  %v17835_v55 = vld [vmem:[%s20310_s1 + $0x48] sm:$0xff] }
 0x84f   : > { %5873 = vmatpush1.msra.mxu0 %v17527_v5  ;;  %5793 = vmatprep.subr.mxu1 %v17751_v4  ;;  %v17842_v5 = vld [vmem:[%s20310_s1 + $0x40] sm:$0xff] }
 0x850   : > { %5874 = vmatprep.subr.mxu0 %v17536_v17  ;;  %5794 = vmatpush1.msra.mxu1 %v17758_v27  ;;  %v17856_v17 = vld [vmem:[%s12812_s24 + $0xd8] sm:$0x7f] }
 0x851   : > { %5875 = vmatpush1.msra.mxu0 %v17542_v12  ;;  %5795 = vmatprep.subr.mxu1 %v17765_v1  ;;  %v17861_v12 = vld [vmem:[%s20310_s1 + $0x30] sm:$0xff] }
 0x852   : > { %5876 = vmatprep.subr.mxu0 %v17551_v11  ;;  %5796 = vmatpush1.msra.mxu1 %v17772_v37  ;;  %v17875_v11 = vld [vmem:[%s20310_s1 + $0x20] sm:$0xff] }
 0x853   : > { %5877 = vmatpush1.msra.mxu0 %v17557_v8  ;;  %5797 = vmatprep.subr.mxu1 %v17779_v31  ;;  %v17882_v8 = vld [vmem:[%s20310_s1 + $0x18] sm:$0xff] }
 0x854   : > { %5878 = vmatprep.subr.mxu0 %v17566_v13  ;;  %5798 = vmatpush1.msra.mxu1 %v17786_v39  ;;  %v17896_v13 = vld [vmem:[%s20310_s1 + $0x10] sm:$0xff] }
 0x855   : > { %5879 = vmatpush1.msra.mxu0 %v17572_v18  ;;  %5799 = vmatprep.subr.mxu1 %v17793_v43  ;;  %v17899_v18 = vld [vmem:[%s12812_s24 + $0xc1] sm:$0xff] }
 0x856   : > { %5880 = vmatprep.subr.mxu0 %v17581_v52  ;;  %5800 = vmatpush1.msra.mxu1 %v17800_v50  ;;  %v17911_v52 = vld [vmem:[%s20310_s1 + $0x8] sm:$0xff] }
 0x857   : > { %5881 = vmatpush1.msra.mxu0 %v17587_v19  ;;  %5801 = vmatprep.subr.mxu1 %v17807_v62  ;;  %v17918_v19 = vld [vmem:[%s20310_s1 + $0x2e8] sm:$0xff] }
 0x858   : > { %5882 = vmatprep.subr.mxu0 %v17596_v60  ;;  %5802 = vmatpush1.msra.mxu1 %v17814_v15  ;;  %v17930_v60 = vld [vmem:[%s20310_s1 + $0x2e0] sm:$0xff] }
 0x859   : > { %5883 = vmatpush1.msra.mxu0 %v17602_v2  ;;  %5803 = vmatprep.subr.mxu1 %v17821_v23  ;;  %v9751_v2 = vld [vmem:[%s12812_s24 + $0xc0] sm:$0xff] }
 0x85a   : > { %5884 = vmatprep.subr.mxu0 %v17611_v47  ;;  %5804 = vmatpush1.msra.mxu1 %v17828_v35  ;;  %v17947_v47 = vld [vmem:[%s20310_s1 + $0x2d0] sm:$0xff] }
 0x85b   : > { %5885 = vmatpush1.msra.mxu0 %v17617_v38  ;;  %5805 = vmatprep.subr.mxu1 %v17835_v55  ;;  %v17953_v38 = vld [vmem:[%s20310_s1 + $0x2c8] sm:$0xff] }
 0x85c   : > { %5886 = vmatprep.subr.mxu0 %v17626_v14  ;;  %5806 = vmatpush1.msra.mxu1 %v17842_v5  ;;  %v17967_v14 = vld [vmem:[%s20310_s1 + $0x2b8] sm:$0xff] }
 0x85d   : > { %5887 = vmatpush1.msra.mxu0 %v17632_v16  ;;  %5776 = vmatprep.mubr.f32.mxu0 %v20426_v61  ;;  %v17974_v16 = vld [vmem:[%s20310_s1 + $0x2b0] sm:$0xff] }
 0x85e   : > { %5807 = vmatprep.subr.mxu1 %v17851_v3  ;;  %5888 = vmatprep.subr.mxu0 %v17641_v40  ;;  %v17988_v40 = vld [vmem:[%s20310_s1 + $0x2a0] sm:$0xff] }
 0x85f   : > { %5777 = vmatmul.mubr.f32.gmra.mxu0 %v17856_v17  ;;  %5808 = vmatpush1.msra.mxu1 %v17861_v12 }
 0x860   : > { %5889 = vmatpush1.msra.mxu0 %v17647_v46  ;;  %5809 = vmatprep.subr.mxu1 %v17868_v33  ;;  %v17995_v46 = vld [vmem:[%s20310_s1 + $0x298] sm:$0xff] }
 0x861   : > { %5890 = vmatprep.subr.mxu0 %v17656_v0  ;;  %5810 = vmatpush1.msra.mxu1 %v17875_v11  ;;  %v18009_v0 = vld [vmem:[%s20310_s1 + $0x288] sm:$0xff] }
 0x862   : > { %5891 = vmatpush1.msra.mxu0 %v17662_v24  ;;  %5811 = vmatprep.subr.mxu1 %v17882_v8  ;;  %v18016_v24 = vld [vmem:[%s20310_s1 + $0x280] sm:$0xff] }
 0x863   : > { %5924 = vmatprep.mubr.f32.mxu0 %v20426_v61  ;;  %6048 = vmatprep.subr.mxu0 %v17889_v41 }
 0x864   : > { %5812 = vmatpush1.msra.mxu1 %v17896_v13  ;;  %5925 = vmatmul.mubr.f32.vlgmr.msra.gmra.mxu0 %v17899_v18 }
 0x865   : > { %6049 = vmatpush1.msra.mxu0 %v17906_v54  ;;  %5813 = vmatprep.subr.mxu1 %v17911_v52 }
 0x866   : > { %6050 = vmatprep.subr.mxu0 %v17918_v19  ;;  %5814 = vmatpush1.msra.mxu1 %v17923_v49 }
 0x867   : > { %5847 = vmatprep.mubr.f32.mxu1 %v20426_v61  ;;  %6051 = vmatpush1.msra.mxu0 %v17930_v60 }
 0x868   : > { %5848 = vmatmul.mubr.f32.vlgmr.msra.gmra.mxu1 %v9751_v2  ;;  %5937 = vmatprep.subr.mxu1 %v17681_v56  ;;  %v18037_v56 = vld [vmem:[%s20310_s1 + $0x268] sm:$0xff]  ;;  %v6224_v2 = vld [vmem:[%s20312_s3 + $0x20] sm:$0xff] }
 0x869   : > { %6052 = vmatprep.subr.mxu0 %v17940_v6  ;;  %5938 = vmatpush1.msra.mxu1 %v17687_v63  ;;  %v18044_v63 = vld [vmem:[%s20310_s1 + $0x260] sm:$0xff] }
 0x86a   : > { %6053 = vmatpush1.msra.mxu0 %v17947_v47  ;;  %5939 = vmatprep.subr.mxu1 %v17695_v53  ;;  %v18051_v53 = vld [vmem:[%s20310_s1 + $0x258] sm:$0xff] }
 0x86b   : > { %6054 = vmatprep.subr.mxu0 %v17953_v38  ;;  %5940 = vmatpush1.msra.mxu1 %v17702_v7  ;;  %v18058_v7 = vld [vmem:[%s20310_s1 + $0x250] sm:$0xff] }
 0x86c   : > { %6055 = vmatpush1.msra.mxu0 %v17960_v26  ;;  %5941 = vmatprep.subr.mxu1 %v17709_v44  ;;  %v18065_v44 = vld [vmem:[%s20310_s1 + $0x248] sm:$0xff] }
 0x86d   : > { %6056 = vmatprep.subr.mxu0 %v17967_v14  ;;  %5942 = vmatpush1.msra.mxu1 %v17716_v45  ;;  %v18072_v45 = vld [vmem:[%s20310_s1 + $0x240] sm:$0xff] }
 0x86e   : > { %6057 = vmatpush1.msra.mxu0 %v17974_v16  ;;  %5943 = vmatprep.subr.mxu1 %v17723_v25  ;;  %v18079_v25 = vld [vmem:[%s20310_s1 + $0x238] sm:$0xff] }
 0x86f   : > { %6058 = vmatprep.subr.mxu0 %v17981_v20  ;;  %5944 = vmatpush1.msra.mxu1 %v17730_v59  ;;  %v18086_v59 = vld [vmem:[%s20310_s1 + $0x230] sm:$0xff] }
 0x870   : > { %6059 = vmatpush1.msra.mxu0 %v17988_v40  ;;  %5945 = vmatprep.subr.mxu1 %v17737_v51  ;;  %v18093_v51 = vld [vmem:[%s20310_s1 + $0x228] sm:$0xff] }
 0x871   : > { %6060 = vmatprep.subr.mxu0 %v17995_v46  ;;  %5946 = vmatpush1.msra.mxu1 %v17744_v22  ;;  %v18100_v22 = vld [vmem:[%s20310_s1 + $0x220] sm:$0xff] }
 0x872   : > { %6061 = vmatpush1.msra.mxu0 %v18002_v58  ;;  %5947 = vmatprep.subr.mxu1 %v17751_v4  ;;  %v9788_v4 = vld [vmem:[%s12812_s24 + $0xc9] sm:$0x7f] }
 0x873   : > { %6062 = vmatprep.subr.mxu0 %v18009_v0  ;;  %5948 = vmatpush1.msra.mxu1 %v17758_v27  ;;  %v9792_v27 = vld [vmem:[%s20310_s1 + $0x218] sm:$0xff] }
 0x874   : > { %6063 = vmatpush1.msra.mxu0 %v18016_v24  ;;  %5949 = vmatprep.subr.mxu1 %v17765_v1  ;;  %v9791_v1 = vld [vmem:[%s20310_s1 + $0x210] sm:$0xff] }
 0x875   : > { %6064 = vmatprep.subr.mxu0 %v18023_v32  ;;  %5950 = vmatpush1.msra.mxu1 %v17772_v37  ;;  %v9790_v37 = vld [vmem:[%s20310_s1 + $0x208] sm:$0xff] }
 0x876   : > { %6065 = vmatpush1.msra.mxu0 %v18030_v36  ;;  %5951 = vmatprep.subr.mxu1 %v17779_v31  ;;  %v9752_v31 = vld [vmem:[%s12812_s24 + $0xc8] sm:$0x7f] }
 0x877   : > { %6066 = vmatprep.subr.mxu0 %v18037_v56  ;;  %5952 = vmatpush1.msra.mxu1 %v17786_v39  ;;  %v9789_v39 = vld [vmem:[%s20310_s1 + $0x200] sm:$0xff] }
 0x878   : > { %6067 = vmatpush1.msra.mxu0 %v18044_v63  ;;  %5953 = vmatprep.subr.mxu1 %v17793_v43  ;;  %v9822_v43 = vld [vmem:[%s12812_s24 + $0xd9] sm:$0x7f] }
 0x879   : > { %6068 = vmatprep.subr.mxu0 %v18051_v53  ;;  %5954 = vmatpush1.msra.mxu1 %v17800_v50  ;;  %v6235_v50 = vld [vmem:[%s20312_s3 + $0x78] sm:$0xff] }
 0x87a   : > { %6069 = vmatpush1.msra.mxu0 %v18058_v7  ;;  %5955 = vmatprep.subr.mxu1 %v17807_v62  ;;  %v6234_v62 = vld [vmem:[%s20312_s3 + $0x70] sm:$0xff] }
 0x87b   : > { %6070 = vmatprep.subr.mxu0 %v18065_v44  ;;  %5956 = vmatpush1.msra.mxu1 %v17814_v15  ;;  %v9838_v15 = vld [vmem:[%s20312_s3 + $0xf8] sm:$0xff] }
 0x87c   : > { %6071 = vmatpush1.msra.mxu0 %v18072_v45  ;;  %5957 = vmatprep.subr.mxu1 %v17821_v23  ;;  %v9837_v23 = vld [vmem:[%s20312_s3 + $0xf0] sm:$0xff] }
 0x87d   : > { %6072 = vmatprep.subr.mxu0 %v18079_v25  ;;  %5958 = vmatpush1.msra.mxu1 %v17828_v35  ;;  %v6233_v35 = vld [vmem:[%s20312_s3 + $0x68] sm:$0xff] }
 0x87e   : > { %6073 = vmatpush1.msra.mxu0 %v18086_v59  ;;  %5959 = vmatprep.subr.mxu1 %v17835_v55  ;;  %v9836_v55 = vld [vmem:[%s20312_s3 + $0xe8] sm:$0xff] }
 0x87f   : > { %6074 = vmatprep.subr.mxu0 %v18093_v51  ;;  %5930 = vmatprep.mubr.f32.mxu0 %v20426_v61 }
 0x880   : > { %5960 = vmatpush1.msra.mxu1 %v17842_v5  ;;  %6075 = vmatpush1.msra.mxu0 %v18100_v22  ;;  %v6232_v5 = vld [vmem:[%s20312_s3 + $0x60] sm:$0xff] }
 0x881   : > { %5931 = vmatmul.mubr.f32.gmra.mxu0 %v9788_v4  ;;  %5961 = vmatprep.subr.mxu1 %v17851_v3  ;;  %v9835_v3 = vld [vmem:[%s20312_s3 + $0xe0] sm:$0xff] }
 0x882   : > { %6076 = vmatprep.subr.mxu0 %v9792_v27  ;;  %5962 = vmatpush1.msra.mxu1 %v17861_v12  ;;  %v9834_v12 = vld [vmem:[%s20312_s3 + $0xd8] sm:$0xff] }
 0x883   : > { %6077 = vmatpush1.msra.mxu0 %v9791_v1  ;;  %5853 = vmatprep.mubr.f32.mxu1 %v20426_v61 }
 0x884   : > { %5963 = vmatprep.subr.mxu1 %v17868_v33  ;;  %6078 = vmatprep.subr.mxu0 %v9790_v37  ;;  %v6230_v33 = vld [vmem:[%s20312_s3 + $0x50] sm:$0xff] }
 0x885   : > { %5854 = vmatmul.mubr.f32.gmra.mxu1 %v9752_v31  ;;  %6079 = vmatpush1.msra.mxu0 %v9789_v39 }
 0x886   : > { %5964 = vmatpush1.msra.mxu1 %v17875_v11  ;;  %6112 = vmatprep.mubr.f32.mxu0 %v20426_v61  ;;  %v9833_v11 = vld [vmem:[%s20312_s3 + $0xd0] sm:$0xff] }
 0x887   : > { %5965 = vmatprep.subr.mxu1 %v17882_v8  ;;  %6113 = vmatmul.mubr.f32.vlgmr.msra.gmra.mxu0 %v17899_v18  ;;  %v6229_v8 = vld [vmem:[%s20312_s3 + $0x48] sm:$0xff]  ;;  %v6227_v18 = vld [vmem:[%s20312_s3 + $0x38] sm:$0xff] }
 0x888   : > { %5966 = vmatpush1.msra.mxu1 %v17896_v13  ;;  %6001 = vmatprep.mubr.f32.mxu1 %v20426_v61  ;;  %v9832_v13 = vld [vmem:[%s20312_s3 + $0xc8] sm:$0xff] }
 0x889   : > { %5967 = vmatprep.subr.mxu1 %v17911_v52  ;;  %6118 = vmatprep.mubr.f32.mxu0 %v20426_v61  ;;  %v6226_v52 = vld [vmem:[%s20312_s3 + $0x30] sm:$0xff] }
 0x88a   : > { %5968 = vmatpush1.msra.mxu1 %v17923_v49  ;;  %11458 = vmatprep.subr.mxu0 %v9838_v15  ;;  %v6225_v49 = vld [vmem:[%s20312_s3 + $0x28] sm:$0xff] }
 0x88b   : > { %6002 = vmatmul.mubr.f32.vlgmr.msra.gmra.mxu1 %v17670_v34  ;;  %6119 = vmatmul.mubr.f32.gmra.mxu0 %v9788_v4  ;;  %v9821_v34 = vld [vmem:[%s12812_s24 + $0xd1] sm:$0xff] }
 0x88c   : > { %6129 = vmatprep.subr.mxu1 %v17889_v41  ;;  %6007 = vmatprep.mubr.f32.mxu1 %v20426_v61  ;;  %v6228_v41 = vld [vmem:[%s20312_s3 + $0x40] sm:$0xff] }
 0x88d   : > { %6130 = vmatpush1.msra.mxu1 %v17906_v54  ;;  %11459 = vmatpush3.msra.mxu0 %v9838_v15  ;;  %v9831_v54 = vld [vmem:[%s20312_s3 + $0xc0] sm:$0xff] }
 0x88e   : > { %6131 = vmatprep.subr.mxu1 %v17918_v19  ;;  %11460 = vmatprep.subr.mxu0 %v9837_v23  ;;  %v9830_v19 = vld [vmem:[%s20312_s3 + $0xb8] sm:$0xff] }
 0x88f   : > { %6132 = vmatpush1.msra.mxu1 %v17930_v60  ;;  %11461 = vmatpush3.msra.mxu0 %v9837_v23  ;;  %v9829_v60 = vld [vmem:[%s20312_s3 + $0xb0] sm:$0xff] }
 0x890   : > { %6133 = vmatprep.subr.mxu1 %v17940_v6  ;;  %6008 = vmatmul.mubr.f32.gmra.mxu1 %v17856_v17  ;;  %v6231_v17 = vld [vmem:[%s20312_s3 + $0x58] sm:$0xff]  ;;  %v9828_v6 = vld [vmem:[%s20312_s3 + $0xa8] sm:$0xff] }
 0x891   : > { %6134 = vmatpush1.msra.mxu1 %v17947_v47  ;;  %6193 = vmatprep.mubr.f32.mxu1 %v20426_v61  ;;  %v6223_v47 = vld [vmem:[%s20312_s3 + $0x18] sm:$0xff] }
 0x892   : > { %6135 = vmatprep.subr.mxu1 %v17953_v38  ;;  %11462 = vmatprep.subr.mxu0 %v9836_v55  ;;  %v9827_v38 = vld [vmem:[%s20312_s3 + $0xa0] sm:$0xff] }
 0x893   : > { %6136 = vmatpush1.msra.mxu1 %v17960_v26  ;;  %11463 = vmatpush3.msra.mxu0 %v9836_v55  ;;  %v6222_v26 = vld [vmem:[%s20312_s3 + $0x10] sm:$0xff] }
 0x894   : > { %6137 = vmatprep.subr.mxu1 %v17967_v14  ;;  %11464 = vmatprep.subr.mxu0 %v9835_v3  ;;  %v9826_v14 = vld [vmem:[%s20312_s3 + $0x98] sm:$0xff] }
 0x895   : > { %6138 = vmatpush1.msra.mxu1 %v17974_v16  ;;  %11465 = vmatpush3.msra.mxu0 %v9835_v3  ;;  %v6221_v16 = vld [vmem:[%s20312_s3 + $0x8] sm:$0xff] }
 0x896   : > { %6139 = vmatprep.subr.mxu1 %v17981_v20  ;;  %11466 = vmatprep.subr.mxu0 %v9834_v12  ;;  %v9825_v20 = vld [vmem:[%s20312_s3 + $0x90] sm:$0xff] }
 0x897   : > { %6140 = vmatpush1.msra.mxu1 %v17988_v40  ;;  %11467 = vmatpush3.msra.mxu0 %v9834_v12  ;;  %v6220_v40 = vld [vmem:[%s20312_s3] sm:$0xff] }
 0x898   : > { %6141 = vmatprep.subr.mxu1 %v17995_v46  ;;  %11468 = vmatprep.subr.mxu0 %v9833_v11  ;;  %v9824_v46 = vld [vmem:[%s20312_s3 + $0x88] sm:$0xff] }
 0x899   : > { %6142 = vmatpush1.msra.mxu1 %v18002_v58  ;;  %11469 = vmatpush3.msra.mxu0 %v9833_v11  ;;  %v18266_v58 = vld [vmem:[%s20310_s1 + $0x1f8] sm:$0xff] }
 0x89a   : > { %6143 = vmatprep.subr.mxu1 %v18009_v0  ;;  %11470 = vmatprep.subr.mxu0 %v9832_v13 }
 0x89b   : > { %6144 = vmatpush1.msra.mxu1 %v18016_v24  ;;  %11471 = vmatpush3.msra.mxu0 %v9832_v13  ;;  %v9823_v24 = vld [vmem:[%s20312_s3 + $0x80] sm:$0xff] }
 0x89c   : > { %6145 = vmatprep.subr.mxu1 %v18023_v32  ;;  %11472 = vmatprep.subr.mxu0 %v9831_v54 }
 0x89d   : > { %6146 = vmatpush1.msra.mxu1 %v18030_v36  ;;  %11473 = vmatpush3.msra.mxu0 %v9831_v54  ;;  %v18275_v36 = vld [vmem:[%s20312_s3 + $0x178] sm:$0xff] }
 0x89e   : > { %6147 = vmatprep.subr.mxu1 %v18037_v56  ;;  %11474 = vmatprep.subr.mxu0 %v9830_v19 }
 0x89f   : > { %6148 = vmatpush1.msra.mxu1 %v18044_v63  ;;  %11475 = vmatpush3.msra.mxu0 %v9830_v19 }
 0x8a0   : > { %6149 = vmatprep.subr.mxu1 %v18051_v53  ;;  %11476 = vmatprep.subr.mxu0 %v9829_v60 }
 0x8a1   : > { %6150 = vmatpush1.msra.mxu1 %v18058_v7  ;;  %11477 = vmatpush3.msra.mxu0 %v9829_v60 }
 0x8a2   : > { %6151 = vmatprep.subr.mxu1 %v18065_v44  ;;  %11478 = vmatprep.subr.mxu0 %v9828_v6 }
 0x8a3   : > { %6152 = vmatpush1.msra.mxu1 %v18072_v45  ;;  %11479 = vmatpush3.msra.mxu0 %v9828_v6 }
 0x8a4   : > { %6153 = vmatprep.subr.mxu1 %v18079_v25  ;;  %11480 = vmatprep.subr.mxu0 %v9827_v38 }
 0x8a5   : > { %6154 = vmatpush1.msra.mxu1 %v18086_v59  ;;  %11481 = vmatpush3.msra.mxu0 %v9827_v38  ;;  %v12255_v59 = vld [vmem:[%s20313_s4] ss:$0 sm:$0xff] }
 0x8a6   : > { %6155 = vmatprep.subr.mxu1 %v18093_v51  ;;  %11482 = vmatprep.subr.mxu0 %v9826_v14 }
 0x8a7   : > { %6156 = vmatpush1.msra.mxu1 %v18100_v22  ;;  %11483 = vmatpush3.msra.mxu0 %v9826_v14 }
 0x8a8   : > { %6157 = vmatprep.subr.mxu1 %v9792_v27  ;;  %11484 = vmatprep.subr.mxu0 %v9825_v20 }
 0x8a9   : > { %6158 = vmatpush1.msra.mxu1 %v9791_v1  ;;  %11485 = vmatpush3.msra.mxu0 %v9825_v20 }
 0x8aa   : > { %6159 = vmatprep.subr.mxu1 %v9790_v37  ;;  %11486 = vmatprep.subr.mxu0 %v9824_v46 }
 0x8ab   : > { %6160 = vmatpush1.msra.mxu1 %v9789_v39  ;;  %11487 = vmatpush3.msra.mxu0 %v9824_v46 }
 0x8ac   : > { %6194 = vmatmul.mubr.f32.vlgmr.msra.gmra.mxu1 %v9821_v34  ;;  %11493 = vmatprep.subr.mxu1 %v6235_v50 }
 0x8ad   : > { %6199 = vmatprep.mubr.f32.mxu1 %v20426_v61  ;;  %11494 = vmatpush3.msra.mxu1 %v6235_v50 }
 0x8ae   : > { %11495 = vmatprep.subr.mxu1 %v6234_v62  ;;  %11488 = vmatprep.subr.mxu0 %v9823_v24 }
 0x8af   : > { %11496 = vmatpush3.msra.mxu1 %v6234_v62  ;;  %11489 = vmatpush3.msra.mxu0 %v9823_v24 }
 0x8b0   : > { %6200 = vmatmul.mubr.f32.gmra.mxu1 %v9822_v43  ;;  %11497 = vmatprep.subr.mxu1 %v6233_v35 }
 0x8b1   : > { %11498 = vmatpush3.msra.mxu1 %v6233_v35  ;;  %11528 = vmatprep.subr.mxu0 %v18275_v36 }
 0x8b2   : > { %11499 = vmatprep.subr.mxu1 %v6232_v5 }
 0x8b3   : > { %11500 = vmatpush3.msra.mxu1 %v6232_v5 }
 0x8b4   : > { %11501 = vmatprep.subr.mxu1 %v6231_v17 }
 0x8b5   : > { %11502 = vmatpush3.msra.mxu1 %v6231_v17 }
 0x8b6   : > { %11503 = vmatprep.subr.mxu1 %v6230_v33 }
 0x8b7   : > { %11504 = vmatpush3.msra.mxu1 %v6230_v33 }
 0x8b8   : > { %11505 = vmatprep.subr.mxu1 %v6229_v8 }
 0x8b9   : > { %11506 = vmatpush3.msra.mxu1 %v6229_v8 }
 0x8ba   : > { %11507 = vmatprep.subr.mxu1 %v6228_v41 }
 0x8bb   : > { %11508 = vmatpush3.msra.mxu1 %v6228_v41 }
 0x8bc   : > { %11509 = vmatprep.subr.mxu1 %v6227_v18 }
 0x8bd   : > { %11510 = vmatpush3.msra.mxu1 %v6227_v18 }
 0x8be   : > { %11511 = vmatprep.subr.mxu1 %v6226_v52 }
 0x8bf   : > { %11512 = vmatpush3.msra.mxu1 %v6226_v52 }
 0x8c0   : > { %11513 = vmatprep.subr.mxu1 %v6225_v49 }
 0x8c1   : > { %11514 = vmatpush3.msra.mxu1 %v6225_v49 }
 0x8c2   : > { %11515 = vmatprep.subr.mxu1 %v6224_v2 }
 0x8c3   : > { %11516 = vmatpush3.msra.mxu1 %v6224_v2 }
 0x8c4   : > { %11517 = vmatprep.subr.mxu1 %v6223_v47 }
 0x8c5   : > { %11518 = vmatpush3.msra.mxu1 %v6223_v47 }
 0x8c6   : > { %11519 = vmatprep.subr.mxu1 %v6222_v26 }
 0x8c7   : > { %11520 = vmatpush3.msra.mxu1 %v6222_v26 }
 0x8c8   : > { %11521 = vmatprep.subr.mxu1 %v6221_v16 }
 0x8c9   : > { %11522 = vmatpush3.msra.mxu1 %v6221_v16 }
 0x8ca   : > { %11523 = vmatprep.subr.mxu1 %v6220_v40 }
 0x8cb   : > { %11524 = vmatpush3.msra.mxu1 %v6220_v40 }
 0x8cc   : > { %6586 = vmatprep.subr.mxu1 %v18266_v58 }
 0x8e0   : > { %v11422_v32 = vpop.f32.mrf.mxu0 }
 0x8e2   : > { %v5520_v53 = vpop.f32.mrf.mxu0 }
 0x8e4   : > { %v11387_v0 = vpop.f32.mrf.mxu1 }
 0x8e5   : > { %v5526_v63 = vadd.f32 %v11422_v32, %v11387_v0 }
 0x8e6   : > { %v5445_v56 = vpop.f32.mrf.mxu1 }
 0x8e7   : > { %v5521_v44 = vadd.f32 %v5520_v53, %v5445_v56 }
 0x904   : > { %v11457_v7 = vpop.f32.mrf.mxu1 }
 0x905   : > { %v5626_v45 = vadd.f32 %v11457_v7, %v5526_v63 }
 0x906   : > { %v5616_v25 = vpop.f32.mrf.mxu1 }
 0x907   : > { %v5628_v51 = vadd.f32 %v12255_v59, %v5626_v45  ;;  %v5625_v22 = vadd.f32 %v5616_v25, %v5521_v44 }
 0x909   : > { %v5630_v4 = vmax.f32 %v5628_v51, 0.0  ;;  %v5627_v27 = vadd.f32 %v12255_v59, %v5625_v22 }
 0x90b   : > { %5633 = vst [vmem:[#allocation2 + $0x58] sm:$0x1f] %v5630_v4  ;;  %v5629_v1 = vmax.f32 %v5627_v27, 0.0 }
 0x90d   : > { %5632 = vst [vmem:[#allocation2 + $0x50] sm:$0xff] %v5629_v1 }
 0x912   : > { %v8355_v37 = vld [vmem:[#allocation2 + $0x58] sm:$0x1]  ;;  %v8474_v31 = vld [vmem:[#allocation2 + $0x59] sm:$0x1]  ;;  %v8593_v43 = vld [vmem:[#allocation2 + $0x5a] sm:$0x1] }
 0x913   : > { %v8391_v39 = vrot.slane %v8355_v37, 3  ;;  %v8510_v34 = vrot.slane %v8474_v31, 3  ;;  %v8629_v50 = vrot.slane %v8593_v43, 3  ;;  %v8712_v8 = vld [vmem:[#allocation2 + $0x5b] sm:$0x1] }
 0x914   : > { %v7879_v23 = vld [vmem:[#allocation2 + $0x54] sm:$0x1]  ;;  %v7998_v5 = vld [vmem:[#allocation2 + $0x55] sm:$0x1]  ;;  %v8117_v17 = vld [vmem:[#allocation2 + $0x56] sm:$0x1] }
 0x915   : > { %v18283_v62 = vsel %vm7464_vm6, %v8391_v39, %v17394_v42  ;;  %v18287_v15 = vsel %vm7464_vm6, %v8510_v34, %v17398_v10  ;;  %v18291_v35 = vsel %vm7464_vm6, %v8629_v50, %v17402_v30  ;;  %v7915_v55 = vrot.slane %v7879_v23, 3  ;;  %v8236_v12 = vld [vmem:[#allocation2 + $0x57] sm:$0x1]  ;;  %v8831_v13 = vld [vmem:[#allocation2 + $0x5c] sm:$0x1] }
 0x916   : > { %v8034_v3 = vrot.slane %v7998_v5, 3  ;;  %v8153_v42 = vrot.slane %v8117_v17, 3  ;;  %v8272_v11 = vrot.slane %v8236_v12, 3  ;;  %v8748_v41 = vrot.slane %v8712_v8, 3  ;;  %v12256_v12 = vld [vmem:[%s20311_s2] ss:$0 sm:$0xff] }
 0x917   : > { %v18295_v33 = vsel %vm7464_vm6, %v7915_v55, %v17406_v28  ;;  %v8867_v54 = vrot.slane %v8831_v13, 3 }
 0x918   : > { %v18299_v10 = vsel %vm7464_vm6, %v8034_v3, %v17410_v9  ;;  %v18303_v30 = vsel %vm7464_vm6, %v8153_v42, %v17414_v29  ;;  %v18307_v18 = vsel %vm7464_vm6, %v8272_v11, %v17418_v48  ;;  %v18311_v28 = vsel %vm7464_vm6, %v8748_v41, %v17422_v57  ;;  %v5772_v9 = vpop.f32.mrf.mxu0 }
 0x919   : > { %v18315_v52 = vsel %vm7464_vm6, %v8867_v54, %v17426_v21  ;;  %v18325_v54 = vld [vmem:[%s20310_s1 + $0x1f0] sm:$0xff] }
 0x91a   : > { %v5774_v19 = vpop.f32.mrf.mxu0 }
 0x91f   : > { %v5778_v49 = vpop.f32.mrf.mxu0 }
 0x921   : > { %v5780_v60 = vpop.f32.mrf.mxu0 }
 0x924   : > { %v5926_v29 = vpop.f32.mrf.mxu0 }
 0x926   : > { %v5928_v47 = vpop.f32.mrf.mxu0 }
 0x928   : > { %v5849_v2 = vpop.f32.mrf.mxu1 }
 0x929   : > { %v5850_v32 = vadd.f32 %v5849_v2, %v5772_v9  ;;  %v18330_v9 = vld [vmem:[%s20310_s1 + $0x1e8] sm:$0xff]  ;;  %v18343_v2 = vld [vmem:[%s20310_s1 + $0x1d8] sm:$0xff] }
 0x92a   : > { %v5851_v6 = vpop.f32.mrf.mxu1 }
 0x92b   : > { %v5852_v0 = vadd.f32 %v5851_v6, %v5774_v19  ;;  %v18336_v19 = vld [vmem:[%s20310_s1 + $0x1e0] sm:$0xff] }
 0x941   : > { %v5932_v48 = vpop.f32.mrf.mxu0 }
 0x943   : > { %v5934_v14 = vpop.f32.mrf.mxu0 }
 0x945   : > { %v5855_v38 = vpop.f32.mrf.mxu1 }
 0x946   : > { %v5856_v59 = vadd.f32 %v5855_v38, %v5778_v49  ;;  %v9853_v38 = vld [vmem:[%s20312_s3 + $0x170] sm:$0xff] }
 0x947   : > { %v5857_v26 = vpop.f32.mrf.mxu1  ;;  %v6114_v20 = vpop.f32.mrf.mxu0 }
 0x948   : > { %v6125_v44 = vadd.f32 %v6114_v20, %v5850_v32  ;;  %v5858_v51 = vadd.f32 %v5857_v26, %v5780_v60  ;;  %v18362_v26 = vld [vmem:[%s20310_s1 + $0x1c8] sm:$0xff]  ;;  %v18416_v32 = vld [vmem:[%s20310_s1 + $0x190] sm:$0xff] }
 0x949   : > { %v6116_v40 = vpop.f32.mrf.mxu0  ;;  %v9852_v20 = vld [vmem:[%s20312_s3 + $0x168] sm:$0xff] }
 0x94a   : > { %v6126_v56 = vadd.f32 %v6116_v40, %v5852_v0  ;;  %v9851_v40 = vld [vmem:[%s20312_s3 + $0x160] sm:$0xff] }
 0x94b   : > { %v6003_v16 = vpop.f32.mrf.mxu1  ;;  %v6120_v21 = vpop.f32.mrf.mxu0  ;;  %v18401_v0 = vld [vmem:[%s20310_s1 + $0x1a0] sm:$0xff] }
 0x94c   : > { %v6004_v53 = vadd.f32 %v6003_v16, %v5926_v29  ;;  %v6210_v27 = vmax.f32 %v6125_v44, %v6126_v56  ;;  %v6127_v50 = vadd.f32 %v6120_v21, %v5856_v59  ;;  %v18372_v16 = vld [vmem:[%s20310_s1 + $0x1c0] sm:$0xff]  ;;  %v9850_v21 = vld [vmem:[%s20312_s3 + $0x158] sm:$0xff]  ;;  %v9849_v56 = vld [vmem:[%s20312_s3 + $0x150] sm:$0xff] }
 0x94d   : > { %v6005_v57 = vpop.f32.mrf.mxu1  ;;  %v6122_v45 = vpop.f32.mrf.mxu0  ;;  %v18440_v44 = vld [vmem:[%s20310_s1 + $0x178] sm:$0xff]  ;;  %v18455_v59 = vld [vmem:[%s20310_s1 + $0x168] sm:$0xff] }
 0x94e   : > { %v6006_v7 = vadd.f32 %v6005_v57, %v5928_v47  ;;  %v6128_v37 = vadd.f32 %v6122_v45, %v5858_v51  ;;  %v18352_v47 = vld [vmem:[%s20310_s1 + $0x1d0] sm:$0xff]  ;;  %v18461_v51 = vld [vmem:[%s20310_s1 + $0x160] sm:$0xff] }
 0x94f   : > { %v18386_v57 = vld [vmem:[%s20310_s1 + $0x1b0] sm:$0xff] }
 0x950   : > { %v6009_v46 = vpop.f32.mrf.mxu1  ;;  %v6211_v3 = vmax.f32 %v6127_v50, %v6128_v37  ;;  %v18446_v45 = vld [vmem:[%s20310_s1 + $0x170] sm:$0xff]  ;;  %v18485_v37 = vld [vmem:[%s20310_s1 + $0x148] sm:$0xff]  ;;  %v9843_v50 = vld [vmem:[%s20312_s3 + $0x120] sm:$0xff] }
 0x951   : > { %v6010_v31 = vadd.f32 %v6009_v46, %v5932_v48  ;;  %v18395_v46 = vld [vmem:[%s20310_s1 + $0x1a8] sm:$0xff] }
 0x952   : > { %v6011_v24 = vpop.f32.mrf.mxu1 }
 0x953   : > { %v6012_v39 = vadd.f32 %v6011_v24, %v5934_v14  ;;  %v18410_v24 = vld [vmem:[%s20310_s1 + $0x198] sm:$0xff] }
 0x96c   : > { %v6195_v63 = vpop.f32.mrf.mxu1 }
 0x96d   : > { %v6206_v22 = vadd.f32 %v6195_v63, %v6004_v53  ;;  %v18425_v63 = vld [vmem:[%s20310_s1 + $0x188] sm:$0xff]  ;;  %v18431_v53 = vld [vmem:[%s20310_s1 + $0x180] sm:$0xff] }
 0x96e   : > { %v6197_v25 = vpop.f32.mrf.mxu1 }
 0x96f   : > { %v6207_v4 = vadd.f32 %v6197_v25, %v6006_v7  ;;  %v9848_v7 = vld [vmem:[%s20312_s3 + $0x148] sm:$0xff]  ;;  %v9847_v25 = vld [vmem:[%s20312_s3 + $0x140] sm:$0xff] }
 0x970   : > { %v6201_v1 = vpop.f32.mrf.mxu1 }
 0x971   : > { %v6212_v34 = vmax.f32 %v6206_v22, %v6207_v4  ;;  %v6208_v55 = vadd.f32 %v6201_v1, %v6010_v31  ;;  %v9846_v22 = vld [vmem:[%s20312_s3 + $0x138] sm:$0xff]  ;;  %v9845_v1 = vld [vmem:[%s20312_s3 + $0x130] sm:$0xff]  ;;  %v18491_v31 = vld [vmem:[%s20310_s1 + $0x140] sm:$0xff] }
 0x972   : > { %v6203_v43 = vpop.f32.mrf.mxu1  ;;  %v18470_v4 = vld [vmem:[%s20310_s1 + $0x158] sm:$0xff] }
 0x973   : > { %v6214_v23 = vmax.f32 %v6210_v27, %v6212_v34  ;;  %v6209_v5 = vadd.f32 %v6203_v43, %v6012_v39  ;;  %v18476_v27 = vld [vmem:[%s20310_s1 + $0x150] sm:$0xff]  ;;  %v9844_v39 = vld [vmem:[%s20312_s3 + $0x128] sm:$0xff]  ;;  %v18500_v34 = vld [vmem:[%s20310_s1 + $0x138] sm:$0xff] }
 0x974   : > { %v18506_v43 = vld [vmem:[%s20310_s1 + $0x130] sm:$0xff] }
 0x975   : > { %v6213_v17 = vmax.f32 %v6208_v55, %v6209_v5  ;;  %v6216_v42 = vadd.f32 %v12256_v12, %v6214_v23  ;;  %v18515_v23 = vld [vmem:[%s20310_s1 + $0x128] sm:$0xff]  ;;  %v18521_v55 = vld [vmem:[%s20310_s1 + $0x120] sm:$0xff]  ;;  %v9842_v5 = vld [vmem:[%s20312_s3 + $0x118] sm:$0xff] }
 0x977   : > { %v6215_v11 = vmax.f32 %v6211_v3, %v6213_v17  ;;  %v6218_v8 = vmax.f32 %v6216_v42, 0.0  ;;  %v18530_v3 = vld [vmem:[%s20310_s1 + $0x118] sm:$0xff]  ;;  %v18536_v17 = vld [vmem:[%s20310_s1 + $0x110] sm:$0xff]  ;;  %v18547_v42 = vld [vmem:[%s20310_s1 + $0x108] sm:$0xff] }
 0x979   : > { %v6217_v41 = vadd.f32 %v12256_v12, %v6215_v11  ;;  %11525 = vmatprep.mubr.f32.mxu1 %v6218_v8  ;;  %v6254_v49 = vrot.slane %v6218_v8, 1  ;;  %v6425_v48 = vrot.slane %v6218_v8, 2  ;;  %v18541_v12 = vld [vmem:[%s20312_s3 + $0x110] sm:$0xff]  ;;  %v18553_v11 = vld [vmem:[%s20310_s1 + $0x100] sm:$0xff]  ;;  %v18558_v8 = vld [vmem:[%s20312_s3 + $0x108] sm:$0xff] }
 0x97b   : > { %v18320_v13 = vmax.f32 %v6217_v41, 0.0  ;;  %v18565_v41 = vld [vmem:[%s12812_s24 + $0xf0] sm:$0xff] }
 0x97d   : > { %11526 = vmatmul.mubr.f32.vlgmr.msra.gmra.mxu1 %v18320_v13  ;;  %v6255_v60 = vrot.slane %v18320_v13, 1  ;;  %v6426_v29 = vrot.slane %v18320_v13, 2  ;;  %v18610_v13 = vld [vmem:[%s20310_s1 + $0xd8] sm:$0xff] }
 0x97e   : > { %6587 = vmatpush1.msra.mxu1 %v18325_v54  ;;  %6650 = vmatprep.mubr.f32.mxu1 %v20426_v61 }
 0x97f   : > { %6588 = vmatprep.subr.mxu1 %v18330_v9  ;;  %v6256_v6 = vsel %vm972_vm0, %v6254_v49, %v6255_v60  ;;  %v6427_v14 = vsel %vm1145_vm1, %v6425_v48, %v6426_v29  ;;  %v18570_v49 = vld [vmem:[%s20312_s3 + $0x100] sm:$0xff] }
 0x980   : > { %6589 = vmatpush1.msra.mxu1 %v18336_v19  ;;  %11490 = vmatprep.mubr.f32.mxu0 %v6256_v6  ;;  %v18588_v6 = vld [vmem:[%s20310_s1 + $0xf0] sm:$0xff]  ;;  %v18659_v48 = vld [vmem:[%s20310_s1 + $0xa0] sm:$0xff] }
 0x981   : > { %6590 = vmatprep.subr.mxu1 %v18343_v2  ;;  %11491 = vmatmul.mubr.f32.vlgmr.msra.gmra.mxu0 %v6255_v60  ;;  %v18581_v60 = vld [vmem:[%s20310_s1 + $0xf8] sm:$0xff] }
 0x982   : > { %11529 = vmatpush3.msra.mxu0 %v18275_v36  ;;  %6591 = vmatpush1.msra.mxu1 %v18352_v47  ;;  %v18380_v36 = vld [vmem:[%s20310_s1 + $0x1b8] sm:$0xff] }
 0x983   : > { %11530 = vmatprep.subr.mxu0 %v9853_v38  ;;  %11560 = vmatprep.mubr.f32.mxu0 %v6427_v14  ;;  %v18673_v14 = vld [vmem:[%s20310_s1 + $0x90] sm:$0xff] }
 0x984   : > { %6592 = vmatprep.subr.mxu1 %v18362_v26  ;;  %11531 = vmatpush3.msra.mxu0 %v9853_v38  ;;  %v18652_v38 = vld [vmem:[%s20310_s1 + $0xa8] sm:$0xff] }
 0x985   : > { %6593 = vmatpush1.msra.mxu1 %v18372_v16  ;;  %11532 = vmatprep.subr.mxu0 %v9852_v20 }
 0x986   : > { %6594 = vmatprep.subr.mxu1 %v18380_v36  ;;  %11533 = vmatpush3.msra.mxu0 %v9852_v20  ;;  %v18687_v20 = vld [vmem:[%s20310_s1 + $0x80] sm:$0xff] }
 0x987   : > { %6595 = vmatpush1.msra.mxu1 %v18386_v57  ;;  %11534 = vmatprep.subr.mxu0 %v9851_v40 }
 0x988   : > { %6596 = vmatprep.subr.mxu1 %v18395_v46  ;;  %11535 = vmatpush3.msra.mxu0 %v9851_v40  ;;  %v18708_v40 = vld [vmem:[%s20310_s1 + $0x68] sm:$0xff] }
 0x989   : > { %6597 = vmatpush1.msra.mxu1 %v18401_v0  ;;  %11536 = vmatprep.subr.mxu0 %v9850_v21 }
 0x98a   : > { %6598 = vmatprep.subr.mxu1 %v18410_v24  ;;  %11537 = vmatpush3.msra.mxu0 %v9850_v21  ;;  %v18729_v21 = vld [vmem:[%s20310_s1 + $0x50] sm:$0xff] }
 0x98b   : > { %6599 = vmatpush1.msra.mxu1 %v18416_v32  ;;  %11538 = vmatprep.subr.mxu0 %v9849_v56 }
 0x98c   : > { %6600 = vmatprep.subr.mxu1 %v18425_v63  ;;  %11539 = vmatpush3.msra.mxu0 %v9849_v56  ;;  %v18752_v56 = vld [vmem:[%s20310_s1 + $0x38] sm:$0xff] }
 0x98d   : > { %6601 = vmatpush1.msra.mxu1 %v18431_v53  ;;  %11540 = vmatprep.subr.mxu0 %v9848_v7 }
 0x98e   : > { %6602 = vmatprep.subr.mxu1 %v18440_v44  ;;  %11541 = vmatpush3.msra.mxu0 %v9848_v7  ;;  %v18769_v7 = vld [vmem:[%s20310_s1 + $0x28] sm:$0xff] }
 0x98f   : > { %6603 = vmatpush1.msra.mxu1 %v18446_v45  ;;  %11542 = vmatprep.subr.mxu0 %v9847_v25 }
 0x990   : > { %6604 = vmatprep.subr.mxu1 %v18455_v59  ;;  %11543 = vmatpush3.msra.mxu0 %v9847_v25  ;;  %v18790_v25 = vld [vmem:[%s20310_s1 + $0x2f8] sm:$0xff] }
 0x991   : > { %6605 = vmatpush1.msra.mxu1 %v18461_v51  ;;  %11544 = vmatprep.subr.mxu0 %v9846_v22 }
 0x992   : > { %6606 = vmatprep.subr.mxu1 %v18470_v4  ;;  %11545 = vmatpush3.msra.mxu0 %v9846_v22  ;;  %v18807_v22 = vld [vmem:[%s20310_s1 + $0x2f0] sm:$0xff] }
 0x993   : > { %6607 = vmatpush1.msra.mxu1 %v18476_v27  ;;  %11546 = vmatprep.subr.mxu0 %v9845_v1 }
 0x994   : > { %6608 = vmatprep.subr.mxu1 %v18485_v37  ;;  %11547 = vmatpush3.msra.mxu0 %v9845_v1  ;;  %v18824_v1 = vld [vmem:[%s20310_s1] sm:$0xff] }
 0x995   : > { %6609 = vmatpush1.msra.mxu1 %v18491_v31  ;;  %11548 = vmatprep.subr.mxu0 %v9844_v39 }
 0x996   : > { %6610 = vmatprep.subr.mxu1 %v18500_v34  ;;  %11549 = vmatpush3.msra.mxu0 %v9844_v39  ;;  %v18841_v39 = vld [vmem:[%s20310_s1 + $0x2d8] sm:$0xff] }
 0x997   : > { %6611 = vmatpush1.msra.mxu1 %v18506_v43  ;;  %11550 = vmatprep.subr.mxu0 %v9843_v50 }
 0x998   : > { %6612 = vmatprep.subr.mxu1 %v18515_v23  ;;  %11551 = vmatpush3.msra.mxu0 %v9843_v50  ;;  %v18861_v50 = vld [vmem:[%s20310_s1 + $0x2c0] sm:$0xff] }
 0x999   : > { %6613 = vmatpush1.msra.mxu1 %v18521_v55  ;;  %11552 = vmatprep.subr.mxu0 %v9842_v5 }
 0x99a   : > { %6614 = vmatprep.subr.mxu1 %v18530_v3  ;;  %11553 = vmatpush3.msra.mxu0 %v9842_v5  ;;  %v18882_v5 = vld [vmem:[%s20310_s1 + $0x2a8] sm:$0xff] }
 0x99b   : > { %6615 = vmatpush1.msra.mxu1 %v18536_v17  ;;  %11554 = vmatprep.subr.mxu0 %v18541_v12 }
 0x99c   : > { %6616 = vmatprep.subr.mxu1 %v18547_v42  ;;  %11555 = vmatpush3.msra.mxu0 %v18541_v12 }
 0x99d   : > { %6617 = vmatpush1.msra.mxu1 %v18553_v11  ;;  %11556 = vmatprep.subr.mxu0 %v18558_v8 }
 0x99e   : > { %6740 = vmatprep.subr.mxu1 %v18266_v58  ;;  %11557 = vmatpush3.msra.mxu0 %v18558_v8  ;;  %v18596_v58 = vld [vmem:[%s20310_s1 + $0xe8] sm:$0xff] }
 0x99f   : > { %6651 = vmatmul.mubr.f32.vlgmr.msra.gmra.mxu1 %v18565_v41  ;;  %11558 = vmatprep.subr.mxu0 %v18570_v49 }
 0x9a0   : > { %6741 = vmatpush1.msra.mxu1 %v18325_v54  ;;  %11559 = vmatpush3.msra.mxu0 %v18570_v49  ;;  %v18603_v54 = vld [vmem:[%s20310_s1 + $0xe0] sm:$0xff] }
 0x9a1   : > { %6742 = vmatprep.subr.mxu1 %v18330_v9  ;;  %11561 = vmatmul.mubr.f32.vlgmr.msra.gmra.mxu0 %v6426_v29  ;;  %v18617_v9 = vld [vmem:[%s20310_s1 + $0xd0] sm:$0xff]  ;;  %v18638_v29 = vld [vmem:[%s20310_s1 + $0xb8] sm:$0xff] }
 0x9a2   : > { %6743 = vmatpush1.msra.mxu1 %v18336_v19  ;;  %6663 = vmatprep.subr.mxu0 %v18581_v60  ;;  %v18624_v19 = vld [vmem:[%s20310_s1 + $0xc8] sm:$0xff] }
 0x9a3   : > { %6744 = vmatprep.subr.mxu1 %v18343_v2  ;;  %6664 = vmatpush1.msra.mxu0 %v18588_v6  ;;  %v18631_v2 = vld [vmem:[%s20310_s1 + $0xc0] sm:$0xff] }
 0x9a4   : > { %6745 = vmatpush1.msra.mxu1 %v18352_v47  ;;  %6665 = vmatprep.subr.mxu0 %v18596_v58  ;;  %v18645_v47 = vld [vmem:[%s20310_s1 + $0xb0] sm:$0xff] }
 0x9a5   : > { %6746 = vmatprep.subr.mxu1 %v18362_v26  ;;  %6666 = vmatpush1.msra.mxu0 %v18603_v54  ;;  %v18666_v26 = vld [vmem:[%s20310_s1 + $0x98] sm:$0xff] }
 0x9a6   : > { %6747 = vmatpush1.msra.mxu1 %v18372_v16  ;;  %6667 = vmatprep.subr.mxu0 %v18610_v13  ;;  %v18680_v16 = vld [vmem:[%s20310_s1 + $0x88] sm:$0xff] }
 0x9a7   : > { %6748 = vmatprep.subr.mxu1 %v18380_v36  ;;  %6668 = vmatpush1.msra.mxu0 %v18617_v9  ;;  %v18694_v36 = vld [vmem:[%s20310_s1 + $0x78] sm:$0xff] }
 0x9a8   : > { %6749 = vmatpush1.msra.mxu1 %v18386_v57  ;;  %6669 = vmatprep.subr.mxu0 %v18624_v19  ;;  %v18701_v57 = vld [vmem:[%s20310_s1 + $0x70] sm:$0xff] }
 0x9a9   : > { %6750 = vmatprep.subr.mxu1 %v18395_v46  ;;  %6670 = vmatpush1.msra.mxu0 %v18631_v2  ;;  %v18715_v46 = vld [vmem:[%s20310_s1 + $0x60] sm:$0xff] }
 0x9aa   : > { %6751 = vmatpush1.msra.mxu1 %v18401_v0  ;;  %6671 = vmatprep.subr.mxu0 %v18638_v29  ;;  %v18722_v0 = vld [vmem:[%s20310_s1 + $0x58] sm:$0xff] }
 0x9ab   : > { %6752 = vmatprep.subr.mxu1 %v18410_v24  ;;  %6672 = vmatpush1.msra.mxu0 %v18645_v47  ;;  %v18736_v24 = vld [vmem:[%s20310_s1 + $0x48] sm:$0xff] }
 0x9ac   : > { %6753 = vmatpush1.msra.mxu1 %v18416_v32  ;;  %6673 = vmatprep.subr.mxu0 %v18652_v38  ;;  %v18743_v32 = vld [vmem:[%s20310_s1 + $0x40] sm:$0xff] }
 0x9ad   : > { %6754 = vmatprep.subr.mxu1 %v18425_v63  ;;  %6674 = vmatpush1.msra.mxu0 %v18659_v48  ;;  %v18757_v63 = vld [vmem:[%s12812_s24 + $0xf8] sm:$0x7f] }
 0x9ae   : > { %6755 = vmatpush1.msra.mxu1 %v18431_v53  ;;  %6675 = vmatprep.subr.mxu0 %v18666_v26  ;;  %v18762_v53 = vld [vmem:[%s20310_s1 + $0x30] sm:$0xff] }
 0x9af   : > { %6756 = vmatprep.subr.mxu1 %v18440_v44  ;;  %6676 = vmatpush1.msra.mxu0 %v18673_v14  ;;  %v18776_v44 = vld [vmem:[%s20310_s1 + $0x20] sm:$0xff] }
 0x9b0   : > { %6757 = vmatpush1.msra.mxu1 %v18446_v45  ;;  %6677 = vmatprep.subr.mxu0 %v18680_v16  ;;  %v18783_v45 = vld [vmem:[%s20310_s1 + $0x18] sm:$0xff] }
 0x9b1   : > { %6758 = vmatprep.subr.mxu1 %v18455_v59  ;;  %6678 = vmatpush1.msra.mxu0 %v18687_v20  ;;  %v18797_v59 = vld [vmem:[%s20310_s1 + $0x10] sm:$0xff] }
 0x9b2   : > { %6759 = vmatpush1.msra.mxu1 %v18461_v51  ;;  %6679 = vmatprep.subr.mxu0 %v18694_v36  ;;  %v18800_v51 = vld [vmem:[%s12812_s24 + $0xe1] sm:$0xff] }
 0x9b3   : > { %6760 = vmatprep.subr.mxu1 %v18470_v4  ;;  %6680 = vmatpush1.msra.mxu0 %v18701_v57  ;;  %v18812_v4 = vld [vmem:[%s20310_s1 + $0x8] sm:$0xff] }
 0x9b4   : > { %6761 = vmatpush1.msra.mxu1 %v18476_v27  ;;  %6681 = vmatprep.subr.mxu0 %v18708_v40  ;;  %v18819_v27 = vld [vmem:[%s20310_s1 + $0x2e8] sm:$0xff] }
 0x9b5   : > { %6762 = vmatprep.subr.mxu1 %v18485_v37  ;;  %6682 = vmatpush1.msra.mxu0 %v18715_v46  ;;  %v18831_v37 = vld [vmem:[%s20310_s1 + $0x2e0] sm:$0xff] }
 0x9b6   : > { %6763 = vmatpush1.msra.mxu1 %v18491_v31  ;;  %6683 = vmatprep.subr.mxu0 %v18722_v0  ;;  %v9855_v31 = vld [vmem:[%s12812_s24 + $0xe0] sm:$0xff] }
 0x9b7   : > { %6764 = vmatprep.subr.mxu1 %v18500_v34  ;;  %6684 = vmatpush1.msra.mxu0 %v18729_v21  ;;  %v18848_v34 = vld [vmem:[%s20310_s1 + $0x2d0] sm:$0xff] }
 0x9b8   : > { %6765 = vmatpush1.msra.mxu1 %v18506_v43  ;;  %6685 = vmatprep.subr.mxu0 %v18736_v24  ;;  %v18854_v43 = vld [vmem:[%s20310_s1 + $0x2c8] sm:$0xff] }
 0x9b9   : > { %6766 = vmatprep.subr.mxu1 %v18515_v23  ;;  %6686 = vmatpush1.msra.mxu0 %v18743_v32  ;;  %v18868_v23 = vld [vmem:[%s20310_s1 + $0x2b8] sm:$0xff] }
 0x9ba   : > { %6767 = vmatpush1.msra.mxu1 %v18521_v55  ;;  %6656 = vmatprep.mubr.f32.mxu1 %v20426_v61  ;;  %v18875_v55 = vld [vmem:[%s20310_s1 + $0x2b0] sm:$0xff] }
 0x9bb   : > { %6687 = vmatprep.subr.mxu0 %v18752_v56  ;;  %6768 = vmatprep.subr.mxu1 %v18530_v3  ;;  %v18889_v3 = vld [vmem:[%s20310_s1 + $0x2a0] sm:$0xff] }
 0x9bc   : > { %6657 = vmatmul.mubr.f32.gmra.mxu1 %v18757_v63  ;;  %6688 = vmatpush1.msra.mxu0 %v18762_v53 }
 0x9bd   : > { %6769 = vmatpush1.msra.mxu1 %v18536_v17  ;;  %6689 = vmatprep.subr.mxu0 %v18769_v7  ;;  %v18896_v17 = vld [vmem:[%s20310_s1 + $0x298] sm:$0xff] }
 0x9be   : > { %6770 = vmatprep.subr.mxu1 %v18547_v42  ;;  %6690 = vmatpush1.msra.mxu0 %v18776_v44  ;;  %v18903_v42 = vld [vmem:[%s20310_s1 + $0x290] sm:$0xff] }
 0x9bf   : > { %6771 = vmatpush1.msra.mxu1 %v18553_v11  ;;  %6691 = vmatprep.subr.mxu0 %v18783_v45  ;;  %v18910_v11 = vld [vmem:[%s20310_s1 + $0x288] sm:$0xff] }
 0x9c0   : > { %6804 = vmatprep.mubr.f32.mxu1 %v20426_v61  ;;  %6928 = vmatprep.subr.mxu1 %v18790_v25 }
 0x9c1   : > { %6692 = vmatpush1.msra.mxu0 %v18797_v59  ;;  %6805 = vmatmul.mubr.f32.vlgmr.msra.gmra.mxu1 %v18800_v51 }
 0x9c2   : > { %6929 = vmatpush1.msra.mxu1 %v18807_v22  ;;  %6693 = vmatprep.subr.mxu0 %v18812_v4 }
 0x9c3   : > { %6930 = vmatprep.subr.mxu1 %v18819_v27  ;;  %6694 = vmatpush1.msra.mxu0 %v18824_v1 }
 0x9c4   : > { %6727 = vmatprep.mubr.f32.mxu0 %v20426_v61  ;;  %6931 = vmatpush1.msra.mxu1 %v18831_v37 }
 0x9c5   : > { %6728 = vmatmul.mubr.f32.vlgmr.msra.gmra.mxu0 %v9855_v31  ;;  %6817 = vmatprep.subr.mxu0 %v18581_v60  ;;  %v18917_v60 = vld [vmem:[%s20310_s1 + $0x280] sm:$0xff]  ;;  %v9934_v31 = vld [vmem:[%s20312_s3 + $0xb8] sm:$0xff] }
 0x9c6   : > { %6932 = vmatprep.subr.mxu1 %v18841_v39  ;;  %6818 = vmatpush1.msra.mxu0 %v18588_v6  ;;  %v18924_v6 = vld [vmem:[%s20310_s1 + $0x278] sm:$0xff] }
 0x9c7   : > { %6933 = vmatpush1.msra.mxu1 %v18848_v34  ;;  %6819 = vmatprep.subr.mxu0 %v18596_v58  ;;  %v18931_v58 = vld [vmem:[%s20310_s1 + $0x270] sm:$0xff] }
 0x9c8   : > { %6934 = vmatprep.subr.mxu1 %v18854_v43  ;;  %6820 = vmatpush1.msra.mxu0 %v18603_v54  ;;  %v18938_v54 = vld [vmem:[%s20310_s1 + $0x268] sm:$0xff] }
 0x9c9   : > { %6935 = vmatpush1.msra.mxu1 %v18861_v50  ;;  %6821 = vmatprep.subr.mxu0 %v18610_v13  ;;  %v18945_v13 = vld [vmem:[%s20310_s1 + $0x260] sm:$0xff] }
 0x9ca   : > { %6936 = vmatprep.subr.mxu1 %v18868_v23  ;;  %6822 = vmatpush1.msra.mxu0 %v18617_v9  ;;  %v18952_v9 = vld [vmem:[%s20310_s1 + $0x258] sm:$0xff] }
 0x9cb   : > { %6937 = vmatpush1.msra.mxu1 %v18875_v55  ;;  %6823 = vmatprep.subr.mxu0 %v18624_v19  ;;  %v18959_v19 = vld [vmem:[%s20310_s1 + $0x250] sm:$0xff] }
 0x9cc   : > { %6938 = vmatprep.subr.mxu1 %v18882_v5  ;;  %6824 = vmatpush1.msra.mxu0 %v18631_v2  ;;  %v18966_v2 = vld [vmem:[%s20310_s1 + $0x248] sm:$0xff] }
 0x9cd   : > { %6939 = vmatpush1.msra.mxu1 %v18889_v3  ;;  %6825 = vmatprep.subr.mxu0 %v18638_v29  ;;  %v18973_v29 = vld [vmem:[%s20310_s1 + $0x240] sm:$0xff] }
 0x9ce   : > { %6940 = vmatprep.subr.mxu1 %v18896_v17  ;;  %6826 = vmatpush1.msra.mxu0 %v18645_v47  ;;  %v18980_v47 = vld [vmem:[%s20310_s1 + $0x238] sm:$0xff] }
 0x9cf   : > { %6941 = vmatpush1.msra.mxu1 %v18903_v42  ;;  %6827 = vmatprep.subr.mxu0 %v18652_v38  ;;  %v18987_v38 = vld [vmem:[%s20310_s1 + $0x230] sm:$0xff] }
 0x9d0   : > { %6942 = vmatprep.subr.mxu1 %v18910_v11  ;;  %6828 = vmatpush1.msra.mxu0 %v18659_v48  ;;  %v18994_v48 = vld [vmem:[%s20310_s1 + $0x228] sm:$0xff] }
 0x9d1   : > { %6943 = vmatpush1.msra.mxu1 %v18917_v60  ;;  %6829 = vmatprep.subr.mxu0 %v18666_v26  ;;  %v19001_v26 = vld [vmem:[%s20310_s1 + $0x220] sm:$0xff] }
 0x9d2   : > { %6944 = vmatprep.subr.mxu1 %v18924_v6  ;;  %6830 = vmatpush1.msra.mxu0 %v18673_v14  ;;  %v9892_v14 = vld [vmem:[%s12812_s24 + $0xe9] sm:$0x7f] }
 0x9d3   : > { %6945 = vmatpush1.msra.mxu1 %v18931_v58  ;;  %6831 = vmatprep.subr.mxu0 %v18680_v16  ;;  %v9896_v16 = vld [vmem:[%s20310_s1 + $0x218] sm:$0xff] }
 0x9d4   : > { %6946 = vmatprep.subr.mxu1 %v18938_v54  ;;  %6832 = vmatpush1.msra.mxu0 %v18687_v20  ;;  %v9895_v20 = vld [vmem:[%s20310_s1 + $0x210] sm:$0xff] }
 0x9d5   : > { %6947 = vmatpush1.msra.mxu1 %v18945_v13  ;;  %6833 = vmatprep.subr.mxu0 %v18694_v36  ;;  %v9894_v36 = vld [vmem:[%s20310_s1 + $0x208] sm:$0xff] }
 0x9d6   : > { %6948 = vmatprep.subr.mxu1 %v18952_v9  ;;  %6834 = vmatpush1.msra.mxu0 %v18701_v57  ;;  %v9856_v57 = vld [vmem:[%s12812_s24 + $0xe8] sm:$0x7f] }
 0x9d7   : > { %6949 = vmatpush1.msra.mxu1 %v18959_v19  ;;  %6835 = vmatprep.subr.mxu0 %v18708_v40  ;;  %v9893_v40 = vld [vmem:[%s20310_s1 + $0x200] sm:$0xff] }
 0x9d8   : > { %6950 = vmatprep.subr.mxu1 %v18966_v2  ;;  %6836 = vmatpush1.msra.mxu0 %v18715_v46  ;;  %v9926_v46 = vld [vmem:[%s12812_s24 + $0xf9] sm:$0x7f] }
 0x9d9   : > { %6951 = vmatpush1.msra.mxu1 %v18973_v29  ;;  %6837 = vmatprep.subr.mxu0 %v18722_v0  ;;  %v7115_v0 = vld [vmem:[%s20312_s3 + $0x78] sm:$0xff] }
 0x9da   : > { %6952 = vmatprep.subr.mxu1 %v18980_v47  ;;  %6838 = vmatpush1.msra.mxu0 %v18729_v21  ;;  %v7114_v21 = vld [vmem:[%s20312_s3 + $0x70] sm:$0xff] }
 0x9db   : > { %6953 = vmatpush1.msra.mxu1 %v18987_v38  ;;  %6839 = vmatprep.subr.mxu0 %v18736_v24  ;;  %v9942_v24 = vld [vmem:[%s20312_s3 + $0xf8] sm:$0xff] }
 0x9dc   : > { %6954 = vmatprep.subr.mxu1 %v18994_v48  ;;  %6810 = vmatprep.mubr.f32.mxu1 %v20426_v61 }
 0x9dd   : > { %6840 = vmatpush1.msra.mxu0 %v18743_v32  ;;  %6955 = vmatpush1.msra.mxu1 %v19001_v26  ;;  %v9941_v32 = vld [vmem:[%s20312_s3 + $0xf0] sm:$0xff] }
 0x9de   : > { %6811 = vmatmul.mubr.f32.gmra.mxu1 %v9892_v14  ;;  %6841 = vmatprep.subr.mxu0 %v18752_v56  ;;  %v7113_v56 = vld [vmem:[%s20312_s3 + $0x68] sm:$0xff] }
 0x9df   : > { %6956 = vmatprep.subr.mxu1 %v9896_v16  ;;  %6842 = vmatpush1.msra.mxu0 %v18762_v53  ;;  %v7112_v53 = vld [vmem:[%s20312_s3 + $0x60] sm:$0xff] }
 0x9e0   : > { %6957 = vmatpush1.msra.mxu1 %v9895_v20  ;;  %6733 = vmatprep.mubr.f32.mxu0 %v20426_v61 }
 0x9e1   : > { %6843 = vmatprep.subr.mxu0 %v18769_v7  ;;  %6958 = vmatprep.subr.mxu1 %v9894_v36  ;;  %v9939_v7 = vld [vmem:[%s20312_s3 + $0xe0] sm:$0xff] }
 0x9e2   : > { %6734 = vmatmul.mubr.f32.gmra.mxu0 %v9856_v57  ;;  %6959 = vmatpush1.msra.mxu1 %v9893_v40 }
 0x9e3   : > { %6844 = vmatpush1.msra.mxu0 %v18776_v44  ;;  %6992 = vmatprep.mubr.f32.mxu1 %v20426_v61  ;;  %v7111_v44 = vld [vmem:[%s20312_s3 + $0x58] sm:$0xff] }
 0x9e4   : > { %6845 = vmatprep.subr.mxu0 %v18783_v45  ;;  %6993 = vmatmul.mubr.f32.vlgmr.msra.gmra.mxu1 %v18800_v51  ;;  %v9938_v45 = vld [vmem:[%s20312_s3 + $0xd8] sm:$0xff]  ;;  %v7109_v51 = vld [vmem:[%s20312_s3 + $0x48] sm:$0xff] }
 0x9e5   : > { %6846 = vmatpush1.msra.mxu0 %v18797_v59  ;;  %6881 = vmatprep.mubr.f32.mxu0 %v20426_v61  ;;  %v9937_v59 = vld [vmem:[%s20312_s3 + $0xd0] sm:$0xff] }
 0x9e6   : > { %6847 = vmatprep.subr.mxu0 %v18812_v4  ;;  %6998 = vmatprep.mubr.f32.mxu1 %v20426_v61  ;;  %v9936_v4 = vld [vmem:[%s20312_s3 + $0xc8] sm:$0xff] }
 0x9e7   : > { %6848 = vmatpush1.msra.mxu0 %v18824_v1  ;;  %11563 = vmatprep.subr.mxu1 %v9942_v24  ;;  %v9935_v1 = vld [vmem:[%s20312_s3 + $0xc0] sm:$0xff] }
 0x9e8   : > { %6882 = vmatmul.mubr.f32.vlgmr.msra.gmra.mxu0 %v18565_v41  ;;  %6999 = vmatmul.mubr.f32.gmra.mxu1 %v9892_v14  ;;  %v9925_v41 = vld [vmem:[%s12812_s24 + $0xf1] sm:$0xff]  ;;  %s10154_s24 = sshll.u32 %s12402_s13, 7  ;;  %s12270_s13 = sshll.u32 %s12330_s27, 4  ;;  %s12271_s13 = int_to_ptr.vmem [resolvable:$false] %s12270_s13 }
 0x9e9   : > { %7009 = vmatprep.subr.mxu0 %v18790_v25  ;;  %6887 = vmatprep.mubr.f32.mxu0 %v20426_v61  ;;  %v7110_v25 = vld [vmem:[%s20312_s3 + $0x50] sm:$0xff]  ;;  %s20274_s22 = scalar_lea.hbm %s20318_s9, %s10154_s24  ;;  %s12272_s26 = scalar_lea.vmem %s12271_s13, 256 }
 0x9ea   : > { %7010 = vmatpush1.msra.mxu0 %v18807_v22  ;;  %11564 = vmatpush3.msra.mxu1 %v9942_v24  ;;  %v7108_v22 = vld [vmem:[%s20312_s3 + $0x40] sm:$0xff]  ;;  %p12273_p0 = scmp.lt.s32.totalorder %s9063_s14, %s12271_s13  ;;  %p12274_p1 = scmp.lt.s32.totalorder %s12272_s26, %s12266_s25 }
 0x9eb   : > { %7011 = vmatprep.subr.mxu0 %v18819_v27  ;;  %11565 = vmatprep.subr.mxu1 %v9941_v32  ;;  %v7107_v27 = vld [vmem:[%s20312_s3 + $0x38] sm:$0xff] }
 0x9ec   : > { %7012 = vmatpush1.msra.mxu0 %v18831_v37  ;;  %11566 = vmatpush3.msra.mxu1 %v9941_v32  ;;  %v7106_v37 = vld [vmem:[%s20312_s3 + $0x30] sm:$0xff]  ;;  %p12275_p2 = por %p12274_p1, %p12273_p0 }
 0x9ed   : > { %7013 = vmatprep.subr.mxu0 %v18841_v39  ;;  %6888 = vmatmul.mubr.f32.gmra.mxu0 %v18757_v63  ;;  %v9940_v63 = vld [vmem:[%s20312_s3 + $0xe8] sm:$0xff] }
 0x9ee   : > { %7014 = vmatpush1.msra.mxu0 %v18848_v34  ;;  %7073 = vmatprep.mubr.f32.mxu0 %v20426_v61  ;;  %v7105_v39 = vld [vmem:[%s20312_s3 + $0x28] sm:$0xff]  ;;  %v9933_v34 = vld [vmem:[%s20312_s3 + $0xb0] sm:$0xff]  ;;  %p12276_p3 = pnand %p12275_p2, %p12269_p13 }
 0x9ef   : > { %7015 = vmatprep.subr.mxu0 %v18854_v43  ;;  %11567 = vmatprep.subr.mxu1 %v9940_v63  ;;  %v7104_v43 = vld [vmem:[%s20312_s3 + $0x20] sm:$0xff] }
 0x9f0   : > { %7016 = vmatpush1.msra.mxu0 %v18861_v50  ;;  %11568 = vmatpush3.msra.mxu1 %v9940_v63  ;;  %v9932_v50 = vld [vmem:[%s20312_s3 + $0xa8] sm:$0xff] }
 0x9f1   : > { %7017 = vmatprep.subr.mxu0 %v18868_v23  ;;  %11569 = vmatprep.subr.mxu1 %v9939_v7  ;;  %v7103_v23 = vld [vmem:[%s20312_s3 + $0x18] sm:$0xff] }
 0x9f2   : > { %7018 = vmatpush1.msra.mxu0 %v18875_v55  ;;  %11570 = vmatpush3.msra.mxu1 %v9939_v7  ;;  %v9931_v55 = vld [vmem:[%s20312_s3 + $0xa0] sm:$0xff] }
 0x9f3   : > { %7019 = vmatprep.subr.mxu0 %v18882_v5  ;;  %11571 = vmatprep.subr.mxu1 %v9938_v45  ;;  %v7102_v5 = vld [vmem:[%s20312_s3 + $0x10] sm:$0xff] }
 0x9f4   : > { %7020 = vmatpush1.msra.mxu0 %v18889_v3  ;;  %11572 = vmatpush3.msra.mxu1 %v9938_v45  ;;  %v9930_v3 = vld [vmem:[%s20312_s3 + $0x98] sm:$0xff] }
 0x9f5   : > { %7021 = vmatprep.subr.mxu0 %v18896_v17  ;;  %11573 = vmatprep.subr.mxu1 %v9937_v59  ;;  %v7101_v17 = vld [vmem:[%s20312_s3 + $0x8] sm:$0xff] }
 0x9f6   : > { %7022 = vmatpush1.msra.mxu0 %v18903_v42  ;;  %11574 = vmatpush3.msra.mxu1 %v9937_v59  ;;  %v9929_v42 = vld [vmem:[%s20312_s3 + $0x90] sm:$0xff] }
 0x9f7   : > { %7023 = vmatprep.subr.mxu0 %v18910_v11  ;;  %11575 = vmatprep.subr.mxu1 %v9936_v4  ;;  %v7100_v11 = vld [vmem:[%s20312_s3] sm:$0xff] }
 0x9f8   : > { %7024 = vmatpush1.msra.mxu0 %v18917_v60  ;;  %11576 = vmatpush3.msra.mxu1 %v9936_v4  ;;  %v9928_v60 = vld [vmem:[%s20312_s3 + $0x88] sm:$0xff] }
 0x9f9   : > { %7025 = vmatprep.subr.mxu0 %v18924_v6  ;;  %11577 = vmatprep.subr.mxu1 %v9935_v1  ;;  %v9927_v6 = vld [vmem:[%s20312_s3 + $0x80] sm:$0xff] }
 0x9fa   : > { %7026 = vmatpush1.msra.mxu0 %v18931_v58  ;;  %11578 = vmatpush3.msra.mxu1 %v9935_v1 }
 0x9fb   : > { %7027 = vmatprep.subr.mxu0 %v18938_v54  ;;  %11579 = vmatprep.subr.mxu1 %v9934_v31  ;;  %v19171_v54 = vld [vmem:[%s20312_s3 + $0x178] sm:$0xff] }
 0x9fc   : > { %7028 = vmatpush1.msra.mxu0 %v18945_v13  ;;  %11580 = vmatpush3.msra.mxu1 %v9934_v31 }
 0x9fd   : > { %7029 = vmatprep.subr.mxu0 %v18952_v9  ;;  %11581 = vmatprep.subr.mxu1 %v9933_v34 }
 0x9fe   : > { %7030 = vmatpush1.msra.mxu0 %v18959_v19  ;;  %11582 = vmatpush3.msra.mxu1 %v9933_v34 }
 0x9ff   : > { %7031 = vmatprep.subr.mxu0 %v18966_v2  ;;  %11583 = vmatprep.subr.mxu1 %v9932_v50 }
 0xa00   : > { %7032 = vmatpush1.msra.mxu0 %v18973_v29  ;;  %11584 = vmatpush3.msra.mxu1 %v9932_v50 }
 0xa01   : > { %7033 = vmatprep.subr.mxu0 %v18980_v47  ;;  %11585 = vmatprep.subr.mxu1 %v9931_v55 }
 0xa02   : > { %7034 = vmatpush1.msra.mxu0 %v18987_v38  ;;  %11586 = vmatpush3.msra.mxu1 %v9931_v55 }
 0xa03   : > { %7035 = vmatprep.subr.mxu0 %v18994_v48  ;;  %11587 = vmatprep.subr.mxu1 %v9930_v3 }
 0xa04   : > { %7036 = vmatpush1.msra.mxu0 %v19001_v26  ;;  %11588 = vmatpush3.msra.mxu1 %v9930_v3  ;;  %v19177_v26 = vld [vmem:[%s20313_s4] ss:$0 sm:$0xff] }
 0xa05   : > { %7037 = vmatprep.subr.mxu0 %v9896_v16  ;;  %11589 = vmatprep.subr.mxu1 %v9929_v42 }
 0xa06   : > { %7038 = vmatpush1.msra.mxu0 %v9895_v20  ;;  %11590 = vmatpush3.msra.mxu1 %v9929_v42 }
 0xa07   : > { %7039 = vmatprep.subr.mxu0 %v9894_v36  ;;  %11591 = vmatprep.subr.mxu1 %v9928_v60 }
 0xa08   : > { %7040 = vmatpush1.msra.mxu0 %v9893_v40  ;;  %11592 = vmatpush3.msra.mxu1 %v9928_v60 }
 0xa09   : > { %7074 = vmatmul.mubr.f32.vlgmr.msra.gmra.mxu0 %v9925_v41  ;;  %11598 = vmatprep.subr.mxu0 %v7115_v0 }
 0xa0a   : > { %7079 = vmatprep.mubr.f32.mxu0 %v20426_v61  ;;  %11599 = vmatpush3.msra.mxu0 %v7115_v0 }
 0xa0b   : > { %11600 = vmatprep.subr.mxu0 %v7114_v21  ;;  %11593 = vmatprep.subr.mxu1 %v9927_v6 }
 0xa0c   : > { %11601 = vmatpush3.msra.mxu0 %v7114_v21  ;;  %11594 = vmatpush3.msra.mxu1 %v9927_v6 }
 0xa0d   : > { %7080 = vmatmul.mubr.f32.gmra.mxu0 %v9926_v46  ;;  %11602 = vmatprep.subr.mxu0 %v7113_v56 }
 0xa0e   : > { %11603 = vmatpush3.msra.mxu0 %v7113_v56  ;;  %11633 = vmatprep.subr.mxu1 %v19171_v54 }
 0xa0f   : > { %11604 = vmatprep.subr.mxu0 %v7112_v53 }
 0xa10   : > { %11605 = vmatpush3.msra.mxu0 %v7112_v53 }
 0xa11   : > { %11606 = vmatprep.subr.mxu0 %v7111_v44 }
 0xa12   : > { %11607 = vmatpush3.msra.mxu0 %v7111_v44 }
 0xa13   : > { %11608 = vmatprep.subr.mxu0 %v7110_v25 }
 0xa14   : > { %11609 = vmatpush3.msra.mxu0 %v7110_v25 }
 0xa15   : > { %11610 = vmatprep.subr.mxu0 %v7109_v51 }
 0xa16   : > { %11611 = vmatpush3.msra.mxu0 %v7109_v51 }
 0xa17   : > { %11612 = vmatprep.subr.mxu0 %v7108_v22 }
 0xa18   : > { %11613 = vmatpush3.msra.mxu0 %v7108_v22 }
 0xa19   : > { %11614 = vmatprep.subr.mxu0 %v7107_v27 }
 0xa1a   : > { %11615 = vmatpush3.msra.mxu0 %v7107_v27 }
 0xa1b   : > { %11616 = vmatprep.subr.mxu0 %v7106_v37 }
 0xa1c   : > { %11617 = vmatpush3.msra.mxu0 %v7106_v37 }
 0xa1d   : > { %11618 = vmatprep.subr.mxu0 %v7105_v39 }
 0xa1e   : > { %11619 = vmatpush3.msra.mxu0 %v7105_v39 }
 0xa1f   : > { %11620 = vmatprep.subr.mxu0 %v7104_v43 }
 0xa20   : > { %11621 = vmatpush3.msra.mxu0 %v7104_v43 }
 0xa21   : > { %11622 = vmatprep.subr.mxu0 %v7103_v23 }
 0xa22   : > { %11623 = vmatpush3.msra.mxu0 %v7103_v23 }
 0xa23   : > { %11624 = vmatprep.subr.mxu0 %v7102_v5 }
 0xa24   : > { %11625 = vmatpush3.msra.mxu0 %v7102_v5 }
 0xa25   : > { %11626 = vmatprep.subr.mxu0 %v7101_v17 }
 0xa26   : > { %11627 = vmatpush3.msra.mxu0 %v7101_v17 }
 0xa27   : > { %11628 = vmatprep.subr.mxu0 %v7100_v11 }
 0xa28   : > { %11629 = vmatpush3.msra.mxu0 %v7100_v11 }
 0xa29   : > { %11668 = vmatprep.subr.mxu0 %v20426_v61 }
 0xa3d   : > { %v11527_v13 = vpop.f32.mrf.mxu1 }
 0xa3f   : > { %v6400_v2 = vpop.f32.mrf.mxu1 }
 0xa41   : > { %v11492_v58 = vpop.f32.mrf.mxu0 }
 0xa42   : > { %v6406_v19 = vadd.f32 %v11527_v13, %v11492_v58 }
 0xa43   : > { %v6325_v9 = vpop.f32.mrf.mxu0 }
 0xa44   : > { %v6401_v47 = vadd.f32 %v6400_v2, %v6325_v9 }
 0xa5f   : > { %v6652_v34 = vpop.f32.mrf.mxu1 }
 0xa61   : > { %v11562_v29 = vpop.f32.mrf.mxu0 }
 0xa62   : > { %v6506_v38 = vadd.f32 %v11562_v29, %v6406_v19 }
 0xa63   : > { %v6496_v48 = vpop.f32.mrf.mxu0 }
 0xa64   : > { %v6508_v14 = vadd.f32 %v19177_v26, %v6506_v38  ;;  %v6505_v16 = vadd.f32 %v6496_v48, %v6401_v47 }
 0xa66   : > { %v6510_v20 = vmax.f32 %v6508_v14, 0.0  ;;  %v6507_v36 = vadd.f32 %v19177_v26, %v6505_v16 }
 0xa68   : > { %6513 = vst [vmem:[#allocation2 + $0x68] sm:$0x1f] %v6510_v20  ;;  %v6509_v57 = vmax.f32 %v6507_v36, 0.0 }
 0xa6a   : > { %6512 = vst [vmem:[#allocation2 + $0x60] sm:$0xff] %v6509_v57 }
 0xa6f   : > { %v8356_v40 = vld [vmem:[#allocation2 + $0x68] sm:$0x1]  ;;  %v8475_v41 = vld [vmem:[#allocation2 + $0x69] sm:$0x1]  ;;  %v8594_v46 = vld [vmem:[#allocation2 + $0x6a] sm:$0x1] }
 0xa70   : > { %v8393_v0 = vrot.slane %v8356_v40, 2  ;;  %v8512_v21 = vrot.slane %v8475_v41, 2  ;;  %v8631_v24 = vrot.slane %v8594_v46, 2  ;;  %v8713_v32 = vld [vmem:[#allocation2 + $0x6b] sm:$0x1] }
 0xa71   : > { %v7880_v63 = vld [vmem:[#allocation2 + $0x64] sm:$0x1]  ;;  %v7999_v53 = vld [vmem:[#allocation2 + $0x65] sm:$0x1]  ;;  %v8750_v45 = vrot.slane %v8713_v32, 2 }
 0xa72   : > { %v19183_v56 = vsel %vm7467_vm7, %v8393_v0, %v18283_v62  ;;  %v19187_v7 = vsel %vm7467_vm7, %v8512_v21, %v18287_v15  ;;  %v19191_v44 = vsel %vm7467_vm7, %v8631_v24, %v18291_v35  ;;  %v7917_v25 = vrot.slane %v7880_v63, 2  ;;  %v8118_v59 = vld [vmem:[#allocation2 + $0x66] sm:$0x1]  ;;  %v8237_v51 = vld [vmem:[#allocation2 + $0x67] sm:$0x1] }
 0xa73   : > { %v8036_v22 = vrot.slane %v7999_v53, 2  ;;  %v8155_v4 = vrot.slane %v8118_v59, 2  ;;  %v8274_v27 = vrot.slane %v8237_v51, 2  ;;  %v8832_v1 = vld [vmem:[#allocation2 + $0x6c] sm:$0x1]  ;;  %v19199_v15 = vsel %vm7467_vm7, %v8750_v45, %v18311_v28  ;;  %v6654_v28 = vpop.f32.mrf.mxu1 }
 0xa74   : > { %v19195_v62 = vsel %vm7467_vm7, %v7917_v25, %v18295_v33  ;;  %v8869_v37 = vrot.slane %v8832_v1, 2 }
 0xa75   : > { %v19203_v35 = vsel %vm7467_vm7, %v8036_v22, %v18299_v10  ;;  %v19207_v31 = vsel %vm7467_vm7, %v8155_v4, %v18303_v30  ;;  %v19211_v39 = vsel %vm7467_vm7, %v8274_v27, %v18307_v18  ;;  %v12258_v4 = vld [vmem:[%s20311_s2] ss:$0 sm:$0xff] }
 0xa76   : > { %v19215_v33 = vsel %vm7467_vm7, %v8869_v37, %v18315_v52 }
 0xa7c   : > { %v6658_v43 = vpop.f32.mrf.mxu1 }
 0xa7e   : > { %v6660_v50 = vpop.f32.mrf.mxu1 }
 0xa81   : > { %v6806_v55 = vpop.f32.mrf.mxu1 }
 0xa83   : > { %v6808_v5 = vpop.f32.mrf.mxu1 }
 0xa85   : > { %v6729_v23 = vpop.f32.mrf.mxu0 }
 0xa86   : > { %v6730_v19 = vadd.f32 %v6729_v23, %v6652_v34 }
 0xa87   : > { %v6731_v10 = vpop.f32.mrf.mxu0 }
 0xa88   : > { %v6732_v13 = vadd.f32 %v6731_v10, %v6654_v28 }
 0xa9e   : > { %v6812_v17 = vpop.f32.mrf.mxu1 }
 0xaa0   : > { %v6814_v42 = vpop.f32.mrf.mxu1 }
 0xaa2   : > { %v6735_v3 = vpop.f32.mrf.mxu0 }
 0xaa3   : > { %v6736_v20 = vadd.f32 %v6735_v3, %v6658_v43 }
 0xaa4   : > { %v6737_v30 = vpop.f32.mrf.mxu0  ;;  %v6994_v60 = vpop.f32.mrf.mxu1 }
 0xaa5   : > { %v7005_v48 = vadd.f32 %v6994_v60, %v6730_v19  ;;  %v6738_v36 = vadd.f32 %v6737_v30, %v6660_v50  ;;  %v9955_v30 = vld [vmem:[%s20312_s3 + $0x160] sm:$0xff]  ;;  %v7417_v19 = vld [vmem:[%s20314_s5 + $0x78] sm:$0xff] }
 0xaa6   : > { %v6996_v6 = vpop.f32.mrf.mxu1  ;;  %v12260_v60 = vld [vmem:[%s20312_s3 + $0x140] sm:$0xff] }
 0xaa7   : > { %v7006_v2 = vadd.f32 %v6996_v6, %v6732_v13  ;;  %v12262_v6 = vld [vmem:[%s20312_s3 + $0x130] sm:$0xff]  ;;  %v12264_v13 = vld [vmem:[%s20312_s3 + $0x120] sm:$0xff] }
 0xaa8   : > { %v6883_v11 = vpop.f32.mrf.mxu0  ;;  %v7000_v52 = vpop.f32.mrf.mxu1 }
 0xaa9   : > { %v6884_v47 = vadd.f32 %v6883_v11, %v6806_v55  ;;  %v7090_v41 = vmax.f32 %v7005_v48, %v7006_v2  ;;  %v7007_v53 = vadd.f32 %v7000_v52, %v6736_v20  ;;  %v12259_v11 = vld [vmem:[%s20312_s3 + $0x148] sm:$0xff]  ;;  %v12265_v52 = vld [vmem:[%s20312_s3 + $0x118] sm:$0xff] }
 0xaaa   : > { %v6885_v18 = vpop.f32.mrf.mxu0  ;;  %v7002_v14 = vpop.f32.mrf.mxu1  ;;  %v7415_v2 = vld [vmem:[%s20314_s5 + $0x68] sm:$0xff]  ;;  %v7413_v48 = vld [vmem:[%s20314_s5 + $0x58] sm:$0xff] }
 0xaab   : > { %v6886_v38 = vadd.f32 %v6885_v18, %v6808_v5  ;;  %v7008_v0 = vadd.f32 %v7002_v14, %v6738_v36  ;;  %v9957_v5 = vld [vmem:[%s20312_s3 + $0x170] sm:$0xff]  ;;  %v12261_v18 = vld [vmem:[%s20312_s3 + $0x138] sm:$0xff]  ;;  %v9968_v20 = vld [vmem:[%s20314_s5 + $0xc8] sm:$0xff] }
 0xaac   : > { %v9969_v14 = vld [vmem:[%s20314_s5 + $0xd0] sm:$0xff]  ;;  %v7411_v36 = vld [vmem:[%s20314_s5 + $0x48] sm:$0xff] }
 0xaad   : > { %v6889_v58 = vpop.f32.mrf.mxu0  ;;  %v7091_v51 = vmax.f32 %v7007_v53, %v7008_v0  ;;  %v9965_v0 = vld [vmem:[%s20314_s5 + $0xb0] sm:$0xff]  ;;  %v7406_v53 = vld [vmem:[%s20314_s5 + $0x20] sm:$0xff] }
 0xaae   : > { %v6890_v21 = vadd.f32 %v6889_v58, %v6812_v17  ;;  %v9956_v17 = vld [vmem:[%s20312_s3 + $0x168] sm:$0xff] }
 0xaaf   : > { %v6891_v9 = vpop.f32.mrf.mxu0  ;;  %v12263_v58 = vld [vmem:[%s20312_s3 + $0x128] sm:$0xff] }
 0xab0   : > { %v6892_v24 = vadd.f32 %v6891_v9, %v6814_v42  ;;  %v9954_v42 = vld [vmem:[%s20312_s3 + $0x158] sm:$0xff] }
 0xab1   : > { %v9974_v9 = vld [vmem:[%s20314_s5 + $0xf8] sm:$0xff] }
 0xac9   : > { %v7075_v29 = vpop.f32.mrf.mxu0 }
 0xaca   : > { %v7086_v57 = vadd.f32 %v7075_v29, %v6884_v47  ;;  %v9971_v29 = vld [vmem:[%s20314_s5 + $0xe0] sm:$0xff] }
 0xacb   : > { %v7077_v16 = vpop.f32.mrf.mxu0  ;;  %v7414_v47 = vld [vmem:[%s20314_s5 + $0x60] sm:$0xff] }
 0xacc   : > { %v7087_v40 = vadd.f32 %v7077_v16, %v6886_v38  ;;  %v9970_v38 = vld [vmem:[%s20314_s5 + $0xd8] sm:$0xff]  ;;  %v7412_v16 = vld [vmem:[%s20314_s5 + $0x50] sm:$0xff] }
 0xacd   : > { %v7081_v46 = vpop.f32.mrf.mxu0 }
 0xace   : > { %v7092_v32 = vmax.f32 %v7086_v57, %v7087_v40  ;;  %v7088_v25 = vadd.f32 %v7081_v46, %v6890_v21  ;;  %v9967_v57 = vld [vmem:[%s20314_s5 + $0xc0] sm:$0xff]  ;;  %v7409_v46 = vld [vmem:[%s20314_s5 + $0x38] sm:$0xff]  ;;  %v7408_v21 = vld [vmem:[%s20314_s5 + $0x30] sm:$0xff] }
 0xacf   : > { %v7083_v63 = vpop.f32.mrf.mxu0  ;;  %v7410_v40 = vld [vmem:[%s20314_s5 + $0x40] sm:$0xff] }
 0xad0   : > { %v7094_v45 = vmax.f32 %v7090_v41, %v7092_v32  ;;  %v7089_v59 = vadd.f32 %v7083_v63, %v6892_v24  ;;  %v9966_v41 = vld [vmem:[%s20314_s5 + $0xb8] sm:$0xff]  ;;  %v9964_v24 = vld [vmem:[%s20314_s5 + $0xa8] sm:$0xff]  ;;  %v9963_v63 = vld [vmem:[%s20314_s5 + $0xa0] sm:$0xff] }
 0xad1   : > { %v7407_v32 = vld [vmem:[%s20314_s5 + $0x28] sm:$0xff] }
 0xad2   : > { %v7093_v22 = vmax.f32 %v7088_v25, %v7089_v59  ;;  %v7096_v27 = vadd.f32 %v12258_v4, %v7094_v45  ;;  %v9962_v45 = vld [vmem:[%s20314_s5 + $0x98] sm:$0xff]  ;;  %v9961_v59 = vld [vmem:[%s20314_s5 + $0x90] sm:$0xff] }
 0xad3   : > { %v7405_v25 = vld [vmem:[%s20314_s5 + $0x18] sm:$0xff] }
 0xad4   : > { %v7095_v1 = vmax.f32 %v7091_v51, %v7093_v22  ;;  %v7098_v37 = vmax.f32 %v7096_v27, 0.0  ;;  %v7404_v51 = vld [vmem:[%s20314_s5 + $0x10] sm:$0xff]  ;;  %v9960_v22 = vld [vmem:[%s20314_s5 + $0x88] sm:$0xff]  ;;  %v9959_v27 = vld [vmem:[%s20314_s5 + $0x80] sm:$0xff] }
 0xad6   : > { %v7097_v34 = vadd.f32 %v12258_v4, %v7095_v1  ;;  %11630 = vmatprep.mubr.f32.mxu0 %v7098_v37  ;;  %v7134_v43 = vrot.slane %v7098_v37, 1  ;;  %v7305_v10 = vrot.slane %v7098_v37, 2  ;;  %v7403_v4 = vld [vmem:[%s20314_s5 + $0x8] sm:$0xff]  ;;  %v7402_v1 = vld [vmem:[%s20314_s5] sm:$0xff] }
 0xad8   : > { %v7099_v28 = vmax.f32 %v7097_v34, 0.0 }
 0xada   : > { %11631 = vmatmul.mubr.f32.vlgmr.msra.gmra.mxu0 %v7099_v28  ;;  %v7135_v50 = vrot.slane %v7099_v28, 1  ;;  %v7306_v23 = vrot.slane %v7099_v28, 2 }
 0xadb   : > { %11669 = vmatpush3.msra.mxu0 %v9974_v9  ;;  %11700 = vmatprep.mubr.msk.f32.mxu0 %vm12329_vm8, %v20426_v61  ;;  %v7397_v9 = vld [vmem:[#allocation2 + $0x30] sm:$0x1] }
 0xadc   : > { %v7136_v55 = vsel %vm972_vm0, %v7134_v43, %v7135_v50  ;;  %v7307_v3 = vsel %vm1145_vm1, %v7305_v10, %v7306_v23  ;;  %11670 = vmatprep.subr.mxu0 %v20426_v61 }
 0xadd   : > { %11595 = vmatprep.mubr.f32.mxu1 %v7136_v55 }
 0xade   : > { %11596 = vmatmul.mubr.f32.vlgmr.msra.gmra.mxu1 %v7135_v50 }
 0xadf   : > { %11634 = vmatpush3.msra.mxu1 %v19171_v54  ;;  %11665 = vmatprep.mubr.f32.mxu1 %v7307_v3  ;;  %v9953_v54 = vld [vmem:[%s20312_s3 + $0x150] sm:$0xff] }
 0xae0   : > { %11635 = vmatprep.subr.mxu1 %v9957_v5 }
 0xae1   : > { %11636 = vmatpush3.msra.mxu1 %v9957_v5 }
 0xae2   : > { %11637 = vmatprep.subr.mxu1 %v9956_v17 }
 0xae3   : > { %11638 = vmatpush3.msra.mxu1 %v9956_v17 }
 0xae4   : > { %11639 = vmatprep.subr.mxu1 %v9955_v30 }
 0xae5   : > { %11640 = vmatpush3.msra.mxu1 %v9955_v30 }
 0xae6   : > { %11641 = vmatprep.subr.mxu1 %v9954_v42 }
 0xae7   : > { %11642 = vmatpush3.msra.mxu1 %v9954_v42 }
 0xae8   : > { %11643 = vmatprep.subr.mxu1 %v9953_v54 }
 0xae9   : > { %11644 = vmatpush3.msra.mxu1 %v9953_v54  ;;  %v7419_v54 = vld [vmem:[#allocation2 + $0x11] sm:$0x1] }
 0xaea   : > { %11645 = vmatprep.subr.mxu1 %v12259_v11 }
 0xaeb   : > { %11646 = vmatpush3.msra.mxu1 %v12259_v11  ;;  %v7395_v11 = vld [vmem:[#allocation2 + $0x10] sm:$0x1] }
 0xaec   : > { %11647 = vmatprep.subr.mxu1 %v12260_v60 }
 0xaed   : > { %11648 = vmatpush3.msra.mxu1 %v12260_v60  ;;  %v7420_v60 = vld [vmem:[#allocation2 + $0x21] sm:$0x1] }
 0xaee   : > { %11649 = vmatprep.subr.mxu1 %v12261_v18 }
 0xaef   : > { %11650 = vmatpush3.msra.mxu1 %v12261_v18  ;;  %v7396_v18 = vld [vmem:[#allocation2 + $0x20] sm:$0x1] }
 0xaf0   : > { %11651 = vmatprep.subr.mxu1 %v12262_v6 }
 0xaf1   : > { %11652 = vmatpush3.msra.mxu1 %v12262_v6 }
 0xaf2   : > { %11653 = vmatprep.subr.mxu1 %v12263_v58 }
 0xaf3   : > { %11654 = vmatpush3.msra.mxu1 %v12263_v58  ;;  %v7421_v58 = vld [vmem:[#allocation2 + $0x31] sm:$0x1] }
 0xaf4   : > { %11655 = vmatprep.subr.mxu1 %v12264_v13 }
 0xaf5   : > { %11656 = vmatpush3.msra.mxu1 %v12264_v13  ;;  %v7422_v13 = vld [vmem:[#allocation2 + $0x41] sm:$0x1] }
 0xaf6   : > { %11657 = vmatprep.subr.mxu1 %v12265_v52 }
 0xaf7   : > { %11658 = vmatpush3.msra.mxu1 %v12265_v52  ;;  %v7451_v52 = vrot.slane %v7419_v54, 7 }
 0xaf8   : > { %11659 = vmatprep.subr.mxu1 %v18541_v12 }
 0xaf9   : > { %11660 = vmatpush3.msra.mxu1 %v18541_v12  ;;  %v9973_v12 = vld [vmem:[%s20314_s5 + $0xf0] sm:$0xff] }
 0xafa   : > { %11661 = vmatprep.subr.mxu1 %v18558_v8  ;;  %11671 = vmatpush3.msra.mxu0 %v9973_v12  ;;  %v7418_v12 = vld [vmem:[#allocation2 + $0x1] sm:$0x1] }
 0xafb   : > { %11662 = vmatpush3.msra.mxu1 %v18558_v8  ;;  %v7416_v8 = vld [vmem:[%s20314_s5 + $0x70] sm:$0xff]  ;;  %11672 = vmatprep.subr.mxu0 %v20426_v61 }
 0xafc   : > { %11663 = vmatprep.subr.mxu1 %v18570_v49 }
 0xafd   : > { %11664 = vmatpush3.msra.mxu1 %v18570_v49  ;;  %v9972_v49 = vld [vmem:[%s20314_s5 + $0xe8] sm:$0xff] }
 0xafe   : > { %11666 = vmatmul.mubr.f32.vlgmr.msra.gmra.mxu1 %v7306_v23  ;;  %11703 = vmatprep.subr.mxu1 %v20426_v61 }
 0xaff   : > { %11704 = vmatpush3.msra.mxu1 %v7417_v19  ;;  %11673 = vmatpush3.msra.mxu0 %v9972_v49  ;;  %v7551_v19 = vrot.slane %v7395_v11, 7  ;;  %v7454_v49 = vrot.slane %v7420_v60, 6 }
 0xb00   : > { %11705 = vmatprep.subr.mxu1 %v20426_v61  ;;  %11674 = vmatprep.subr.mxu0 %v20426_v61 }
 0xb01   : > { %11706 = vmatpush3.msra.mxu1 %v7416_v8  ;;  %11675 = vmatpush3.msra.mxu0 %v9971_v29  ;;  %v7423_v8 = vld [vmem:[#allocation2 + $0x51] sm:$0x1]  ;;  %v7553_v29 = vrot.slane %v7396_v18, 6 }
 0xb02   : > { %11707 = vmatprep.subr.mxu1 %v20426_v61  ;;  %11676 = vmatprep.subr.mxu0 %v20426_v61  ;;  %v10005_v18 = vld [vmem:[%s20314_s5 + $0x1f0] sm:$0xff] }
 0xb03   : > { %11708 = vmatpush3.msra.mxu1 %v7415_v2  ;;  %11677 = vmatpush3.msra.mxu0 %v9970_v38  ;;  %v7398_v2 = vld [vmem:[#allocation2 + $0x40] sm:$0x1] }
 0xb04   : > { %11709 = vmatprep.subr.mxu1 %v20426_v61  ;;  %11678 = vmatprep.subr.mxu0 %v20426_v61  ;;  %v7394_v38 = vld [vmem:[#allocation2] sm:$0x1] }
 0xb05   : > { %11710 = vmatpush3.msra.mxu1 %v7414_v47  ;;  %11679 = vmatpush3.msra.mxu0 %v9969_v14  ;;  %v7457_v47 = vrot.slane %v7421_v58, 5  ;;  %v7460_v14 = vrot.slane %v7422_v13, 4 }
 0xb06   : > { %11711 = vmatprep.subr.mxu1 %v20426_v61  ;;  %11680 = vmatprep.subr.mxu0 %v20426_v61 }
 0xb07   : > { %11712 = vmatpush3.msra.mxu1 %v7413_v48  ;;  %11681 = vmatpush3.msra.mxu0 %v9968_v20  ;;  %v7424_v48 = vld [vmem:[#allocation2 + $0x61] sm:$0x1]  ;;  %v7555_v20 = vrot.slane %v7397_v9, 5 }
 0xb08   : > { %11713 = vmatprep.subr.mxu1 %v20426_v61  ;;  %11682 = vmatprep.subr.mxu0 %v20426_v61 }
 0xb09   : > { %11714 = vmatpush3.msra.mxu1 %v7412_v16  ;;  %11683 = vmatpush3.msra.mxu0 %v9967_v57  ;;  %v7400_v16 = vld [vmem:[#allocation2 + $0x60] sm:$0x1]  ;;  %v7463_v57 = vrot.slane %v7423_v8, 3 }
 0xb0a   : > { %11715 = vmatprep.subr.mxu1 %v20426_v61  ;;  %11684 = vmatprep.subr.mxu0 %v20426_v61 }
 0xb0b   : > { %11716 = vmatpush3.msra.mxu1 %v7411_v36  ;;  %11685 = vmatpush3.msra.mxu0 %v9966_v41  ;;  %v7453_v36 = vsel %vm7452_vm2, %v7451_v52, %v7418_v12  ;;  %v7557_v41 = vrot.slane %v7398_v2, 4  ;;  %v10004_v2 = vld [vmem:[%s20314_s5 + $0x1e8] sm:$0xff] }
 0xb0c   : > { %11717 = vmatprep.subr.mxu1 %v20426_v61  ;;  %11686 = vmatprep.subr.mxu0 %v20426_v61 }
 0xb0d   : > { %11718 = vmatpush3.msra.mxu1 %v7410_v40  ;;  %11687 = vmatpush3.msra.mxu0 %v9965_v0  ;;  %v7552_v40 = vsel %vm7452_vm2, %v7551_v19, %v7394_v38 }
 0xb0e   : > { %11719 = vmatprep.subr.mxu1 %v20426_v61  ;;  %11688 = vmatprep.subr.mxu0 %v20426_v61  ;;  %v7554_v0 = vsel %vm7455_vm3, %v7553_v29, %v7552_v40  ;;  %v9999_v40 = vld [vmem:[%s20314_s5 + $0x1c0] sm:$0xff] }
 0xb0f   : > { %11720 = vmatpush3.msra.mxu1 %v7409_v46  ;;  %11689 = vmatpush3.msra.mxu0 %v9964_v24  ;;  %v7456_v46 = vsel %vm7455_vm3, %v7454_v49, %v7453_v36  ;;  %v9988_v49 = vld [vmem:[%s20314_s5 + $0x168] sm:$0xff] }
 0xb10   : > { %11721 = vmatprep.subr.mxu1 %v20426_v61  ;;  %11690 = vmatprep.subr.mxu0 %v20426_v61  ;;  %v7459_v24 = vsel %vm7458_vm4, %v7457_v47, %v7456_v46  ;;  %v10000_v36 = vld [vmem:[%s20314_s5 + $0x1c8] sm:$0xff]  ;;  %v9998_v46 = vld [vmem:[%s20314_s5 + $0x1b8] sm:$0xff] }
 0xb11   : > { %11722 = vmatpush3.msra.mxu1 %v7408_v21  ;;  %11691 = vmatpush3.msra.mxu0 %v9963_v63  ;;  %v7561_v63 = vrot.slane %v7400_v16, 2  ;;  %v10002_v16 = vld [vmem:[%s20314_s5 + $0x1d8] sm:$0xff] }
 0xb12   : > { %11723 = vmatprep.subr.mxu1 %v20426_v61  ;;  %11692 = vmatprep.subr.mxu0 %v20426_v61 }
 0xb13   : > { %11724 = vmatpush3.msra.mxu1 %v7407_v32  ;;  %11693 = vmatpush3.msra.mxu0 %v9962_v45  ;;  %v7466_v32 = vrot.slane %v7424_v48, 2  ;;  %v7462_v45 = vsel %vm7461_vm5, %v7460_v14, %v7459_v24  ;;  %v9986_v14 = vld [vmem:[%s20314_s5 + $0x158] sm:$0xff]  ;;  %v7637_v24 = vld [vmem:[#allocation2 + $0x12] sm:$0x1] }
 0xb14   : > { %11725 = vmatprep.subr.mxu1 %v20426_v61  ;;  %11694 = vmatprep.subr.mxu0 %v20426_v61 }
 0xb15   : > { %11726 = vmatpush3.msra.mxu1 %v7406_v53  ;;  %11695 = vmatpush3.msra.mxu0 %v9961_v59 }
 0xb16   : > { %11727 = vmatprep.subr.mxu1 %v20426_v61  ;;  %11696 = vmatprep.subr.mxu0 %v20426_v61 }
 0xb17   : > { %11728 = vmatpush3.msra.mxu1 %v7405_v25  ;;  %11697 = vmatpush3.msra.mxu0 %v9960_v22  ;;  %v7556_v25 = vsel %vm7458_vm4, %v7555_v20, %v7554_v0  ;;  %v7465_v22 = vsel %vm7464_vm6, %v7463_v57, %v7462_v45  ;;  %v9984_v20 = vld [vmem:[%s20314_s5 + $0x148] sm:$0xff]  ;;  %v9983_v57 = vld [vmem:[%s20314_s5 + $0x140] sm:$0xff]  ;;  %v9981_v0 = vld [vmem:[%s20314_s5 + $0x130] sm:$0xff] }
 0xb18   : > { %11729 = vmatprep.subr.mxu1 %v20426_v61  ;;  %11698 = vmatprep.subr.mxu0 %v20426_v61  ;;  %v7638_v45 = vld [vmem:[#allocation2 + $0x22] sm:$0x1] }
 0xb19   : > { %11730 = vmatpush3.msra.mxu1 %v7404_v51  ;;  %11699 = vmatpush3.msra.mxu0 %v9959_v27  ;;  %v7558_v27 = vsel %vm7461_vm5, %v7557_v41, %v7556_v25  ;;  %v9982_v41 = vld [vmem:[%s20314_s5 + $0x138] sm:$0xff]  ;;  %v7757_v25 = vld [vmem:[#allocation2 + $0x23] sm:$0x1] }
 0xb1a   : > { %11731 = vmatprep.subr.mxu1 %v20426_v61  ;;  %11735 = vmatprep.mubr.msk.f32.mxu1 %vm12329_vm8, %v20426_v61 }
 0xb1b   : > { %11732 = vmatpush3.msra.mxu1 %v7403_v4  ;;  %11738 = vmatprep.subr.mxu0 %v20426_v61 }
 0xb1c   : > { %11733 = vmatprep.subr.mxu1 %v20426_v61 }
 0xb1d   : > { %11734 = vmatpush3.msra.mxu1 %v7402_v1 }
 0xb1e   : > { %11773 = vmatprep.subr.mxu1 %v20426_v61 }
 0xb9a   : > { %v11632_v34 = vpop.f32.mrf.mxu0 }
 0xb9c   : > { %v7280_v50 = vpop.f32.mrf.mxu0 }
 0xb9e   : > { %v11597_v37 = vpop.f32.mrf.mxu1 }
 0xb9f   : > { %v7286_v43 = vadd.f32 %v11632_v34, %v11597_v37 }
 0xba0   : > { %v7205_v28 = vpop.f32.mrf.mxu1 }
 0xba1   : > { %v7281_v55 = vadd.f32 %v7280_v50, %v7205_v28  ;;  %v9990_v28 = vld [vmem:[%s20314_s5 + $0x178] sm:$0xff] }
 0xbbe   : > { %v11667_v23 = vpop.f32.mrf.mxu1 }
 0xbbf   : > { %v7386_v10 = vadd.f32 %v11667_v23, %v7286_v43  ;;  %v10006_v43 = vld [vmem:[%s20314_s5 + $0x1f8] sm:$0xff] }
 0xbc0   : > { %v7376_v5 = vpop.f32.mrf.mxu1 }
 0xbc1   : > { %v7388_v3 = vadd.f32 %v19177_v26, %v7386_v10  ;;  %v7385_v17 = vadd.f32 %v7376_v5, %v7281_v55  ;;  %v7468_v55 = vsel %vm7467_vm7, %v7466_v32, %v7465_v22  ;;  %v7756_v32 = vld [vmem:[#allocation2 + $0x13] sm:$0x1]  ;;  %v7669_v22 = vrot.slane %v7637_v24, 7 }
 0xbc3   : > { %v7390_v30 = vmax.f32 %v7388_v3, 0.0  ;;  %v7387_v42 = vadd.f32 %v19177_v26, %v7385_v17  ;;  %v7399_v26 = vld [vmem:[#allocation2 + $0x50] sm:$0x1] }
 0xbc4   : > { %v7559_v21 = vrot.slane %v7399_v26, 3 }
 0xbc5   : > { %7393 = vst [vmem:[#allocation2 + $0x78] sm:$0x1f] %v7390_v30  ;;  %v7389_v6 = vmax.f32 %v7387_v42, 0.0 }
 0xbc6   : > { %v7560_v37 = vsel %vm7464_vm6, %v7559_v21, %v7558_v27  ;;  %v9997_v21 = vld [vmem:[%s20314_s5 + $0x1b0] sm:$0xff] }
 0xbc7   : > { %7392 = vst [vmem:[#allocation2 + $0x70] sm:$0xff] %v7389_v6  ;;  %v7562_v10 = vsel %vm7467_vm7, %v7561_v63, %v7560_v37  ;;  %v9980_v63 = vld [vmem:[%s20314_s5 + $0x128] sm:$0xff]  ;;  %v7639_v27 = vld [vmem:[#allocation2 + $0x32] sm:$0x1]  ;;  %v7758_v37 = vld [vmem:[#allocation2 + $0x33] sm:$0x1] }
 0xbcc   : > { %v8357_v53 = vld [vmem:[#allocation2 + $0x78] sm:$0x1]  ;;  %v8476_v23 = vld [vmem:[#allocation2 + $0x79] sm:$0x1]  ;;  %v8595_v17 = vld [vmem:[#allocation2 + $0x7a] sm:$0x1] }
 0xbcd   : > { %v8395_v59 = vrot.slane %v8357_v53, 1  ;;  %v8514_v9 = vrot.slane %v8476_v23, 1  ;;  %v8633_v19 = vrot.slane %v8595_v17, 1  ;;  %v8714_v12 = vld [vmem:[#allocation2 + $0x7b] sm:$0x1]  ;;  %v9996_v53 = vld [vmem:[%s20314_s5 + $0x1a8] sm:$0xff] }
 0xbce   : > { %v7425_v51 = vld [vmem:[#allocation2 + $0x71] sm:$0x1]  ;;  %v7401_v4 = vld [vmem:[#allocation2 + $0x70] sm:$0x1]  ;;  %v7881_v5 = vld [vmem:[#allocation2 + $0x74] sm:$0x1] }
 0xbcf   : > { %v7469_v1 = vrot.slane %v7425_v51, 1  ;;  %v7563_v34 = vrot.slane %v7401_v4, 1  ;;  %v19418_v50 = vsel %vm7470_vm9, %v8395_v59, %v19183_v56  ;;  %v8000_v3 = vld [vmem:[#allocation2 + $0x75] sm:$0x1]  ;;  %v7919_v54 = vrot.slane %v7881_v5, 1  ;;  %v9979_v59 = vld [vmem:[%s20314_s5 + $0x120] sm:$0xff] }
 0xbd0   : > { %v8119_v11 = vld [vmem:[#allocation2 + $0x76] sm:$0x1]  ;;  %v8238_v60 = vld [vmem:[#allocation2 + $0x77] sm:$0x1]  ;;  %v8038_v6 = vrot.slane %v8000_v3, 1  ;;  %v8752_v38 = vrot.slane %v8714_v12, 1  ;;  %v19456_v26 = vsel %vm7470_vm9, %v8514_v9, %v19187_v7  ;;  %v19460_v48 = vsel %vm7470_vm9, %v8633_v19, %v19191_v44 }
 0xbd1   : > { %v7471_v30 = vsel %vm7470_vm9, %v7469_v1, %v7468_v55  ;;  %v7564_v42 = vsel %vm7470_vm9, %v7563_v34, %v7562_v10  ;;  %v9989_v56 = vld [vmem:[%s20314_s5 + $0x170] sm:$0xff]  ;;  %v8157_v58 = vrot.slane %v8119_v11, 1  ;;  %v8276_v13 = vrot.slane %v8238_v60, 1  ;;  %v8833_v8 = vld [vmem:[#allocation2 + $0x7c] sm:$0x1]  ;;  %v9995_v51 = vld [vmem:[%s20314_s5 + $0x1a0] sm:$0xff] }
 0xbd2   : > { %11701 = vmatmul.mubr.f32.vlgmr.msra.gmra.mxu0 %v7471_v30  ;;  %11736 = vmatmul.mubr.f32.vlgmr.msra.gmra.mxu1 %v7564_v42  ;;  %v19432_v52 = vsel %vm7470_vm9, %v7919_v54, %v19195_v62  ;;  %v19444_v62 = vsel %vm7470_vm9, %v8038_v6, %v19203_v35  ;;  %v8871_v35 = vrot.slane %v8833_v8, 1  ;;  %v19472_v7 = vsel %vm7470_vm9, %v8752_v38, %v19199_v15  ;;  %v9985_v15 = vld [vmem:[%s20314_s5 + $0x150] sm:$0xff]  ;;  %v7640_v1 = vld [vmem:[#allocation2 + $0x42] sm:$0x1]  ;;  %v9978_v34 = vld [vmem:[%s20314_s5 + $0x118] sm:$0xff] }
 0xbd3   : > { %11739 = vmatpush3.msra.mxu0 %v9990_v28  ;;  %11774 = vmatpush3.msra.mxu1 %v10006_v43  ;;  %v19448_v29 = vsel %vm7470_vm9, %v8157_v58, %v19207_v31  ;;  %v19452_v47 = vsel %vm7470_vm9, %v8276_v13, %v19211_v39  ;;  %v9987_v31 = vld [vmem:[%s20314_s5 + $0x160] sm:$0xff]  ;;  %v7788_v4 = vrot.slane %v7756_v32, 7  ;;  %v9994_v28 = vld [vmem:[%s20314_s5 + $0x198] sm:$0xff]  ;;  %v7671_v43 = vrot.slane %v7638_v45, 6  ;;  %v7641_v5 = vld [vmem:[#allocation2 + $0x52] sm:$0x1] }
 0xbd4   : > { %11740 = vmatprep.subr.mxu0 %v20426_v61  ;;  %11775 = vmatprep.subr.mxu1 %v20426_v61  ;;  %v10003_v39 = vld [vmem:[%s20314_s5 + $0x1e0] sm:$0xff]  ;;  %v19476_v44 = vsel %vm7470_vm9, %v8871_v35, %v19215_v33  ;;  %v10001_v33 = vld [vmem:[%s20314_s5 + $0x1d0] sm:$0xff]  ;;  %v7790_v55 = vrot.slane %v7757_v25, 6  ;;  %v7673_v11 = vrot.slane %v7639_v27, 5  ;;  %v7675_v6 = vrot.slane %v7640_v1, 4  ;;  %v9976_v9 = vld [vmem:[%s20314_s5 + $0x108] sm:$0xff] }
 0xbd5   : > { %11741 = vmatpush3.msra.mxu0 %v9989_v56  ;;  %11776 = vmatpush3.msra.mxu1 %v10005_v18  ;;  %v7759_v23 = vld [vmem:[#allocation2 + $0x43] sm:$0x1]  ;;  %v7636_v10 = vld [vmem:[#allocation2 + $0x2] sm:$0x1]  ;;  %v7760_v30 = vld [vmem:[#allocation2 + $0x53] sm:$0x1] }
 0xbd6   : > { %11742 = vmatprep.subr.mxu0 %v20426_v61  ;;  %11777 = vmatprep.subr.mxu1 %v20426_v61  ;;  %v7642_v3 = vld [vmem:[#allocation2 + $0x62] sm:$0x1]  ;;  %v7755_v17 = vld [vmem:[#allocation2 + $0x3] sm:$0x1]  ;;  %v9977_v42 = vld [vmem:[%s20314_s5 + $0x110] sm:$0xff]  ;;  %v7792_v56 = vrot.slane %v7758_v37, 5  ;;  %v7670_v12 = vsel %vm7452_vm2, %v7669_v22, %v7636_v10 }
 0xbd7   : > { %11743 = vmatpush3.msra.mxu0 %v9988_v49  ;;  %11778 = vmatpush3.msra.mxu1 %v10004_v2  ;;  %v9993_v54 = vld [vmem:[%s20314_s5 + $0x190] sm:$0xff]  ;;  %v7761_v60 = vld [vmem:[#allocation2 + $0x63] sm:$0x1]  ;;  %v7794_v13 = vrot.slane %v7759_v23, 4  ;;  %v9992_v19 = vld [vmem:[%s20314_s5 + $0x188] sm:$0xff]  ;;  %v7677_v8 = vrot.slane %v7641_v5, 3  ;;  %v7789_v49 = vsel %vm7452_vm2, %v7788_v4, %v7755_v17  ;;  %v7672_v38 = vsel %vm7455_vm3, %v7671_v43, %v7670_v12 }
 0xbd8   : > { %11744 = vmatprep.subr.mxu0 %v20426_v61  ;;  %11779 = vmatprep.subr.mxu1 %v20426_v61  ;;  %v7643_v18 = vld [vmem:[#allocation2 + $0x72] sm:$0x1]  ;;  %v7762_v58 = vld [vmem:[#allocation2 + $0x73] sm:$0x1]  ;;  %v7796_v2 = vrot.slane %v7760_v30, 3  ;;  %v7679_v35 = vrot.slane %v7642_v3, 2 }
 0xbd9   : > { %11745 = vmatpush3.msra.mxu0 %v9987_v31  ;;  %11780 = vmatpush3.msra.mxu1 %v10003_v39  ;;  %v7791_v31 = vsel %vm7455_vm3, %v7790_v55, %v7789_v49  ;;  %v7798_v39 = vrot.slane %v7761_v60, 2  ;;  %v10021_v45 = vld [vmem:[%s20314_s5 + $0x270] sm:$0xff]  ;;  %v10019_v22 = vld [vmem:[%s20314_s5 + $0x260] sm:$0xff]  ;;  %v10018_v27 = vld [vmem:[%s20314_s5 + $0x258] sm:$0xff] }
 0xbda   : > { %11746 = vmatprep.subr.mxu0 %v20426_v61  ;;  %11781 = vmatprep.subr.mxu1 %v20426_v61  ;;  %v10037_v25 = vld [vmem:[%s20314_s5 + $0x2f0] sm:$0xff]  ;;  %v10035_v4 = vld [vmem:[%s20314_s5 + $0x2e0] sm:$0xff]  ;;  %v10034_v1 = vld [vmem:[%s20314_s5 + $0x2d8] sm:$0xff] }
 0xbdb   : > { %11747 = vmatpush3.msra.mxu0 %v9986_v14  ;;  %11782 = vmatpush3.msra.mxu1 %v10002_v16  ;;  %v9975_v14 = vld [vmem:[%s20314_s5 + $0x100] sm:$0xff]  ;;  %v7674_v16 = vsel %vm7458_vm4, %v7673_v11, %v7672_v38  ;;  %v10017_v37 = vld [vmem:[%s20314_s5 + $0x250] sm:$0xff]  ;;  %v10032_v43 = vld [vmem:[%s20314_s5 + $0x2c8] sm:$0xff] }
 0xbdc   : > { %11748 = vmatprep.subr.mxu0 %v20426_v61  ;;  %11783 = vmatprep.subr.mxu1 %v20426_v61  ;;  %v10015_v23 = vld [vmem:[%s20314_s5 + $0x240] sm:$0xff]  ;;  %v10014_v10 = vld [vmem:[%s20314_s5 + $0x238] sm:$0xff]  ;;  %v10013_v3 = vld [vmem:[%s20314_s5 + $0x230] sm:$0xff] }
 0xbdd   : > { %11749 = vmatpush3.msra.mxu0 %v9985_v15  ;;  %11784 = vmatpush3.msra.mxu1 %v10001_v33  ;;  %v7681_v15 = vrot.slane %v7643_v18, 1  ;;  %v7793_v33 = vsel %vm7458_vm4, %v7792_v56, %v7791_v31  ;;  %v10031_v55 = vld [vmem:[%s20314_s5 + $0x2c0] sm:$0xff]  ;;  %v10030_v5 = vld [vmem:[%s20314_s5 + $0x2b8] sm:$0xff]  ;;  %v10029_v17 = vld [vmem:[%s20314_s5 + $0x2b0] sm:$0xff] }
 0xbde   : > { %11750 = vmatprep.subr.mxu0 %v20426_v61  ;;  %11785 = vmatprep.subr.mxu1 %v20426_v61  ;;  %v10012_v30 = vld [vmem:[%s20314_s5 + $0x228] sm:$0xff]  ;;  %v10027_v11 = vld [vmem:[%s20314_s5 + $0x2a0] sm:$0xff]  ;;  %v10010_v60 = vld [vmem:[%s20314_s5 + $0x218] sm:$0xff] }
 0xbdf   : > { %11751 = vmatpush3.msra.mxu0 %v9984_v20  ;;  %11786 = vmatpush3.msra.mxu1 %v10000_v36  ;;  %v7800_v20 = vrot.slane %v7762_v58, 1  ;;  %v9991_v36 = vld [vmem:[%s20314_s5 + $0x180] sm:$0xff]  ;;  %v10026_v56 = vld [vmem:[%s20314_s5 + $0x298] sm:$0xff]  ;;  %v10009_v18 = vld [vmem:[%s20314_s5 + $0x210] sm:$0xff] }
 0xbe0   : > { %11752 = vmatprep.subr.mxu0 %v20426_v61  ;;  %11787 = vmatprep.subr.mxu1 %v20426_v61  ;;  %v10008_v58 = vld [vmem:[%s20314_s5 + $0x208] sm:$0xff]  ;;  %v10054_v12 = vld [vmem:[%s20314_s5 + $0x378] sm:$0xff]  ;;  %v10053_v49 = vld [vmem:[%s20314_s5 + $0x370] sm:$0xff] }
 0xbe1   : > { %11753 = vmatpush3.msra.mxu0 %v9983_v57  ;;  %11788 = vmatpush3.msra.mxu1 %v9999_v40  ;;  %v7676_v57 = vsel %vm7461_vm5, %v7675_v6, %v7674_v16  ;;  %v7795_v40 = vsel %vm7461_vm5, %v7794_v13, %v7793_v33  ;;  %v10025_v6 = vld [vmem:[%s20314_s5 + $0x290] sm:$0xff]  ;;  %v10024_v13 = vld [vmem:[%s20314_s5 + $0x288] sm:$0xff]  ;;  %v10051_v38 = vld [vmem:[%s20314_s5 + $0x360] sm:$0xff] }
 0xbe2   : > { %11754 = vmatprep.subr.mxu0 %v20426_v61  ;;  %11789 = vmatprep.subr.mxu1 %v20426_v61  ;;  %v10050_v31 = vld [vmem:[%s20314_s5 + $0x358] sm:$0xff]  ;;  %v10065_v16 = vld [vmem:[%s20314_s5 + $0x3d0] sm:$0xff]  ;;  %v10064_v33 = vld [vmem:[%s20314_s5 + $0x3c8] sm:$0xff] }
 0xbe3   : > { %11755 = vmatpush3.msra.mxu0 %v9982_v41  ;;  %11790 = vmatpush3.msra.mxu1 %v9998_v46  ;;  %v7678_v41 = vsel %vm7464_vm6, %v7677_v8, %v7676_v57  ;;  %v7797_v46 = vsel %vm7464_vm6, %v7796_v2, %v7795_v40  ;;  %v10070_v8 = vld [vmem:[%s20314_s5 + $0x3f8] sm:$0xff]  ;;  %v10069_v2 = vld [vmem:[%s20314_s5 + $0x3f0] sm:$0xff] }
 0xbe4   : > { %11756 = vmatprep.subr.mxu0 %v20426_v61  ;;  %11791 = vmatprep.subr.mxu1 %v20426_v61  ;;  %v10046_v57 = vld [vmem:[%s20314_s5 + $0x338] sm:$0xff] }
 0xbe5   : > { %11757 = vmatpush3.msra.mxu0 %v9981_v0  ;;  %11792 = vmatpush3.msra.mxu1 %v9997_v21  ;;  %v7680_v0 = vsel %vm7467_vm7, %v7679_v35, %v7678_v41  ;;  %v7799_v21 = vsel %vm7467_vm7, %v7798_v39, %v7797_v46  ;;  %v10067_v35 = vld [vmem:[%s20314_s5 + $0x3e0] sm:$0xff]  ;;  %v10066_v39 = vld [vmem:[%s20314_s5 + $0x3d8] sm:$0xff]  ;;  %v10045_v41 = vld [vmem:[%s20314_s5 + $0x330] sm:$0xff] }
 0xbe6   : > { %11758 = vmatprep.subr.mxu0 %v20426_v61  ;;  %11793 = vmatprep.subr.mxu1 %v20426_v61  ;;  %v7682_v24 = vsel %vm7470_vm9, %v7681_v15, %v7680_v0  ;;  %v7801_v32 = vsel %vm7470_vm9, %v7800_v20, %v7799_v21  ;;  %v10048_v15 = vld [vmem:[%s20314_s5 + $0x348] sm:$0xff]  ;;  %v10047_v20 = vld [vmem:[%s20314_s5 + $0x340] sm:$0xff]  ;;  %v10062_v40 = vld [vmem:[%s20314_s5 + $0x3b8] sm:$0xff] }
 0xbe7   : > { %11759 = vmatpush3.msra.mxu0 %v9980_v63  ;;  %11794 = vmatpush3.msra.mxu1 %v9996_v53  ;;  %v10022_v63 = vld [vmem:[%s20314_s5 + $0x278] sm:$0xff]  ;;  %v10061_v46 = vld [vmem:[%s20314_s5 + $0x3b0] sm:$0xff]  ;;  %v10044_v0 = vld [vmem:[%s20314_s5 + $0x328] sm:$0xff] }
 0xbe8   : > { %11760 = vmatprep.subr.mxu0 %v20426_v61  ;;  %11795 = vmatprep.subr.mxu1 %v20426_v61  ;;  %v10038_v53 = vld [vmem:[%s20314_s5 + $0x2f8] sm:$0xff]  ;;  %v10060_v21 = vld [vmem:[%s20314_s5 + $0x3a8] sm:$0xff] }
 0xbe9   : > { %11761 = vmatpush3.msra.mxu0 %v9979_v59  ;;  %11796 = vmatpush3.msra.mxu1 %v9995_v51  ;;  %v10020_v59 = vld [vmem:[%s20314_s5 + $0x268] sm:$0xff] }
 0xbea   : > { %11762 = vmatprep.subr.mxu0 %v20426_v61  ;;  %11797 = vmatprep.subr.mxu1 %v20426_v61  ;;  %v10036_v51 = vld [vmem:[%s20314_s5 + $0x2e8] sm:$0xff] }
 0xbeb   : > { %11763 = vmatpush3.msra.mxu0 %v9978_v34  ;;  %11798 = vmatpush3.msra.mxu1 %v9994_v28  ;;  %v10033_v34 = vld [vmem:[%s20314_s5 + $0x2d0] sm:$0xff]  ;;  %v10016_v28 = vld [vmem:[%s20314_s5 + $0x248] sm:$0xff] }
 0xbec   : > { %11764 = vmatprep.subr.mxu0 %v20426_v61  ;;  %11799 = vmatprep.subr.mxu1 %v20426_v61 }
 0xbed   : > { %11765 = vmatpush3.msra.mxu0 %v9977_v42  ;;  %11800 = vmatpush3.msra.mxu1 %v9993_v54  ;;  %v10028_v42 = vld [vmem:[%s20314_s5 + $0x2a8] sm:$0xff]  ;;  %v10011_v54 = vld [vmem:[%s20314_s5 + $0x220] sm:$0xff] }
 0xbee   : > { %11766 = vmatprep.subr.mxu0 %v20426_v61  ;;  %11801 = vmatprep.subr.mxu1 %v20426_v61 }
 0xbef   : > { %11767 = vmatpush3.msra.mxu0 %v9976_v9  ;;  %11802 = vmatpush3.msra.mxu1 %v9992_v19  ;;  %v10007_v9 = vld [vmem:[%s20314_s5 + $0x200] sm:$0xff] }
 0xbf0   : > { %11768 = vmatprep.subr.mxu0 %v20426_v61  ;;  %11803 = vmatprep.subr.mxu1 %v20426_v61  ;;  %v10023_v19 = vld [vmem:[%s20314_s5 + $0x280] sm:$0xff] }
 0xbf1   : > { %11769 = vmatpush3.msra.mxu0 %v9975_v14  ;;  %11770 = vmatprep.mubr.msk.f32.mxu0 %vm12329_vm8, %v20426_v61  ;;  %v10049_v14 = vld [vmem:[%s20314_s5 + $0x350] sm:$0xff] }
 0xbf2   : > { %11804 = vmatpush3.msra.mxu1 %v9991_v36  ;;  %11805 = vmatprep.mubr.msk.f32.mxu1 %vm12329_vm8, %v20426_v61  ;;  %v10063_v36 = vld [vmem:[%s20314_s5 + $0x3c0] sm:$0xff] }
 0xbf3   : > { %11771 = vmatmul.mubr.f32.vlgmr.msra.gmra.mxu0 %v7682_v24  ;;  %11806 = vmatmul.mubr.f32.vlgmr.msra.gmra.mxu1 %v7801_v32  ;;  %v10043_v24 = vld [vmem:[%s20314_s5 + $0x320] sm:$0xff] }
 0xbf4   : > { %11808 = vmatprep.subr.mxu0 %v20426_v61  ;;  %11843 = vmatprep.subr.mxu1 %v20426_v61  ;;  %v10059_v32 = vld [vmem:[%s20314_s5 + $0x3a0] sm:$0xff] }
 0xbf5   : > { %11809 = vmatpush3.msra.mxu0 %v10022_v63  ;;  %11844 = vmatpush3.msra.mxu1 %v10038_v53  ;;  %v10042_v63 = vld [vmem:[%s20314_s5 + $0x318] sm:$0xff] }
 0xbf6   : > { %11810 = vmatprep.subr.mxu0 %v20426_v61  ;;  %11845 = vmatprep.subr.mxu1 %v20426_v61  ;;  %v10058_v53 = vld [vmem:[%s20314_s5 + $0x398] sm:$0xff] }
 0xbf7   : > { %11811 = vmatpush3.msra.mxu0 %v10021_v45  ;;  %11846 = vmatpush3.msra.mxu1 %v10037_v25  ;;  %v10041_v45 = vld [vmem:[%s20314_s5 + $0x310] sm:$0xff] }
 0xbf8   : > { %11812 = vmatprep.subr.mxu0 %v20426_v61  ;;  %11847 = vmatprep.subr.mxu1 %v20426_v61  ;;  %v10057_v25 = vld [vmem:[%s20314_s5 + $0x390] sm:$0xff] }
 0xbf9   : > { %11813 = vmatpush3.msra.mxu0 %v10020_v59  ;;  %11848 = vmatpush3.msra.mxu1 %v10036_v51  ;;  %v10040_v59 = vld [vmem:[%s20314_s5 + $0x308] sm:$0xff] }
 0xbfa   : > { %11814 = vmatprep.subr.mxu0 %v20426_v61  ;;  %11849 = vmatprep.subr.mxu1 %v20426_v61  ;;  %v10056_v51 = vld [vmem:[%s20314_s5 + $0x388] sm:$0xff] }
 0xbfb   : > { %11815 = vmatpush3.msra.mxu0 %v10019_v22  ;;  %11850 = vmatpush3.msra.mxu1 %v10035_v4  ;;  %v10039_v22 = vld [vmem:[%s20314_s5 + $0x300] sm:$0xff] }
 0xbfc   : > { %11816 = vmatprep.subr.mxu0 %v20426_v61  ;;  %11851 = vmatprep.subr.mxu1 %v20426_v61  ;;  %v10055_v4 = vld [vmem:[%s20314_s5 + $0x380] sm:$0xff] }
 0xbfd   : > { %11817 = vmatpush3.msra.mxu0 %v10018_v27  ;;  %11852 = vmatpush3.msra.mxu1 %v10034_v1  ;;  %v10086_v27 = vld [vmem:[%s20314_s5 + $0x478] sm:$0xff] }
 0xbfe   : > { %11818 = vmatprep.subr.mxu0 %v20426_v61  ;;  %11853 = vmatprep.subr.mxu1 %v20426_v61  ;;  %v10102_v1 = vld [vmem:[%s20314_s5 + $0x4f8] sm:$0xff] }
 0xbff   : > { %11819 = vmatpush3.msra.mxu0 %v10017_v37  ;;  %11854 = vmatpush3.msra.mxu1 %v10033_v34  ;;  %v10085_v37 = vld [vmem:[%s20314_s5 + $0x470] sm:$0xff] }
 0xc00   : > { %11820 = vmatprep.subr.mxu0 %v20426_v61  ;;  %11855 = vmatprep.subr.mxu1 %v20426_v61  ;;  %v10101_v34 = vld [vmem:[%s20314_s5 + $0x4f0] sm:$0xff] }
 0xc01   : > { %11821 = vmatpush3.msra.mxu0 %v10016_v28  ;;  %11856 = vmatpush3.msra.mxu1 %v10032_v43  ;;  %v10083_v28 = vld [vmem:[%s20314_s5 + $0x460] sm:$0xff] }
 0xc02   : > { %11822 = vmatprep.subr.mxu0 %v20426_v61  ;;  %11857 = vmatprep.subr.mxu1 %v20426_v61  ;;  %v10099_v43 = vld [vmem:[%s20314_s5 + $0x4e0] sm:$0xff] }
 0xc03   : > { %11823 = vmatpush3.msra.mxu0 %v10015_v23  ;;  %11858 = vmatpush3.msra.mxu1 %v10031_v55  ;;  %v10082_v23 = vld [vmem:[%s20314_s5 + $0x458] sm:$0xff] }
 0xc04   : > { %11824 = vmatprep.subr.mxu0 %v20426_v61  ;;  %11859 = vmatprep.subr.mxu1 %v20426_v61  ;;  %v10098_v55 = vld [vmem:[%s20314_s5 + $0x4d8] sm:$0xff] }
 0xc05   : > { %11825 = vmatpush3.msra.mxu0 %v10014_v10  ;;  %11860 = vmatpush3.msra.mxu1 %v10030_v5  ;;  %v10081_v10 = vld [vmem:[%s20314_s5 + $0x450] sm:$0xff] }
 0xc06   : > { %11826 = vmatprep.subr.mxu0 %v20426_v61  ;;  %11861 = vmatprep.subr.mxu1 %v20426_v61  ;;  %v10097_v5 = vld [vmem:[%s20314_s5 + $0x4d0] sm:$0xff] }
 0xc07   : > { %11827 = vmatpush3.msra.mxu0 %v10013_v3  ;;  %11862 = vmatpush3.msra.mxu1 %v10029_v17  ;;  %v10080_v3 = vld [vmem:[%s20314_s5 + $0x448] sm:$0xff] }
 0xc08   : > { %11828 = vmatprep.subr.mxu0 %v20426_v61  ;;  %11863 = vmatprep.subr.mxu1 %v20426_v61  ;;  %v10096_v17 = vld [vmem:[%s20314_s5 + $0x4c8] sm:$0xff] }
 0xc09   : > { %11829 = vmatpush3.msra.mxu0 %v10012_v30  ;;  %11864 = vmatpush3.msra.mxu1 %v10028_v42  ;;  %v10079_v30 = vld [vmem:[%s20314_s5 + $0x440] sm:$0xff] }
 0xc0a   : > { %11830 = vmatprep.subr.mxu0 %v20426_v61  ;;  %11865 = vmatprep.subr.mxu1 %v20426_v61  ;;  %v10095_v42 = vld [vmem:[%s20314_s5 + $0x4c0] sm:$0xff] }
 0xc0b   : > { %11831 = vmatpush3.msra.mxu0 %v10011_v54  ;;  %11866 = vmatpush3.msra.mxu1 %v10027_v11  ;;  %v10078_v54 = vld [vmem:[%s20314_s5 + $0x438] sm:$0xff] }
 0xc0c   : > { %11832 = vmatprep.subr.mxu0 %v20426_v61  ;;  %11867 = vmatprep.subr.mxu1 %v20426_v61  ;;  %v10094_v11 = vld [vmem:[%s20314_s5 + $0x4b8] sm:$0xff] }
 0xc0d   : > { %11833 = vmatpush3.msra.mxu0 %v10010_v60  ;;  %11868 = vmatpush3.msra.mxu1 %v10026_v56  ;;  %v10077_v60 = vld [vmem:[%s20314_s5 + $0x430] sm:$0xff] }
 0xc0e   : > { %11834 = vmatprep.subr.mxu0 %v20426_v61  ;;  %11869 = vmatprep.subr.mxu1 %v20426_v61  ;;  %v10093_v56 = vld [vmem:[%s20314_s5 + $0x4b0] sm:$0xff] }
 0xc0f   : > { %11835 = vmatpush3.msra.mxu0 %v10009_v18  ;;  %11870 = vmatpush3.msra.mxu1 %v10025_v6  ;;  %v10076_v18 = vld [vmem:[%s20314_s5 + $0x428] sm:$0xff] }
 0xc10   : > { %11836 = vmatprep.subr.mxu0 %v20426_v61  ;;  %11871 = vmatprep.subr.mxu1 %v20426_v61  ;;  %v10092_v6 = vld [vmem:[%s20314_s5 + $0x4a8] sm:$0xff] }
 0xc11   : > { %11837 = vmatpush3.msra.mxu0 %v10008_v58  ;;  %11872 = vmatpush3.msra.mxu1 %v10024_v13  ;;  %v10075_v58 = vld [vmem:[%s20314_s5 + $0x420] sm:$0xff] }
 0xc12   : > { %11838 = vmatprep.subr.mxu0 %v20426_v61  ;;  %11873 = vmatprep.subr.mxu1 %v20426_v61  ;;  %v10091_v13 = vld [vmem:[%s20314_s5 + $0x4a0] sm:$0xff] }
 0xc13   : > { %11839 = vmatpush3.msra.mxu0 %v10007_v9  ;;  %11840 = vmatprep.mubr.msk.f32.mxu0 %vm12329_vm8, %v20426_v61  ;;  %v10074_v9 = vld [vmem:[%s20314_s5 + $0x418] sm:$0xff] }
 0xc14   : > { %11874 = vmatpush3.msra.mxu1 %v10023_v19  ;;  %11875 = vmatprep.mubr.msk.f32.mxu1 %vm12329_vm8, %v20426_v61  ;;  %v10090_v19 = vld [vmem:[%s20314_s5 + $0x498] sm:$0xff] }
 0xc15   : > { %11841 = vmatmul.mubr.f32.vlgmr.msra.gmra.mxu0 %v19432_v52  ;;  %11876 = vmatmul.mubr.f32.vlgmr.msra.gmra.mxu1 %v19444_v62  ;;  %v10052_v52 = vld [vmem:[%s20314_s5 + $0x368] sm:$0xff] }
 0xc16   : > { %11878 = vmatprep.subr.mxu0 %v20426_v61  ;;  %11913 = vmatprep.subr.mxu1 %v20426_v61  ;;  %v10068_v62 = vld [vmem:[%s20314_s5 + $0x3e8] sm:$0xff] }
 0xc17   : > { %11879 = vmatpush3.msra.mxu0 %v10054_v12  ;;  %11914 = vmatpush3.msra.mxu1 %v10070_v8  ;;  %v10073_v12 = vld [vmem:[%s20314_s5 + $0x410] sm:$0xff] }
 0xc18   : > { %11880 = vmatprep.subr.mxu0 %v20426_v61  ;;  %11915 = vmatprep.subr.mxu1 %v20426_v61  ;;  %v10089_v8 = vld [vmem:[%s20314_s5 + $0x490] sm:$0xff] }
 0xc19   : > { %11881 = vmatpush3.msra.mxu0 %v10053_v49  ;;  %11916 = vmatpush3.msra.mxu1 %v10069_v2  ;;  %v10072_v49 = vld [vmem:[%s20314_s5 + $0x408] sm:$0xff] }
 0xc1a   : > { %11882 = vmatprep.subr.mxu0 %v20426_v61  ;;  %11917 = vmatprep.subr.mxu1 %v20426_v61  ;;  %v10088_v2 = vld [vmem:[%s20314_s5 + $0x488] sm:$0xff] }
 0xc1b   : > { %11883 = vmatpush3.msra.mxu0 %v10052_v52  ;;  %11918 = vmatpush3.msra.mxu1 %v10068_v62  ;;  %v10071_v52 = vld [vmem:[%s20314_s5 + $0x400] sm:$0xff] }
 0xc1c   : > { %11884 = vmatprep.subr.mxu0 %v20426_v61  ;;  %11919 = vmatprep.subr.mxu1 %v20426_v61  ;;  %v10087_v62 = vld [vmem:[%s20314_s5 + $0x480] sm:$0xff] }
 0xc1d   : > { %11885 = vmatpush3.msra.mxu0 %v10051_v38  ;;  %11920 = vmatpush3.msra.mxu1 %v10067_v35  ;;  %v10118_v38 = vld [vmem:[%s20314_s5 + $0x578] sm:$0xff] }
 0xc1e   : > { %11886 = vmatprep.subr.mxu0 %v20426_v61  ;;  %11921 = vmatprep.subr.mxu1 %v20426_v61  ;;  %v10134_v35 = vld [vmem:[%s20314_s5 + $0x5f8] sm:$0xff] }
 0xc1f   : > { %11887 = vmatpush3.msra.mxu0 %v10050_v31  ;;  %11922 = vmatpush3.msra.mxu1 %v10066_v39  ;;  %v10117_v31 = vld [vmem:[%s20314_s5 + $0x570] sm:$0xff] }
 0xc20   : > { %11888 = vmatprep.subr.mxu0 %v20426_v61  ;;  %11923 = vmatprep.subr.mxu1 %v20426_v61  ;;  %v10133_v39 = vld [vmem:[%s20314_s5 + $0x5f0] sm:$0xff] }
 0xc21   : > { %11889 = vmatpush3.msra.mxu0 %v10049_v14  ;;  %11924 = vmatpush3.msra.mxu1 %v10065_v16  ;;  %v10115_v14 = vld [vmem:[%s20314_s5 + $0x560] sm:$0xff] }
 0xc22   : > { %11890 = vmatprep.subr.mxu0 %v20426_v61  ;;  %11925 = vmatprep.subr.mxu1 %v20426_v61  ;;  %v10131_v16 = vld [vmem:[%s20314_s5 + $0x5e0] sm:$0xff] }
 0xc23   : > { %11891 = vmatpush3.msra.mxu0 %v10048_v15  ;;  %11926 = vmatpush3.msra.mxu1 %v10064_v33  ;;  %v10114_v15 = vld [vmem:[%s20314_s5 + $0x558] sm:$0xff] }
 0xc24   : > { %11892 = vmatprep.subr.mxu0 %v20426_v61  ;;  %11927 = vmatprep.subr.mxu1 %v20426_v61  ;;  %v10130_v33 = vld [vmem:[%s20314_s5 + $0x5d8] sm:$0xff] }
 0xc25   : > { %11893 = vmatpush3.msra.mxu0 %v10047_v20  ;;  %11928 = vmatpush3.msra.mxu1 %v10063_v36  ;;  %v10113_v20 = vld [vmem:[%s20314_s5 + $0x550] sm:$0xff] }
 0xc26   : > { %11894 = vmatprep.subr.mxu0 %v20426_v61  ;;  %11929 = vmatprep.subr.mxu1 %v20426_v61  ;;  %v10129_v36 = vld [vmem:[%s20314_s5 + $0x5d0] sm:$0xff] }
 0xc27   : > { %11895 = vmatpush3.msra.mxu0 %v10046_v57  ;;  %11930 = vmatpush3.msra.mxu1 %v10062_v40  ;;  %v10112_v57 = vld [vmem:[%s20314_s5 + $0x548] sm:$0xff] }
 0xc28   : > { %11896 = vmatprep.subr.mxu0 %v20426_v61  ;;  %11931 = vmatprep.subr.mxu1 %v20426_v61  ;;  %v10128_v40 = vld [vmem:[%s20314_s5 + $0x5c8] sm:$0xff] }
 0xc29   : > { %11897 = vmatpush3.msra.mxu0 %v10045_v41  ;;  %11932 = vmatpush3.msra.mxu1 %v10061_v46  ;;  %v10111_v41 = vld [vmem:[%s20314_s5 + $0x540] sm:$0xff] }
 0xc2a   : > { %11898 = vmatprep.subr.mxu0 %v20426_v61  ;;  %11933 = vmatprep.subr.mxu1 %v20426_v61  ;;  %v10127_v46 = vld [vmem:[%s20314_s5 + $0x5c0] sm:$0xff] }
 0xc2b   : > { %11899 = vmatpush3.msra.mxu0 %v10044_v0  ;;  %11934 = vmatpush3.msra.mxu1 %v10060_v21  ;;  %v10110_v0 = vld [vmem:[%s20314_s5 + $0x538] sm:$0xff] }
 0xc2c   : > { %11900 = vmatprep.subr.mxu0 %v20426_v61  ;;  %11935 = vmatprep.subr.mxu1 %v20426_v61  ;;  %v10126_v21 = vld [vmem:[%s20314_s5 + $0x5b8] sm:$0xff] }
 0xc2d   : > { %11901 = vmatpush3.msra.mxu0 %v10043_v24  ;;  %11936 = vmatpush3.msra.mxu1 %v10059_v32  ;;  %v10109_v24 = vld [vmem:[%s20314_s5 + $0x530] sm:$0xff] }
 0xc2e   : > { %11902 = vmatprep.subr.mxu0 %v20426_v61  ;;  %11937 = vmatprep.subr.mxu1 %v20426_v61  ;;  %v10125_v32 = vld [vmem:[%s20314_s5 + $0x5b0] sm:$0xff] }
 0xc2f   : > { %11903 = vmatpush3.msra.mxu0 %v10042_v63  ;;  %11938 = vmatpush3.msra.mxu1 %v10058_v53  ;;  %v10108_v63 = vld [vmem:[%s20314_s5 + $0x528] sm:$0xff] }
 0xc30   : > { %11904 = vmatprep.subr.mxu0 %v20426_v61  ;;  %11939 = vmatprep.subr.mxu1 %v20426_v61  ;;  %v10124_v53 = vld [vmem:[%s20314_s5 + $0x5a8] sm:$0xff] }
 0xc31   : > { %11905 = vmatpush3.msra.mxu0 %v10041_v45  ;;  %11940 = vmatpush3.msra.mxu1 %v10057_v25  ;;  %v10107_v45 = vld [vmem:[%s20314_s5 + $0x520] sm:$0xff] }
 0xc32   : > { %11906 = vmatprep.subr.mxu0 %v20426_v61  ;;  %11941 = vmatprep.subr.mxu1 %v20426_v61  ;;  %v10123_v25 = vld [vmem:[%s20314_s5 + $0x5a0] sm:$0xff] }
 0xc33   : > { %11907 = vmatpush3.msra.mxu0 %v10040_v59  ;;  %11942 = vmatpush3.msra.mxu1 %v10056_v51  ;;  %v10106_v59 = vld [vmem:[%s20314_s5 + $0x518] sm:$0xff] }
 0xc34   : > { %11908 = vmatprep.subr.mxu0 %v20426_v61  ;;  %11943 = vmatprep.subr.mxu1 %v20426_v61  ;;  %v10122_v51 = vld [vmem:[%s20314_s5 + $0x598] sm:$0xff] }
 0xc35   : > { %11909 = vmatpush3.msra.mxu0 %v10039_v22  ;;  %11910 = vmatprep.mubr.msk.f32.mxu0 %vm12329_vm8, %v20426_v61  ;;  %v10105_v22 = vld [vmem:[%s20314_s5 + $0x510] sm:$0xff] }
 0xc36   : > { %11944 = vmatpush3.msra.mxu1 %v10055_v4  ;;  %11945 = vmatprep.mubr.msk.f32.mxu1 %vm12329_vm8, %v20426_v61  ;;  %v10121_v4 = vld [vmem:[%s20314_s5 + $0x590] sm:$0xff] }
 0xc37   : > { %11911 = vmatmul.mubr.f32.vlgmr.msra.gmra.mxu0 %v19448_v29  ;;  %11946 = vmatmul.mubr.f32.vlgmr.msra.gmra.mxu1 %v19452_v47  ;;  %v10084_v29 = vld [vmem:[%s20314_s5 + $0x468] sm:$0xff] }
 0xc38   : > { %11948 = vmatprep.subr.mxu0 %v20426_v61  ;;  %11983 = vmatprep.subr.mxu1 %v20426_v61  ;;  %v10100_v47 = vld [vmem:[%s20314_s5 + $0x4e8] sm:$0xff] }
 0xc39   : > { %11949 = vmatpush3.msra.mxu0 %v10086_v27  ;;  %11984 = vmatpush3.msra.mxu1 %v10102_v1  ;;  %v10104_v27 = vld [vmem:[%s20314_s5 + $0x508] sm:$0xff] }
 0xc3a   : > { %11950 = vmatprep.subr.mxu0 %v20426_v61  ;;  %11985 = vmatprep.subr.mxu1 %v20426_v61  ;;  %v10120_v1 = vld [vmem:[%s20314_s5 + $0x588] sm:$0xff] }
 0xc3b   : > { %11951 = vmatpush3.msra.mxu0 %v10085_v37  ;;  %11986 = vmatpush3.msra.mxu1 %v10101_v34  ;;  %v10103_v37 = vld [vmem:[%s20314_s5 + $0x500] sm:$0xff] }
 0xc3c   : > { %11952 = vmatprep.subr.mxu0 %v20426_v61  ;;  %11987 = vmatprep.subr.mxu1 %v20426_v61  ;;  %v10119_v34 = vld [vmem:[%s20314_s5 + $0x580] sm:$0xff] }
 0xc3d   : > { %11953 = vmatpush3.msra.mxu0 %v10084_v29  ;;  %11988 = vmatpush3.msra.mxu1 %v10100_v47  ;;  %v10150_v29 = vld [vmem:[%s20314_s5 + $0x678] sm:$0xff]  ;;  %v10149_v47 = vld [vmem:[%s20314_s5 + $0x670] sm:$0xff] }
 0xc3e   : > { %11954 = vmatprep.subr.mxu0 %v20426_v61  ;;  %11989 = vmatprep.subr.mxu1 %v20426_v61 }
 0xc3f   : > { %11955 = vmatpush3.msra.mxu0 %v10083_v28  ;;  %11990 = vmatpush3.msra.mxu1 %v10099_v43  ;;  %v10146_v28 = vld [vmem:[%s20314_s5 + $0x658] sm:$0xff]  ;;  %v10145_v43 = vld [vmem:[%s20314_s5 + $0x650] sm:$0xff] }
 0xc40   : > { %11956 = vmatprep.subr.mxu0 %v20426_v61  ;;  %11991 = vmatprep.subr.mxu1 %v20426_v61 }
 0xc41   : > { %11957 = vmatpush3.msra.mxu0 %v10082_v23  ;;  %11992 = vmatpush3.msra.mxu1 %v10098_v55  ;;  %v10144_v23 = vld [vmem:[%s20314_s5 + $0x648] sm:$0xff]  ;;  %v10143_v55 = vld [vmem:[%s20314_s5 + $0x640] sm:$0xff] }
 0xc42   : > { %11958 = vmatprep.subr.mxu0 %v20426_v61  ;;  %11993 = vmatprep.subr.mxu1 %v20426_v61 }
 0xc43   : > { %11959 = vmatpush3.msra.mxu0 %v10081_v10  ;;  %11994 = vmatpush3.msra.mxu1 %v10097_v5  ;;  %v10142_v10 = vld [vmem:[%s20314_s5 + $0x638] sm:$0xff]  ;;  %v10141_v5 = vld [vmem:[%s20314_s5 + $0x630] sm:$0xff] }
 0xc44   : > { %11960 = vmatprep.subr.mxu0 %v20426_v61  ;;  %11995 = vmatprep.subr.mxu1 %v20426_v61 }
 0xc45   : > { %11961 = vmatpush3.msra.mxu0 %v10080_v3  ;;  %11996 = vmatpush3.msra.mxu1 %v10096_v17  ;;  %v10140_v3 = vld [vmem:[%s20314_s5 + $0x628] sm:$0xff]  ;;  %v10139_v17 = vld [vmem:[%s20314_s5 + $0x620] sm:$0xff] }
 0xc46   : > { %11962 = vmatprep.subr.mxu0 %v20426_v61  ;;  %11997 = vmatprep.subr.mxu1 %v20426_v61 }
 0xc47   : > { %11963 = vmatpush3.msra.mxu0 %v10079_v30  ;;  %11998 = vmatpush3.msra.mxu1 %v10095_v42  ;;  %v10138_v30 = vld [vmem:[%s20314_s5 + $0x618] sm:$0xff] }
 0xc48   : > { %11964 = vmatprep.subr.mxu0 %v20426_v61  ;;  %11999 = vmatprep.subr.mxu1 %v20426_v61 }
 0xc49   : > { %11965 = vmatpush3.msra.mxu0 %v10078_v54  ;;  %12000 = vmatpush3.msra.mxu1 %v10094_v11 }
 0xc4a   : > { %11966 = vmatprep.subr.mxu0 %v20426_v61  ;;  %12001 = vmatprep.subr.mxu1 %v20426_v61 }
 0xc4b   : > { %11967 = vmatpush3.msra.mxu0 %v10077_v60  ;;  %12002 = vmatpush3.msra.mxu1 %v10093_v56  ;;  %v10137_v60 = vld [vmem:[%s20314_s5 + $0x610] sm:$0xff] }
 0xc4c   : > { %11968 = vmatprep.subr.mxu0 %v20426_v61  ;;  %12003 = vmatprep.subr.mxu1 %v20426_v61 }
 0xc4d   : > { %11969 = vmatpush3.msra.mxu0 %v10076_v18  ;;  %12004 = vmatpush3.msra.mxu1 %v10092_v6  ;;  %v10136_v6 = vld [vmem:[%s20314_s5 + $0x608] sm:$0xff] }
 0xc4e   : > { %11970 = vmatprep.subr.mxu0 %v20426_v61  ;;  %12005 = vmatprep.subr.mxu1 %v20426_v61 }
 0xc4f   : > { %11971 = vmatpush3.msra.mxu0 %v10075_v58  ;;  %12006 = vmatpush3.msra.mxu1 %v10091_v13  ;;  %v10135_v58 = vld [vmem:[%s20314_s5 + $0x600] sm:$0xff] }
 0xc50   : > { %11972 = vmatprep.subr.mxu0 %v20426_v61  ;;  %12007 = vmatprep.subr.mxu1 %v20426_v61 }
 0xc51   : > { %11973 = vmatpush3.msra.mxu0 %v10074_v9  ;;  %12008 = vmatpush3.msra.mxu1 %v10090_v19 }
 0xc52   : > { %11974 = vmatprep.subr.mxu0 %v20426_v61  ;;  %12009 = vmatprep.subr.mxu1 %v20426_v61 }
 0xc53   : > { %11975 = vmatpush3.msra.mxu0 %v10073_v12  ;;  %12010 = vmatpush3.msra.mxu1 %v10089_v8 }
 0xc54   : > { %11976 = vmatprep.subr.mxu0 %v20426_v61  ;;  %12011 = vmatprep.subr.mxu1 %v20426_v61 }
 0xc55   : > { %11977 = vmatpush3.msra.mxu0 %v10072_v49  ;;  %12012 = vmatpush3.msra.mxu1 %v10088_v2  ;;  %v8969_v2 = vld [vmem:[%s20316_s7 + $0x78] sm:$0xff] }
 0xc56   : > { %11978 = vmatprep.subr.mxu0 %v20426_v61  ;;  %12013 = vmatprep.subr.mxu1 %v20426_v61 }
 0xc57   : > { %11979 = vmatpush3.msra.mxu0 %v10071_v52  ;;  %11980 = vmatprep.mubr.msk.f32.mxu0 %vm12329_vm8, %v20426_v61  ;;  %v8968_v52 = vld [vmem:[%s20316_s7 + $0x70] sm:$0xff] }
 0xc58   : > { %12014 = vmatpush3.msra.mxu1 %v10087_v62  ;;  %12015 = vmatprep.mubr.msk.f32.mxu1 %vm12329_vm8, %v20426_v61  ;;  %v8966_v62 = vld [vmem:[%s20316_s7 + $0x60] sm:$0xff] }
 0xc59   : > { %11981 = vmatmul.mubr.f32.vlgmr.msra.gmra.mxu0 %v19418_v50  ;;  %12016 = vmatmul.mubr.f32.vlgmr.msra.gmra.mxu1 %v19456_v26  ;;  %v10116_v50 = vld [vmem:[%s20314_s5 + $0x568] sm:$0xff] }
 0xc5a   : > { %12018 = vmatprep.subr.mxu0 %v20426_v61  ;;  %12053 = vmatprep.subr.mxu1 %v20426_v61  ;;  %v10132_v26 = vld [vmem:[%s20314_s5 + $0x5e8] sm:$0xff] }
 0xc5b   : > { %12019 = vmatpush3.msra.mxu0 %v10118_v38  ;;  %12054 = vmatpush3.msra.mxu1 %v10134_v35  ;;  %v8965_v38 = vld [vmem:[%s20316_s7 + $0x58] sm:$0xff]  ;;  %v8964_v35 = vld [vmem:[%s20316_s7 + $0x50] sm:$0xff] }
 0xc5c   : > { %12020 = vmatprep.subr.mxu0 %v20426_v61  ;;  %12055 = vmatprep.subr.mxu1 %v20426_v61 }
 0xc5d   : > { %12021 = vmatpush3.msra.mxu0 %v10117_v31  ;;  %12056 = vmatpush3.msra.mxu1 %v10133_v39  ;;  %v8963_v31 = vld [vmem:[%s20316_s7 + $0x48] sm:$0xff]  ;;  %v8962_v39 = vld [vmem:[%s20316_s7 + $0x40] sm:$0xff] }
 0xc5e   : > { %12022 = vmatprep.subr.mxu0 %v20426_v61  ;;  %12057 = vmatprep.subr.mxu1 %v20426_v61 }
 0xc5f   : > { %12023 = vmatpush3.msra.mxu0 %v10116_v50  ;;  %12058 = vmatpush3.msra.mxu1 %v10132_v26  ;;  %v8961_v50 = vld [vmem:[%s20316_s7 + $0x38] sm:$0xff]  ;;  %v8960_v26 = vld [vmem:[%s20316_s7 + $0x30] sm:$0xff] }
 0xc60   : > { %12024 = vmatprep.subr.mxu0 %v20426_v61  ;;  %12059 = vmatprep.subr.mxu1 %v20426_v61 }
 0xc61   : > { %12025 = vmatpush3.msra.mxu0 %v10115_v14  ;;  %12060 = vmatpush3.msra.mxu1 %v10131_v16  ;;  %v8959_v14 = vld [vmem:[%s20316_s7 + $0x28] sm:$0xff]  ;;  %v8958_v16 = vld [vmem:[%s20316_s7 + $0x20] sm:$0xff] }
 0xc62   : > { %12026 = vmatprep.subr.mxu0 %v20426_v61  ;;  %12061 = vmatprep.subr.mxu1 %v20426_v61 }
 0xc63   : > { %12027 = vmatpush3.msra.mxu0 %v10114_v15  ;;  %12062 = vmatpush3.msra.mxu1 %v10130_v33 }
 0xc64   : > { %12028 = vmatprep.subr.mxu0 %v20426_v61  ;;  %12063 = vmatprep.subr.mxu1 %v20426_v61 }
 0xc65   : > { %12029 = vmatpush3.msra.mxu0 %v10113_v20  ;;  %12064 = vmatpush3.msra.mxu1 %v10129_v36 }
 0xc66   : > { %12030 = vmatprep.subr.mxu0 %v20426_v61  ;;  %12065 = vmatprep.subr.mxu1 %v20426_v61 }
 0xc67   : > { %12031 = vmatpush3.msra.mxu0 %v10112_v57  ;;  %12066 = vmatpush3.msra.mxu1 %v10128_v40 }
 0xc68   : > { %12032 = vmatprep.subr.mxu0 %v20426_v61  ;;  %12067 = vmatprep.subr.mxu1 %v20426_v61 }
 0xc69   : > { %12033 = vmatpush3.msra.mxu0 %v10111_v41  ;;  %12068 = vmatpush3.msra.mxu1 %v10127_v46  ;;  %v8957_v41 = vld [vmem:[%s20316_s7 + $0x18] sm:$0xff]  ;;  %v8956_v46 = vld [vmem:[%s20316_s7 + $0x10] sm:$0xff] }
 0xc6a   : > { %12034 = vmatprep.subr.mxu0 %v20426_v61  ;;  %12069 = vmatprep.subr.mxu1 %v20426_v61 }
 0xc6b   : > { %12035 = vmatpush3.msra.mxu0 %v10110_v0  ;;  %12070 = vmatpush3.msra.mxu1 %v10126_v21  ;;  %v8955_v0 = vld [vmem:[%s20316_s7 + $0x8] sm:$0xff]  ;;  %v8954_v21 = vld [vmem:[%s20316_s7] sm:$0xff] }
 0xc6c   : > { %12036 = vmatprep.subr.mxu0 %v20426_v61  ;;  %12071 = vmatprep.subr.mxu1 %v20426_v61 }
 0xc6d   : > { %12037 = vmatpush3.msra.mxu0 %v10109_v24  ;;  %12072 = vmatpush3.msra.mxu1 %v10125_v32 }
 0xc6e   : > { %12038 = vmatprep.subr.mxu0 %v20426_v61  ;;  %12073 = vmatprep.subr.mxu1 %v20426_v61 }
 0xc6f   : > { %12039 = vmatpush3.msra.mxu0 %v10108_v63  ;;  %12074 = vmatpush3.msra.mxu1 %v10124_v53 }
 0xc70   : > { %12040 = vmatprep.subr.mxu0 %v20426_v61  ;;  %12075 = vmatprep.subr.mxu1 %v20426_v61 }
 0xc71   : > { %12041 = vmatpush3.msra.mxu0 %v10107_v45  ;;  %12076 = vmatpush3.msra.mxu1 %v10123_v25 }
 0xc72   : > { %12042 = vmatprep.subr.mxu0 %v20426_v61  ;;  %12077 = vmatprep.subr.mxu1 %v20426_v61 }
 0xc73   : > { %12043 = vmatpush3.msra.mxu0 %v10106_v59  ;;  %12078 = vmatpush3.msra.mxu1 %v10122_v51 }
 0xc74   : > { %12044 = vmatprep.subr.mxu0 %v20426_v61  ;;  %12079 = vmatprep.subr.mxu1 %v20426_v61 }
 0xc75   : > { %12045 = vmatpush3.msra.mxu0 %v10105_v22  ;;  %12080 = vmatpush3.msra.mxu1 %v10121_v4 }
 0xc76   : > { %12046 = vmatprep.subr.mxu0 %v20426_v61  ;;  %12081 = vmatprep.subr.mxu1 %v20426_v61 }
 0xc77   : > { %12047 = vmatpush3.msra.mxu0 %v10104_v27  ;;  %12082 = vmatpush3.msra.mxu1 %v10120_v1 }
 0xc78   : > { %12048 = vmatprep.subr.mxu0 %v20426_v61  ;;  %12083 = vmatprep.subr.mxu1 %v20426_v61 }
 0xc79   : > { %12049 = vmatpush3.msra.mxu0 %v10103_v37  ;;  %12050 = vmatprep.mubr.msk.f32.mxu0 %vm12329_vm8, %v20426_v61 }
 0xc7a   : > { %12084 = vmatpush3.msra.mxu1 %v10119_v34  ;;  %12085 = vmatprep.mubr.msk.f32.mxu1 %vm12329_vm8, %v20426_v61 }
 0xc7b   : > { %12051 = vmatmul.mubr.f32.vlgmr.msra.gmra.mxu0 %v19460_v48  ;;  %12086 = vmatmul.mubr.f32.vlgmr.msra.gmra.mxu1 %v19472_v7  ;;  %v10148_v48 = vld [vmem:[%s20314_s5 + $0x668] sm:$0xff]  ;;  %v10147_v7 = vld [vmem:[%s20314_s5 + $0x660] sm:$0xff] }
 0xc7c   : > { %12088 = vmatprep.subr.mxu0 %v20426_v61  ;;  %12120 = vmatprep.mubr.msk.f32.mxu0 %vm12329_vm8, %v20426_v61 }
 0xc7d   : > { %12089 = vmatpush3.msra.mxu0 %v10150_v29  ;;  %12123 = vmatprep.subr.mxu1 %v20426_v61 }
 0xc7e   : > { %12090 = vmatprep.subr.mxu0 %v20426_v61  ;;  %12155 = vmatprep.mubr.msk.f32.mxu1 %vm12329_vm8, %v20426_v61 }
 0xc7f   : > { %12091 = vmatpush3.msra.mxu0 %v10149_v47  ;;  %12124 = vmatpush3.msra.mxu1 %v8969_v2 }
 0xc80   : > { %12092 = vmatprep.subr.mxu0 %v20426_v61  ;;  %12125 = vmatprep.subr.mxu1 %v20426_v61 }
 0xc81   : > { %12093 = vmatpush3.msra.mxu0 %v10148_v48  ;;  %12126 = vmatpush3.msra.mxu1 %v8968_v52 }
 0xc82   : > { %12094 = vmatprep.subr.mxu0 %v20426_v61  ;;  %12127 = vmatprep.subr.mxu1 %v20426_v61 }
 0xc83   : > { %12095 = vmatpush3.msra.mxu0 %v10147_v7 }
 0xc84   : > { %12096 = vmatprep.subr.mxu0 %v20426_v61 }
 0xc85   : > { %12097 = vmatpush3.msra.mxu0 %v10146_v28  ;;  %v10151_v28 = vld [vmem:[%s20315_s6] ss:$0 sm:$0xff] }
 0xc86   : > { %12098 = vmatprep.subr.mxu0 %v20426_v61 }
 0xc87   : > { %12099 = vmatpush3.msra.mxu0 %v10145_v43 }
 0xc88   : > { %12100 = vmatprep.subr.mxu0 %v20426_v61 }
 0xc89   : > { %12101 = vmatpush3.msra.mxu0 %v10144_v23 }
 0xc8a   : > { %12102 = vmatprep.subr.mxu0 %v20426_v61 }
 0xc8b   : > { %12103 = vmatpush3.msra.mxu0 %v10143_v55 }
 0xc8c   : > { %12104 = vmatprep.subr.mxu0 %v20426_v61 }
 0xc8d   : > { %12105 = vmatpush3.msra.mxu0 %v10142_v10 }
 0xc8e   : > { %12106 = vmatprep.subr.mxu0 %v20426_v61 }
 0xc8f   : > { %12107 = vmatpush3.msra.mxu0 %v10141_v5  ;;  %v10152_v5 = vld [vmem:[%s20317_s8] ss:$0 sm:$0xff] }
 0xc90   : > { %12108 = vmatprep.subr.mxu0 %v20426_v61 }
 0xc91   : > { %12109 = vmatpush3.msra.mxu0 %v10140_v3 }
 0xc92   : > { %12110 = vmatprep.subr.mxu0 %v20426_v61  ;;  %v7539_v42 = vpop.f32.mrf.mxu0  ;;  %v7632_v54 = vpop.f32.mrf.mxu1 }
 0xc93   : > { %12111 = vmatpush3.msra.mxu0 %v10139_v17  ;;  %v7633_v11 = vadd.f32 %v7632_v54, %v7539_v42 }
 0xc94   : > { %12112 = vmatprep.subr.mxu0 %v20426_v61  ;;  %v11702_v56 = vpop.f32.mrf.mxu0  ;;  %v11737_v18 = vpop.f32.mrf.mxu1 }
 0xc95   : > { %12113 = vmatpush3.msra.mxu0 %v10138_v30 }
 0xc96   : > { %12114 = vmatprep.subr.mxu0 %v20426_v61 }
 0xc97   : > { %12115 = vmatpush3.msra.mxu0 %v10137_v60 }
 0xc98   : > { %12116 = vmatprep.subr.mxu0 %v20426_v61 }
 0xc99   : > { %12117 = vmatpush3.msra.mxu0 %v10136_v6 }
 0xc9a   : > { %12118 = vmatprep.subr.mxu0 %v20426_v61 }
 0xc9b   : > { %12119 = vmatpush3.msra.mxu0 %v10135_v58 }
 0xc9c   : > { %12121 = vmatmul.mubr.f32.vlgmr.msra.gmra.mxu0 %v19476_v44  ;;  %v8967_v44 = vld [vmem:[%s20316_s7 + $0x68] sm:$0xff] }
 0xc9d   : > { %12128 = vmatpush3.msra.mxu1 %v8967_v44 }
 0xc9e   : > { %12129 = vmatprep.subr.mxu1 %v20426_v61 }
 0xc9f   : > { %12130 = vmatpush3.msra.mxu1 %v8966_v62 }
 0xca0   : > { %12131 = vmatprep.subr.mxu1 %v20426_v61 }
 0xca1   : > { %12132 = vmatpush3.msra.mxu1 %v8965_v38 }
 0xca2   : > { %12133 = vmatprep.subr.mxu1 %v20426_v61 }
 0xca3   : > { %12134 = vmatpush3.msra.mxu1 %v8964_v35 }
 0xca4   : > { %12135 = vmatprep.subr.mxu1 %v20426_v61 }
 0xca5   : > { %12136 = vmatpush3.msra.mxu1 %v8963_v31 }
 0xca6   : > { %12137 = vmatprep.subr.mxu1 %v20426_v61 }
 0xca7   : > { %12138 = vmatpush3.msra.mxu1 %v8962_v39 }
 0xca8   : > { %12139 = vmatprep.subr.mxu1 %v20426_v61 }
 0xca9   : > { %12140 = vmatpush3.msra.mxu1 %v8961_v50 }
 0xcaa   : > { %12141 = vmatprep.subr.mxu1 %v20426_v61 }
 0xcab   : > { %12142 = vmatpush3.msra.mxu1 %v8960_v26 }
 0xcac   : > { %12143 = vmatprep.subr.mxu1 %v20426_v61 }
 0xcad   : > { %12144 = vmatpush3.msra.mxu1 %v8959_v14 }
 0xcae   : > { %12145 = vmatprep.subr.mxu1 %v20426_v61 }
 0xcaf   : > { %12146 = vmatpush3.msra.mxu1 %v8958_v16 }
 0xcb0   : > { %12147 = vmatprep.subr.mxu1 %v20426_v61 }
 0xcb1   : > { %12148 = vmatpush3.msra.mxu1 %v8957_v41 }
 0xcb2   : > { %12149 = vmatprep.subr.mxu1 %v20426_v61 }
 0xcb3   : > { %v7750_v13 = vpop.f32.mrf.mxu0  ;;  %v7869_v9 = vpop.f32.mrf.mxu1  ;;  %12150 = vmatpush3.msra.mxu1 %v8956_v46 }
 0xcb4   : > { %v7754_v19 = vadd.f32 %v7750_v13, %v7633_v11  ;;  %12151 = vmatprep.subr.mxu1 %v20426_v61 }
 0xcb5   : > { %v11772_v12 = vpop.f32.mrf.mxu0  ;;  %v11807_v8 = vpop.f32.mrf.mxu1  ;;  %12152 = vmatpush3.msra.mxu1 %v8955_v0 }
 0xcb6   : > { %v7873_v49 = vadd.f32 %v7869_v9, %v7754_v19  ;;  %12153 = vmatprep.subr.mxu1 %v20426_v61 }
 0xcb7   : > { %12154 = vmatpush3.msra.mxu1 %v8954_v21 }
 0xcd5   : > { %v7988_v15 = vpop.f32.mrf.mxu0  ;;  %v8107_v33 = vpop.f32.mrf.mxu1 }
 0xcd6   : > { %v7992_v20 = vadd.f32 %v7988_v15, %v7873_v49 }
 0xcd7   : > { %v11842_v36 = vpop.f32.mrf.mxu0  ;;  %v11877_v57 = vpop.f32.mrf.mxu1 }
 0xcd8   : > { %v8111_v40 = vadd.f32 %v8107_v33, %v7992_v20 }
 0xcf7   : > { %v8226_v24 = vpop.f32.mrf.mxu0  ;;  %v8345_v32 = vpop.f32.mrf.mxu1 }
 0xcf8   : > { %v8230_v63 = vadd.f32 %v8226_v24, %v8111_v40 }
 0xcf9   : > { %v11912_v53 = vpop.f32.mrf.mxu0  ;;  %v11947_v45 = vpop.f32.mrf.mxu1 }
 0xcfa   : > { %v8349_v25 = vadd.f32 %v8345_v32, %v8230_v63 }
 0xd19   : > { %v8464_v59 = vpop.f32.mrf.mxu0  ;;  %v8583_v51 = vpop.f32.mrf.mxu1 }
 0xd1a   : > { %v8468_v34 = vadd.f32 %v8464_v59, %v8349_v25 }
 0xd1b   : > { %v11982_v22 = vpop.f32.mrf.mxu0  ;;  %v12017_v4 = vpop.f32.mrf.mxu1 }
 0xd1c   : > { %v8587_v29 = vadd.f32 %v8583_v51, %v8468_v34 }
 0xd3b   : > { %v8702_v27 = vpop.f32.mrf.mxu0  ;;  %v8821_v1 = vpop.f32.mrf.mxu1 }
 0xd3c   : > { %v8706_v47 = vadd.f32 %v8702_v27, %v8587_v29 }
 0xd3d   : > { %v12052_v37 = vpop.f32.mrf.mxu0  ;;  %v12087_v61 = vpop.f32.mrf.mxu1 }
 0xd3e   : > { %v8825_v48 = vadd.f32 %v8821_v1, %v8706_v47 }
 0xd5c   : > { %v8940_v7 = vpop.f32.mrf.mxu0 }
 0xd5d   : > { %v8944_v43 = vadd.f32 %v8940_v7, %v8825_v48 }
 0xd5e   : > { %v12122_v23 = vpop.f32.mrf.mxu0 }
 0xd5f   : > { %v8952_v55 = vadd.f32 %v10151_v28, %v8944_v43 }
 0xd61   : > { %v8953_v10 = vmax.f32 %v8952_v55, 0.0 }
 0xd63   : > { %12156 = vmatmul.mubr.f32.vlgmr.msra.gmra.mxu1 %v8953_v10 }
 0xe23   : > { %v9043_v3 = vpop.f32.mrf.mxu1 }
 0xe24   : > { %v9044_v17 = vadd.f32 %v10152_v5, %v9043_v3 }
 0xe25   : > { %v12157_v30 = vpop.f32.mrf.mxu1 }
 0xe26   : > { %9047 = vst [vmem:[%s328_s28] sm:$0xff] %v9044_v17 }
 0xe27   : > { %12279 = shalt.err (!%p12276_p3)
}
 0xe28   : > { %s12280_s17 = scalar_lea.hbm %s20274_s22, 128  ;;  %s12284_s28 = scalar_lea.hbm %s20318_s9, 256 }
 0xe29   : > { %p12281_p4 = scmp.ne.s32.totalorder %s20274_s22, %s12280_s17  ;;  %p12285_p9 = scmp.lt.s32.totalorder %s20274_s22, %s20318_s9 }
 0xe2a   : > { %p12286_p10 = scmp.lt.s32.totalorder %s12284_s28, %s12280_s17 }
 0xe2b   : > { %p12282_p7 = pnand %p12281_p4, %p12419_p5 }
 0xe2c   : > { %p12287_p11 = por %p12286_p10, %p12285_p9 }
 0xe2d   : > { %p12283_p8 = pneg %p12282_p7 }
 0xe2f   : > { %p12288_p12 = pnand %p12287_p11, %p12283_p8 }
 0xe31   : > { %12291 = shalt.err (!%p12288_p12)
}
 0xe32   : > { %12158 = dma.vmem_to_hbm [thread:$0]  (%p12419_p5), %s9063_s14, 128, %s20274_s22, %s9049_s23  }
 0xe33 PF: > { %p12164_p13 = scmp.ge.s32.totalorder %s12326_s12, 2  ;;  %s9074_s25 = sand.u32 1, %s12314_s30  }
 0xe34   : > { %s9075_s27 = scalar_lea.sflag [#allocation4], %s9074_s25 }
 0xe35   : > { %p12161_p0 = pnand %p12164_p13, %p12423_p6 }
 0xe37   : > { %p12162_p1 = pneg %p12161_p0 }
 0xe39   : > { %12309 = dma.done.wait (%p12162_p1), %s9075_s27, 128  }
 0xe3a   : > { %12311 = vsyncadd (%p12162_p1), %s9075_s27, 4294967168  ;;  %p19_p2 = scmp.ge.s32.totalorder %s12406_s15, 4   ;;  %s20466_s30 = smov %s12318_s10 }
 0xe3b   : > { %s20467_s10 = smov %s12322_s11  ;;  %s20468_s11 = smov %s12417_s18 }
 0xe3c   : > { %s20469_s12 = smov %s12406_s15  ;;  %21 = sbr.rel (!%p19_p2) target bundleno = 3 (0x3), region = 129 }
 0xe41   :  { %9080 = vsyncpa [#allocation4], 1 }
 0xe42   :  { %9082 = vsyncpa [#allocation4 + $0x1], 1 }

</bundles_post_ra>
